<compile_context>
chip_gen: v5e
topology: v5e:2x2
jax: 0.10.0
libtpu: 0.0.40
codegen_flags: <defaults>
</compile_context>

<pallas_src>
import functools

import jax
import jax.numpy as jnp
from jax import lax
from jax.experimental import pallas as pl
from jax.experimental.pallas import tpu as pltpu

EPS = 1e-5


def residual_inner_kernel(x_ref, b1_ref, b2_ref, g1_ref, be1_ref, g2_ref, be2_ref,
                          sel_ref, selt_ref, o_ref, xpad_ref, *, N, D, S, C):
    """Fused (conv3d 3x3x3 'SAME' -> BatchNorm3d(batch stats) -> ReLU) x 2.

    Layout: one row per (n, d) slab, S = H*W*C lanes (lane-dense).

    x_ref    : (N, D, S)    f32   input, channels-last, (h, w, c) folded into lanes
    b1_ref   : (3, S, S)    bf16  banded conv1 weight, one matrix per kd tap
    b2_ref   : (3, S, S)    bf16  banded conv2 weight
    g*_ref   : (1, C)       f32   BN gamma
    be*_ref  : (1, C)       f32   BN beta
    sel_ref  : (S, C)       f32   lane->channel fold matrix  (sel[j, c] = [j % C == c])
    selt_ref : (C, S)       f32   channel->lane broadcast matrix (sel transposed)
    o_ref    : (N, D, S)    f32   output
    xpad_ref : (N, D+2, S)  f32   VMEM scratch: D-padded stage input, reused by both stages
    """
    M = N * D
    inv_count = 1.0 / float(M * (S // C))            # 1 / (N*D*H*W)
    sel = sel_ref[...]
    sel_t = selt_ref[...]

    # Zero the padded scratch once; both stages only rewrite the interior, so the
    # d-halo rows stay zero (this replaces the old wrapper-side jnp.pad).
    xpad_ref[...] = jnp.zeros((N, D + 2, S), jnp.float32)

    def conv_bn_relu(x_f32, b_ref, gamma, beta):
        # --- stage input -> D-padded VMEM scratch (interior only) ---
        xpad_ref[:, 1:D + 1, :] = x_f32

        # --- 3x3x3 conv as 3 banded, lane-dense MXU matmuls (bf16 in, f32 acc) ---
        acc = jnp.zeros((M, S), jnp.float32)
        for kd in range(3):
            xs = xpad_ref[:, kd:kd + D, :].reshape(M, S).astype(jnp.bfloat16)
            acc = acc + jnp.dot(xs, b_ref[kd], preferred_element_type=jnp.float32)

        # --- BatchNorm3d (training-mode biased batch stats), single reduction pass ---
        stats = jnp.concatenate(
            [jnp.sum(acc, axis=0, keepdims=True),
             jnp.sum(acc * acc, axis=0, keepdims=True)], axis=0)             # (2, S)
        per_c = jnp.dot(stats, sel, preferred_element_type=jnp.float32) * inv_count  # (2, C)
        mean = per_c[0:1, :]
        var = per_c[1:2, :] - mean * mean
        scale = gamma * lax.rsqrt(var + EPS)                                  # (1, C)
        shift = beta - mean * scale                                           # (1, C)
        lanes = jnp.dot(jnp.concatenate([scale, shift], axis=0), sel_t,
                        preferred_element_type=jnp.float32)                   # (2, S)

        # --- affine + ReLU, fully lane-dense ---
        y = jnp.maximum(acc * lanes[0:1, :] + lanes[1:2, :], 0.0)
        return y.reshape(N, D, S)

    y1 = conv_bn_relu(x_ref[...], b1_ref, g1_ref[...], be1_ref[...])
    y2 = conv_bn_relu(y1, b2_ref, g2_ref[...], be2_ref[...])
    o_ref[...] = y2


def _banded_weights(w, H, W):
    """Conv3d weight (Cout, Cin, 3, 3, 3) -> per-kd banded matmul weights.

    Returns B of shape (3, H*W*Cin, H*W*Cout) with
      B[kd, (hi, wi, ci), (ho, wo, co)] = w[co, ci, kd, hi-ho+1, wi-wo+1]
    when |hi-ho| <= 1 and |wi-wo| <= 1, else 0 — i.e. the kh/kw taps and the
    h/w 'SAME' zero padding are folded into one matrix per kd tap.
    """
    c_out, c_in = w.shape[0], w.shape[1]
    eh = jnp.stack([jnp.eye(H, H, k=-(kh - 1), dtype=jnp.float32) for kh in range(3)])
    ew = jnp.stack([jnp.eye(W, W, k=-(kw - 1), dtype=jnp.float32) for kw in range(3)])
    # (kd, hi, wi, ci, ho, wo, co)
    banded = jnp.einsum('xhp,ywq,oidxy->dhwipqo', eh, ew, w.astype(jnp.float32))
    return banded.reshape(3, H * W * c_in, H * W * c_out)


def _pallas_forward(x_nds, bw1, bw2, g1, be1, g2, be2, sel, sel_t):
    N, D, S = x_nds.shape
    C = g1.shape[-1]
    kernel = functools.partial(residual_inner_kernel, N=N, D=D, S=S, C=C)
    vmem = pl.BlockSpec(memory_space=pltpu.MemorySpace.VMEM)
    # TODO(synk): for production-size volumes, add haloed BlockSpec tiling over
    # (N, D) with a two-pass BatchNorm (sum/sumsq then normalize) so statistics
    # stay global, and mark the non-reduction grid axes "parallel" for v7x
    # megacore; the whole-volume-resident banded strategy here is sized for
    # small feature maps (S = H*W*C up to a few thousand lanes).
    return pl.pallas_call(
        kernel,
        out_shape=jax.ShapeDtypeStruct((N, D, S), jnp.float32),
        in_specs=[vmem] * 9,
        out_specs=vmem,
        scratch_shapes=[pltpu.VMEM((N, D + 2, S), jnp.float32)],
        compiler_params=pltpu.CompilerParams(vmem_limit_bytes=32 * 1024 * 1024),
    )(x_nds, bw1, bw2, g1, be1, g2, be2, sel, sel_t)


@jax.jit
def residual_inner_forward(x_ncdhw, w1, g1, b1, w2, g2, b2):
    """Forward of ResidualInner. Input/output use the PyTorch NCDHW layout."""
    N, C, D, H, W = x_ncdhw.shape
    S = H * W * C
    # NCDHW -> (N, D, H*W*C): channels-last with (h, w, c) folded into the lane axis.
    x = jnp.transpose(x_ncdhw, (0, 2, 3, 4, 1)).reshape(N, D, S).astype(jnp.float32)
    # Banded per-kd conv matrices (weight preprocessing), bf16 for the MXU.
    bw1 = _banded_weights(w1, H, W).astype(jnp.bfloat16)   # (3, S, S)
    bw2 = _banded_weights(w2, H, W).astype(jnp.bfloat16)   # (3, S, S)
    # Lane<->channel fold matrices for per-channel BN stats on the lane-dense layout.
    lane_c = jnp.arange(S, dtype=jnp.int32) % C
    sel = (lane_c[:, None] == jnp.arange(C, dtype=jnp.int32)[None, :]).astype(jnp.float32)
    y = _pallas_forward(
        x, bw1, bw2,
        g1.reshape(1, C).astype(jnp.float32), b1.reshape(1, C).astype(jnp.float32),
        g2.reshape(1, C).astype(jnp.float32), b2.reshape(1, C).astype(jnp.float32),
        sel, sel.T)
    return jnp.transpose(y.reshape(N, D, H, W, C), (0, 4, 1, 2, 3))  # back to NCDHW


# ---------------------- pure-JAX f32 reference (for checking) ----------------------
def _reference(x, w1, g1, b1, w2, g2, b2):
    def conv(x, w):
        return lax.conv_general_dilated(
            x, w, window_strides=(1, 1, 1),
            padding=[(1, 1), (1, 1), (1, 1)],
            dimension_numbers=("NCDHW", "OIDHW", "NCDHW"),
        )

    def bn_relu(x, g, b):
        mean = jnp.mean(x, axis=(0, 2, 3, 4), keepdims=True)
        var = jnp.mean((x - mean) ** 2, axis=(0, 2, 3, 4), keepdims=True)
        xn = (x - mean) / jnp.sqrt(var + EPS)
        xn = xn * g.reshape(1, -1, 1, 1, 1) + b.reshape(1, -1, 1, 1, 1)
        return jnp.maximum(xn, 0.0)

    x = bn_relu(conv(x, w1), g1, b1)
    x = bn_relu(conv(x, w2), g2, b2)
    return x


if __name__ == "__main__":
    key = jax.random.PRNGKey(0)
    kx, kw1, kw2, kg1, kb1, kg2, kb2 = jax.random.split(key, 7)

    N, C, D, H, W = 2, 8, 8, 8, 8
    x = jax.random.normal(kx, (N, C, D, H, W), jnp.float32)

    # Conv3d(channels, channels, 3, padding=1, bias=False) weights: (Cout, Cin, 3, 3, 3)
    w1 = 0.1 * jax.random.normal(kw1, (C, C, 3, 3, 3), jnp.float32)
    w2 = 0.1 * jax.random.normal(kw2, (C, C, 3, 3, 3), jnp.float32)
    # BatchNorm3d affine params (shape (C,)); perturbed to exercise the affine path.
    g1 = 1.0 + 0.1 * jax.random.normal(kg1, (C,), jnp.float32)
    b1 = 0.1 * jax.random.normal(kb1, (C,), jnp.float32)
    g2 = 1.0 + 0.1 * jax.random.normal(kg2, (C,), jnp.float32)
    b2 = 0.1 * jax.random.normal(kb2, (C,), jnp.float32)

    out = jax.block_until_ready(residual_inner_forward(x, w1, g1, b1, w2, g2, b2))
    ref = _reference(x, w1, g1, b1, w2, g2, b2)

    assert out.shape == (N, C, D, H, W)
    # Kernel uses bf16 MXU operands (f32 accumulation + f32 BN math) vs. an f32
    # reference: two chained bf16-operand convs put the expected worst-case
    # deviation around ~2e-2 on the O(1) BN-normalized outputs.
    max_err = jnp.max(jnp.abs(out - ref))
    assert jnp.allclose(out, ref, rtol=5e-2, atol=5e-2), f"max abs err {max_err}"
    print("KERNEL_OK")
</pallas_src>

<mosaic_0001>
module attributes {stable_mosaic.version = 11 : i64} {
  func.func @residual_inner_kernel(%arg0: memref<2x8x512xf32, #tpu.memory_space<vmem>>, %arg1: memref<3x512x512xbf16, #tpu.memory_space<vmem>>, %arg2: memref<3x512x512xbf16, #tpu.memory_space<vmem>>, %arg3: memref<1x8xf32, #tpu.memory_space<vmem>>, %arg4: memref<1x8xf32, #tpu.memory_space<vmem>>, %arg5: memref<1x8xf32, #tpu.memory_space<vmem>>, %arg6: memref<1x8xf32, #tpu.memory_space<vmem>>, %arg7: memref<512x8xf32, #tpu.memory_space<vmem>>, %arg8: memref<8x512xf32, #tpu.memory_space<vmem>>, %arg9: memref<2x8x512xf32, #tpu.memory_space<vmem>>, %arg10: memref<2x10x512xf32, #tpu.memory_space<vmem>>) attributes {dimension_semantics = [], scalar_prefetch = 0 : i64, scratch_operands = 1 : i64, tpu.core_type = #tpu.core_type<tc>} {
    %c0 = arith.constant 0 : index
    %c0_0 = arith.constant 0 : index
    %0 = vector.load %arg7[%c0, %c0_0] : memref<512x8xf32, #tpu.memory_space<vmem>>, vector<512x8xf32>
    %c0_1 = arith.constant 0 : index
    %c0_2 = arith.constant 0 : index
    %1 = vector.load %arg8[%c0_1, %c0_2] : memref<8x512xf32, #tpu.memory_space<vmem>>, vector<8x512xf32>
    %cst = arith.constant 0.000000e+00 : f32
    %2 = vector.broadcast %cst : f32 to vector<2x10x512xf32>
    %c0_3 = arith.constant 0 : index
    %c0_4 = arith.constant 0 : index
    %c0_5 = arith.constant 0 : index
    %3 = vector.load %arg10[%c0_3, %c0_4, %c0_5] : memref<2x10x512xf32, #tpu.memory_space<vmem>>, vector<2x10x512xf32>
    tpu.vector_store %arg10[%c0_3, %c0_4, %c0_5], %2 {strides = array<i32>} : memref<2x10x512xf32, #tpu.memory_space<vmem>>, vector<2x10x512xf32>,
    %c0_6 = arith.constant 0 : index
    %c0_7 = arith.constant 0 : index
    %c0_8 = arith.constant 0 : index
    %4 = vector.load %arg0[%c0_6, %c0_7, %c0_8] : memref<2x8x512xf32, #tpu.memory_space<vmem>>, vector<2x8x512xf32>
    %c0_9 = arith.constant 0 : index
    %c0_10 = arith.constant 0 : index
    %5 = vector.load %arg3[%c0_9, %c0_10] : memref<1x8xf32, #tpu.memory_space<vmem>>, vector<1x8xf32>
    %c0_11 = arith.constant 0 : index
    %c0_12 = arith.constant 0 : index
    %6 = vector.load %arg4[%c0_11, %c0_12] : memref<1x8xf32, #tpu.memory_space<vmem>>, vector<1x8xf32>
    %c0_13 = arith.constant 0 : index
    %c1 = arith.constant 1 : index
    %c0_14 = arith.constant 0 : index
    %7 = vector.load %arg10[%c0_13, %c1, %c0_14] : memref<2x10x512xf32, #tpu.memory_space<vmem>>, vector<2x8x512xf32>
    tpu.vector_store %arg10[%c0_13, %c1, %c0_14], %4 {strides = array<i32>} : memref<2x10x512xf32, #tpu.memory_space<vmem>>, vector<2x8x512xf32>,
    %cst_15 = arith.constant 0.000000e+00 : f32
    %8 = vector.broadcast %cst_15 : f32 to vector<16x512xf32>
    %c0_16 = arith.constant 0 : index
    %c0_17 = arith.constant 0 : index
    %c0_18 = arith.constant 0 : index
    %9 = vector.load %arg10[%c0_16, %c0_17, %c0_18] : memref<2x10x512xf32, #tpu.memory_space<vmem>>, vector<2x8x512xf32>
    %10 = vector.shape_cast %9 : vector<2x8x512xf32> to vector<16x512xf32>
    %11 = arith.truncf %10 : vector<16x512xf32> to vector<16x512xbf16>
    %c0_19 = arith.constant 0 : index
    %c0_20 = arith.constant 0 : index
    %c0_21 = arith.constant 0 : index
    %12 = vector.load %arg1[%c0_19, %c0_20, %c0_21] : memref<3x512x512xbf16, #tpu.memory_space<vmem>>, vector<1x512x512xbf16>
    %13 = vector.shape_cast %12 : vector<1x512x512xbf16> to vector<512x512xbf16>
    %cst_22 = arith.constant dense<0.000000e+00> : vector<16x512xf32>
    %14 = tpu.matmul %11, %13, %cst_22 {dimension_numbers = #tpu.dot_dimension_numbers<[1], [0], [0], [1], [0, 0, 1, 1], [], []>} : vector<16x512xbf16>, vector<512x512xbf16>, vector<16x512xf32> -> vector<16x512xf32>
    %15 = arith.addf %8, %14 : vector<16x512xf32>
    %c0_23 = arith.constant 0 : index
    %c1_24 = arith.constant 1 : index
    %c0_25 = arith.constant 0 : index
    %16 = vector.load %arg10[%c0_23, %c1_24, %c0_25] : memref<2x10x512xf32, #tpu.memory_space<vmem>>, vector<2x8x512xf32>
    %17 = vector.shape_cast %16 : vector<2x8x512xf32> to vector<16x512xf32>
    %18 = arith.truncf %17 : vector<16x512xf32> to vector<16x512xbf16>
    %c1_26 = arith.constant 1 : index
    %c0_27 = arith.constant 0 : index
    %c0_28 = arith.constant 0 : index
    %19 = vector.load %arg1[%c1_26, %c0_27, %c0_28] : memref<3x512x512xbf16, #tpu.memory_space<vmem>>, vector<1x512x512xbf16>
    %20 = vector.shape_cast %19 : vector<1x512x512xbf16> to vector<512x512xbf16>
    %cst_29 = arith.constant dense<0.000000e+00> : vector<16x512xf32>
    %21 = tpu.matmul %18, %20, %cst_29 {dimension_numbers = #tpu.dot_dimension_numbers<[1], [0], [0], [1], [0, 0, 1, 1], [], []>} : vector<16x512xbf16>, vector<512x512xbf16>, vector<16x512xf32> -> vector<16x512xf32>
    %22 = arith.addf %15, %21 : vector<16x512xf32>
    %c0_30 = arith.constant 0 : index
    %c2 = arith.constant 2 : index
    %c0_31 = arith.constant 0 : index
    %23 = vector.load %arg10[%c0_30, %c2, %c0_31] : memref<2x10x512xf32, #tpu.memory_space<vmem>>, vector<2x8x512xf32>
    %24 = vector.shape_cast %23 : vector<2x8x512xf32> to vector<16x512xf32>
    %25 = arith.truncf %24 : vector<16x512xf32> to vector<16x512xbf16>
    %c2_32 = arith.constant 2 : index
    %c0_33 = arith.constant 0 : index
    %c0_34 = arith.constant 0 : index
    %26 = vector.load %arg1[%c2_32, %c0_33, %c0_34] : memref<3x512x512xbf16, #tpu.memory_space<vmem>>, vector<1x512x512xbf16>
    %27 = vector.shape_cast %26 : vector<1x512x512xbf16> to vector<512x512xbf16>
    %cst_35 = arith.constant dense<0.000000e+00> : vector<16x512xf32>
    %28 = tpu.matmul %25, %27, %cst_35 {dimension_numbers = #tpu.dot_dimension_numbers<[1], [0], [0], [1], [0, 0, 1, 1], [], []>} : vector<16x512xbf16>, vector<512x512xbf16>, vector<16x512xf32> -> vector<16x512xf32>
    %29 = arith.addf %22, %28 : vector<16x512xf32>
    %cst_36 = arith.constant dense<0.000000e+00> : vector<512xf32>
    %30 = vector.multi_reduction <add>, %29, %cst_36 [0] : vector<16x512xf32> to vector<512xf32>
    %31 = vector.shape_cast %30 : vector<512xf32> to vector<1x512xf32>
    %32 = arith.mulf %29, %29 : vector<16x512xf32>
    %cst_37 = arith.constant dense<0.000000e+00> : vector<512xf32>
    %33 = vector.multi_reduction <add>, %32, %cst_37 [0] : vector<16x512xf32> to vector<512xf32>
    %34 = vector.shape_cast %33 : vector<512xf32> to vector<1x512xf32>
    %35 = tpu.concatenate %31, %34 in 0 : vector<1x512xf32>, vector<1x512xf32> -> vector<2x512xf32>
    %cst_38 = arith.constant dense<0.000000e+00> : vector<2x8xf32>
    %36 = tpu.matmul %35, %0, %cst_38 {dimension_numbers = #tpu.dot_dimension_numbers<[1], [0], [0], [1], [0, 0, 1, 1], [], []>} : vector<2x512xf32>, vector<512x8xf32>, vector<2x8xf32> -> vector<2x8xf32>
    %cst_39 = arith.constant 9.765625E-4 : f32
    %37 = vector.broadcast %cst_39 : f32 to vector<2x8xf32>
    %38 = arith.mulf %36, %37 : vector<2x8xf32>
    %39 = vector.extract_strided_slice %38 {offsets = [0, 0], sizes = [1, 8], strides = [1, 1]} : vector<2x8xf32> to vector<1x8xf32>
    %40 = vector.extract_strided_slice %38 {offsets = [1, 0], sizes = [1, 8], strides = [1, 1]} : vector<2x8xf32> to vector<1x8xf32>
    %41 = arith.mulf %39, %39 : vector<1x8xf32>
    %42 = arith.subf %40, %41 : vector<1x8xf32>
    %cst_40 = arith.constant 9.99999974E-6 : f32
    %43 = vector.broadcast %cst_40 : f32 to vector<1x8xf32>
    %44 = arith.addf %42, %43 : vector<1x8xf32>
    %45 = math.rsqrt %44 : vector<1x8xf32>
    %46 = arith.mulf %5, %45 : vector<1x8xf32>
    %47 = arith.mulf %39, %46 : vector<1x8xf32>
    %48 = arith.subf %6, %47 : vector<1x8xf32>
    %49 = tpu.concatenate %46, %48 in 0 : vector<1x8xf32>, vector<1x8xf32> -> vector<2x8xf32>
    %cst_41 = arith.constant dense<0.000000e+00> : vector<2x512xf32>
    %50 = tpu.matmul %49, %1, %cst_41 {dimension_numbers = #tpu.dot_dimension_numbers<[1], [0], [0], [1], [0, 0, 1, 1], [], []>} : vector<2x8xf32>, vector<8x512xf32>, vector<2x512xf32> -> vector<2x512xf32>
    %51 = vector.extract_strided_slice %50 {offsets = [0, 0], sizes = [1, 512], strides = [1, 1]} : vector<2x512xf32> to vector<1x512xf32>
    %52 = vector.broadcast %51 : vector<1x512xf32> to vector<16x512xf32>
    %53 = arith.mulf %29, %52 : vector<16x512xf32>
    %54 = vector.extract_strided_slice %50 {offsets = [1, 0], sizes = [1, 512], strides = [1, 1]} : vector<2x512xf32> to vector<1x512xf32>
    %55 = vector.broadcast %54 : vector<1x512xf32> to vector<16x512xf32>
    %56 = arith.addf %53, %55 : vector<16x512xf32>
    %cst_42 = arith.constant 0.000000e+00 : f32
    %57 = vector.broadcast %cst_42 : f32 to vector<16x512xf32>
    %58 = arith.maximumf %56, %57 : vector<16x512xf32>
    %59 = vector.shape_cast %58 : vector<16x512xf32> to vector<2x8x512xf32>
    %c0_43 = arith.constant 0 : index
    %c0_44 = arith.constant 0 : index
    %60 = vector.load %arg5[%c0_43, %c0_44] : memref<1x8xf32, #tpu.memory_space<vmem>>, vector<1x8xf32>
    %c0_45 = arith.constant 0 : index
    %c0_46 = arith.constant 0 : index
    %61 = vector.load %arg6[%c0_45, %c0_46] : memref<1x8xf32, #tpu.memory_space<vmem>>, vector<1x8xf32>
    %c0_47 = arith.constant 0 : index
    %c1_48 = arith.constant 1 : index
    %c0_49 = arith.constant 0 : index
    %62 = vector.load %arg10[%c0_47, %c1_48, %c0_49] : memref<2x10x512xf32, #tpu.memory_space<vmem>>, vector<2x8x512xf32>
    tpu.vector_store %arg10[%c0_47, %c1_48, %c0_49], %59 {strides = array<i32>} : memref<2x10x512xf32, #tpu.memory_space<vmem>>, vector<2x8x512xf32>,
    %cst_50 = arith.constant 0.000000e+00 : f32
    %63 = vector.broadcast %cst_50 : f32 to vector<16x512xf32>
    %c0_51 = arith.constant 0 : index
    %c0_52 = arith.constant 0 : index
    %c0_53 = arith.constant 0 : index
    %64 = vector.load %arg10[%c0_51, %c0_52, %c0_53] : memref<2x10x512xf32, #tpu.memory_space<vmem>>, vector<2x8x512xf32>
    %65 = vector.shape_cast %64 : vector<2x8x512xf32> to vector<16x512xf32>
    %66 = arith.truncf %65 : vector<16x512xf32> to vector<16x512xbf16>
    %c0_54 = arith.constant 0 : index
    %c0_55 = arith.constant 0 : index
    %c0_56 = arith.constant 0 : index
    %67 = vector.load %arg2[%c0_54, %c0_55, %c0_56] : memref<3x512x512xbf16, #tpu.memory_space<vmem>>, vector<1x512x512xbf16>
    %68 = vector.shape_cast %67 : vector<1x512x512xbf16> to vector<512x512xbf16>
    %cst_57 = arith.constant dense<0.000000e+00> : vector<16x512xf32>
    %69 = tpu.matmul %66, %68, %cst_57 {dimension_numbers = #tpu.dot_dimension_numbers<[1], [0], [0], [1], [0, 0, 1, 1], [], []>} : vector<16x512xbf16>, vector<512x512xbf16>, vector<16x512xf32> -> vector<16x512xf32>
    %70 = arith.addf %63, %69 : vector<16x512xf32>
    %c0_58 = arith.constant 0 : index
    %c1_59 = arith.constant 1 : index
    %c0_60 = arith.constant 0 : index
    %71 = vector.load %arg10[%c0_58, %c1_59, %c0_60] : memref<2x10x512xf32, #tpu.memory_space<vmem>>, vector<2x8x512xf32>
    %72 = vector.shape_cast %71 : vector<2x8x512xf32> to vector<16x512xf32>
    %73 = arith.truncf %72 : vector<16x512xf32> to vector<16x512xbf16>
    %c1_61 = arith.constant 1 : index
    %c0_62 = arith.constant 0 : index
    %c0_63 = arith.constant 0 : index
    %74 = vector.load %arg2[%c1_61, %c0_62, %c0_63] : memref<3x512x512xbf16, #tpu.memory_space<vmem>>, vector<1x512x512xbf16>
    %75 = vector.shape_cast %74 : vector<1x512x512xbf16> to vector<512x512xbf16>
    %cst_64 = arith.constant dense<0.000000e+00> : vector<16x512xf32>
    %76 = tpu.matmul %73, %75, %cst_64 {dimension_numbers = #tpu.dot_dimension_numbers<[1], [0], [0], [1], [0, 0, 1, 1], [], []>} : vector<16x512xbf16>, vector<512x512xbf16>, vector<16x512xf32> -> vector<16x512xf32>
    %77 = arith.addf %70, %76 : vector<16x512xf32>
    %c0_65 = arith.constant 0 : index
    %c2_66 = arith.constant 2 : index
    %c0_67 = arith.constant 0 : index
    %78 = vector.load %arg10[%c0_65, %c2_66, %c0_67] : memref<2x10x512xf32, #tpu.memory_space<vmem>>, vector<2x8x512xf32>
    %79 = vector.shape_cast %78 : vector<2x8x512xf32> to vector<16x512xf32>
    %80 = arith.truncf %79 : vector<16x512xf32> to vector<16x512xbf16>
    %c2_68 = arith.constant 2 : index
    %c0_69 = arith.constant 0 : index
    %c0_70 = arith.constant 0 : index
    %81 = vector.load %arg2[%c2_68, %c0_69, %c0_70] : memref<3x512x512xbf16, #tpu.memory_space<vmem>>, vector<1x512x512xbf16>
    %82 = vector.shape_cast %81 : vector<1x512x512xbf16> to vector<512x512xbf16>
    %cst_71 = arith.constant dense<0.000000e+00> : vector<16x512xf32>
    %83 = tpu.matmul %80, %82, %cst_71 {dimension_numbers = #tpu.dot_dimension_numbers<[1], [0], [0], [1], [0, 0, 1, 1], [], []>} : vector<16x512xbf16>, vector<512x512xbf16>, vector<16x512xf32> -> vector<16x512xf32>
    %84 = arith.addf %77, %83 : vector<16x512xf32>
    %cst_72 = arith.constant dense<0.000000e+00> : vector<512xf32>
    %85 = vector.multi_reduction <add>, %84, %cst_72 [0] : vector<16x512xf32> to vector<512xf32>
    %86 = vector.shape_cast %85 : vector<512xf32> to vector<1x512xf32>
    %87 = arith.mulf %84, %84 : vector<16x512xf32>
    %cst_73 = arith.constant dense<0.000000e+00> : vector<512xf32>
    %88 = vector.multi_reduction <add>, %87, %cst_73 [0] : vector<16x512xf32> to vector<512xf32>
    %89 = vector.shape_cast %88 : vector<512xf32> to vector<1x512xf32>
    %90 = tpu.concatenate %86, %89 in 0 : vector<1x512xf32>, vector<1x512xf32> -> vector<2x512xf32>
    %cst_74 = arith.constant dense<0.000000e+00> : vector<2x8xf32>
    %91 = tpu.matmul %90, %0, %cst_74 {dimension_numbers = #tpu.dot_dimension_numbers<[1], [0], [0], [1], [0, 0, 1, 1], [], []>} : vector<2x512xf32>, vector<512x8xf32>, vector<2x8xf32> -> vector<2x8xf32>
    %cst_75 = arith.constant 9.765625E-4 : f32
    %92 = vector.broadcast %cst_75 : f32 to vector<2x8xf32>
    %93 = arith.mulf %91, %92 : vector<2x8xf32>
    %94 = vector.extract_strided_slice %93 {offsets = [0, 0], sizes = [1, 8], strides = [1, 1]} : vector<2x8xf32> to vector<1x8xf32>
    %95 = vector.extract_strided_slice %93 {offsets = [1, 0], sizes = [1, 8], strides = [1, 1]} : vector<2x8xf32> to vector<1x8xf32>
    %96 = arith.mulf %94, %94 : vector<1x8xf32>
    %97 = arith.subf %95, %96 : vector<1x8xf32>
    %cst_76 = arith.constant 9.99999974E-6 : f32
    %98 = vector.broadcast %cst_76 : f32 to vector<1x8xf32>
    %99 = arith.addf %97, %98 : vector<1x8xf32>
    %100 = math.rsqrt %99 : vector<1x8xf32>
    %101 = arith.mulf %60, %100 : vector<1x8xf32>
    %102 = arith.mulf %94, %101 : vector<1x8xf32>
    %103 = arith.subf %61, %102 : vector<1x8xf32>
    %104 = tpu.concatenate %101, %103 in 0 : vector<1x8xf32>, vector<1x8xf32> -> vector<2x8xf32>
    %cst_77 = arith.constant dense<0.000000e+00> : vector<2x512xf32>
    %105 = tpu.matmul %104, %1, %cst_77 {dimension_numbers = #tpu.dot_dimension_numbers<[1], [0], [0], [1], [0, 0, 1, 1], [], []>} : vector<2x8xf32>, vector<8x512xf32>, vector<2x512xf32> -> vector<2x512xf32>
    %106 = vector.extract_strided_slice %105 {offsets = [0, 0], sizes = [1, 512], strides = [1, 1]} : vector<2x512xf32> to vector<1x512xf32>
    %107 = vector.broadcast %106 : vector<1x512xf32> to vector<16x512xf32>
    %108 = arith.mulf %84, %107 : vector<16x512xf32>
    %109 = vector.extract_strided_slice %105 {offsets = [1, 0], sizes = [1, 512], strides = [1, 1]} : vector<2x512xf32> to vector<1x512xf32>
    %110 = vector.broadcast %109 : vector<1x512xf32> to vector<16x512xf32>
    %111 = arith.addf %108, %110 : vector<16x512xf32>
    %cst_78 = arith.constant 0.000000e+00 : f32
    %112 = vector.broadcast %cst_78 : f32 to vector<16x512xf32>
    %113 = arith.maximumf %111, %112 : vector<16x512xf32>
    %114 = vector.shape_cast %113 : vector<16x512xf32> to vector<2x8x512xf32>
    %c0_79 = arith.constant 0 : index
    %c0_80 = arith.constant 0 : index
    %c0_81 = arith.constant 0 : index
    %115 = vector.load %arg9[%c0_79, %c0_80, %c0_81] : memref<2x8x512xf32, #tpu.memory_space<vmem>>, vector<2x8x512xf32>
    tpu.vector_store %arg9[%c0_79, %c0_80, %c0_81], %114 {strides = array<i32>} : memref<2x8x512xf32, #tpu.memory_space<vmem>>, vector<2x8x512xf32>,
    return
  }
}

</mosaic_0001>

<bundles_post_ra>
// kernel: residual_inner_forward.1
= control target key start
LH: loop header
LB: loop body
LE: loop exit
PB: predicated region body
PF: predicated region fallthrough
CT: control target
= control target key end

     0   :  { %vm338_vm0 = vcmask 1046528   ;;  %vm2264_vm1 = vcmask 1045504   ;;  %vm3366_vm2 = vcmask 1040384   ;;  %vm3480_vm6 = vcmask 64512   ;;  %s17277_s1 = inlined_call_operand.vmem [shape: bf16[3,512,512], index: 1, kind: input, shape index: {}]   ;;  %s17278_s0 = inlined_call_operand.vmem [shape: f32[2,8,512], index: 0, kind: input, shape index: {}]   ;;  %s17279_s7 = inlined_call_operand.vmem [shape: f32[512,8], index: 7, kind: input, shape index: {}]   ;;  %s17280_s8 = inlined_call_operand.vmem [shape: f32[8,512], index: 8, kind: input, shape index: {}]   ;;  %s17281_s2 = inlined_call_operand.vmem [shape: bf16[3,512,512], index: 2, kind: input, shape index: {}]   ;;  %s17282_s3 = inlined_call_operand.vmem [shape: f32[1,8], index: 3, kind: input, shape index: {}]   ;;  %s17283_s4 = inlined_call_operand.vmem [shape: f32[1,8], index: 4, kind: input, shape index: {}]   ;;  %s17284_s5 = inlined_call_operand.vmem [shape: f32[1,8], index: 5, kind: input, shape index: {}]   ;;  %s17285_s6 = inlined_call_operand.vmem [shape: f32[1,8], index: 6, kind: input, shape index: {}]   ;;  %s17286_s9 = inlined_call_operand.vmem [shape: f32[2,8,512], index: 9, kind: output, shape index: {}]  }
   0x1   :  { %v7318_v0 = vld [vmem:[%s17277_s1 + $0x4e0] sm:$0xf]  ;;  %v10826_v1 = vld [vmem:[%s17277_s1 + $0x4ec] sm:$0xf0] }
   0x2   :  { %v7446_v2 = vld [vmem:[%s17277_s1 + $0x5e0] sm:$0xf]  ;;  %v7319_v3 = vor.u32 %v10826_v1, %v7318_v0  ;;  %v10858_v4 = vld [vmem:[%s17277_s1 + $0x5ec] sm:$0xf0] }
   0x3   :  { %v7574_v5 = vld [vmem:[%s17277_s1 + $0x6e0] sm:$0xf]  ;;  %v10890_v6 = vld [vmem:[%s17277_s1 + $0x6ec] sm:$0xf0]  ;;  %v7447_v7 = vor.u32 %v10858_v4, %v7446_v2 }
   0x4   :  { %v7575_v8 = vor.u32 %v10890_v6, %v7574_v5  ;;  %v7702_v9 = vld [vmem:[%s17277_s1 + $0x7e0] sm:$0xf]  ;;  %v10922_v10 = vld [vmem:[%s17277_s1 + $0x7ec] sm:$0xf0]  ;;  %1144 = vmatpush.bf16.msra.mxu0 %v7319_v3 }
   0x5   :  { %v7302_v11 = vld [vmem:[%s17277_s1 + $0x4c0] sm:$0xf]  ;;  %v7703_v12 = vor.u32 %v10922_v10, %v7702_v9  ;;  %v10822_v13 = vld [vmem:[%s17277_s1 + $0x4cc] sm:$0xf0]  ;;  %1158 = vmatpush.bf16.msra.mxu1 %v7447_v7 }
   0x6   :  { %v7430_v14 = vld [vmem:[%s17277_s1 + $0x5c0] sm:$0xf]  ;;  %v10854_v15 = vld [vmem:[%s17277_s1 + $0x5cc] sm:$0xf0]  ;;  %1172 = vmatpush.bf16.msra.mxu2 %v7575_v8  ;;  %v7303_v16 = vor.u32 %v10822_v13, %v7302_v11 }
   0x7   :  { %v7431_v17 = vor.u32 %v10854_v15, %v7430_v14  ;;  %v7558_v18 = vld [vmem:[%s17277_s1 + $0x6c0] sm:$0xf]  ;;  %v10886_v19 = vld [vmem:[%s17277_s1 + $0x6cc] sm:$0xf0]  ;;  %1186 = vmatpush.bf16.msra.mxu3 %v7703_v12 }
   0x8   :  { %v7686_v20 = vld [vmem:[%s17277_s1 + $0x7c0] sm:$0xf]  ;;  %v7559_v21 = vor.u32 %v10886_v19, %v7558_v18  ;;  %v10918_v22 = vld [vmem:[%s17277_s1 + $0x7cc] sm:$0xf0]  ;;  %1145 = vmatpush.bf16.msra.mxu0 %v7303_v16 }
   0x9   :  { %v7286_v23 = vld [vmem:[%s17277_s1 + $0x4a0] sm:$0xf]  ;;  %v10818_v24 = vld [vmem:[%s17277_s1 + $0x4ac] sm:$0xf0]  ;;  %v7687_v25 = vor.u32 %v10918_v22, %v7686_v20  ;;  %1159 = vmatpush.bf16.msra.mxu1 %v7431_v17 }
   0xa   :  { %v7414_v26 = vld [vmem:[%s17277_s1 + $0x5a0] sm:$0xf]  ;;  %v10850_v27 = vld [vmem:[%s17277_s1 + $0x5ac] sm:$0xf0]  ;;  %v7287_v29 = vor.u32 %v10818_v24, %v7286_v23  ;;  %1173 = vmatpush.bf16.msra.mxu2 %v7559_v21 }
   0xb   :  { %v7542_v28 = vld [vmem:[%s17277_s1 + $0x6a0] sm:$0xf]  ;;  %v10882_v30 = vld [vmem:[%s17277_s1 + $0x6ac] sm:$0xf0]  ;;  %v7415_v33 = vor.u32 %v10850_v27, %v7414_v26  ;;  %1187 = vmatpush.bf16.msra.mxu3 %v7687_v25 }
   0xc   :  { %v7670_v31 = vld [vmem:[%s17277_s1 + $0x7a0] sm:$0xf]  ;;  %v10914_v32 = vld [vmem:[%s17277_s1 + $0x7ac] sm:$0xf0]  ;;  %v7543_v34 = vor.u32 %v10882_v30, %v7542_v28  ;;  %1146 = vmatpush.bf16.msra.mxu0 %v7287_v29  ;;  %v10824_v28 = vld [vmem:[%s17277_s1 + $0x4e4] sm:$0xf] }
   0xd   :  { %v7270_v35 = vld [vmem:[%s17277_s1 + $0x480] sm:$0xf]  ;;  %v10814_v36 = vld [vmem:[%s17277_s1 + $0x48c] sm:$0xf0]  ;;  %v7671_v38 = vor.u32 %v10914_v32, %v7670_v31  ;;  %1160 = vmatpush.bf16.msra.mxu1 %v7415_v33  ;;  %v7320_v29 = vld [vmem:[%s17277_s1 + $0x4f0] sm:$0xf0] }
   0xe   :  { %v7398_v37 = vld [vmem:[%s17277_s1 + $0x580] sm:$0xf]  ;;  %v10846_v39 = vld [vmem:[%s17277_s1 + $0x58c] sm:$0xf0]  ;;  %v7271_v44 = vor.u32 %v10814_v36, %v7270_v35  ;;  %1174 = vmatpush.bf16.msra.mxu2 %v7543_v34  ;;  %v10856_v30 = vld [vmem:[%s17277_s1 + $0x5e4] sm:$0xf] }
   0xf   :  { %v7526_v40 = vld [vmem:[%s17277_s1 + $0x680] sm:$0xf]  ;;  %v10878_v41 = vld [vmem:[%s17277_s1 + $0x68c] sm:$0xf0]  ;;  %v7399_v45 = vor.u32 %v10846_v39, %v7398_v37  ;;  %1188 = vmatpush.bf16.msra.mxu3 %v7671_v38  ;;  %v7448_v32 = vld [vmem:[%s17277_s1 + $0x5f0] sm:$0xf0] }
  0x10   :  { %v7654_v42 = vld [vmem:[%s17277_s1 + $0x780] sm:$0xf]  ;;  %v10910_v43 = vld [vmem:[%s17277_s1 + $0x78c] sm:$0xf0]  ;;  %v7527_v46 = vor.u32 %v10878_v41, %v7526_v40  ;;  %1147 = vmatpush.bf16.msra.mxu0 %v7271_v44  ;;  %v10888_v33 = vld [vmem:[%s17277_s1 + $0x6e4] sm:$0xf]  ;;  %v7323_v40 = vor.u32 %v10824_v28, %v7320_v29  ;;  %v7451_v41 = vor.u32 %v10856_v30, %v7448_v32 }
  0x11   :  { %v7254_v47 = vld [vmem:[%s17277_s1 + $0x460] sm:$0xf]  ;;  %v10810_v48 = vld [vmem:[%s17277_s1 + $0x46c] sm:$0xf0]  ;;  %v7655_v50 = vor.u32 %v10910_v43, %v7654_v42  ;;  %1161 = vmatpush.bf16.msra.mxu1 %v7399_v45  ;;  %v7576_v34 = vld [vmem:[%s17277_s1 + $0x6f0] sm:$0xf0] }
  0x12   :  { %v7382_v49 = vld [vmem:[%s17277_s1 + $0x560] sm:$0xf]  ;;  %v10842_v51 = vld [vmem:[%s17277_s1 + $0x56c] sm:$0xf0]  ;;  %v7255_v56 = vor.u32 %v10810_v48, %v7254_v47  ;;  %1175 = vmatpush.bf16.msra.mxu2 %v7527_v46  ;;  %v10920_v37 = vld [vmem:[%s17277_s1 + $0x7e4] sm:$0xf]  ;;  %v7579_v42 = vor.u32 %v10888_v33, %v7576_v34 }
  0x13   :  { %v7510_v52 = vld [vmem:[%s17277_s1 + $0x660] sm:$0xf]  ;;  %v10874_v53 = vld [vmem:[%s17277_s1 + $0x66c] sm:$0xf0]  ;;  %v7383_v57 = vor.u32 %v10842_v51, %v7382_v49  ;;  %1189 = vmatpush.bf16.msra.mxu3 %v7655_v50  ;;  %v7704_v38 = vld [vmem:[%s17277_s1 + $0x7f0] sm:$0xf0] }
  0x14   :  { %v7638_v54 = vld [vmem:[%s17277_s1 + $0x760] sm:$0xf]  ;;  %v10906_v55 = vld [vmem:[%s17277_s1 + $0x76c] sm:$0xf0]  ;;  %v7511_v58 = vor.u32 %v10874_v53, %v7510_v52  ;;  %1148 = vmatpush.bf16.msra.mxu0 %v7255_v56  ;;  %v10820_v43 = vld [vmem:[%s17277_s1 + $0x4c4] sm:$0xf]  ;;  %v7707_v46 = vor.u32 %v10920_v37, %v7704_v38 }
  0x15   :  { %v7238_v59 = vld [vmem:[%s17277_s1 + $0x440] sm:$0xf]  ;;  %v10806_v60 = vld [vmem:[%s17277_s1 + $0x44c] sm:$0xf0]  ;;  %v7639_v62 = vor.u32 %v10906_v55, %v7638_v54  ;;  %1162 = vmatpush.bf16.msra.mxu1 %v7383_v57  ;;  %v7304_v44 = vld [vmem:[%s17277_s1 + $0x4d0] sm:$0xf0] }
  0x16   :  { %v7366_v61 = vld [vmem:[%s17277_s1 + $0x540] sm:$0xf]  ;;  %v10838_v63 = vld [vmem:[%s17277_s1 + $0x54c] sm:$0xf0]  ;;  %v7239_v4 = vor.u32 %v10806_v60, %v7238_v59  ;;  %1176 = vmatpush.bf16.msra.mxu2 %v7511_v58  ;;  %v10852_v45 = vld [vmem:[%s17277_s1 + $0x5c4] sm:$0xf]  ;;  %v7307_v52 = vor.u32 %v10820_v43, %v7304_v44 }
  0x17   :  { %v7494_v0 = vld [vmem:[%s17277_s1 + $0x640] sm:$0xf]  ;;  %v10870_v1 = vld [vmem:[%s17277_s1 + $0x64c] sm:$0xf0]  ;;  %v7367_v5 = vor.u32 %v10838_v63, %v7366_v61  ;;  %1190 = vmatpush.bf16.msra.mxu3 %v7639_v62  ;;  %v7432_v47 = vld [vmem:[%s17277_s1 + $0x5d0] sm:$0xf0] }
  0x18   :  { %v7622_v2 = vld [vmem:[%s17277_s1 + $0x740] sm:$0xf]  ;;  %v10902_v3 = vld [vmem:[%s17277_s1 + $0x74c] sm:$0xf0]  ;;  %v7495_v6 = vor.u32 %v10870_v1, %v7494_v0  ;;  %1149 = vmatpush.bf16.msra.mxu0 %v7239_v4  ;;  %v10884_v48 = vld [vmem:[%s17277_s1 + $0x6c4] sm:$0xf]  ;;  %v7435_v54 = vor.u32 %v10852_v45, %v7432_v47 }
  0x19   :  { %v7222_v7 = vld [vmem:[%s17277_s1 + $0x420] sm:$0xf]  ;;  %v10802_v8 = vld [vmem:[%s17277_s1 + $0x42c] sm:$0xf0]  ;;  %v7623_v10 = vor.u32 %v10902_v3, %v7622_v2  ;;  %1163 = vmatpush.bf16.msra.mxu1 %v7367_v5  ;;  %v7560_v49 = vld [vmem:[%s17277_s1 + $0x6d0] sm:$0xf0] }
  0x1a   :  { %v7350_v9 = vld [vmem:[%s17277_s1 + $0x520] sm:$0xf]  ;;  %v10834_v11 = vld [vmem:[%s17277_s1 + $0x52c] sm:$0xf0]  ;;  %v7223_v16 = vor.u32 %v10802_v8, %v7222_v7  ;;  %1177 = vmatpush.bf16.msra.mxu2 %v7495_v6  ;;  %v10916_v50 = vld [vmem:[%s17277_s1 + $0x7c4] sm:$0xf]  ;;  %v7563_v55 = vor.u32 %v10884_v48, %v7560_v49 }
  0x1b   :  { %v7478_v12 = vld [vmem:[%s17277_s1 + $0x620] sm:$0xf]  ;;  %v10866_v13 = vld [vmem:[%s17277_s1 + $0x62c] sm:$0xf0]  ;;  %v7351_v19 = vor.u32 %v10834_v11, %v7350_v9  ;;  %1191 = vmatpush.bf16.msra.mxu3 %v7623_v10  ;;  %v7688_v51 = vld [vmem:[%s17277_s1 + $0x7d0] sm:$0xf0] }
  0x1c   :  { %v7606_v14 = vld [vmem:[%s17277_s1 + $0x720] sm:$0xf]  ;;  %v10898_v15 = vld [vmem:[%s17277_s1 + $0x72c] sm:$0xf0]  ;;  %v7479_v20 = vor.u32 %v10866_v13, %v7478_v12  ;;  %1150 = vmatpush.bf16.msra.mxu0 %v7223_v16  ;;  %v10816_v53 = vld [vmem:[%s17277_s1 + $0x4a4] sm:$0xf]  ;;  %v7691_v59 = vor.u32 %v10916_v50, %v7688_v51 }
  0x1d   :  { %v7206_v17 = vld [vmem:[%s17277_s1 + $0x400] sm:$0xf]  ;;  %v10798_v18 = vld [vmem:[%s17277_s1 + $0x40c] sm:$0xf0]  ;;  %v7607_v24 = vor.u32 %v10898_v15, %v7606_v14  ;;  %1164 = vmatpush.bf16.msra.mxu1 %v7351_v19  ;;  %v7288_v56 = vld [vmem:[%s17277_s1 + $0x4b0] sm:$0xf0] }
  0x1e   :  { %v7334_v21 = vld [vmem:[%s17277_s1 + $0x500] sm:$0xf]  ;;  %v10830_v22 = vld [vmem:[%s17277_s1 + $0x50c] sm:$0xf0]  ;;  %v7207_v31 = vor.u32 %v10798_v18, %v7206_v17  ;;  %1178 = vmatpush.bf16.msra.mxu2 %v7479_v20  ;;  %v10848_v57 = vld [vmem:[%s17277_s1 + $0x5a4] sm:$0xf]  ;;  %v7291_v2 = vor.u32 %v10816_v53, %v7288_v56 }
  0x1f   :  { %v7462_v23 = vld [vmem:[%s17277_s1 + $0x600] sm:$0xf]  ;;  %v10862_v25 = vld [vmem:[%s17277_s1 + $0x60c] sm:$0xf0]  ;;  %v7335_v35 = vor.u32 %v10830_v22, %v7334_v21  ;;  %1192 = vmatpush.bf16.msra.mxu3 %v7607_v24  ;;  %v7416_v58 = vld [vmem:[%s17277_s1 + $0x5b0] sm:$0xf0] }
  0x20   :  { %v7590_v26 = vld [vmem:[%s17277_s1 + $0x700] sm:$0xf]  ;;  %v10894_v27 = vld [vmem:[%s17277_s1 + $0x70c] sm:$0xf0]  ;;  %v7463_v36 = vor.u32 %v10862_v25, %v7462_v23  ;;  %1151 = vmatpush.bf16.msra.mxu0 %v7207_v31  ;;  %v10880_v60 = vld [vmem:[%s17277_s1 + $0x6a4] sm:$0xf]  ;;  %v7419_v7 = vor.u32 %v10848_v57, %v7416_v58 }
  0x21   :  { %v7591_v39 = vor.u32 %v10894_v27, %v7590_v26  ;;  %1165 = vmatpush.bf16.msra.mxu1 %v7335_v35  ;;  %v7544_v61 = vld [vmem:[%s17277_s1 + $0x6b0] sm:$0xf0]  ;;  %v10912_v62 = vld [vmem:[%s17277_s1 + $0x7a4] sm:$0xf]  ;;  %v11509_v11 = vmov 0.0  }
  0x22   :  { %1179 = vmatpush.bf16.msra.mxu2 %v7463_v36  ;;  %v7672_v63 = vld [vmem:[%s17277_s1 + $0x7b0] sm:$0xf0]  ;;  %v10812_v0 = vld [vmem:[%s17277_s1 + $0x484] sm:$0xf]  ;;  %v7547_v8 = vor.u32 %v10880_v60, %v7544_v61  ;;  %102 = vst [vmem:[#allocation2 + $0x58] sm:$0xff] %v11509_v11 }
  0x23   :  { %1193 = vmatpush.bf16.msra.mxu3 %v7591_v39  ;;  %v7272_v1 = vld [vmem:[%s17277_s1 + $0x490] sm:$0xf0]  ;;  %v10844_v3 = vld [vmem:[%s17277_s1 + $0x584] sm:$0xf]  ;;  %v7675_v13 = vor.u32 %v10912_v62, %v7672_v63  ;;  %106 = vst [vmem:[#allocation2 + $0x8] sm:$0x3] %v11509_v11 }
  0x24   :  { %1200 = vmatpush.bf16.msrb.mxu0 %v7323_v40  ;;  %v7400_v4 = vld [vmem:[%s17277_s1 + $0x590] sm:$0xf0]  ;;  %v10876_v9 = vld [vmem:[%s17277_s1 + $0x684] sm:$0xf]  ;;  %110 = vst [vmem:[#allocation2 + $0x10] sm:$0xff] %v11509_v11  ;;  %v7275_v19 = vor.u32 %v10812_v0, %v7272_v1 }
  0x25   :  { %1214 = vmatpush.bf16.msrb.mxu1 %v7451_v41  ;;  %v118_v5 = vld [vmem:[%s17278_s0 + $0x10] sm:$0xff]  ;;  %v10908_v14 = vld [vmem:[%s17277_s1 + $0x784] sm:$0xf]  ;;  %114 = vst [vmem:[#allocation2 + $0x78] sm:$0x3] %v11509_v11  ;;  %v7403_v22 = vor.u32 %v10844_v3, %v7400_v4  ;;  %v11912_v41 = vld [vmem:[%s17278_s0 + $0x18] sm:$0xff] }
  0x26   :  { %1228 = vmatpush.bf16.msrb.mxu2 %v7579_v42  ;;  %v122_v6 = vld [vmem:[%s17278_s0 + $0x30] sm:$0xff]  ;;  %v136_v12 = vrot.slane %v118_v5, 7  ;;  %v10808_v16 = vld [vmem:[%s17277_s1 + $0x464] sm:$0xf]  ;;  %100 = vst [vmem:[#allocation2 + $0x30] sm:$0xff] %v11509_v11 }
  0x27   :  { %1242 = vmatpush.bf16.msrb.mxu3 %v7707_v46  ;;  %v7528_v10 = vld [vmem:[%s17277_s1 + $0x690] sm:$0xf0]  ;;  %v140_v18 = vrot.slane %v122_v6, 7  ;;  %v10840_v20 = vld [vmem:[%s17277_s1 + $0x564] sm:$0xf]  ;;  %101 = vst [vmem:[#allocation2] sm:$0xff] %v11509_v11 }
  0x28   :  { %1201 = vmatpush.bf16.msrb.mxu0 %v7307_v52  ;;  %v7656_v15 = vld [vmem:[%s17277_s1 + $0x790] sm:$0xf0]  ;;  %v7531_v23 = vor.u32 %v10876_v9, %v7528_v10  ;;  %v10872_v24 = vld [vmem:[%s17277_s1 + $0x664] sm:$0xf]  ;;  %152 = vst [vmem:[#allocation2 + $0x58] sm:$0xfe] %v136_v12 }
  0x29   :  { %1215 = vmatpush.bf16.msrb.mxu1 %v7435_v54  ;;  %v7256_v17 = vld [vmem:[%s17277_s1 + $0x470] sm:$0xf0]  ;;  %v7659_v26 = vor.u32 %v10908_v14, %v7656_v15  ;;  %v10904_v27 = vld [vmem:[%s17277_s1 + $0x764] sm:$0xf]  ;;  %156 = vst [vmem:[#allocation2 + $0x8] sm:$0x1] %v136_v12 }
  0x2a   :  { %1229 = vmatpush.bf16.msrb.mxu2 %v7563_v55  ;;  %v7384_v21 = vld [vmem:[%s17277_s1 + $0x570] sm:$0xf0]  ;;  %v10804_v29 = vld [vmem:[%s17277_s1 + $0x444] sm:$0xf]  ;;  %160 = vst [vmem:[#allocation2 + $0x10] sm:$0xfe] %v140_v18  ;;  %v7259_v31 = vor.u32 %v10808_v16, %v7256_v17 }
  0x2b   :  { %1243 = vmatpush.bf16.msrb.mxu3 %v7691_v59  ;;  %v7512_v25 = vld [vmem:[%s17277_s1 + $0x670] sm:$0xf0]  ;;  %v10836_v32 = vld [vmem:[%s17277_s1 + $0x544] sm:$0xf]  ;;  %164 = vst [vmem:[#allocation2 + $0x78] sm:$0x1] %v140_v18  ;;  %v7387_v34 = vor.u32 %v10840_v20, %v7384_v21 }
  0x2c   :  { %1202 = vmatpush.bf16.msrb.mxu0 %v7291_v2  ;;  %v7640_v28 = vld [vmem:[%s17277_s1 + $0x770] sm:$0xf0]  ;;  %v7515_v35 = vor.u32 %v10872_v24, %v7512_v25  ;;  %v10868_v36 = vld [vmem:[%s17277_s1 + $0x644] sm:$0xf]  ;;  %103 = vst [vmem:[#allocation2 + $0x18] sm:$0xff] %v11509_v11  ;;  %v123_v52 = vld [vmem:[%s17278_s0 + $0x38] sm:$0xff] }
  0x2d   :  { %1216 = vmatpush.bf16.msrb.mxu1 %v7419_v7  ;;  %v7240_v30 = vld [vmem:[%s17277_s1 + $0x450] sm:$0xf0]  ;;  %v7643_v38 = vor.u32 %v10904_v27, %v7640_v28  ;;  %v10900_v39 = vld [vmem:[%s17277_s1 + $0x744] sm:$0xf]  ;;  %104 = vst [vmem:[#allocation2 + $0x50] sm:$0x3] %v11509_v11 }
  0x2e   :  { %1230 = vmatpush.bf16.msrb.mxu2 %v7547_v8  ;;  %v7368_v33 = vld [vmem:[%s17277_s1 + $0x550] sm:$0xf0]  ;;  %v10800_v42 = vld [vmem:[%s17277_s1 + $0x424] sm:$0xf]  ;;  %v7243_v44 = vor.u32 %v10804_v29, %v7240_v30  ;;  %105 = vst [vmem:[#allocation2 + $0x68] sm:$0x3] %v11509_v11 }
  0x2f   :  { %1244 = vmatpush.bf16.msrb.mxu3 %v7675_v13  ;;  %v7496_v37 = vld [vmem:[%s17277_s1 + $0x650] sm:$0xf0]  ;;  %v308_v45 = vld [vmem:[#allocation2 + $0x58] sm:$0xfe]  ;;  %v7371_v48 = vor.u32 %v10836_v32, %v7368_v33  ;;  %107 = vst [vmem:[#allocation2 + $0x48] sm:$0x3] %v11509_v11 }
  0x30   :  { %1203 = vmatpush.bf16.msrb.mxu0 %v7275_v19  ;;  %v7624_v40 = vld [vmem:[%s17277_s1 + $0x750] sm:$0xf0]  ;;  %v10832_v46 = vld [vmem:[%s17277_s1 + $0x524] sm:$0xf]  ;;  %v7499_v49 = vor.u32 %v10868_v36, %v7496_v37  ;;  %v312_v50 = vld [vmem:[#allocation2 + $0x8] sm:$0x1] }
  0x31   :  { %1217 = vmatpush.bf16.msrb.mxu1 %v7403_v22  ;;  %v7224_v43 = vld [vmem:[%s17277_s1 + $0x430] sm:$0xf0]  ;;  %v345_v51 = vrot.slane %v308_v45, 1  ;;  %v10864_v53 = vld [vmem:[%s17277_s1 + $0x624] sm:$0xf]  ;;  %v7627_v56 = vor.u32 %v10900_v39, %v7624_v40  ;;  %v346_v58 = vrot.slane %v312_v50, 1 }
  0x32   :  { %1231 = vmatpush.bf16.msrb.mxu2 %v7531_v23  ;;  %v7352_v47 = vld [vmem:[%s17277_s1 + $0x530] sm:$0xf0]  ;;  %v10896_v55 = vld [vmem:[%s17277_s1 + $0x724] sm:$0xf]  ;;  %v316_v57 = vld [vmem:[#allocation2 + $0x10] sm:$0xfe]  ;;  %v7227_v1 = vor.u32 %v10800_v42, %v7224_v43 }
  0x33   :  { %1245 = vmatpush.bf16.msrb.mxu3 %v7659_v26  ;;  %v7480_v54 = vld [vmem:[%s17277_s1 + $0x630] sm:$0xf0]  ;;  %v137_v59 = vrot.slane %v11912_v41, 7  ;;  %v320_v60 = vld [vmem:[#allocation2 + $0x78] sm:$0x1]  ;;  %v357_v61 = vrot.slane %v316_v57, 1  ;;  %v347_v63 = vsel %vm338_vm0, %v345_v51, %v346_v58  ;;  %v7355_v6 = vor.u32 %v10832_v46, %v7352_v47 }
  0x34   :  { %1204 = vmatpush.bf16.msrb.mxu0 %v7259_v31  ;;  %108 = vst [vmem:[#allocation2 + $0x40] sm:$0xff] %v11509_v11  ;;  %v7608_v62 = vld [vmem:[%s17277_s1 + $0x730] sm:$0xf0]  ;;  %v358_v0 = vrot.slane %v320_v60, 1  ;;  %v116_v2 = vld [vmem:[%s17278_s0] sm:$0xff]  ;;  %v141_v5 = vrot.slane %v123_v52, 7  ;;  %v7483_v10 = vor.u32 %v10864_v53, %v7480_v54 }
  0x35   :  { %1218 = vmatpush.bf16.msrb.mxu1 %v7387_v34  ;;  %109 = vst [vmem:[#allocation2 + $0x20] sm:$0xff] %v11509_v11  ;;  %v10796_v3 = vld [vmem:[%s17277_s1 + $0x404] sm:$0xf]  ;;  %v7208_v4 = vld [vmem:[%s17277_s1 + $0x410] sm:$0xf0]  ;;  %v7611_v12 = vor.u32 %v10896_v55, %v7608_v62  ;;  %v134_v20 = vrot.slane %v116_v2, 7 }
  0x36   :  { %1232 = vmatpush.bf16.msrb.mxu2 %v7515_v35  ;;  %111 = vst [vmem:[#allocation2 + $0x38] sm:$0xff] %v11509_v11  ;;  %v10828_v7 = vld [vmem:[%s17277_s1 + $0x504] sm:$0xf]  ;;  %v7336_v8 = vld [vmem:[%s17277_s1 + $0x510] sm:$0xf0]  ;;  %v359_v9 = vsel %vm338_vm0, %v357_v61, %v358_v0  ;;  %v7211_v19 = vor.u32 %v10796_v3, %v7208_v4  ;;  %v121_v28 = vld [vmem:[%s17278_s0 + $0x28] sm:$0xff] }
  0x37   :  { %1246 = vmatpush.bf16.msrb.mxu3 %v7643_v38  ;;  %112 = vst [vmem:[#allocation2 + $0x60] sm:$0x3] %v11509_v11  ;;  %v10860_v13 = vld [vmem:[%s17277_s1 + $0x604] sm:$0xf]  ;;  %v7464_v14 = vld [vmem:[%s17277_s1 + $0x610] sm:$0xf0]  ;;  %v11972_v15 = vpack.c.bf16 %v359_v9, %v347_v63  ;;  %v7339_v21 = vor.u32 %v10828_v7, %v7336_v8 }
  0x38   :  { %1205 = vmatpush.bf16.msrb.mxu0 %v7243_v44  ;;  %113 = vst [vmem:[#allocation2 + $0x70] sm:$0x3] %v11509_v11  ;;  %v10892_v16 = vld [vmem:[%s17277_s1 + $0x704] sm:$0xf]  ;;  %v7592_v17 = vld [vmem:[%s17277_s1 + $0x710] sm:$0xf0]  ;;  %v7467_v23 = vor.u32 %v10860_v13, %v7464_v14 }
  0x39   :  { %1219 = vmatpush.bf16.msrb.mxu1 %v7371_v48  ;;  %115 = vst [vmem:[#allocation2 + $0x28] sm:$0x3] %v11509_v11  ;;  %v120_v18 = vld [vmem:[%s17278_s0 + $0x20] sm:$0xff]  ;;  %1180 = vmatmul.bf16.vlgmr.msra.gmra.mxu2 %v11972_v15  ;;  %v7582_v22 = vld [vmem:[%s17277_s1 + $0x6e8] sm:$0xf]  ;;  %v7595_v24 = vor.u32 %v10892_v16, %v7592_v17  ;;  %v139_v32 = vrot.slane %v121_v28, 7 }
  0x3a   :  { %1233 = vmatpush.bf16.msrb.mxu2 %v7499_v49  ;;  %153 = vst [vmem:[#allocation2 + $0x18] sm:$0xfe] %v137_v59  ;;  %v117_v11 = vld [vmem:[%s17278_s0 + $0x8] sm:$0xff]  ;;  %v10891_v25 = vld [vmem:[%s17277_s1 + $0x6f4] sm:$0xf0]  ;;  %v138_v26 = vrot.slane %v120_v18, 7 }
  0x3b   :  { %1247 = vmatpush.bf16.msrb.mxu3 %v7627_v56  ;;  %157 = vst [vmem:[#allocation2 + $0x48] sm:$0x1] %v137_v59  ;;  %v7583_v27 = vor.u32 %v10891_v25, %v7582_v22  ;;  %v135_v29 = vrot.slane %v117_v11, 7  ;;  %v7566_v30 = vld [vmem:[%s17277_s1 + $0x6c8] sm:$0xf] }
  0x3c   :  { %1206 = vmatpush.bf16.msrb.mxu0 %v7227_v1  ;;  %161 = vst [vmem:[#allocation2 + $0x38] sm:$0xfe] %v141_v5  ;;  %v10887_v31 = vld [vmem:[%s17277_s1 + $0x6d4] sm:$0xf0]  ;;  %v7710_v37 = vld [vmem:[%s17277_s1 + $0x7e8] sm:$0xf] }
  0x3d   :  { %1220 = vmatpush.bf16.msrb.mxu1 %v7355_v6  ;;  %165 = vst [vmem:[#allocation2 + $0x28] sm:$0x1] %v141_v5  ;;  %v7567_v33 = vor.u32 %v10887_v31, %v7566_v30  ;;  %v10923_v38 = vld [vmem:[%s17277_s1 + $0x7f4] sm:$0xf0]  ;;  %v7326_v48 = vld [vmem:[%s17277_s1 + $0x4e8] sm:$0xf] }
  0x3e   :  { %1234 = vmatpush.bf16.msrb.mxu2 %v7483_v10  ;;  %150 = vst [vmem:[#allocation2 + $0x30] sm:$0xfe] %v134_v20  ;;  %v10827_v49 = vld [vmem:[%s17277_s1 + $0x4f4] sm:$0xf0]  ;;  %v7694_v50 = vld [vmem:[%s17277_s1 + $0x7c8] sm:$0xf]  ;;  %v7711_v54 = vor.u32 %v10923_v38, %v7710_v37 }
  0x3f   :  { %1248 = vmatpush.bf16.msrb.mxu3 %v7611_v12  ;;  %154 = vst [vmem:[#allocation2 + $0x50] sm:$0x1] %v134_v20  ;;  %v10919_v55 = vld [vmem:[%s17277_s1 + $0x7d4] sm:$0xf0]  ;;  %v7550_v59 = vld [vmem:[%s17277_s1 + $0x6a8] sm:$0xf]  ;;  %v7327_v8 = vor.u32 %v10827_v49, %v7326_v48 }
  0x40   :  { %1207 = vmatpush.bf16.msrb.mxu0 %v7211_v19  ;;  %158 = vst [vmem:[#allocation2 + $0x40] sm:$0xfe] %v138_v26  ;;  %v7454_v63 = vld [vmem:[%s17277_s1 + $0x5e8] sm:$0xf]  ;;  %v10883_v0 = vld [vmem:[%s17277_s1 + $0x6b4] sm:$0xf0]  ;;  %v7695_v10 = vor.u32 %v10919_v55, %v7694_v50 }
  0x41   :  { %1221 = vmatpush.bf16.msrb.mxu1 %v7339_v21  ;;  %v309_v34 = vld [vmem:[#allocation2 + $0x18] sm:$0xfe]  ;;  %162 = vst [vmem:[#allocation2 + $0x60] sm:$0x1] %v138_v26  ;;  %v10859_v3 = vld [vmem:[%s17277_s1 + $0x5f4] sm:$0xf0]  ;;  %v7551_v4 = vor.u32 %v10883_v0, %v7550_v59 }
  0x42   :  { %1235 = vmatpush.bf16.msrb.mxu2 %v7467_v23  ;;  %v313_v35 = vld [vmem:[#allocation2 + $0x48] sm:$0x1]  ;;  %v348_v36 = vrot.slane %v309_v34, 1  ;;  %151 = vst [vmem:[#allocation2] sm:$0xfe] %v135_v29  ;;  %v7455_v21 = vor.u32 %v10859_v3, %v7454_v63 }
  0x43   :  { %1249 = vmatpush.bf16.msrb.mxu3 %v7595_v24  ;;  %v317_v39 = vld [vmem:[#allocation2 + $0x38] sm:$0xfe]  ;;  %v349_v40 = vrot.slane %v313_v35, 1  ;;  %155 = vst [vmem:[#allocation2 + $0x68] sm:$0x1] %v135_v29 }
  0x44   :  { %v321_v41 = vld [vmem:[#allocation2 + $0x28] sm:$0x1]  ;;  %v360_v42 = vrot.slane %v317_v39, 1  ;;  %159 = vst [vmem:[#allocation2 + $0x20] sm:$0xfe] %v139_v32 }
  0x45   :  { %v350_v43 = vsel %vm338_vm0, %v348_v36, %v349_v40  ;;  %v361_v44 = vrot.slane %v321_v41, 1  ;;  %v306_v45 = vld [vmem:[#allocation2 + $0x30] sm:$0xfe]  ;;  %163 = vst [vmem:[#allocation2 + $0x70] sm:$0x1] %v139_v32 }
  0x46   :  { %1284 = vmatpush.bf16.msra.mxu2 %v7583_v27  ;;  %v310_v46 = vld [vmem:[#allocation2 + $0x50] sm:$0x1]  ;;  %v339_v47 = vrot.slane %v306_v45, 1  ;;  %v7310_v9 = vld [vmem:[%s17277_s1 + $0x4c8] sm:$0xf] }
  0x47   :  { %v362_v51 = vsel %vm338_vm0, %v360_v42, %v361_v44  ;;  %v314_v52 = vld [vmem:[#allocation2 + $0x40] sm:$0xfe]  ;;  %v340_v53 = vrot.slane %v310_v46, 1  ;;  %v10823_v16 = vld [vmem:[%s17277_s1 + $0x4d4] sm:$0xf0] }
  0x48   :  { %v12024_v56 = vpack.c.bf16 %v362_v51, %v350_v43  ;;  %v318_v57 = vld [vmem:[#allocation2 + $0x60] sm:$0x1]  ;;  %v351_v58 = vrot.slane %v314_v52, 1  ;;  %v10915_v20 = vld [vmem:[%s17277_s1 + $0x7b4] sm:$0xf0]  ;;  %v7311_v24 = vor.u32 %v10823_v16, %v7310_v9 }
  0x49   :  { %v341_v60 = vsel %vm338_vm0, %v339_v47, %v340_v53  ;;  %v352_v61 = vrot.slane %v318_v57, 1  ;;  %v307_v62 = vld [vmem:[#allocation2] sm:$0xfe]  ;;  %1236 = vmatmul.bf16.vlgmr.msrb.gmra.mxu2 %v11972_v15  ;;  %v10879_v11 = vld [vmem:[%s17277_s1 + $0x694] sm:$0xf0] }
  0x4a   :  { %1285 = vmatpush.bf16.msra.mxu2 %v7567_v33  ;;  %1194 = vmatmul.bf16.vlgmr.msra.gmra.mxu3 %v12024_v56  ;;  %v311_v1 = vld [vmem:[#allocation2 + $0x68] sm:$0x1]  ;;  %v342_v2 = vrot.slane %v307_v62, 1  ;;  %v7678_v19 = vld [vmem:[%s17277_s1 + $0x7a8] sm:$0xf] }
  0x4b   :  { %v353_v5 = vsel %vm338_vm0, %v351_v58, %v352_v61  ;;  %v315_v6 = vld [vmem:[#allocation2 + $0x20] sm:$0xfe]  ;;  %v343_v7 = vrot.slane %v311_v1, 1  ;;  %1298 = vmatpush.bf16.msra.mxu3 %v7711_v54  ;;  %v10855_v26 = vld [vmem:[%s17277_s1 + $0x5d4] sm:$0xf0]  ;;  %v7679_v31 = vor.u32 %v10915_v20, %v7678_v19 }
  0x4c   :  { %v12045_v12 = vpack.c.bf16 %v353_v5, %v341_v60  ;;  %v319_v13 = vld [vmem:[#allocation2 + $0x70] sm:$0x1]  ;;  %v354_v14 = vrot.slane %v315_v6, 1  ;;  %v7534_v22 = vld [vmem:[%s17277_s1 + $0x688] sm:$0xf] }
  0x4d   :  { %v344_v17 = vsel %vm338_vm0, %v342_v2, %v343_v7  ;;  %v355_v18 = vrot.slane %v319_v13, 1  ;;  %v7438_v25 = vld [vmem:[%s17277_s1 + $0x5c8] sm:$0xf]  ;;  %v7535_v27 = vor.u32 %v10879_v11, %v7534_v22  ;;  %v10819_v30 = vld [vmem:[%s17277_s1 + $0x4b4] sm:$0xf0] }
  0x4e   :  { %1286 = vmatpush.bf16.msra.mxu2 %v7551_v4  ;;  %1152 = vmatmul.bf16.vlgmr.msra.gmra.mxu0 %v12045_v12  ;;  %v7294_v29 = vld [vmem:[%s17277_s1 + $0x4a8] sm:$0xf]  ;;  %v10911_v33 = vld [vmem:[%s17277_s1 + $0x794] sm:$0xf0]  ;;  %v7439_v37 = vor.u32 %v10855_v26, %v7438_v25  ;;  %v10889_v4 = vld [vmem:[%s17277_s1 + $0x6ec] sm:$0xf] }
  0x4f   :  { %v356_v23 = vsel %vm338_vm0, %v354_v14, %v355_v18  ;;  %1256 = vmatpush.bf16.msra.mxu0 %v7327_v8  ;;  %1299 = vmatpush.bf16.msra.mxu3 %v7695_v10  ;;  %v7662_v32 = vld [vmem:[%s17277_s1 + $0x788] sm:$0xf]  ;;  %v10875_v35 = vld [vmem:[%s17277_s1 + $0x674] sm:$0xf0]  ;;  %v7295_v38 = vor.u32 %v10819_v30, %v7294_v29  ;;  %v7584_v8 = vld [vmem:[%s17277_s1 + $0x6f8] sm:$0xf0] }
  0x50   :  { %v12071_v28 = vpack.c.bf16 %v356_v23, %v344_v17  ;;  %v7518_v34 = vld [vmem:[%s17277_s1 + $0x668] sm:$0xf]  ;;  %v10851_v40 = vld [vmem:[%s17277_s1 + $0x5b4] sm:$0xf0]  ;;  %v7663_v44 = vor.u32 %v10911_v33, %v7662_v32  ;;  %v7587_v14 = vor.u32 %v10889_v4, %v7584_v8  ;;  %v10885_v19 = vld [vmem:[%s17277_s1 + $0x6cc] sm:$0xf] }
  0x51   :  { %v7519_v36 = vor.u32 %v10875_v35, %v7518_v34  ;;  %v7422_v39 = vld [vmem:[%s17277_s1 + $0x5a8] sm:$0xf]  ;;  %v10815_v43 = vld [vmem:[%s17277_s1 + $0x494] sm:$0xf0]  ;;  %v7568_v20 = vld [vmem:[%s17277_s1 + $0x6d8] sm:$0xf0] }
  0x52   :  { %1287 = vmatpush.bf16.msra.mxu2 %v7535_v27  ;;  %1166 = vmatmul.bf16.vlgmr.msra.gmra.mxu1 %v12071_v28  ;;  %v7502_v41 = vld [vmem:[%s17277_s1 + $0x648] sm:$0xf]  ;;  %v10871_v45 = vld [vmem:[%s17277_s1 + $0x654] sm:$0xf0]  ;;  %v7423_v51 = vor.u32 %v10851_v40, %v7422_v39  ;;  %v10921_v26 = vld [vmem:[%s17277_s1 + $0x7ec] sm:$0xf]  ;;  %v7571_v29 = vor.u32 %v10885_v19, %v7568_v20 }
  0x53   :  { %1270 = vmatpush.bf16.msra.mxu1 %v7455_v21  ;;  %1257 = vmatpush.bf16.msra.mxu0 %v7311_v24  ;;  %v7278_v42 = vld [vmem:[%s17277_s1 + $0x488] sm:$0xf]  ;;  %v10907_v47 = vld [vmem:[%s17277_s1 + $0x774] sm:$0xf0]  ;;  %v7503_v48 = vor.u32 %v10871_v45, %v7502_v41  ;;  %v7712_v27 = vld [vmem:[%s17277_s1 + $0x7f8] sm:$0xf0] }
  0x54   :  { %1300 = vmatpush.bf16.msra.mxu3 %v7679_v31  ;;  %v7646_v46 = vld [vmem:[%s17277_s1 + $0x768] sm:$0xf]  ;;  %v10867_v50 = vld [vmem:[%s17277_s1 + $0x634] sm:$0xf0]  ;;  %v7279_v52 = vor.u32 %v10815_v43, %v7278_v42  ;;  %v10881_v33 = vld [vmem:[%s17277_s1 + $0x6ac] sm:$0xf]  ;;  %v7715_v41 = vor.u32 %v10921_v26, %v7712_v27 }
  0x55   :  { %v7486_v49 = vld [vmem:[%s17277_s1 + $0x628] sm:$0xf]  ;;  %v10847_v54 = vld [vmem:[%s17277_s1 + $0x594] sm:$0xf0]  ;;  %v7647_v58 = vor.u32 %v10907_v47, %v7646_v46  ;;  %v7552_v34 = vld [vmem:[%s17277_s1 + $0x6b8] sm:$0xf0] }
  0x56   :  { %1288 = vmatpush.bf16.msra.mxu2 %v7519_v36  ;;  %v7406_v53 = vld [vmem:[%s17277_s1 + $0x588] sm:$0xf]  ;;  %v10811_v57 = vld [vmem:[%s17277_s1 + $0x474] sm:$0xf0]  ;;  %v7487_v61 = vor.u32 %v10867_v50, %v7486_v49  ;;  %v10825_v39 = vld [vmem:[%s17277_s1 + $0x4ec] sm:$0xf] }
  0x57   :  { %1271 = vmatpush.bf16.msra.mxu1 %v7439_v37  ;;  %1258 = vmatpush.bf16.msra.mxu0 %v7295_v38  ;;  %v7262_v55 = vld [vmem:[%s17277_s1 + $0x468] sm:$0xf]  ;;  %v10903_v60 = vld [vmem:[%s17277_s1 + $0x754] sm:$0xf0]  ;;  %v7407_v0 = vor.u32 %v10847_v54, %v7406_v53  ;;  %v7328_v40 = vld [vmem:[%s17277_s1 + $0x4f8] sm:$0xf0] }
  0x58   :  { %1301 = vmatpush.bf16.msra.mxu3 %v7663_v44  ;;  %v7630_v59 = vld [vmem:[%s17277_s1 + $0x748] sm:$0xf]  ;;  %v10863_v63 = vld [vmem:[%s17277_s1 + $0x614] sm:$0xf0]  ;;  %v7263_v1 = vor.u32 %v10811_v57, %v7262_v55  ;;  %v10917_v42 = vld [vmem:[%s17277_s1 + $0x7cc] sm:$0xf]  ;;  %v7555_v44 = vor.u32 %v10881_v33, %v7552_v34 }
  0x59   :  { %v7470_v62 = vld [vmem:[%s17277_s1 + $0x608] sm:$0xf]  ;;  %v10843_v3 = vld [vmem:[%s17277_s1 + $0x574] sm:$0xf0]  ;;  %v7631_v7 = vor.u32 %v10903_v60, %v7630_v59  ;;  %v7696_v43 = vld [vmem:[%s17277_s1 + $0x7d8] sm:$0xf0] }
  0x5a   :  { %1289 = vmatpush.bf16.msra.mxu2 %v7503_v48  ;;  %1250 = vmatmul.bf16.vlgmr.msrb.gmra.mxu3 %v12024_v56  ;;  %v7390_v2 = vld [vmem:[%s17277_s1 + $0x568] sm:$0xf]  ;;  %v10807_v6 = vld [vmem:[%s17277_s1 + $0x454] sm:$0xf0]  ;;  %v7471_v13 = vor.u32 %v10863_v63, %v7470_v62  ;;  %v10877_v47 = vld [vmem:[%s17277_s1 + $0x68c] sm:$0xf]  ;;  %v7699_v57 = vor.u32 %v10917_v42, %v7696_v43 }
  0x5b   :  { %1272 = vmatpush.bf16.msra.mxu1 %v7423_v51  ;;  %1259 = vmatpush.bf16.msra.mxu0 %v7279_v52  ;;  %v7246_v5 = vld [vmem:[%s17277_s1 + $0x448] sm:$0xf]  ;;  %v10899_v10 = vld [vmem:[%s17277_s1 + $0x734] sm:$0xf0]  ;;  %v7391_v16 = vor.u32 %v10843_v3, %v7390_v2  ;;  %v7536_v48 = vld [vmem:[%s17277_s1 + $0x698] sm:$0xf0]  ;;  %v7331_v51 = vor.u32 %v10825_v39, %v7328_v40 }
  0x5c   :  { %1302 = vmatpush.bf16.msra.mxu3 %v7647_v58  ;;  %v7614_v9 = vld [vmem:[%s17277_s1 + $0x728] sm:$0xf]  ;;  %v7247_v17 = vor.u32 %v10807_v6, %v7246_v5  ;;  %v10839_v21 = vld [vmem:[%s17277_s1 + $0x554] sm:$0xf0]  ;;  %v10857_v52 = vld [vmem:[%s17277_s1 + $0x5ec] sm:$0xf]  ;;  %v7539_v60 = vor.u32 %v10877_v47, %v7536_v48 }
  0x5d   :  { %v7374_v18 = vld [vmem:[%s17277_s1 + $0x548] sm:$0xf]  ;;  %v10803_v11 = vld [vmem:[%s17277_s1 + $0x434] sm:$0xf0]  ;;  %v7615_v23 = vor.u32 %v10899_v10, %v7614_v9  ;;  %v7456_v53 = vld [vmem:[%s17277_s1 + $0x5f8] sm:$0xf0] }
  0x5e   :  { %1290 = vmatpush.bf16.msra.mxu2 %v7487_v61  ;;  %1208 = vmatmul.bf16.vlgmr.msrb.gmra.mxu0 %v12045_v12  ;;  %v7230_v22 = vld [vmem:[%s17277_s1 + $0x428] sm:$0xf]  ;;  %v10895_v25 = vld [vmem:[%s17277_s1 + $0x714] sm:$0xf0]  ;;  %v7375_v30 = vor.u32 %v10839_v21, %v7374_v18  ;;  %v10821_v54 = vld [vmem:[%s17277_s1 + $0x4cc] sm:$0xf] }
  0x5f   :  { %1273 = vmatpush.bf16.msra.mxu1 %v7407_v0  ;;  %1260 = vmatpush.bf16.msra.mxu0 %v7263_v1  ;;  %v7598_v24 = vld [vmem:[%s17277_s1 + $0x708] sm:$0xf]  ;;  %v7231_v31 = vor.u32 %v10803_v11, %v7230_v22  ;;  %v10835_v35 = vld [vmem:[%s17277_s1 + $0x534] sm:$0xf0]  ;;  %v7312_v55 = vld [vmem:[%s17277_s1 + $0x4d8] sm:$0xf0]  ;;  %v7459_v0 = vor.u32 %v10857_v52, %v7456_v53 }
  0x60   :  { %1303 = vmatpush.bf16.msra.mxu3 %v7631_v7  ;;  %v7358_v32 = vld [vmem:[%s17277_s1 + $0x528] sm:$0xf]  ;;  %v10799_v37 = vld [vmem:[%s17277_s1 + $0x414] sm:$0xf0]  ;;  %v7599_v38 = vor.u32 %v10895_v25, %v7598_v24  ;;  %v10913_v58 = vld [vmem:[%s17277_s1 + $0x7ac] sm:$0xf]  ;;  %v7315_v1 = vor.u32 %v10821_v54, %v7312_v55 }
  0x61   :  { %v7214_v36 = vld [vmem:[%s17277_s1 + $0x408] sm:$0xf]  ;;  %v7359_v45 = vor.u32 %v10835_v35, %v7358_v32  ;;  %v10831_v50 = vld [vmem:[%s17277_s1 + $0x514] sm:$0xf0]  ;;  %v7680_v59 = vld [vmem:[%s17277_s1 + $0x7b8] sm:$0xf0] }
  0x62   :  { %1291 = vmatpush.bf16.msra.mxu2 %v7471_v13  ;;  %1222 = vmatmul.bf16.vlgmr.msrb.gmra.mxu1 %v12071_v28  ;;  %v7215_v46 = vor.u32 %v10799_v37, %v7214_v36  ;;  %v7342_v49 = vld [vmem:[%s17277_s1 + $0x508] sm:$0xf]  ;;  %v10873_v62 = vld [vmem:[%s17277_s1 + $0x66c] sm:$0xf]  ;;  %v7520_v63 = vld [vmem:[%s17277_s1 + $0x678] sm:$0xf0]  ;;  %v7683_v6 = vor.u32 %v10913_v58, %v7680_v59 }
  0x63   :  { %1274 = vmatpush.bf16.msra.mxu1 %v7391_v16  ;;  %1261 = vmatpush.bf16.msra.mxu0 %v7247_v17  ;;  %v7343_v61 = vor.u32 %v10831_v50, %v7342_v49  ;;  %v10853_v2 = vld [vmem:[%s17277_s1 + $0x5cc] sm:$0xf]  ;;  %v7440_v3 = vld [vmem:[%s17277_s1 + $0x5d8] sm:$0xf0]  ;;  %v7523_v9 = vor.u32 %v10873_v62, %v7520_v63  ;;  %v8086_v42 = vld [vmem:[%s17277_s1 + $0x2e0] sm:$0xf] }
  0x64   :  { %1304 = vmatpush.bf16.msra.mxu3 %v7615_v23  ;;  %v10817_v4 = vld [vmem:[%s17277_s1 + $0x4ac] sm:$0xf]  ;;  %v7296_v5 = vld [vmem:[%s17277_s1 + $0x4b8] sm:$0xf0]  ;;  %v10762_v43 = vld [vmem:[%s17277_s1 + $0x2ec] sm:$0xf0] }
  0x65   :  { %1292 = vmatmul.bf16.vlgmr.msra.gmra.mxu2 %v11972_v15  ;;  %v10909_v7 = vld [vmem:[%s17277_s1 + $0x78c] sm:$0xf]  ;;  %v7664_v8 = vld [vmem:[%s17277_s1 + $0x798] sm:$0xf0]  ;;  %v7299_v16 = vor.u32 %v10817_v4, %v7296_v5  ;;  %v8070_v55 = vld [vmem:[%s17277_s1 + $0x2c0] sm:$0xf] }
  0x66   :  { %1340 = vmatpush.bf16.msrb.mxu2 %v7587_v14  ;;  %v10869_v10 = vld [vmem:[%s17277_s1 + $0x64c] sm:$0xf]  ;;  %v7504_v13 = vld [vmem:[%s17277_s1 + $0x658] sm:$0xf0]  ;;  %v7443_v14 = vor.u32 %v10853_v2, %v7440_v3  ;;  %v7667_v21 = vor.u32 %v10909_v7, %v7664_v8  ;;  %v10754_v7 = vld [vmem:[%s17277_s1 + $0x2ac] sm:$0xf0] }
  0x67   :  { %1275 = vmatpush.bf16.msra.mxu1 %v7375_v30  ;;  %1262 = vmatpush.bf16.msra.mxu0 %v7231_v31  ;;  %v10849_v17 = vld [vmem:[%s17277_s1 + $0x5ac] sm:$0xf]  ;;  %v7424_v18 = vld [vmem:[%s17277_s1 + $0x5b8] sm:$0xf0]  ;;  %v7507_v23 = vor.u32 %v10869_v10, %v7504_v13 }
  0x68   :  { %1305 = vmatpush.bf16.msra.mxu3 %v7599_v38  ;;  %v10813_v19 = vld [vmem:[%s17277_s1 + $0x48c] sm:$0xf]  ;;  %v7280_v20 = vld [vmem:[%s17277_s1 + $0x498] sm:$0xf0]  ;;  %v7427_v26 = vor.u32 %v10849_v17, %v7424_v18  ;;  %v8198_v18 = vld [vmem:[%s17277_s1 + $0x3c0] sm:$0xf] }
  0x69   :  { %v10905_v22 = vld [vmem:[%s17277_s1 + $0x76c] sm:$0xf]  ;;  %v7648_v11 = vld [vmem:[%s17277_s1 + $0x778] sm:$0xf0]  ;;  %v7283_v27 = vor.u32 %v10813_v19, %v7280_v20  ;;  %v10790_v19 = vld [vmem:[%s17277_s1 + $0x3cc] sm:$0xf0] }
  0x6a   :  { %1341 = vmatpush.bf16.msrb.mxu2 %v7571_v29  ;;  %v10865_v24 = vld [vmem:[%s17277_s1 + $0x62c] sm:$0xf]  ;;  %v7488_v25 = vld [vmem:[%s17277_s1 + $0x638] sm:$0xf0]  ;;  %v7651_v33 = vor.u32 %v10905_v22, %v7648_v11  ;;  %v8038_v22 = vld [vmem:[%s17277_s1 + $0x280] sm:$0xf] }
  0x6b   :  { %1276 = vmatpush.bf16.msra.mxu1 %v7359_v45  ;;  %1263 = vmatpush.bf16.msra.mxu0 %v7215_v46  ;;  %v10845_v29 = vld [vmem:[%s17277_s1 + $0x58c] sm:$0xf]  ;;  %v7408_v30 = vld [vmem:[%s17277_s1 + $0x598] sm:$0xf0]  ;;  %v7491_v36 = vor.u32 %v10865_v24, %v7488_v25  ;;  %v10750_v11 = vld [vmem:[%s17277_s1 + $0x28c] sm:$0xf0] }
  0x6c   :  { %1354 = vmatpush.bf16.msrb.mxu3 %v7715_v41  ;;  %v10809_v31 = vld [vmem:[%s17277_s1 + $0x46c] sm:$0xf]  ;;  %v7264_v32 = vld [vmem:[%s17277_s1 + $0x478] sm:$0xf0]  ;;  %v7411_v39 = vor.u32 %v10845_v29, %v7408_v30  ;;  %v7814_v29 = vld [vmem:[%s17277_s1 + $0xc0] sm:$0xf] }
  0x6d   :  { %1306 = vmatmul.bf16.vlgmr.msra.gmra.mxu3 %v12024_v56  ;;  %v10901_v34 = vld [vmem:[%s17277_s1 + $0x74c] sm:$0xf]  ;;  %v7632_v35 = vld [vmem:[%s17277_s1 + $0x758] sm:$0xf0]  ;;  %v7267_v40 = vor.u32 %v10809_v31, %v7264_v32  ;;  %v10694_v30 = vld [vmem:[%s17277_s1 + $0xcc] sm:$0xf0]  ;;  %v8199_v31 = vor.u32 %v10790_v19, %v8198_v18 }
  0x6e   :  { %1342 = vmatpush.bf16.msrb.mxu2 %v7555_v44  ;;  %1264 = vmatmul.bf16.vlgmr.msra.gmra.mxu0 %v12045_v12  ;;  %v10861_v37 = vld [vmem:[%s17277_s1 + $0x60c] sm:$0xf]  ;;  %v7472_v38 = vld [vmem:[%s17277_s1 + $0x618] sm:$0xf0]  ;;  %v7635_v47 = vor.u32 %v10901_v34, %v7632_v35  ;;  %v8182_v32 = vld [vmem:[%s17277_s1 + $0x3a0] sm:$0xf]  ;;  %v8039_v34 = vor.u32 %v10750_v11, %v8038_v22 }
  0x6f   :  { %1312 = vmatpush.bf16.msrb.mxu0 %v7331_v51  ;;  %1277 = vmatpush.bf16.msra.mxu1 %v7343_v61  ;;  %v10841_v41 = vld [vmem:[%s17277_s1 + $0x56c] sm:$0xf]  ;;  %v7392_v44 = vld [vmem:[%s17277_s1 + $0x578] sm:$0xf0]  ;;  %v7475_v50 = vor.u32 %v10861_v37, %v7472_v38  ;;  %v8087_v51 = vor.u32 %v10762_v43, %v8086_v42  ;;  %v10746_v37 = vld [vmem:[%s17277_s1 + $0x26c] sm:$0xf0] }
  0x70   :  { %1355 = vmatpush.bf16.msrb.mxu3 %v7699_v57  ;;  %v10805_v45 = vld [vmem:[%s17277_s1 + $0x44c] sm:$0xf]  ;;  %v7248_v46 = vld [vmem:[%s17277_s1 + $0x458] sm:$0xf0]  ;;  %v7395_v52 = vor.u32 %v10841_v41, %v7392_v44  ;;  %v10758_v57 = vld [vmem:[%s17277_s1 + $0x2cc] sm:$0xf0] }
  0x71   :  { %v10897_v48 = vld [vmem:[%s17277_s1 + $0x72c] sm:$0xf]  ;;  %v7616_v49 = vld [vmem:[%s17277_s1 + $0x738] sm:$0xf0]  ;;  %v7251_v53 = vor.u32 %v10805_v45, %v7248_v46  ;;  %v8071_v2 = vor.u32 %v10758_v57, %v8070_v55  ;;  %v10726_v41 = vld [vmem:[%s17277_s1 + $0x1cc] sm:$0xf0] }
  0x72   :  { %1343 = vmatpush.bf16.msrb.mxu2 %v7539_v60  ;;  %1278 = vmatmul.bf16.vlgmr.msra.gmra.mxu1 %v12071_v28  ;;  %v10837_v54 = vld [vmem:[%s17277_s1 + $0x54c] sm:$0xf]  ;;  %v7376_v58 = vld [vmem:[%s17277_s1 + $0x558] sm:$0xf0]  ;;  %v7619_v61 = vor.u32 %v10897_v48, %v7616_v49  ;;  %v7798_v42 = vld [vmem:[%s17277_s1 + $0xa0] sm:$0xf] }
  0x73   :  { %1326 = vmatpush.bf16.msrb.mxu1 %v7459_v0  ;;  %1313 = vmatpush.bf16.msrb.mxu0 %v7315_v1  ;;  %v10801_v59 = vld [vmem:[%s17277_s1 + $0x42c] sm:$0xf]  ;;  %v7232_v60 = vld [vmem:[%s17277_s1 + $0x438] sm:$0xf0]  ;;  %v8214_v0 = vld [vmem:[%s17277_s1 + $0x3e0] sm:$0xf]  ;;  %v7379_v3 = vor.u32 %v10837_v54, %v7376_v58 }
  0x74   :  { %1356 = vmatpush.bf16.msrb.mxu3 %v7683_v6  ;;  %v10893_v62 = vld [vmem:[%s17277_s1 + $0x70c] sm:$0xf]  ;;  %v7600_v63 = vld [vmem:[%s17277_s1 + $0x718] sm:$0xf0]  ;;  %v10794_v1 = vld [vmem:[%s17277_s1 + $0x3ec] sm:$0xf0]  ;;  %v7235_v4 = vor.u32 %v10801_v59, %v7232_v60 }
  0x75   :  { %v10833_v5 = vld [vmem:[%s17277_s1 + $0x52c] sm:$0xf]  ;;  %v8054_v6 = vld [vmem:[%s17277_s1 + $0x2a0] sm:$0xf]  ;;  %v7360_v8 = vld [vmem:[%s17277_s1 + $0x538] sm:$0xf0]  ;;  %v7603_v13 = vor.u32 %v10893_v62, %v7600_v63  ;;  %v8215_v17 = vor.u32 %v10794_v1, %v8214_v0 }
  0x76   :  { %1344 = vmatpush.bf16.msrb.mxu2 %v7523_v9  ;;  %v10797_v9 = vld [vmem:[%s17277_s1 + $0x40c] sm:$0xf]  ;;  %v7216_v10 = vld [vmem:[%s17277_s1 + $0x418] sm:$0xf0]  ;;  %v8055_v20 = vor.u32 %v10754_v7, %v8054_v6  ;;  %v10690_v43 = vld [vmem:[%s17277_s1 + $0xac] sm:$0xf0] }
  0x77   :  { %1327 = vmatpush.bf16.msrb.mxu1 %v7443_v14  ;;  %1314 = vmatpush.bf16.msrb.mxu0 %v7299_v16  ;;  %v7830_v14 = vld [vmem:[%s17277_s1 + $0xe0] sm:$0xf]  ;;  %v10698_v16 = vld [vmem:[%s17277_s1 + $0xec] sm:$0xf0]  ;;  %v7344_v24 = vld [vmem:[%s17277_s1 + $0x518] sm:$0xf0] }
  0x78   :  { %1357 = vmatpush.bf16.msrb.mxu3 %v7667_v21  ;;  %v7219_v21 = vor.u32 %v10797_v9, %v7216_v10  ;;  %v7831_v25 = vor.u32 %v10698_v16, %v7830_v14  ;;  %v8166_v45 = vld [vmem:[%s17277_s1 + $0x380] sm:$0xf]  ;;  %v10742_v48 = vld [vmem:[%s17277_s1 + $0x24c] sm:$0xf0]  ;;  %v10760_v14 = vld [vmem:[%s17277_s1 + $0x2e4] sm:$0xf] }
  0x79   :  { %v8150_v55 = vld [vmem:[%s17277_s1 + $0x360] sm:$0xf]  ;;  %v10778_v57 = vld [vmem:[%s17277_s1 + $0x36c] sm:$0xf0]  ;;  %v8088_v16 = vld [vmem:[%s17277_s1 + $0x2f0] sm:$0xf0] }
  0x7a   :  { %1345 = vmatpush.bf16.msrb.mxu2 %v7507_v23  ;;  %v10829_v23 = vld [vmem:[%s17277_s1 + $0x50c] sm:$0xf]  ;;  %v7990_v59 = vld [vmem:[%s17277_s1 + $0x220] sm:$0xf]  ;;  %v10738_v60 = vld [vmem:[%s17277_s1 + $0x22c] sm:$0xf0] }
  0x7b   :  { %1328 = vmatpush.bf16.msrb.mxu1 %v7427_v26  ;;  %1315 = vmatpush.bf16.msrb.mxu0 %v7283_v27  ;;  %v7958_v26 = vld [vmem:[%s17277_s1 + $0x1e0] sm:$0xf]  ;;  %v10730_v27 = vld [vmem:[%s17277_s1 + $0x1ec] sm:$0xf0]  ;;  %v7347_v35 = vor.u32 %v10829_v23, %v7344_v24  ;;  %v172_v11 = vld [vmem:[#allocation2 + $0x10] sm:$0xff]  ;;  %v8091_v23 = vor.u32 %v10760_v14, %v8088_v16 }
  0x7c   :  { %1358 = vmatpush.bf16.msrb.mxu3 %v7651_v33  ;;  %v10786_v33 = vld [vmem:[%s17277_s1 + $0x3ac] sm:$0xf0]  ;;  %v7959_v38 = vor.u32 %v10730_v27, %v7958_v26  ;;  %v7910_v63 = vld [vmem:[%s17277_s1 + $0x180] sm:$0xf]  ;;  %v10756_v27 = vld [vmem:[%s17277_s1 + $0x2c4] sm:$0xf] }
  0x7d   :  { %v8183_v44 = vor.u32 %v10786_v33, %v8182_v32  ;;  %v7766_v0 = vld [vmem:[%s17277_s1 + $0x60] sm:$0xf]  ;;  %v10682_v1 = vld [vmem:[%s17277_s1 + $0x6c] sm:$0xf0]  ;;  %v171_v14 = vld [vmem:[#allocation2 + $0x20] sm:$0xff] }
  0x7e   :  { %1346 = vmatpush.bf16.msrb.mxu2 %v7491_v36  ;;  %v8022_v36 = vld [vmem:[%s17277_s1 + $0x260] sm:$0xf]  ;;  %v7767_v10 = vor.u32 %v10682_v1, %v7766_v0  ;;  %v10678_v18 = vld [vmem:[%s17277_s1 + $0x4c] sm:$0xf0]  ;;  %v10728_v0 = vld [vmem:[%s17277_s1 + $0x1e4] sm:$0xf] }
  0x7f   :  { %1329 = vmatpush.bf16.msrb.mxu1 %v7411_v39  ;;  %1316 = vmatpush.bf16.msrb.mxu0 %v7267_v40  ;;  %v7815_v39 = vor.u32 %v10694_v30, %v7814_v29  ;;  %v7942_v40 = vld [vmem:[%s17277_s1 + $0x1c0] sm:$0xf]  ;;  %v8023_v46 = vor.u32 %v10746_v37, %v8022_v36  ;;  %v8072_v29 = vld [vmem:[%s17277_s1 + $0x2d0] sm:$0xf0]  ;;  %v10710_v30 = vld [vmem:[%s17277_s1 + $0x14c] sm:$0xf0] }
  0x80   :  { %1359 = vmatpush.bf16.msrb.mxu3 %v7635_v47  ;;  %v8006_v47 = vld [vmem:[%s17277_s1 + $0x240] sm:$0xf]  ;;  %v7943_v49 = vor.u32 %v10726_v41, %v7942_v40  ;;  %v10674_v32 = vld [vmem:[%s17277_s1 + $0x2c] sm:$0xf0]  ;;  %v8075_v40 = vor.u32 %v10756_v27, %v8072_v29  ;;  %v10744_v16 = vld [vmem:[%s17277_s1 + $0x264] sm:$0xf] }
  0x81   :  { %v8007_v58 = vor.u32 %v10742_v48, %v8006_v47  ;;  %v7894_v6 = vld [vmem:[%s17277_s1 + $0x160] sm:$0xf]  ;;  %v10766_v36 = vld [vmem:[%s17277_s1 + $0x30c] sm:$0xf0]  ;;  %v10696_v48 = vld [vmem:[%s17277_s1 + $0xe4] sm:$0xf] }
  0x82   :  { %1347 = vmatpush.bf16.msrb.mxu2 %v7475_v50  ;;  %v7799_v50 = vor.u32 %v10690_v43, %v7798_v42  ;;  %v7974_v7 = vld [vmem:[%s17277_s1 + $0x200] sm:$0xf]  ;;  %v10706_v43 = vld [vmem:[%s17277_s1 + $0x12c] sm:$0xf0]  ;;  %v10740_v27 = vld [vmem:[%s17277_s1 + $0x244] sm:$0xf] }
  0x83   :  { %1330 = vmatpush.bf16.msrb.mxu1 %v7395_v52  ;;  %1317 = vmatpush.bf16.msrb.mxu0 %v7251_v53  ;;  %v7782_v52 = vld [vmem:[%s17277_s1 + $0x80] sm:$0xf]  ;;  %v10686_v53 = vld [vmem:[%s17277_s1 + $0x8c] sm:$0xf0]  ;;  %v8008_v29 = vld [vmem:[%s17277_s1 + $0x250] sm:$0xf0] }
  0x84   :  { %1360 = vmatpush.bf16.msrb.mxu3 %v7619_v61  ;;  %v7783_v62 = vor.u32 %v10686_v53, %v7782_v52  ;;  %v168_v22 = vld [vmem:[#allocation2 + $0x58] sm:$0xff]  ;;  %v166_v52 = vld [vmem:[#allocation2 + $0x30] sm:$0xff] }
  0x85   :  { %1348 = vmatmul.bf16.vlgmr.msrb.gmra.mxu2 %v11972_v15  ;;  %v7363_v15 = vor.u32 %v10833_v5, %v7360_v8  ;;  %v7991_v5 = vor.u32 %v10738_v60, %v7990_v59  ;;  %v10734_v8 = vld [vmem:[%s17277_s1 + $0x20c] sm:$0xf0]  ;;  %v7878_v26 = vld [vmem:[%s17277_s1 + $0x140] sm:$0xf]  ;;  %v10788_v53 = vld [vmem:[%s17277_s1 + $0x3c4] sm:$0xf] }
  0x86   :  { %2036 = vmatpush.bf16.msra.mxu2 %v8087_v51  ;;  %v7926_v51 = vld [vmem:[%s17277_s1 + $0x1a0] sm:$0xf]  ;;  %v7879_v41 = vor.u32 %v10710_v30, %v7878_v26  ;;  %v170_v59 = vld [vmem:[#allocation2 + $0x40] sm:$0xff]  ;;  %v10748_v60 = vld [vmem:[%s17277_s1 + $0x284] sm:$0xf] }
  0x87   :  { %1331 = vmatpush.bf16.msrb.mxu1 %v7379_v3  ;;  %1318 = vmatpush.bf16.msrb.mxu0 %v7235_v4  ;;  %v8134_v3 = vld [vmem:[%s17277_s1 + $0x340] sm:$0xf]  ;;  %v10774_v4 = vld [vmem:[%s17277_s1 + $0x34c] sm:$0xf0] }
  0x88   :  { %1361 = vmatpush.bf16.msrb.mxu3 %v7603_v13  ;;  %v10714_v13 = vld [vmem:[%s17277_s1 + $0x16c] sm:$0xf0]  ;;  %v8135_v19 = vor.u32 %v10774_v4, %v8134_v3  ;;  %v7862_v37 = vld [vmem:[%s17277_s1 + $0x120] sm:$0xf]  ;;  %v10692_v3 = vld [vmem:[%s17277_s1 + $0xc4] sm:$0xf] }
  0x89   :  { %v7895_v24 = vor.u32 %v10714_v13, %v7894_v6  ;;  %v7816_v4 = vld [vmem:[%s17277_s1 + $0xd0] sm:$0xf0]  ;;  %v12654_v6 = vpack.c.bf16 %v170_v59, %v166_v52 }
  0x8a   :  { %2037 = vmatpush.bf16.msra.mxu2 %v8071_v2  ;;  %v8151_v2 = vor.u32 %v10778_v57, %v8150_v55  ;;  %v7863_v57 = vor.u32 %v10706_v43, %v7862_v37  ;;  %v7976_v52 = vld [vmem:[%s17277_s1 + $0x210] sm:$0xf0] }
  0x8b   :  { %1332 = vmatpush.bf16.msrb.mxu1 %v7363_v15  ;;  %1319 = vmatpush.bf16.msrb.mxu0 %v7219_v21  ;;  %v10770_v15 = vld [vmem:[%s17277_s1 + $0x32c] sm:$0xf0]  ;;  %v7975_v21 = vor.u32 %v10734_v8, %v7974_v7  ;;  %v167_v7 = vld [vmem:[#allocation2] sm:$0xff]  ;;  %v10784_v8 = vld [vmem:[%s17277_s1 + $0x3a4] sm:$0xf] }
  0x8c   :  { %2050 = vmatpush.bf16.msra.mxu3 %v8215_v17  ;;  %v7750_v17 = vld [vmem:[%s17277_s1 + $0x40] sm:$0xf]  ;;  %v7896_v59 = vld [vmem:[%s17277_s1 + $0x170] sm:$0xf0] }
  0x8d   :  { %1362 = vmatmul.bf16.vlgmr.msrb.gmra.mxu3 %v12024_v56  ;;  %v10782_v56 = vld [vmem:[%s17277_s1 + $0x38c] sm:$0xf0] }
  0x8e   :  { %2038 = vmatpush.bf16.msra.mxu2 %v8055_v20  ;;  %1320 = vmatmul.bf16.vlgmr.msrb.gmra.mxu0 %v12045_v12  ;;  %v10722_v12 = vld [vmem:[%s17277_s1 + $0x1ac] sm:$0xf0]  ;;  %v8167_v54 = vor.u32 %v10782_v56, %v8166_v45  ;;  %v8118_v20 = vld [vmem:[%s17277_s1 + $0x320] sm:$0xf]  ;;  %v8056_v45 = vld [vmem:[%s17277_s1 + $0x2b0] sm:$0xf0] }
  0x8f   :  { %2008 = vmatpush.bf16.msra.mxu0 %v7831_v25  ;;  %1333 = vmatpush.bf16.msrb.mxu1 %v7347_v35  ;;  %v7927_v61 = vor.u32 %v10722_v12, %v7926_v51  ;;  %v7751_v25 = vor.u32 %v10678_v18, %v7750_v17  ;;  %v8119_v33 = vor.u32 %v10770_v15, %v8118_v20  ;;  %v8102_v35 = vld [vmem:[%s17277_s1 + $0x300] sm:$0xf]  ;;  %v8024_v17 = vld [vmem:[%s17277_s1 + $0x270] sm:$0xf0]  ;;  %v10724_v20 = vld [vmem:[%s17277_s1 + $0x1c4] sm:$0xf] }
  0x90   :  { %2051 = vmatpush.bf16.msra.mxu3 %v8199_v31  ;;  %v7734_v31 = vld [vmem:[%s17277_s1 + $0x20] sm:$0xf]  ;;  %v8103_v47 = vor.u32 %v10766_v36, %v8102_v35  ;;  %v7944_v15 = vld [vmem:[%s17277_s1 + $0x1d0] sm:$0xf0]  ;;  %v8027_v26 = vor.u32 %v10744_v16, %v8024_v17  ;;  %v10684_v35 = vld [vmem:[%s17277_s1 + $0x84] sm:$0xf] }
  0x91   :  { %v7735_v42 = vor.u32 %v10674_v32, %v7734_v31  ;;  %v7718_v56 = vld [vmem:[%s17277_s1] sm:$0xf]  ;;  %v7947_v30 = vor.u32 %v10724_v20, %v7944_v15  ;;  %v10720_v32 = vld [vmem:[%s17277_s1 + $0x1a4] sm:$0xf]  ;;  %v7784_v36 = vld [vmem:[%s17277_s1 + $0x90] sm:$0xf0] }
  0x92   :  { %2039 = vmatpush.bf16.msra.mxu2 %v8039_v34  ;;  %1334 = vmatmul.bf16.vlgmr.msrb.gmra.mxu1 %v12071_v28  ;;  %v10718_v28 = vld [vmem:[%s17277_s1 + $0x18c] sm:$0xf0]  ;;  %v12583_v34 = vpack.c.bf16 %v172_v11, %v168_v22  ;;  %v169_v51 = vld [vmem:[#allocation2 + $0x18] sm:$0xff]  ;;  %v7800_v22 = vld [vmem:[%s17277_s1 + $0xb0] sm:$0xf0] }
  0x93   :  { %2022 = vmatpush.bf16.msra.mxu1 %v7959_v38  ;;  %2009 = vmatpush.bf16.msra.mxu0 %v7815_v39  ;;  %v7911_v9 = vor.u32 %v10718_v28, %v7910_v63  ;;  %v10792_v38 = vld [vmem:[%s17277_s1 + $0x3e4] sm:$0xf]  ;;  %v8216_v39 = vld [vmem:[%s17277_s1 + $0x3f0] sm:$0xf0]  ;;  %v10702_v63 = vld [vmem:[%s17277_s1 + $0x10c] sm:$0xf0] }
  0x94   :  { %2052 = vmatpush.bf16.msra.mxu3 %v8183_v44  ;;  %v10752_v44 = vld [vmem:[%s17277_s1 + $0x2a4] sm:$0xf]  ;;  %v8104_v17 = vld [vmem:[%s17277_s1 + $0x310] sm:$0xf0] }
  0x95   :  { %v173_v12 = vld [vmem:[#allocation2 + $0x38] sm:$0xff]  ;;  %v8059_v55 = vor.u32 %v10752_v44, %v8056_v45  ;;  %v7787_v44 = vor.u32 %v10684_v35, %v7784_v36  ;;  %v10791_v35 = vld [vmem:[%s17277_s1 + $0x3d4] sm:$0xf0] }
  0x96   :  { %2040 = vmatpush.bf16.msra.mxu2 %v8023_v46  ;;  %v10670_v46 = vld [vmem:[%s17277_s1 + $0xc] sm:$0xf0]  ;;  %v12643_v1 = vpack.c.bf16 %v173_v12, %v169_v51  ;;  %v10716_v45 = vld [vmem:[%s17277_s1 + $0x184] sm:$0xf] }
  0x97   :  { %2023 = vmatpush.bf16.msra.mxu1 %v7943_v49  ;;  %2010 = vmatpush.bf16.msra.mxu0 %v7799_v50  ;;  %v7832_v49 = vld [vmem:[%s17277_s1 + $0xf0] sm:$0xf0]  ;;  %v8219_v50 = vor.u32 %v10792_v38, %v8216_v39  ;;  %v10776_v38 = vld [vmem:[%s17277_s1 + $0x364] sm:$0xf] }
  0x98   :  { %2053 = vmatpush.bf16.msra.mxu3 %v8167_v54  ;;  %v8200_v54 = vld [vmem:[%s17277_s1 + $0x3d0] sm:$0xf0]  ;;  %v7835_v28 = vor.u32 %v10696_v48, %v7832_v49  ;;  %v10772_v49 = vld [vmem:[%s17277_s1 + $0x344] sm:$0xf] }
  0x99   :  { %v8152_v39 = vld [vmem:[%s17277_s1 + $0x370] sm:$0xf0]  ;;  %v10732_v12 = vld [vmem:[%s17277_s1 + $0x204] sm:$0xf] }
  0x9a   :  { %2041 = vmatpush.bf16.msra.mxu2 %v8007_v58  ;;  %v7719_v58 = vor.u32 %v10670_v46, %v7718_v56  ;;  %v7912_v56 = vld [vmem:[%s17277_s1 + $0x190] sm:$0xf0]  ;;  %v10680_v46 = vld [vmem:[%s17277_s1 + $0x64] sm:$0xf]  ;;  %v8155_v48 = vor.u32 %v10776_v38, %v8152_v39  ;;  %v8046_v39 = vld [vmem:[%s17277_s1 + $0x288] sm:$0xf] }
  0x9b   :  { %2024 = vmatpush.bf16.msra.mxu1 %v7927_v61  ;;  %2011 = vmatpush.bf16.msra.mxu0 %v7783_v62  ;;  %v8040_v61 = vld [vmem:[%s17277_s1 + $0x290] sm:$0xf0]  ;;  %v7846_v62 = vld [vmem:[%s17277_s1 + $0x100] sm:$0xf]  ;;  %v10764_v16 = vld [vmem:[%s17277_s1 + $0x304] sm:$0xf] }
  0x9c   :  { %2054 = vmatpush.bf16.msra.mxu3 %v8151_v2  ;;  %v7960_v2 = vld [vmem:[%s17277_s1 + $0x1f0] sm:$0xf0]  ;;  %v7847_v13 = vor.u32 %v10702_v63, %v7846_v62  ;;  %v10768_v63 = vld [vmem:[%s17277_s1 + $0x324] sm:$0xf] }
  0x9d   :  { %v7963_v18 = vor.u32 %v10728_v0, %v7960_v2  ;;  %v7979_v0 = vor.u32 %v10732_v12, %v7976_v52  ;;  %v8030_v12 = vld [vmem:[%s17277_s1 + $0x268] sm:$0xf]  ;;  %v10747_v52 = vld [vmem:[%s17277_s1 + $0x274] sm:$0xf0] }
  0x9e   :  { %2042 = vmatpush.bf16.msra.mxu2 %v7991_v5  ;;  %v8203_v5 = vor.u32 %v10788_v53, %v8200_v54  ;;  %v7915_v53 = vor.u32 %v10716_v45, %v7912_v56  ;;  %v10731_v45 = vld [vmem:[%s17277_s1 + $0x1f4] sm:$0xf0]  ;;  %v7822_v56 = vld [vmem:[%s17277_s1 + $0xc8] sm:$0xf] }
  0x9f   :  { %2025 = vmatpush.bf16.msra.mxu1 %v7911_v9  ;;  %2012 = vmatpush.bf16.msra.mxu0 %v7767_v10  ;;  %v8184_v9 = vld [vmem:[%s17277_s1 + $0x3b0] sm:$0xf0]  ;;  %v8043_v10 = vor.u32 %v10748_v60, %v8040_v61  ;;  %v10676_v60 = vld [vmem:[%s17277_s1 + $0x44] sm:$0xf] }
  0xa0   :  { %2055 = vmatpush.bf16.msra.mxu3 %v8135_v19  ;;  %v7819_v19 = vor.u32 %v10692_v3, %v7816_v4  ;;  %v8187_v11 = vor.u32 %v10784_v8, %v8184_v9  ;;  %v7752_v61 = vld [vmem:[%s17277_s1 + $0x50] sm:$0xf0]  ;;  %v10759_v8 = vld [vmem:[%s17277_s1 + $0x2d4] sm:$0xf0] }
  0xa1   :  { %v7755_v4 = vor.u32 %v10676_v60, %v7752_v61  ;;  %v7880_v9 = vld [vmem:[%s17277_s1 + $0x150] sm:$0xf0]  ;;  %v8174_v61 = vld [vmem:[%s17277_s1 + $0x388] sm:$0xf] }
  0xa2   :  { %2043 = vmatpush.bf16.msra.mxu2 %v7975_v21  ;;  %v10688_v21 = vld [vmem:[%s17277_s1 + $0xa4] sm:$0xf] }
  0xa3   :  { %2026 = vmatpush.bf16.msra.mxu1 %v7895_v24  ;;  %2013 = vmatpush.bf16.msra.mxu0 %v7751_v25  ;;  %v10780_v24 = vld [vmem:[%s17277_s1 + $0x384] sm:$0xf]  ;;  %v8168_v25 = vld [vmem:[%s17277_s1 + $0x390] sm:$0xf0]  ;;  %v7803_v31 = vor.u32 %v10688_v21, %v7800_v22 }
  0xa4   :  { %2056 = vmatpush.bf16.msra.mxu3 %v8119_v33  ;;  %v7928_v33 = vld [vmem:[%s17277_s1 + $0x1b0] sm:$0xf0]  ;;  %v8171_v37 = vor.u32 %v10780_v24, %v8168_v25  ;;  %v10704_v22 = vld [vmem:[%s17277_s1 + $0x124] sm:$0xf]  ;;  %v10755_v24 = vld [vmem:[%s17277_s1 + $0x2b4] sm:$0xf0] }
  0xa5   :  { %2044 = vmatmul.bf16.vlgmr.msra.gmra.mxu2 %v12583_v34  ;;  %v7931_v43 = vor.u32 %v10720_v32, %v7928_v33  ;;  %v7864_v25 = vld [vmem:[%s17277_s1 + $0x130] sm:$0xf0]  ;;  %v8206_v33 = vld [vmem:[%s17277_s1 + $0x3c8] sm:$0xf] }
  0xa6   :  { %2092 = vmatpush.bf16.msrb.mxu2 %v8091_v23  ;;  %v12682_v23 = vpack.c.bf16 %v171_v14, %v167_v7  ;;  %v8078_v7 = vld [vmem:[%s17277_s1 + $0x2c8] sm:$0xf] }
  0xa7   :  { %2027 = vmatpush.bf16.msra.mxu1 %v7879_v41  ;;  %2014 = vmatpush.bf16.msra.mxu0 %v7735_v42  ;;  %v10736_v41 = vld [vmem:[%s17277_s1 + $0x224] sm:$0xf]  ;;  %v7992_v42 = vld [vmem:[%s17277_s1 + $0x230] sm:$0xf0]  ;;  %v8079_v20 = vor.u32 %v10759_v8, %v8078_v7  ;;  %v7790_v7 = vld [vmem:[%s17277_s1 + $0x88] sm:$0xf] }
  0xa8   :  { %2057 = vmatpush.bf16.msra.mxu3 %v8103_v47  ;;  %v7768_v47 = vld [vmem:[%s17277_s1 + $0x70] sm:$0xf0]  ;;  %v7995_v51 = vor.u32 %v10736_v41, %v7992_v42  ;;  %v10700_v41 = vld [vmem:[%s17277_s1 + $0x104] sm:$0xf]  ;;  %v10687_v8 = vld [vmem:[%s17277_s1 + $0x94] sm:$0xf0] }
  0xa9   :  { %v7771_v54 = vor.u32 %v10680_v46, %v7768_v47  ;;  %v7848_v42 = vld [vmem:[%s17277_s1 + $0x110] sm:$0xf0]  ;;  %v10695_v46 = vld [vmem:[%s17277_s1 + $0xd4] sm:$0xf0]  ;;  %v8207_v47 = vor.u32 %v10791_v35, %v8206_v33 }
  0xaa   :  { %2093 = vmatpush.bf16.msrb.mxu2 %v8075_v40  ;;  %v8011_v40 = vor.u32 %v10740_v27, %v8008_v29  ;;  %v7720_v27 = vld [vmem:[%s17277_s1 + $0x10] sm:$0xf0]  ;;  %v8107_v29 = vor.u32 %v10764_v16, %v8104_v17  ;;  %v7998_v16 = vld [vmem:[%s17277_s1 + $0x228] sm:$0xf]  ;;  %v10739_v17 = vld [vmem:[%s17277_s1 + $0x234] sm:$0xf0] }
  0xab   :  { %2028 = vmatpush.bf16.msra.mxu1 %v7863_v57  ;;  %2015 = vmatpush.bf16.msra.mxu0 %v7719_v58  ;;  %v8094_v57 = vld [vmem:[%s17277_s1 + $0x2e8] sm:$0xf]  ;;  %v10763_v58 = vld [vmem:[%s17277_s1 + $0x2f4] sm:$0xf0] }
  0xac   :  { %2106 = vmatpush.bf16.msrb.mxu3 %v8219_v50  ;;  %v8136_v50 = vld [vmem:[%s17277_s1 + $0x350] sm:$0xf0]  ;;  %v8095_v2 = vor.u32 %v10763_v58, %v8094_v57  ;;  %v10727_v57 = vld [vmem:[%s17277_s1 + $0x1d4] sm:$0xf0]  ;;  %v7806_v58 = vld [vmem:[%s17277_s1 + $0xa8] sm:$0xf] }
  0xad   :  { %2058 = vmatmul.bf16.vlgmr.msra.gmra.mxu3 %v12643_v1  ;;  %v8139_v62 = vor.u32 %v10772_v49, %v8136_v50  ;;  %v10787_v49 = vld [vmem:[%s17277_s1 + $0x3b4] sm:$0xf0] }
  0xae   :  { %2094 = vmatpush.bf16.msrb.mxu2 %v8059_v55  ;;  %2016 = vmatmul.bf16.vlgmr.msra.gmra.mxu0 %v12654_v6  ;;  %v10712_v55 = vld [vmem:[%s17277_s1 + $0x164] sm:$0xf] }
  0xaf   :  { %2064 = vmatpush.bf16.msrb.mxu0 %v7835_v28  ;;  %2029 = vmatpush.bf16.msra.mxu1 %v7847_v13  ;;  %v8120_v28 = vld [vmem:[%s17277_s1 + $0x330] sm:$0xf0]  ;;  %v7899_v3 = vor.u32 %v10712_v55, %v7896_v59  ;;  %v7950_v55 = vld [vmem:[%s17277_s1 + $0x1c8] sm:$0xf]  ;;  %v10691_v59 = vld [vmem:[%s17277_s1 + $0xb4] sm:$0xf0] }
  0xb0   :  { %2107 = vmatpush.bf16.msrb.mxu3 %v8203_v5  ;;  %v10708_v5 = vld [vmem:[%s17277_s1 + $0x144] sm:$0xf]  ;;  %v7736_v13 = vld [vmem:[%s17277_s1 + $0x30] sm:$0xf0]  ;;  %v8123_v14 = vor.u32 %v10768_v63, %v8120_v28  ;;  %v8031_v63 = vor.u32 %v10747_v52, %v8030_v12  ;;  %v8014_v28 = vld [vmem:[%s17277_s1 + $0x248] sm:$0xf] }
  0xb1   :  { %v7883_v15 = vor.u32 %v10708_v5, %v7880_v9  ;;  %v10723_v5 = vld [vmem:[%s17277_s1 + $0x1b4] sm:$0xf0]  ;;  %v7742_v52 = vld [vmem:[%s17277_s1 + $0x28] sm:$0xf] }
  0xb2   :  { %2095 = vmatpush.bf16.msrb.mxu2 %v8043_v10  ;;  %2030 = vmatmul.bf16.vlgmr.msra.gmra.mxu1 %v12682_v23  ;;  %v10672_v10 = vld [vmem:[%s17277_s1 + $0x24] sm:$0xf]  ;;  %v10711_v12 = vld [vmem:[%s17277_s1 + $0x154] sm:$0xf0] }
  0xb3   :  { %2078 = vmatpush.bf16.msrb.mxu1 %v7963_v18  ;;  %2065 = vmatpush.bf16.msrb.mxu0 %v7819_v19  ;;  %v8222_v18 = vld [vmem:[%s17277_s1 + $0x3e8] sm:$0xf]  ;;  %v10795_v19 = vld [vmem:[%s17277_s1 + $0x3f4] sm:$0xf0]  ;;  %v7739_v21 = vor.u32 %v10672_v10, %v7736_v13 }
  0xb4   :  { %2108 = vmatpush.bf16.msrb.mxu3 %v8187_v11  ;;  %v8062_v11 = vld [vmem:[%s17277_s1 + $0x2a8] sm:$0xf]  ;;  %v8223_v32 = vor.u32 %v10795_v19, %v8222_v18  ;;  %v10779_v13 = vld [vmem:[%s17277_s1 + $0x374] sm:$0xf0] }
  0xb5   :  { %v8063_v36 = vor.u32 %v10755_v24, %v8062_v11  ;;  %v8158_v10 = vld [vmem:[%s17277_s1 + $0x368] sm:$0xf]  ;;  %v10683_v11 = vld [vmem:[%s17277_s1 + $0x74] sm:$0xf0] }
  0xb6   :  { %2096 = vmatpush.bf16.msrb.mxu2 %v8027_v26  ;;  %v10668_v26 = vld [vmem:[%s17277_s1 + $0x4] sm:$0xf]  ;;  %v8159_v24 = vor.u32 %v10779_v13, %v8158_v10  ;;  %v10697_v13 = vld [vmem:[%s17277_s1 + $0xec] sm:$0xf] }
  0xb7   :  { %2079 = vmatpush.bf16.msrb.mxu1 %v7947_v30  ;;  %2066 = vmatpush.bf16.msrb.mxu0 %v7803_v31  ;;  %v7838_v30 = vld [vmem:[%s17277_s1 + $0xe8] sm:$0xf]  ;;  %v10699_v31 = vld [vmem:[%s17277_s1 + $0xf4] sm:$0xf0]  ;;  %v7723_v38 = vor.u32 %v10668_v26, %v7720_v27 }
  0xb8   :  { %2109 = vmatpush.bf16.msrb.mxu3 %v8171_v37  ;;  %v7867_v37 = vor.u32 %v10704_v22, %v7864_v25  ;;  %v7774_v22 = vld [vmem:[%s17277_s1 + $0x68] sm:$0xf]  ;;  %v10775_v27 = vld [vmem:[%s17277_s1 + $0x354] sm:$0xf0] }
  0xb9   :  { %v8142_v26 = vld [vmem:[%s17277_s1 + $0x348] sm:$0xf] }
  0xba   :  { %2097 = vmatpush.bf16.msrb.mxu2 %v8011_v40  ;;  %v10751_v40 = vld [vmem:[%s17277_s1 + $0x294] sm:$0xf0] }
  0xbb   :  { %2080 = vmatpush.bf16.msrb.mxu1 %v7931_v43  ;;  %2067 = vmatpush.bf16.msrb.mxu0 %v7787_v44  ;;  %v7839_v43 = vor.u32 %v10699_v31, %v7838_v30  ;;  %v7966_v44 = vld [vmem:[%s17277_s1 + $0x1e8] sm:$0xf]  ;;  %v8047_v50 = vor.u32 %v10751_v40, %v8046_v39  ;;  %v10735_v31 = vld [vmem:[%s17277_s1 + $0x214] sm:$0xf0]  ;;  %v8096_v39 = vld [vmem:[%s17277_s1 + $0x2f8] sm:$0xf0] }
  0xbc   :  { %2110 = vmatpush.bf16.msrb.mxu3 %v8155_v48  ;;  %v8190_v48 = vld [vmem:[%s17277_s1 + $0x3a8] sm:$0xf]  ;;  %v12931_v25 = vpop.f32.mrf.mxu2  ;;  %v10715_v40 = vld [vmem:[%s17277_s1 + $0x174] sm:$0xf0] }
  0xbd   :  { %v8191_v60 = vor.u32 %v10787_v49, %v8190_v48  ;;  %v7982_v30 = vld [vmem:[%s17277_s1 + $0x208] sm:$0xf] }
  0xbe   :  { %2098 = vmatpush.bf16.msrb.mxu2 %v7995_v51  ;;  %v7851_v51 = vor.u32 %v10700_v41, %v7848_v42  ;;  %v7758_v41 = vld [vmem:[%s17277_s1 + $0x48] sm:$0xf]  ;;  %v10679_v42 = vld [vmem:[%s17277_s1 + $0x54] sm:$0xf0] }
  0xbf   :  { %2081 = vmatpush.bf16.msrb.mxu1 %v7915_v53  ;;  %2068 = vmatpush.bf16.msrb.mxu0 %v7771_v54  ;;  %v7967_v53 = vor.u32 %v10731_v45, %v7966_v44  ;;  %v7823_v54 = vor.u32 %v10695_v46, %v7822_v56  ;;  %v8126_v44 = vld [vmem:[%s17277_s1 + $0x328] sm:$0xf]  ;;  %v10771_v45 = vld [vmem:[%s17277_s1 + $0x334] sm:$0xf0]  ;;  %v7983_v56 = vor.u32 %v10735_v31, %v7982_v30  ;;  %v7968_v30 = vld [vmem:[%s17277_s1 + $0x1f8] sm:$0xf0] }
  0xc0   :  { %2111 = vmatpush.bf16.msrb.mxu3 %v8139_v62  ;;  %v10783_v62 = vld [vmem:[%s17277_s1 + $0x394] sm:$0xf0]  ;;  %v7759_v48 = vor.u32 %v10679_v42, %v7758_v41  ;;  %v7886_v49 = vld [vmem:[%s17277_s1 + $0x148] sm:$0xf]  ;;  %v10693_v31 = vld [vmem:[%s17277_s1 + $0xcc] sm:$0xf] }
  0xc1   :  { %v8175_v9 = vor.u32 %v10783_v62, %v8174_v61 }
  0xc2   :  { %2099 = vmatpush.bf16.msrb.mxu2 %v7979_v0  ;;  %v10743_v0 = vld [vmem:[%s17277_s1 + $0x254] sm:$0xf0] }
  0xc3   :  { %2082 = vmatpush.bf16.msrb.mxu1 %v7899_v3  ;;  %2069 = vmatpush.bf16.msrb.mxu0 %v7755_v4  ;;  %v7807_v3 = vor.u32 %v10691_v59, %v7806_v58  ;;  %v7934_v4 = vld [vmem:[%s17277_s1 + $0x1a8] sm:$0xf]  ;;  %v10767_v58 = vld [vmem:[%s17277_s1 + $0x314] sm:$0xf0]  ;;  %v10793_v59 = vld [vmem:[%s17277_s1 + $0x3ec] sm:$0xf] }
  0xc4   :  { %2112 = vmatpush.bf16.msrb.mxu3 %v8123_v14  ;;  %v8015_v14 = vor.u32 %v10743_v0, %v8014_v28  ;;  %v7935_v19 = vor.u32 %v10723_v5, %v7934_v4  ;;  %v7887_v28 = vor.u32 %v10711_v12, %v7886_v49  ;;  %v8064_v4 = vld [vmem:[%s17277_s1 + $0x2b8] sm:$0xf0]  ;;  %v10707_v5 = vld [vmem:[%s17277_s1 + $0x134] sm:$0xf0] }
  0xc5   :  { %2100 = vmatmul.bf16.vlgmr.msrb.gmra.mxu2 %v12583_v34  ;;  %v7952_v49 = vld [vmem:[%s17277_s1 + $0x1d8] sm:$0xf0] }
  0xc6   :  { %2148 = vmatpush.bf16.msra.mxu2 %v8095_v2  ;;  %v7951_v2 = vor.u32 %v10727_v57, %v7950_v55  ;;  %v8110_v57 = vld [vmem:[%s17277_s1 + $0x308] sm:$0xf] }
  0xc7   :  { %2083 = vmatpush.bf16.msrb.mxu1 %v7883_v15  ;;  %2070 = vmatpush.bf16.msrb.mxu0 %v7739_v21  ;;  %v7918_v15 = vld [vmem:[%s17277_s1 + $0x188] sm:$0xf]  ;;  %v10719_v21 = vld [vmem:[%s17277_s1 + $0x194] sm:$0xf0] }
  0xc8   :  { %2113 = vmatpush.bf16.msrb.mxu3 %v8107_v29  ;;  %v7999_v29 = vor.u32 %v10739_v17, %v7998_v16  ;;  %v7919_v35 = vor.u32 %v10719_v21, %v7918_v15  ;;  %v10789_v17 = vld [vmem:[%s17277_s1 + $0x3cc] sm:$0xf] }
  0xca   :  { %2149 = vmatpush.bf16.msra.mxu2 %v8079_v20  ;;  %v7791_v20 = vor.u32 %v10687_v8, %v7790_v7  ;;  %v7726_v7 = vld [vmem:[%s17277_s1 + $0x8] sm:$0xf]  ;;  %v10671_v8 = vld [vmem:[%s17277_s1 + $0x14] sm:$0xf0] }
  0xcb   :  { %2084 = vmatpush.bf16.msrb.mxu1 %v7867_v37  ;;  %2071 = vmatpush.bf16.msrb.mxu0 %v7723_v38  ;;  %v12917_v18 = vpop.f32.mrf.mxu0  ;;  %v7902_v37 = vld [vmem:[%s17277_s1 + $0x168] sm:$0xf]  ;;  %v10761_v38 = vld [vmem:[%s17277_s1 + $0x2ec] sm:$0xf]  ;;  %v7727_v21 = vor.u32 %v10671_v8, %v7726_v7 }
  0xcc   :  { %2162 = vmatpush.bf16.msra.mxu3 %v8223_v32  ;;  %v8099_v46 = vor.u32 %v10761_v38, %v8096_v39  ;;  %v10785_v38 = vld [vmem:[%s17277_s1 + $0x3ac] sm:$0xf]  ;;  %v8192_v39 = vld [vmem:[%s17277_s1 + $0x3b8] sm:$0xf0] }
  0xcd   :  { %2114 = vmatmul.bf16.vlgmr.msrb.gmra.mxu3 %v12643_v1  ;;  %v12947_v33 = vpop.f32.mrf.mxu3  ;;  %v8195_v12 = vor.u32 %v10785_v38, %v8192_v39  ;;  %v10777_v8 = vld [vmem:[%s17277_s1 + $0x36c] sm:$0xf] }
  0xce   :  { %2150 = vmatpush.bf16.msra.mxu2 %v8063_v36  ;;  %2072 = vmatmul.bf16.vlgmr.msrb.gmra.mxu0 %v12654_v6  ;;  %v7775_v36 = vor.u32 %v10683_v11, %v7774_v22  ;;  %v10749_v22 = vld [vmem:[%s17277_s1 + $0x28c] sm:$0xf]  ;;  %v8048_v11 = vld [vmem:[%s17277_s1 + $0x298] sm:$0xf0] }
  0xcf   :  { %2120 = vmatpush.bf16.msra.mxu0 %v7839_v43  ;;  %2085 = vmatpush.bf16.msrb.mxu1 %v7851_v51  ;;  %v12945_v32 = vpop.f32.mrf.mxu1  ;;  %v8143_v43 = vor.u32 %v10775_v27, %v8142_v26  ;;  %v8080_v51 = vld [vmem:[%s17277_s1 + $0x2d8] sm:$0xf0]  ;;  %v10703_v26 = vld [vmem:[%s17277_s1 + $0x114] sm:$0xf0] }
  0xd0   :  { %2163 = vmatpush.bf16.msra.mxu3 %v8207_v47  ;;  %v7903_v47 = vor.u32 %v10715_v40, %v7902_v37  ;;  %v8051_v40 = vor.u32 %v10749_v22, %v8048_v11  ;;  %v7920_v22 = vld [vmem:[%s17277_s1 + $0x198] sm:$0xf0] }
  0xd2   :  { %2151 = vmatpush.bf16.msra.mxu2 %v8047_v50  ;;  %2086 = vmatmul.bf16.vlgmr.msrb.gmra.mxu1 %v12682_v23  ;;  %v10757_v50 = vld [vmem:[%s17277_s1 + $0x2cc] sm:$0xf] }
  0xd3   :  { %2134 = vmatpush.bf16.msra.mxu1 %v7967_v53  ;;  %2121 = vmatpush.bf16.msra.mxu0 %v7823_v54  ;;  %v10675_v53 = vld [vmem:[%s17277_s1 + $0x34] sm:$0xf0]  ;;  %v8127_v54 = vor.u32 %v10771_v45, %v8126_v44  ;;  %v12991_v55 = vpop.f32.mrf.mxu0  ;;  %v8083_v61 = vor.u32 %v10757_v50, %v8080_v51  ;;  %v10745_v44 = vld [vmem:[%s17277_s1 + $0x26c] sm:$0xf]  ;;  %v8032_v45 = vld [vmem:[%s17277_s1 + $0x278] sm:$0xf0] }
  0xd4   :  { %2164 = vmatpush.bf16.msra.mxu3 %v8191_v60  ;;  %v8224_v60 = vld [vmem:[%s17277_s1 + $0x3f8] sm:$0xf0]  ;;  %v7743_v0 = vor.u32 %v10675_v53, %v7742_v52  ;;  %v10689_v50 = vld [vmem:[%s17277_s1 + $0xac] sm:$0xf] }
  0xd5   :  { %v13028_v10 = vpop.f32.mrf.mxu3  ;;  %v8227_v16 = vor.u32 %v10793_v59, %v8224_v60  ;;  %v7808_v51 = vld [vmem:[%s17277_s1 + $0xb8] sm:$0xf0]  ;;  %v10741_v59 = vld [vmem:[%s17277_s1 + $0x24c] sm:$0xf] }
  0xd6   :  { %2152 = vmatpush.bf16.msra.mxu2 %v8031_v63  ;;  %v13007_v63 = vpop.f32.mrf.mxu2  ;;  %v8016_v60 = vld [vmem:[%s17277_s1 + $0x258] sm:$0xf0] }
  0xd7   :  { %2135 = vmatpush.bf16.msra.mxu1 %v7951_v2  ;;  %2122 = vmatpush.bf16.msra.mxu0 %v7807_v3  ;;  %v13005_v62 = vpop.f32.mrf.mxu1  ;;  %v7870_v2 = vld [vmem:[%s17277_s1 + $0x128] sm:$0xf]  ;;  %v10753_v3 = vld [vmem:[%s17277_s1 + $0x2ac] sm:$0xf] }
  0xd8   :  { %2165 = vmatpush.bf16.msra.mxu3 %v8175_v9  ;;  %v8111_v9 = vor.u32 %v10767_v58, %v8110_v57  ;;  %v7871_v15 = vor.u32 %v10707_v5, %v7870_v2  ;;  %v8176_v57 = vld [vmem:[%s17277_s1 + $0x398] sm:$0xf0]  ;;  %v8035_v58 = vor.u32 %v10745_v44, %v8032_v45  ;;  %v10677_v44 = vld [vmem:[%s17277_s1 + $0x4c] sm:$0xf] }
  0xd9   :  { %v7792_v5 = vld [vmem:[%s17277_s1 + $0x98] sm:$0xf0] }
  0xda   :  { %2153 = vmatpush.bf16.msra.mxu2 %v8015_v14  ;;  %v7840_v14 = vld [vmem:[%s17277_s1 + $0xf8] sm:$0xf0] }
  0xdb   :  { %2136 = vmatpush.bf16.msra.mxu1 %v7935_v19  ;;  %2123 = vmatpush.bf16.msra.mxu0 %v7791_v20  ;;  %v8208_v19 = vld [vmem:[%s17277_s1 + $0x3d8] sm:$0xf0]  ;;  %v8067_v20 = vor.u32 %v10753_v3, %v8064_v4  ;;  %v7843_v27 = vor.u32 %v10697_v13, %v7840_v14  ;;  %v1209_v37 = vpop.f32.mrf.mxu0  ;;  %v10685_v4 = vld [vmem:[%s17277_s1 + $0x8c] sm:$0xf]  ;;  %v8019_v13 = vor.u32 %v10741_v59, %v8016_v60 }
  0xdc   :  { %2166 = vmatpush.bf16.msra.mxu3 %v8159_v24  ;;  %v7854_v24 = vld [vmem:[%s17277_s1 + $0x108] sm:$0xf]  ;;  %v7936_v3 = vld [vmem:[%s17277_s1 + $0x1b8] sm:$0xf0]  ;;  %v10673_v60 = vld [vmem:[%s17277_s1 + $0x2c] sm:$0xf] }
  0xdd   :  { %v7855_v41 = vor.u32 %v10703_v26, %v7854_v24  ;;  %v1251_v52 = vpop.f32.mrf.mxu3  ;;  %v10681_v24 = vld [vmem:[%s17277_s1 + $0x6c] sm:$0xf]  ;;  %v7776_v26 = vld [vmem:[%s17277_s1 + $0x78] sm:$0xf0] }
  0xde   :  { %2154 = vmatpush.bf16.msra.mxu2 %v7999_v29  ;;  %v10729_v29 = vld [vmem:[%s17277_s1 + $0x1ec] sm:$0xf]  ;;  %v7779_v39 = vor.u32 %v10681_v24, %v7776_v26  ;;  %v7760_v45 = vld [vmem:[%s17277_s1 + $0x58] sm:$0xf0] }
  0xdf   :  { %2137 = vmatpush.bf16.msra.mxu1 %v7919_v35  ;;  %2124 = vmatpush.bf16.msra.mxu0 %v7775_v36  ;;  %v7824_v35 = vld [vmem:[%s17277_s1 + $0xd8] sm:$0xf0]  ;;  %v8211_v36 = vor.u32 %v10789_v17, %v8208_v19  ;;  %v1223_v42 = vpop.f32.mrf.mxu1  ;;  %v10737_v17 = vld [vmem:[%s17277_s1 + $0x22c] sm:$0xf] }
  0xe0   :  { %2167 = vmatpush.bf16.msra.mxu3 %v8143_v43  ;;  %v1237_v43 = vpop.f32.mrf.mxu2  ;;  %v8000_v19 = vld [vmem:[%s17277_s1 + $0x238] sm:$0xf0]  ;;  %v10669_v26 = vld [vmem:[%s17277_s1 + $0xc] sm:$0xf] }
  0xe1   :  { %v7888_v59 = vld [vmem:[%s17277_s1 + $0x158] sm:$0xf0] }
  0xe2   :  { %2155 = vmatpush.bf16.msra.mxu2 %v7983_v56  ;;  %v7971_v56 = vor.u32 %v10729_v29, %v7968_v30  ;;  %v10773_v29 = vld [vmem:[%s17277_s1 + $0x34c] sm:$0xf]  ;;  %v8144_v30 = vld [vmem:[%s17277_s1 + $0x358] sm:$0xf0] }
  0xe3   :  { %2138 = vmatpush.bf16.msra.mxu1 %v7903_v47  ;;  %2125 = vmatpush.bf16.msra.mxu0 %v7759_v48  ;;  %v10725_v47 = vld [vmem:[%s17277_s1 + $0x1cc] sm:$0xf]  ;;  %v1224_v48 = vadd.f32 %v1223_v42, %v1209_v37  ;;  %v13125_v14 = vpop.f32.mrf.mxu0  ;;  %v7984_v37 = vld [vmem:[%s17277_s1 + $0x218] sm:$0xf0]  ;;  %v11018_v42 = vld [vmem:[%s17277_s1 + $0xaec] sm:$0xf0] }
  0xe4   :  { %2168 = vmatpush.bf16.msra.mxu3 %v8127_v54  ;;  %v10781_v54 = vld [vmem:[%s17277_s1 + $0x38c] sm:$0xf]  ;;  %v7872_v24 = vld [vmem:[%s17277_s1 + $0x138] sm:$0xf0] }
  0xe5   :  { %2156 = vmatmul.bf16.vlgmr.msra.gmra.mxu2 %v12583_v34  ;;  %v1238_v53 = vadd.f32 %v1237_v43, %v1224_v48  ;;  %v8179_v7 = vor.u32 %v10781_v54, %v8176_v57  ;;  %v7904_v43 = vld [vmem:[%s17277_s1 + $0x178] sm:$0xf0]  ;;  %v8710_v54 = vld [vmem:[%s17277_s1 + $0xac0] sm:$0xf]  ;;  %v11014_v57 = vld [vmem:[%s17277_s1 + $0xacc] sm:$0xf0] }
  0xe6   :  { %2204 = vmatpush.bf16.msrb.mxu2 %v8099_v46  ;;  %v7827_v46 = vor.u32 %v10693_v31, %v7824_v35  ;;  %v8003_v31 = vor.u32 %v10737_v17, %v8000_v19  ;;  %v13155_v35 = vpop.f32.mrf.mxu3 }
  0xe7   :  { %2139 = vmatpush.bf16.msra.mxu1 %v7887_v28  ;;  %2126 = vmatpush.bf16.msra.mxu0 %v7743_v0  ;;  %v7811_v28 = vor.u32 %v10689_v50, %v7808_v51  ;;  %v10721_v0 = vld [vmem:[%s17277_s1 + $0x1ac] sm:$0xf]  ;;  %v13107_v2 = vadd.f32 %v1251_v52, %v1238_v53  ;;  %v7763_v52 = vor.u32 %v10677_v44, %v7760_v45  ;;  %v7856_v44 = vld [vmem:[%s17277_s1 + $0x118] sm:$0xf0] }
  0xe8   :  { %2169 = vmatpush.bf16.msra.mxu3 %v8111_v9  ;;  %v8160_v9 = vld [vmem:[%s17277_s1 + $0x378] sm:$0xf0]  ;;  %v13141_v11 = vpop.f32.mrf.mxu2  ;;  %v10709_v53 = vld [vmem:[%s17277_s1 + $0x14c] sm:$0xf] }
  0xe9   :  { %v7891_v17 = vor.u32 %v10709_v53, %v7888_v59  ;;  %v8662_v53 = vld [vmem:[%s17277_s1 + $0xa60] sm:$0xf] }
  0xea   :  { %2205 = vmatpush.bf16.msrb.mxu2 %v8083_v61  ;;  %v7955_v61 = vor.u32 %v10725_v47, %v7952_v49  ;;  %v8128_v47 = vld [vmem:[%s17277_s1 + $0x338] sm:$0xf0]  ;;  %v8582_v59 = vld [vmem:[%s17277_s1 + $0x9c0] sm:$0xf] }
  0xeb   :  { %2140 = vmatpush.bf16.msra.mxu1 %v7871_v15  ;;  %2127 = vmatpush.bf16.msra.mxu0 %v7727_v21  ;;  %v7795_v15 = vor.u32 %v10685_v4, %v7792_v5  ;;  %v10717_v21 = vld [vmem:[%s17277_s1 + $0x18c] sm:$0xf]  ;;  %v1265_v50 = vpop.f32.mrf.mxu0  ;;  %v8112_v4 = vld [vmem:[%s17277_s1 + $0x318] sm:$0xf0] }
  0xec   :  { %2218 = vmatpush.bf16.msrb.mxu3 %v8227_v16  ;;  %v13127_v16 = vpop.f32.mrf.mxu1  ;;  %v7923_v38 = vor.u32 %v10717_v21, %v7920_v22  ;;  %v11010_v21 = vld [vmem:[%s17277_s1 + $0xaac] sm:$0xf0] }
  0xed   :  { %2170 = vmatmul.bf16.vlgmr.msra.gmra.mxu3 %v12643_v1 }
  0xee   :  { %2206 = vmatpush.bf16.msrb.mxu2 %v8067_v20  ;;  %2128 = vmatmul.bf16.vlgmr.msra.gmra.mxu0 %v12654_v6  ;;  %v7939_v20 = vor.u32 %v10721_v0, %v7936_v3  ;;  %v10765_v3 = vld [vmem:[%s17277_s1 + $0x30c] sm:$0xf] }
  0xef   :  { %2176 = vmatpush.bf16.msrb.mxu0 %v7843_v27  ;;  %2141 = vmatpush.bf16.msra.mxu1 %v7855_v41  ;;  %v8163_v27 = vor.u32 %v10777_v8, %v8160_v9  ;;  %v8726_v41 = vld [vmem:[%s17277_s1 + $0xae0] sm:$0xf]  ;;  %v11050_v8 = vld [vmem:[%s17277_s1 + $0xbec] sm:$0xf0]  ;;  %v8711_v9 = vor.u32 %v11014_v57, %v8710_v54 }
  0xf0   :  { %2219 = vmatpush.bf16.msrb.mxu3 %v8211_v36  ;;  %v10733_v36 = vld [vmem:[%s17277_s1 + $0x20c] sm:$0xf]  ;;  %v8727_v49 = vor.u32 %v11018_v42, %v8726_v41  ;;  %v1293_v0 = vpop.f32.mrf.mxu2  ;;  %v8678_v41 = vld [vmem:[%s17277_s1 + $0xa80] sm:$0xf]  ;;  %v11006_v42 = vld [vmem:[%s17277_s1 + $0xa8c] sm:$0xf0] }
  0xf1   :  { %v7987_v48 = vor.u32 %v10733_v36, %v7984_v37  ;;  %v8838_v37 = vld [vmem:[%s17277_s1 + $0xbc0] sm:$0xf]  ;;  %v11002_v54 = vld [vmem:[%s17277_s1 + $0xa6c] sm:$0xf0] }
  0xf2   :  { %2207 = vmatpush.bf16.msrb.mxu2 %v8051_v40  ;;  %2142 = vmatmul.bf16.vlgmr.msra.gmra.mxu1 %v12682_v23  ;;  %v10713_v40 = vld [vmem:[%s17277_s1 + $0x16c] sm:$0xf] }
  0xf3   :  { %2190 = vmatpush.bf16.msrb.mxu1 %v7971_v56  ;;  %2177 = vmatpush.bf16.msrb.mxu0 %v7827_v46  ;;  %v8147_v56 = vor.u32 %v10773_v29, %v8144_v30  ;;  %v10769_v46 = vld [vmem:[%s17277_s1 + $0x32c] sm:$0xf]  ;;  %v8115_v29 = vor.u32 %v10765_v3, %v8112_v4  ;;  %v8470_v30 = vld [vmem:[%s17277_s1 + $0x8e0] sm:$0xf]  ;;  %v11038_v3 = vld [vmem:[%s17277_s1 + $0xb8c] sm:$0xf0]  ;;  %v8663_v4 = vor.u32 %v11002_v54, %v8662_v53 }
  0xf4   :  { %2220 = vmatpush.bf16.msrb.mxu3 %v8195_v12  ;;  %v1279_v51 = vpop.f32.mrf.mxu1  ;;  %v7907_v12 = vor.u32 %v10713_v40, %v7904_v43  ;;  %v10701_v43 = vld [vmem:[%s17277_s1 + $0x10c] sm:$0xf]  ;;  %v13376_v53 = vld [vmem:[%s17277_s1 + $0x840] sm:$0xf] }
  0xf5   :  { %v8614_v54 = vld [vmem:[%s17277_s1 + $0xa00] sm:$0xf] }
  0xf6   :  { %2208 = vmatpush.bf16.msrb.mxu2 %v8035_v58  ;;  %v1280_v58 = vadd.f32 %v1279_v51, %v1265_v50  ;;  %v8822_v50 = vld [vmem:[%s17277_s1 + $0xba0] sm:$0xf]  ;;  %v11042_v51 = vld [vmem:[%s17277_s1 + $0xbac] sm:$0xf0] }
  0xf7   :  { %2191 = vmatpush.bf16.msrb.mxu1 %v7955_v61  ;;  %2178 = vmatpush.bf16.msrb.mxu0 %v7811_v28  ;;  %v7744_v61 = vld [vmem:[%s17277_s1 + $0x38] sm:$0xf0]  ;;  %v8131_v28 = vor.u32 %v10769_v46, %v8128_v47  ;;  %v10986_v46 = vld [vmem:[%s17277_s1 + $0x9ec] sm:$0xf0]  ;;  %v8454_v47 = vld [vmem:[%s17277_s1 + $0x8c0] sm:$0xf] }
  0xf8   :  { %2221 = vmatpush.bf16.msrb.mxu3 %v8179_v7  ;;  %v1294_v5 = vadd.f32 %v1293_v0, %v1280_v58  ;;  %v8854_v7 = vld [vmem:[%s17277_s1 + $0xbe0] sm:$0xf]  ;;  %v7747_v19 = vor.u32 %v10673_v60, %v7744_v61  ;;  %v10982_v60 = vld [vmem:[%s17277_s1 + $0x9cc] sm:$0xf0]  ;;  %v8823_v0 = vor.u32 %v11042_v51, %v8822_v50 }
  0xf9   :  { %v8855_v36 = vor.u32 %v11050_v8, %v8854_v7  ;;  %v8438_v61 = vld [vmem:[%s17277_s1 + $0x8a0] sm:$0xf]  ;;  %v10998_v7 = vld [vmem:[%s17277_s1 + $0xa4c] sm:$0xf0] }
  0xfa   :  { %2209 = vmatpush.bf16.msrb.mxu2 %v8019_v13  ;;  %v1307_v13 = vpop.f32.mrf.mxu3  ;;  %v13364_v51 = vld [vmem:[%s17277_s1 + $0x960] sm:$0xf] }
  0xfb   :  { %2192 = vmatpush.bf16.msrb.mxu1 %v7939_v20  ;;  %2179 = vmatpush.bf16.msrb.mxu0 %v7795_v15  ;;  %v10705_v20 = vld [vmem:[%s17277_s1 + $0x12c] sm:$0xf]  ;;  %v8694_v15 = vld [vmem:[%s17277_s1 + $0xaa0] sm:$0xf]  ;;  %v13226_v22 = vadd.f32 %v1307_v13, %v1294_v5  ;;  %v10978_v13 = vld [vmem:[%s17277_s1 + $0x9ac] sm:$0xf0] }
  0xfc   :  { %2222 = vmatpush.bf16.msrb.mxu3 %v8163_v27  ;;  %v7728_v27 = vld [vmem:[%s17277_s1 + $0x18] sm:$0xf0]  ;;  %v8646_v5 = vld [vmem:[%s17277_s1 + $0xa40] sm:$0xf] }
  0xfd   :  { %v7731_v40 = vor.u32 %v10669_v26, %v7728_v27  ;;  %v8630_v26 = vld [vmem:[%s17277_s1 + $0xa20] sm:$0xf]  ;;  %v10994_v27 = vld [vmem:[%s17277_s1 + $0xa2c] sm:$0xf0] }
  0xfe   :  { %2210 = vmatpush.bf16.msrb.mxu2 %v8003_v31  ;;  %v10954_v31 = vld [vmem:[%s17277_s1 + $0x8ec] sm:$0xf0] }
  0xff   :  { %2193 = vmatpush.bf16.msrb.mxu1 %v7923_v38  ;;  %2180 = vmatpush.bf16.msrb.mxu0 %v7779_v39  ;;  %v11046_v38 = vld [vmem:[%s17277_s1 + $0xbcc] sm:$0xf0]  ;;  %v8695_v39 = vor.u32 %v11010_v21, %v8694_v15  ;;  %v8471_v45 = vor.u32 %v10954_v31, %v8470_v30  ;;  %v8790_v15 = vld [vmem:[%s17277_s1 + $0xb60] sm:$0xf]  ;;  %v13337_v30 = vpop.f32.mrf.mxu0  ;;  %v13339_v31 = vpop.f32.mrf.mxu1 }
 0x100   :  { %2223 = vmatpush.bf16.msrb.mxu3 %v8147_v56  ;;  %v8598_v56 = vld [vmem:[%s17277_s1 + $0x9e0] sm:$0xf]  ;;  %v11034_v21 = vld [vmem:[%s17277_s1 + $0xb6c] sm:$0xf0] }
 0x101   :  { %v8599_v57 = vor.u32 %v10986_v46, %v8598_v56  ;;  %v8631_v56 = vor.u32 %v10994_v27, %v8630_v26  ;;  %v11030_v46 = vld [vmem:[%s17277_s1 + $0xb4c] sm:$0xf0]  ;;  %v11012_v27 = vld [vmem:[%s17277_s1 + $0xac4] sm:$0xf] }
 0x102   :  { %2211 = vmatpush.bf16.msrb.mxu2 %v7987_v48  ;;  %v10950_v48 = vld [vmem:[%s17277_s1 + $0x8cc] sm:$0xf0] }
 0x103   :  { %2194 = vmatpush.bf16.msrb.mxu1 %v7907_v12  ;;  %2181 = vmatpush.bf16.msrb.mxu0 %v7763_v52  ;;  %v8679_v12 = vor.u32 %v11006_v42, %v8678_v41  ;;  %v7859_v52 = vor.u32 %v10701_v43, %v7856_v44  ;;  %v8455_v58 = vor.u32 %v10950_v48, %v8454_v47  ;;  %v13347_v41 = vpop.f32.mrf.mxu2  ;;  %v8406_v42 = vld [vmem:[%s17277_s1 + $0x860] sm:$0xf]  ;;  %v10938_v43 = vld [vmem:[%s17277_s1 + $0x86c] sm:$0xf0] }
 0x104   :  { %2224 = vmatpush.bf16.msrb.mxu3 %v8131_v28  ;;  %v10946_v28 = vld [vmem:[%s17277_s1 + $0x8ac] sm:$0xf0]  ;;  %v8791_v44 = vor.u32 %v11034_v21, %v8790_v15  ;;  %v13422_v15 = vld [vmem:[%s17277_s1 + $0x820] sm:$0xf] }
 0x105   :  { %2212 = vmatmul.bf16.vlgmr.msrb.gmra.mxu2 %v12583_v34  ;;  %v7875_v34 = vor.u32 %v10705_v20, %v7872_v24  ;;  %v8439_v8 = vor.u32 %v10946_v28, %v8438_v61  ;;  %v8647_v24 = vor.u32 %v10998_v7, %v8646_v5  ;;  %v11016_v61 = vld [vmem:[%s17277_s1 + $0xae4] sm:$0xf]  ;;  %v8728_v28 = vld [vmem:[%s17277_s1 + $0xaf0] sm:$0xf0]  ;;  %v13427_v21 = vld [vmem:[%s17277_s1 + $0x82c] sm:$0xf0] }
 0x106   :  { %3098 = vmatpush.bf16.msra.mxu2 %v8727_v49  ;;  %v8839_v49 = vor.u32 %v11046_v38, %v8838_v37  ;;  %v2242_v37 = vld [vmem:[#allocation2 + $0x10] sm:$0xfc]  ;;  %v2246_v38 = vld [vmem:[#allocation2 + $0x78] sm:$0x3]  ;;  %v8731_v26 = vor.u32 %v11016_v61, %v8728_v28 }
 0x107   :  { %2195 = vmatpush.bf16.msrb.mxu1 %v7891_v17  ;;  %2182 = vmatpush.bf16.msrb.mxu0 %v7747_v19  ;;  %v8422_v17 = vld [vmem:[%s17277_s1 + $0x880] sm:$0xf]  ;;  %v10942_v19 = vld [vmem:[%s17277_s1 + $0x88c] sm:$0xf0]  ;;  %v2284_v50 = vrot.slane %v2246_v38, 2 }
 0x108   :  { %2225 = vmatpush.bf16.msrb.mxu3 %v8115_v29  ;;  %v2234_v29 = vld [vmem:[#allocation2 + $0x58] sm:$0xfc] }
 0x109   :  { %v2271_v47 = vrot.slane %v2234_v29, 2  ;;  %v8712_v29 = vld [vmem:[%s17277_s1 + $0xad0] sm:$0xf0] }
 0x10a   :  { %3099 = vmatpush.bf16.msra.mxu2 %v8711_v9  ;;  %v8566_v9 = vld [vmem:[%s17277_s1 + $0x9a0] sm:$0xf] }
 0x10b   :  { %2196 = vmatpush.bf16.msrb.mxu1 %v7875_v34  ;;  %2183 = vmatpush.bf16.msrb.mxu0 %v7731_v40  ;;  %v8550_v34 = vld [vmem:[%s17277_s1 + $0x980] sm:$0xf]  ;;  %v10974_v40 = vld [vmem:[%s17277_s1 + $0x98c] sm:$0xf0] }
 0x10c   :  { %3112 = vmatpush.bf16.msra.mxu3 %v8855_v36  ;;  %v2238_v36 = vld [vmem:[#allocation2 + $0x8] sm:$0x3] }
 0x10d   :  { %2226 = vmatmul.bf16.vlgmr.msrb.gmra.mxu3 %v12643_v1  ;;  %v8806_v1 = vld [vmem:[%s17277_s1 + $0xb80] sm:$0xf]  ;;  %v2272_v48 = vrot.slane %v2238_v36, 2  ;;  %v13435_v36 = vld [vmem:[#allocation2 + $0x30] sm:$0xfc] }
 0x10e   :  { %3100 = vmatpush.bf16.msra.mxu2 %v8695_v39  ;;  %2184 = vmatmul.bf16.vlgmr.msrb.gmra.mxu0 %v12654_v6  ;;  %v8583_v6 = vor.u32 %v10982_v60, %v8582_v59  ;;  %v8807_v20 = vor.u32 %v11038_v3, %v8806_v1  ;;  %v8423_v39 = vor.u32 %v10942_v19, %v8422_v17  ;;  %v10934_v60 = vld [vmem:[%s17277_s1 + $0x84c] sm:$0xf0]  ;;  %v8758_v1 = vld [vmem:[%s17277_s1 + $0xb20] sm:$0xf]  ;;  %v2265_v61 = vrot.slane %v13435_v36, 2 }
 0x10f   :  { %3070 = vmatpush.bf16.msra.mxu0 %v8471_v45  ;;  %2197 = vmatpush.bf16.msrb.mxu1 %v7859_v52  ;;  %v8774_v45 = vld [vmem:[%s17277_s1 + $0xb40] sm:$0xf]  ;;  %v13371_v52 = vpop.f32.mrf.mxu3  ;;  %v8407_v59 = vor.u32 %v10938_v43, %v8406_v42  ;;  %v11026_v3 = vld [vmem:[%s17277_s1 + $0xb2c] sm:$0xf0]  ;;  %v2273_v7 = vsel %vm2264_vm1, %v2271_v47, %v2272_v48  ;;  %v8391_v38 = vor.u32 %v10934_v60, %v13376_v53  ;;  %v8856_v53 = vld [vmem:[%s17277_s1 + $0xbf0] sm:$0xf0] }
 0x110   :  { %3113 = vmatpush.bf16.msra.mxu3 %v8839_v49  ;;  %v2283_v49 = vrot.slane %v2242_v37, 2  ;;  %v13412_v17 = vld [vmem:[%s17277_s1 + $0x940] sm:$0xf]  ;;  %v13417_v19 = vld [vmem:[%s17277_s1 + $0x94c] sm:$0xf0] }
 0x111   :  { %v13443_v42 = vld [vmem:[%s17277_s1 + $0x920] sm:$0xf]  ;;  %v13448_v43 = vld [vmem:[%s17277_s1 + $0x92c] sm:$0xf0]  ;;  %v11044_v36 = vld [vmem:[%s17277_s1 + $0xbc4] sm:$0xf] }
 0x112   :  { %3101 = vmatpush.bf16.msra.mxu2 %v8679_v12  ;;  %2198 = vmatmul.bf16.vlgmr.msrb.gmra.mxu1 %v12682_v23  ;;  %v8567_v23 = vor.u32 %v10978_v13, %v8566_v9  ;;  %v13369_v12 = vld [vmem:[%s17277_s1 + $0x96c] sm:$0xf0]  ;;  %v13405_v9 = vld [vmem:[#allocation2 + $0x38] sm:$0xfc] }
 0x113   :  { %3084 = vmatpush.bf16.msra.mxu1 %v8599_v57  ;;  %3071 = vmatpush.bf16.msra.mxu0 %v8455_v58  ;;  %v10990_v57 = vld [vmem:[%s17277_s1 + $0xa0c] sm:$0xf0]  ;;  %v8551_v58 = vor.u32 %v10974_v40, %v8550_v34  ;;  %v8535_v37 = vor.u32 %v13369_v12, %v13364_v51  ;;  %v2240_v34 = vld [vmem:[#allocation2 + $0x40] sm:$0xfc]  ;;  %v2244_v40 = vld [vmem:[#allocation2 + $0x60] sm:$0x3] }
 0x114   :  { %3114 = vmatpush.bf16.msra.mxu3 %v8823_v0  ;;  %v8775_v0 = vor.u32 %v11030_v46, %v8774_v45  ;;  %v8615_v5 = vor.u32 %v10990_v57, %v8614_v54  ;;  %v13407_v13 = vld [vmem:[#allocation2 + $0x28] sm:$0x3]  ;;  %v8742_v45 = vld [vmem:[%s17277_s1 + $0xb00] sm:$0xf]  ;;  %v1349_v46 = vpop.f32.mrf.mxu2  ;;  %v11048_v12 = vld [vmem:[%s17277_s1 + $0xbe4] sm:$0xf] }
 0x115   :  { %v13468_v51 = vld [vmem:[%s17277_s1 + $0x80c] sm:$0xf0]  ;;  %v2286_v57 = vrot.slane %v13405_v9, 2  ;;  %v8696_v9 = vld [vmem:[%s17277_s1 + $0xab0] sm:$0xf0] }
 0x116   :  { %3102 = vmatpush.bf16.msra.mxu2 %v8663_v4  ;;  %v13399_v4 = vld [vmem:[#allocation2 + $0x18] sm:$0xfc] }
 0x117   :  { %3085 = vmatpush.bf16.msra.mxu1 %v8583_v6  ;;  %3072 = vmatpush.bf16.msra.mxu0 %v8439_v8  ;;  %v2285_v6 = vsel %vm2264_vm1, %v2283_v49, %v2284_v50  ;;  %v13403_v8 = vld [vmem:[#allocation2 + $0x48] sm:$0x3]  ;;  %v2274_v48 = vrot.slane %v13399_v4, 2  ;;  %v13463_v50 = vld [vmem:[%s17277_s1 + $0x800] sm:$0xf]  ;;  %v1363_v60 = vpop.f32.mrf.mxu3  ;;  %v8519_v4 = vor.u32 %v13417_v19, %v13412_v17  ;;  %v8503_v19 = vor.u32 %v13448_v43, %v13443_v42 }
 0x118   :  { %3115 = vmatpush.bf16.msra.mxu3 %v8807_v20  ;;  %v1321_v20 = vpop.f32.mrf.mxu0  ;;  %v13456_v47 = vpack.c.bf16 %v2285_v6, %v2273_v7  ;;  %v2275_v49 = vrot.slane %v13403_v8, 2  ;;  %v2237_v6 = vld [vmem:[#allocation2 + $0x68] sm:$0x3]  ;;  %v11008_v8 = vld [vmem:[%s17277_s1 + $0xaa4] sm:$0xf] }
 0x119   :  { %v2245_v17 = vld [vmem:[#allocation2 + $0x70] sm:$0x3] }
 0x11a   :  { %3103 = vmatpush.bf16.msra.mxu2 %v8647_v24  ;;  %v1335_v24 = vpop.f32.mrf.mxu1  ;;  %v2281_v43 = vrot.slane %v2245_v17, 2 }
 0x11b   :  { %3086 = vmatpush.bf16.msra.mxu1 %v8567_v23  ;;  %3073 = vmatpush.bf16.msra.mxu0 %v8423_v39  ;;  %v1336_v23 = vadd.f32 %v1335_v24, %v1321_v20  ;;  %v2236_v39 = vld [vmem:[#allocation2 + $0x50] sm:$0x3]  ;;  %v2241_v20 = vld [vmem:[#allocation2 + $0x20] sm:$0xfc]  ;;  %v8859_v24 = vor.u32 %v11048_v12, %v8856_v53  ;;  %v10948_v12 = vld [vmem:[%s17277_s1 + $0x8c4] sm:$0xf] }
 0x11c   :  { %3116 = vmatpush.bf16.msra.mxu3 %v8791_v44  ;;  %v8759_v44 = vor.u32 %v11026_v3, %v8758_v1  ;;  %v2266_v28 = vrot.slane %v2236_v39, 2  ;;  %v2278_v1 = vrot.slane %v2244_v40, 2  ;;  %v2233_v3 = vld [vmem:[#allocation2] sm:$0xfc]  ;;  %v8699_v39 = vor.u32 %v11008_v8, %v8696_v9  ;;  %v8456_v53 = vld [vmem:[%s17277_s1 + $0x8d0] sm:$0xf0] }
 0x11d   :  { %v1350_v54 = vadd.f32 %v1349_v46, %v1336_v23  ;;  %v2269_v23 = vrot.slane %v2237_v6, 2  ;;  %v2280_v42 = vrot.slane %v2241_v20, 2  ;;  %v10958_v46 = vld [vmem:[%s17277_s1 + $0x90c] sm:$0xf0]  ;;  %v10980_v6 = vld [vmem:[%s17277_s1 + $0x9c4] sm:$0xf] }
 0x11e   :  { %3104 = vmatpush.bf16.msra.mxu2 %v8631_v56  ;;  %v11022_v56 = vld [vmem:[%s17277_s1 + $0xb0c] sm:$0xf0]  ;;  %v8584_v9 = vld [vmem:[%s17277_s1 + $0x9d0] sm:$0xf0] }
 0x11f   :  { %3087 = vmatpush.bf16.msra.mxu1 %v8551_v58  ;;  %3074 = vmatpush.bf16.msra.mxu0 %v8407_v59  ;;  %v2287_v58 = vrot.slane %v13407_v13, 2  ;;  %v8715_v59 = vor.u32 %v11012_v27, %v8712_v29  ;;  %v13483_v7 = vadd.f32 %v1363_v60, %v1350_v54  ;;  %v8743_v13 = vor.u32 %v11022_v56, %v8742_v45  ;;  %v8680_v45 = vld [vmem:[%s17277_s1 + $0xa90] sm:$0xf0]  ;;  %v8486_v56 = vld [vmem:[%s17277_s1 + $0x900] sm:$0xf] }
 0x120   :  { %3117 = vmatpush.bf16.msra.mxu3 %v8775_v0  ;;  %v2277_v0 = vrot.slane %v2240_v34, 2  ;;  %v8359_v29 = vor.u32 %v13468_v51, %v13463_v50  ;;  %v2267_v34 = vsel %vm2264_vm1, %v2265_v61, %v2266_v28  ;;  %v8600_v51 = vld [vmem:[%s17277_s1 + $0x9f0] sm:$0xf0]  ;;  %v8487_v61 = vor.u32 %v10958_v46, %v8486_v56  ;;  %v13558_v8 = vpop.f32.mrf.mxu0  ;;  %v13610_v56 = vpop.f32.mrf.mxu3  ;;  %v10992_v46 = vld [vmem:[%s17277_s1 + $0xa24] sm:$0xf] }
 0x121   :  { %v2288_v27 = vsel %vm2264_vm1, %v2286_v57, %v2287_v58  ;;  %v11040_v58 = vld [vmem:[%s17277_s1 + $0xba4] sm:$0xf]  ;;  %v8440_v20 = vld [vmem:[%s17277_s1 + $0x8b0] sm:$0xf0] }
 0x122   :  { %3105 = vmatpush.bf16.msra.mxu2 %v8615_v5  ;;  %v8375_v5 = vor.u32 %v13427_v21, %v13422_v15  ;;  %v10952_v15 = vld [vmem:[%s17277_s1 + $0x8e4] sm:$0xf]  ;;  %v8472_v21 = vld [vmem:[%s17277_s1 + $0x8f0] sm:$0xf0]  ;;  %v2279_v40 = vsel %vm2264_vm1, %v2277_v0, %v2278_v1  ;;  %v2282_v0 = vsel %vm2264_vm1, %v2280_v42, %v2281_v43 }
 0x123   :  { %3088 = vmatpush.bf16.msra.mxu1 %v8535_v37  ;;  %3075 = vmatpush.bf16.msra.mxu0 %v8391_v38  ;;  %v8840_v37 = vld [vmem:[%s17277_s1 + $0xbd0] sm:$0xf0]  ;;  %v2268_v38 = vrot.slane %v2233_v3, 2  ;;  %v13538_v57 = vpack.c.bf16 %v2279_v40, %v2267_v34  ;;  %v11000_v1 = vld [vmem:[%s17277_s1 + $0xa64] sm:$0xf] }
 0x124   :  { %3118 = vmatpush.bf16.msra.mxu3 %v8759_v44  ;;  %v11004_v44 = vld [vmem:[%s17277_s1 + $0xa84] sm:$0xf]  ;;  %v8843_v54 = vor.u32 %v11044_v36, %v8840_v37  ;;  %v8664_v3 = vld [vmem:[%s17277_s1 + $0xa70] sm:$0xf0]  ;;  %v13589_v37 = vpop.f32.mrf.mxu1 }
 0x125   :  { %3106 = vmatmul.bf16.vlgmr.msra.gmra.mxu2 %v13456_v47  ;;  %v8683_v60 = vor.u32 %v11004_v44, %v8680_v45  ;;  %v2270_v28 = vsel %vm2264_vm1, %v2268_v38, %v2269_v23  ;;  %v10976_v36 = vld [vmem:[%s17277_s1 + $0x9a4] sm:$0xf]  ;;  %v8568_v38 = vld [vmem:[%s17277_s1 + $0x9b0] sm:$0xf0]  ;;  %v13594_v23 = vpop.f32.mrf.mxu2 }
 0x126   :  { %3154 = vmatpush.bf16.msrb.mxu2 %v8731_v26  ;;  %v2276_v26 = vsel %vm2264_vm1, %v2274_v48, %v2275_v49  ;;  %v8475_v48 = vor.u32 %v10952_v15, %v8472_v21  ;;  %v10984_v49 = vld [vmem:[%s17277_s1 + $0x9e4] sm:$0xf]  ;;  %v13572_v15 = vpack.c.bf16 %v2282_v0, %v2270_v28  ;;  %v8424_v34 = vld [vmem:[%s17277_s1 + $0x890] sm:$0xf0] }
 0x127   :  { %3089 = vmatpush.bf16.msra.mxu1 %v8519_v4  ;;  %3076 = vmatpush.bf16.msra.mxu0 %v8375_v5  ;;  %v13527_v50 = vpack.c.bf16 %v2288_v27, %v2276_v26  ;;  %v8603_v4 = vor.u32 %v10984_v49, %v8600_v51  ;;  %v8459_v5 = vor.u32 %v10948_v12, %v8456_v53  ;;  %v11036_v21 = vld [vmem:[%s17277_s1 + $0xb84] sm:$0xf]  ;;  %v8792_v44 = vld [vmem:[%s17277_s1 + $0xb70] sm:$0xf0] }
 0x128   :  { %3119 = vmatpush.bf16.msra.mxu3 %v8743_v13  ;;  %v10944_v13 = vld [vmem:[%s17277_s1 + $0x8a4] sm:$0xf]  ;;  %v8667_v26 = vor.u32 %v11000_v1, %v8664_v3  ;;  %v8552_v12 = vld [vmem:[%s17277_s1 + $0x990] sm:$0xf0] }
 0x129   :  { %v10996_v27 = vld [vmem:[%s17277_s1 + $0xa44] sm:$0xf]  ;;  %v8616_v3 = vld [vmem:[%s17277_s1 + $0xa10] sm:$0xf0] }
 0x12a   :  { %3155 = vmatpush.bf16.msrb.mxu2 %v8715_v59  ;;  %v8824_v59 = vld [vmem:[%s17277_s1 + $0xbb0] sm:$0xf0]  ;;  %v11032_v43 = vld [vmem:[%s17277_s1 + $0xb64] sm:$0xf] }
 0x12b   :  { %3090 = vmatpush.bf16.msra.mxu1 %v8503_v19  ;;  %3077 = vmatpush.bf16.msra.mxu0 %v8359_v29  ;;  %v8827_v17 = vor.u32 %v11040_v58, %v8824_v59  ;;  %v1168_v19 = vadd.f32 %v12945_v32, %v12917_v18  ;;  %v8648_v18 = vld [vmem:[%s17277_s1 + $0xa50] sm:$0xf0]  ;;  %v8587_v32 = vor.u32 %v10980_v6, %v8584_v9  ;;  %v10972_v51 = vld [vmem:[%s17277_s1 + $0x984] sm:$0xf]  ;;  %v2017_v0 = vpop.f32.mrf.mxu0  ;;  %v8734_v9 = vld [vmem:[%s17277_s1 + $0xae8] sm:$0xf] }
 0x12c   :  { %3168 = vmatpush.bf16.msrb.mxu3 %v8859_v24  ;;  %v8808_v24 = vld [vmem:[%s17277_s1 + $0xb90] sm:$0xf0]  ;;  %v8443_v29 = vor.u32 %v10944_v13, %v8440_v20  ;;  %v8651_v45 = vor.u32 %v10996_v27, %v8648_v18  ;;  %v10936_v53 = vld [vmem:[%s17277_s1 + $0x864] sm:$0xf]  ;;  %v8795_v58 = vor.u32 %v11032_v43, %v8792_v44  ;;  %v11019_v13 = vld [vmem:[%s17277_s1 + $0xaf4] sm:$0xf0] }
 0x12d   :  { %3120 = vmatmul.bf16.vlgmr.msra.gmra.mxu3 %v13527_v50  ;;  %v8811_v40 = vor.u32 %v11036_v21, %v8808_v24  ;;  %v1182_v42 = vadd.f32 %v12931_v25, %v1168_v19  ;;  %v8632_v25 = vld [vmem:[%s17277_s1 + $0xa30] sm:$0xf0]  ;;  %v10988_v1 = vld [vmem:[%s17277_s1 + $0xa04] sm:$0xf] }
 0x12e   :  { %3156 = vmatpush.bf16.msrb.mxu2 %v8699_v39  ;;  %3078 = vmatmul.bf16.vlgmr.msra.gmra.mxu0 %v13538_v57  ;;  %v10940_v39 = vld [vmem:[%s17277_s1 + $0x884] sm:$0xf]  ;;  %v8635_v28 = vor.u32 %v10992_v46, %v8632_v25  ;;  %v8536_v20 = vld [vmem:[%s17277_s1 + $0x970] sm:$0xf0]  ;;  %v8619_v27 = vor.u32 %v10988_v1, %v8616_v3 }
 0x12f   :  { %3126 = vmatpush.bf16.msrb.mxu0 %v8475_v48  ;;  %3091 = vmatpush.bf16.msra.mxu1 %v8487_v61  ;;  %v8571_v48 = vor.u32 %v10976_v36, %v8568_v38  ;;  %v8427_v49 = vor.u32 %v10940_v39, %v8424_v34  ;;  %v1196_v59 = vadd.f32 %v12947_v33, %v1182_v42  ;;  %v8776_v61 = vld [vmem:[%s17277_s1 + $0xb50] sm:$0xf0]  ;;  %v10968_v6 = vld [vmem:[%s17277_s1 + $0x964] sm:$0xf]  ;;  %v2031_v18 = vpop.f32.mrf.mxu1  ;;  %v11015_v42 = vld [vmem:[%s17277_s1 + $0xad4] sm:$0xf0] }
 0x130   :  { %3169 = vmatpush.bf16.msrb.mxu3 %v8843_v54  ;;  %v8408_v54 = vld [vmem:[%s17277_s1 + $0x870] sm:$0xf0]  ;;  %v11024_v24 = vld [vmem:[%s17277_s1 + $0xb24] sm:$0xf]  ;;  %v8539_v38 = vor.u32 %v10968_v6, %v8536_v20  ;;  %v2059_v43 = vpop.f32.mrf.mxu3  ;;  %v10955_v6 = vld [vmem:[%s17277_s1 + $0x8f4] sm:$0xf0] }
 0x131   :  { %v2018_v33 = vadd.f32 %v2017_v0, %v1196_v59  ;;  %v8392_v19 = vld [vmem:[%s17277_s1 + $0x850] sm:$0xf0]  ;;  %v10964_v34 = vld [vmem:[%s17277_s1 + $0x944] sm:$0xf]  ;;  %v11011_v0 = vld [vmem:[%s17277_s1 + $0xab4] sm:$0xf0] }
 0x132   :  { %3157 = vmatpush.bf16.msrb.mxu2 %v8683_v60  ;;  %3092 = vmatmul.bf16.vlgmr.msra.gmra.mxu1 %v13572_v15  ;;  %v11028_v60 = vld [vmem:[%s17277_s1 + $0xb44] sm:$0xf]  ;;  %v8520_v44 = vld [vmem:[%s17277_s1 + $0x950] sm:$0xf0]  ;;  %v11047_v20 = vld [vmem:[%s17277_s1 + $0xbd4] sm:$0xf0] }
 0x133   :  { %3140 = vmatpush.bf16.msrb.mxu1 %v8603_v4  ;;  %3127 = vmatpush.bf16.msrb.mxu0 %v8459_v5  ;;  %v8555_v4 = vor.u32 %v10972_v51, %v8552_v12  ;;  %v8411_v5 = vor.u32 %v10936_v53, %v8408_v54  ;;  %v8779_v21 = vor.u32 %v11028_v60, %v8776_v61  ;;  %v8376_v46 = vld [vmem:[%s17277_s1 + $0x830] sm:$0xf0]  ;;  %v8862_v12 = vld [vmem:[%s17277_s1 + $0xbe8] sm:$0xf]  ;;  %v11051_v53 = vld [vmem:[%s17277_s1 + $0xbf4] sm:$0xf0] }
 0x134   :  { %3170 = vmatpush.bf16.msrb.mxu3 %v8827_v17  ;;  %v10932_v17 = vld [vmem:[%s17277_s1 + $0x844] sm:$0xf]  ;;  %v2032_v36 = vadd.f32 %v2031_v18, %v2018_v33  ;;  %v8744_v51 = vld [vmem:[%s17277_s1 + $0xb10] sm:$0xf0]  ;;  %v8523_v59 = vor.u32 %v10964_v34, %v8520_v44 }
 0x135   :  { %v8395_v39 = vor.u32 %v10932_v17, %v8392_v19  ;;  %v10960_v61 = vld [vmem:[%s17277_s1 + $0x924] sm:$0xf]  ;;  %v8504_v1 = vld [vmem:[%s17277_s1 + $0x930] sm:$0xf0] }
 0x136   :  { %3158 = vmatpush.bf16.msrb.mxu2 %v8667_v26  ;;  %v8760_v26 = vld [vmem:[%s17277_s1 + $0xb30] sm:$0xf0]  ;;  %v10924_v3 = vld [vmem:[%s17277_s1 + $0x804] sm:$0xf]  ;;  %v8507_v19 = vor.u32 %v10960_v61, %v8504_v1  ;;  %v10999_v1 = vld [vmem:[%s17277_s1 + $0xa54] sm:$0xf0] }
 0x137   :  { %3141 = vmatpush.bf16.msrb.mxu1 %v8587_v32  ;;  %3128 = vmatpush.bf16.msrb.mxu0 %v8443_v29  ;;  %v2045_v32 = vpop.f32.mrf.mxu2  ;;  %v8735_v29 = vor.u32 %v11019_v13, %v8734_v9  ;;  %v8763_v25 = vor.u32 %v11024_v24, %v8760_v26  ;;  %v8360_v33 = vld [vmem:[%s17277_s1 + $0x810] sm:$0xf0]  ;;  %v8863_v9 = vor.u32 %v11051_v53, %v8862_v12  ;;  %v8846_v13 = vld [vmem:[%s17277_s1 + $0xbc8] sm:$0xf]  ;;  %v11007_v26 = vld [vmem:[%s17277_s1 + $0xa94] sm:$0xf0] }
 0x138   :  { %3171 = vmatpush.bf16.msrb.mxu3 %v8811_v40  ;;  %v8718_v40 = vld [vmem:[%s17277_s1 + $0xac8] sm:$0xf]  ;;  %v8488_v18 = vld [vmem:[%s17277_s1 + $0x910] sm:$0xf0]  ;;  %v8847_v34 = vor.u32 %v11047_v20, %v8846_v13  ;;  %v10947_v53 = vld [vmem:[%s17277_s1 + $0x8b4] sm:$0xf0] }
 0x139   :  { %v8719_v54 = vor.u32 %v11015_v42, %v8718_v40  ;;  %v8686_v24 = vld [vmem:[%s17277_s1 + $0xa88] sm:$0xf]  ;;  %v11043_v42 = vld [vmem:[%s17277_s1 + $0xbb4] sm:$0xf0] }
 0x13a   :  { %3159 = vmatpush.bf16.msrb.mxu2 %v8651_v45  ;;  %v10928_v45 = vld [vmem:[%s17277_s1 + $0x824] sm:$0xf]  ;;  %v8830_v40 = vld [vmem:[%s17277_s1 + $0xba8] sm:$0xf] }
 0x13b   :  { %3142 = vmatpush.bf16.msrb.mxu1 %v8571_v48  ;;  %3129 = vmatpush.bf16.msrb.mxu0 %v8427_v49  ;;  %v2046_v48 = vadd.f32 %v2045_v32, %v2032_v36  ;;  %v11020_v49 = vld [vmem:[%s17277_s1 + $0xb04] sm:$0xf]  ;;  %v8379_v60 = vor.u32 %v10928_v45, %v8376_v46  ;;  %v10987_v36 = vld [vmem:[%s17277_s1 + $0x9f4] sm:$0xf0]  ;;  %v8670_v45 = vld [vmem:[%s17277_s1 + $0xa68] sm:$0xf] }
 0x13c   :  { %3172 = vmatpush.bf16.msrb.mxu3 %v8795_v58  ;;  %v11003_v46 = vld [vmem:[%s17277_s1 + $0xa74] sm:$0xf0]  ;;  %v8446_v12 = vld [vmem:[%s17277_s1 + $0x8a8] sm:$0xf] }
 0x13d   :  { %v13697_v58 = vadd.f32 %v2059_v43, %v2046_v48  ;;  %v8687_v43 = vor.u32 %v11007_v26, %v8686_v24  ;;  %v8671_v61 = vor.u32 %v11003_v46, %v8670_v45  ;;  %v8798_v20 = vld [vmem:[%s17277_s1 + $0xb68] sm:$0xf] }
 0x13e   :  { %3160 = vmatpush.bf16.msrb.mxu2 %v8635_v28  ;;  %v8702_v28 = vld [vmem:[%s17277_s1 + $0xaa8] sm:$0xf] }
 0x13f   :  { %3143 = vmatpush.bf16.msrb.mxu1 %v8555_v4  ;;  %3130 = vmatpush.bf16.msrb.mxu0 %v8411_v5  ;;  %v8747_v4 = vor.u32 %v11020_v49, %v8744_v51  ;;  %v8478_v5 = vld [vmem:[%s17277_s1 + $0x8e8] sm:$0xf]  ;;  %v8703_v17 = vor.u32 %v11011_v0, %v8702_v28  ;;  %v10983_v51 = vld [vmem:[%s17277_s1 + $0x9d4] sm:$0xf0]  ;;  %v13786_v28 = vpop.f32.mrf.mxu0  ;;  %v13815_v24 = vpop.f32.mrf.mxu2 }
 0x140   :  { %3173 = vmatpush.bf16.msrb.mxu3 %v8779_v21  ;;  %v8363_v21 = vor.u32 %v10924_v3, %v8360_v33  ;;  %v8479_v32 = vor.u32 %v10955_v6, %v8478_v5  ;;  %v8590_v49 = vld [vmem:[%s17277_s1 + $0x9c8] sm:$0xf]  ;;  %v8447_v33 = vor.u32 %v10947_v53, %v8446_v12  ;;  %v10979_v5 = vld [vmem:[%s17277_s1 + $0x9b4] sm:$0xf0]  ;;  %v11017_v53 = vld [vmem:[%s17277_s1 + $0xaec] sm:$0xf] }
 0x141   :  { %v8654_v0 = vld [vmem:[%s17277_s1 + $0xa48] sm:$0xf]  ;;  %v8591_v3 = vor.u32 %v10983_v51, %v8590_v49 }
 0x142   :  { %3161 = vmatpush.bf16.msrb.mxu2 %v8619_v27  ;;  %v10956_v27 = vld [vmem:[%s17277_s1 + $0x904] sm:$0xf]  ;;  %v8430_v6 = vld [vmem:[%s17277_s1 + $0x888] sm:$0xf] }
 0x143   :  { %3144 = vmatpush.bf16.msrb.mxu1 %v8539_v38  ;;  %3131 = vmatpush.bf16.msrb.mxu0 %v8395_v39  ;;  %v8462_v38 = vld [vmem:[%s17277_s1 + $0x8c8] sm:$0xf]  ;;  %v10951_v39 = vld [vmem:[%s17277_s1 + $0x8d4] sm:$0xf0]  ;;  %v8491_v44 = vor.u32 %v10956_v27, %v8488_v18 }
 0x144   :  { %3174 = vmatpush.bf16.msrb.mxu3 %v8763_v25  ;;  %v8463_v48 = vor.u32 %v10951_v39, %v8462_v38  ;;  %v8638_v26 = vld [vmem:[%s17277_s1 + $0xa28] sm:$0xf]  ;;  %v10995_v27 = vld [vmem:[%s17277_s1 + $0xa34] sm:$0xf0] }
 0x145   :  { %3162 = vmatmul.bf16.vlgmr.msrb.gmra.mxu2 %v13456_v47  ;;  %v10975_v38 = vld [vmem:[%s17277_s1 + $0x994] sm:$0xf0]  ;;  %v8414_v39 = vld [vmem:[%s17277_s1 + $0x868] sm:$0xf] }
 0x146   :  { %3210 = vmatpush.bf16.msra.mxu2 %v8735_v29  ;;  %v8606_v29 = vld [vmem:[%s17277_s1 + $0x9e8] sm:$0xf] }
 0x147   :  { %3145 = vmatpush.bf16.msrb.mxu1 %v8523_v59  ;;  %3132 = vmatpush.bf16.msrb.mxu0 %v8379_v60  ;;  %v8607_v25 = vor.u32 %v10987_v36, %v8606_v29  ;;  %v8814_v59 = vld [vmem:[%s17277_s1 + $0xb88] sm:$0xf]  ;;  %v11039_v60 = vld [vmem:[%s17277_s1 + $0xb94] sm:$0xf0]  ;;  %v13826_v36 = vpop.f32.mrf.mxu3 }
 0x148   :  { %3175 = vmatpush.bf16.msrb.mxu3 %v8747_v4  ;;  %v8574_v4 = vld [vmem:[%s17277_s1 + $0x9a8] sm:$0xf]  ;;  %v8815_v13 = vor.u32 %v11039_v60, %v8814_v59  ;;  %v10971_v59 = vld [vmem:[%s17277_s1 + $0x974] sm:$0xf0] }
 0x149   :  { %v8575_v18 = vor.u32 %v10979_v5, %v8574_v4  ;;  %v8558_v29 = vld [vmem:[%s17277_s1 + $0x988] sm:$0xf]  ;;  %v10935_v60 = vld [vmem:[%s17277_s1 + $0x854] sm:$0xf0]  ;;  %v2101_v4 = vpop.f32.mrf.mxu2 }
 0x14a   :  { %3211 = vmatpush.bf16.msra.mxu2 %v8719_v54  ;;  %v8831_v54 = vor.u32 %v11043_v42, %v8830_v40  ;;  %v8782_v42 = vld [vmem:[%s17277_s1 + $0xb48] sm:$0xf]  ;;  %v8559_v49 = vor.u32 %v10975_v38, %v8558_v29 }
 0x14b   :  { %3146 = vmatpush.bf16.msrb.mxu1 %v8507_v19  ;;  %3133 = vmatpush.bf16.msrb.mxu0 %v8363_v21  ;;  %v8655_v19 = vor.u32 %v10999_v1, %v8654_v0  ;;  %v13813_v21 = vpop.f32.mrf.mxu1  ;;  %v2073_v45 = vpop.f32.mrf.mxu0  ;;  %v8622_v46 = vld [vmem:[%s17277_s1 + $0xa08] sm:$0xf]  ;;  %v11027_v1 = vld [vmem:[%s17277_s1 + $0xb34] sm:$0xf0] }
 0x14c   :  { %3224 = vmatpush.bf16.msra.mxu3 %v8863_v9  ;;  %v10943_v9 = vld [vmem:[%s17277_s1 + $0x894] sm:$0xf0]  ;;  %v8542_v12 = vld [vmem:[%s17277_s1 + $0x968] sm:$0xf] }
 0x14d   :  { %3176 = vmatmul.bf16.vlgmr.msrb.gmra.mxu3 %v13527_v50  ;;  %v8766_v0 = vld [vmem:[%s17277_s1 + $0xb28] sm:$0xf] }
 0x14e   :  { %3212 = vmatpush.bf16.msra.mxu2 %v8703_v17  ;;  %3134 = vmatmul.bf16.vlgmr.msrb.gmra.mxu0 %v13538_v57  ;;  %v11035_v17 = vld [vmem:[%s17277_s1 + $0xb74] sm:$0xf0]  ;;  %v8767_v29 = vor.u32 %v11027_v1, %v8766_v0  ;;  %v8848_v0 = vld [vmem:[%s17277_s1 + $0xbd8] sm:$0xf0] }
 0x14f   :  { %3182 = vmatpush.bf16.msra.mxu0 %v8479_v32  ;;  %3147 = vmatpush.bf16.msrb.mxu1 %v8491_v44  ;;  %v8431_v32 = vor.u32 %v10943_v9, %v8430_v6  ;;  %v8799_v40 = vor.u32 %v11035_v17, %v8798_v20  ;;  %v8639_v44 = vor.u32 %v10995_v27, %v8638_v26  ;;  %v8526_v20 = vld [vmem:[%s17277_s1 + $0x948] sm:$0xf]  ;;  %v11013_v17 = vld [vmem:[%s17277_s1 + $0xacc] sm:$0xf]  ;;  %v10967_v27 = vld [vmem:[%s17277_s1 + $0x954] sm:$0xf0] }
 0x150   :  { %3225 = vmatpush.bf16.msra.mxu3 %v8847_v34  ;;  %v10939_v34 = vld [vmem:[%s17277_s1 + $0x874] sm:$0xf0]  ;;  %v8543_v9 = vor.u32 %v10971_v59, %v8542_v12  ;;  %v2115_v26 = vpop.f32.mrf.mxu3  ;;  %v8366_v12 = vld [vmem:[%s17277_s1 + $0x808] sm:$0xf]  ;;  %v10953_v59 = vld [vmem:[%s17277_s1 + $0x8ec] sm:$0xf] }
 0x151   :  { %v8415_v51 = vor.u32 %v10939_v34, %v8414_v39  ;;  %v8750_v39 = vld [vmem:[%s17277_s1 + $0xb08] sm:$0xf]  ;;  %v11023_v34 = vld [vmem:[%s17277_s1 + $0xb14] sm:$0xf0] }
 0x152   :  { %3213 = vmatpush.bf16.msra.mxu2 %v8687_v43  ;;  %3148 = vmatmul.bf16.vlgmr.msrb.gmra.mxu1 %v13572_v15  ;;  %v11031_v43 = vld [vmem:[%s17277_s1 + $0xb54] sm:$0xf0] }
 0x153   :  { %3196 = vmatpush.bf16.msra.mxu1 %v8607_v25  ;;  %3183 = vmatpush.bf16.msra.mxu0 %v8463_v48  ;;  %v10991_v25 = vld [vmem:[%s17277_s1 + $0xa14] sm:$0xf0]  ;;  %v2074_v48 = vadd.f32 %v2073_v45, %v13107_v2  ;;  %v8398_v2 = vld [vmem:[%s17277_s1 + $0x848] sm:$0xf]  ;;  %v8527_v45 = vor.u32 %v10967_v27, %v8526_v20  ;;  %v10985_v20 = vld [vmem:[%s17277_s1 + $0x9ec] sm:$0xf] }
 0x154   :  { %3226 = vmatpush.bf16.msra.mxu3 %v8831_v54  ;;  %v8736_v54 = vld [vmem:[%s17277_s1 + $0xaf8] sm:$0xf0] }
 0x155   :  { %v8739_v5 = vor.u32 %v11017_v53, %v8736_v54  ;;  %v10927_v53 = vld [vmem:[%s17277_s1 + $0x814] sm:$0xf0]  ;;  %v8751_v54 = vor.u32 %v11023_v34, %v8750_v39  ;;  %v11001_v39 = vld [vmem:[%s17277_s1 + $0xa6c] sm:$0xf]  ;;  %v8672_v34 = vld [vmem:[%s17277_s1 + $0xa78] sm:$0xf0] }
 0x156   :  { %3214 = vmatpush.bf16.msra.mxu2 %v8671_v61  ;;  %v8783_v61 = vor.u32 %v11031_v43, %v8782_v42  ;;  %v8864_v42 = vld [vmem:[%s17277_s1 + $0xbf8] sm:$0xf0] }
 0x157   :  { %3197 = vmatpush.bf16.msra.mxu1 %v8591_v3  ;;  %3184 = vmatpush.bf16.msra.mxu0 %v8447_v33  ;;  %v8623_v3 = vor.u32 %v10991_v25, %v8622_v46  ;;  %v2087_v33 = vpop.f32.mrf.mxu1  ;;  %v8510_v25 = vld [vmem:[%s17277_s1 + $0x928] sm:$0xf] }
 0x158   :  { %3227 = vmatpush.bf16.msra.mxu3 %v8815_v13  ;;  %v2088_v6 = vadd.f32 %v2087_v33, %v2074_v48  ;;  %v8399_v13 = vor.u32 %v10935_v60, %v8398_v2  ;;  %v11009_v48 = vld [vmem:[%s17277_s1 + $0xaac] sm:$0xf]  ;;  %v8480_v2 = vld [vmem:[%s17277_s1 + $0x8f8] sm:$0xf0]  ;;  %v8367_v33 = vor.u32 %v10927_v53, %v8366_v12  ;;  %v8675_v12 = vor.u32 %v11001_v39, %v8672_v34  ;;  %v13993_v53 = vpop.f32.mrf.mxu0 }
 0x159   :  { %v11029_v34 = vld [vmem:[%s17277_s1 + $0xb4c] sm:$0xf] }
 0x15a   :  { %3215 = vmatpush.bf16.msra.mxu2 %v8655_v19  ;;  %v8720_v19 = vld [vmem:[%s17277_s1 + $0xad8] sm:$0xf0]  ;;  %v2102_v38 = vadd.f32 %v2101_v4, %v2088_v6  ;;  %v11005_v4 = vld [vmem:[%s17277_s1 + $0xa8c] sm:$0xf]  ;;  %v8494_v6 = vld [vmem:[%s17277_s1 + $0x908] sm:$0xf] }
 0x15b   :  { %3198 = vmatpush.bf16.msra.mxu1 %v8575_v18  ;;  %3185 = vmatpush.bf16.msra.mxu0 %v8431_v32  ;;  %v8382_v18 = vld [vmem:[%s17277_s1 + $0x828] sm:$0xf]  ;;  %v10931_v32 = vld [vmem:[%s17277_s1 + $0x834] sm:$0xf0]  ;;  %v8723_v43 = vor.u32 %v11013_v17, %v8720_v19  ;;  %v8608_v17 = vld [vmem:[%s17277_s1 + $0x9f8] sm:$0xf0] }
 0x15c   :  { %3228 = vmatpush.bf16.msra.mxu3 %v8799_v40  ;;  %v11049_v40 = vld [vmem:[%s17277_s1 + $0xbec] sm:$0xf]  ;;  %v8383_v46 = vor.u32 %v10931_v32, %v8382_v18  ;;  %v8832_v32 = vld [vmem:[%s17277_s1 + $0xbb8] sm:$0xf0] }
 0x15d   :  { %v8867_v60 = vor.u32 %v11049_v40, %v8864_v42  ;;  %v10949_v19 = vld [vmem:[%s17277_s1 + $0x8cc] sm:$0xf]  ;;  %v8611_v40 = vor.u32 %v10985_v20, %v8608_v17  ;;  %v8640_v17 = vld [vmem:[%s17277_s1 + $0xa38] sm:$0xf0] }
 0x15e   :  { %3216 = vmatpush.bf16.msra.mxu2 %v8639_v44  ;;  %v13904_v44 = vadd.f32 %v2115_v26, %v2102_v38  ;;  %v8464_v26 = vld [vmem:[%s17277_s1 + $0x8d8] sm:$0xf0]  ;;  %v11041_v18 = vld [vmem:[%s17277_s1 + $0xbac] sm:$0xf] }
 0x15f   :  { %3199 = vmatpush.bf16.msra.mxu1 %v8559_v49  ;;  %3186 = vmatpush.bf16.msra.mxu0 %v8415_v51  ;;  %v8704_v49 = vld [vmem:[%s17277_s1 + $0xab8] sm:$0xf0]  ;;  %v10963_v51 = vld [vmem:[%s17277_s1 + $0x934] sm:$0xf0]  ;;  %v8467_v42 = vor.u32 %v10949_v19, %v8464_v26  ;;  %v10993_v20 = vld [vmem:[%s17277_s1 + $0xa2c] sm:$0xf] }
 0x160   :  { %3229 = vmatpush.bf16.msra.mxu3 %v8783_v61  ;;  %v11045_v61 = vld [vmem:[%s17277_s1 + $0xbcc] sm:$0xf]  ;;  %v8707_v1 = vor.u32 %v11009_v48, %v8704_v49  ;;  %v8835_v48 = vor.u32 %v11041_v18, %v8832_v32  ;;  %v14033_v18 = vpop.f32.mrf.mxu3  ;;  %v8560_v32 = vld [vmem:[%s17277_s1 + $0x998] sm:$0xf0] }
 0x161   :  { %v8851_v27 = vor.u32 %v11045_v61, %v8848_v0  ;;  %v11037_v49 = vld [vmem:[%s17277_s1 + $0xb8c] sm:$0xf]  ;;  %v8576_v0 = vld [vmem:[%s17277_s1 + $0x9b8] sm:$0xf0] }
 0x162   :  { %3217 = vmatpush.bf16.msra.mxu2 %v8623_v3  ;;  %v8511_v3 = vor.u32 %v10963_v51, %v8510_v25  ;;  %v8448_v25 = vld [vmem:[%s17277_s1 + $0x8b8] sm:$0xf0]  ;;  %v10977_v61 = vld [vmem:[%s17277_s1 + $0x9ac] sm:$0xf] }
 0x163   :  { %3200 = vmatpush.bf16.msra.mxu1 %v8543_v9  ;;  %3187 = vmatpush.bf16.msra.mxu0 %v8399_v13  ;;  %v10959_v9 = vld [vmem:[%s17277_s1 + $0x914] sm:$0xf0]  ;;  %v8483_v13 = vor.u32 %v10953_v59, %v8480_v2  ;;  %v8816_v51 = vld [vmem:[%s17277_s1 + $0xb98] sm:$0xf0]  ;;  %v8579_v19 = vor.u32 %v10977_v61, %v8576_v0 }
 0x164   :  { %3230 = vmatpush.bf16.msra.mxu3 %v8767_v29  ;;  %v8495_v38 = vor.u32 %v10959_v9, %v8494_v6  ;;  %v8656_v59 = vld [vmem:[%s17277_s1 + $0xa58] sm:$0xf0]  ;;  %v14020_v9 = vpop.f32.mrf.mxu1 }
 0x165   :  { %3218 = vmatmul.bf16.vlgmr.msra.gmra.mxu2 %v13456_v47 }
 0x166   :  { %3266 = vmatpush.bf16.msrb.mxu2 %v8739_v5  ;;  %v8688_v5 = vld [vmem:[%s17277_s1 + $0xa98] sm:$0xf0] }
 0x167   :  { %3201 = vmatpush.bf16.msra.mxu1 %v8527_v45  ;;  %3188 = vmatpush.bf16.msra.mxu0 %v8383_v46  ;;  %v8691_v29 = vor.u32 %v11005_v4, %v8688_v5  ;;  %v8592_v45 = vld [vmem:[%s17277_s1 + $0x9d8] sm:$0xf0]  ;;  %v10945_v46 = vld [vmem:[%s17277_s1 + $0x8ac] sm:$0xf] }
 0x168   :  { %3231 = vmatpush.bf16.msra.mxu3 %v8751_v54  ;;  %v10997_v54 = vld [vmem:[%s17277_s1 + $0xa4c] sm:$0xf]  ;;  %v8800_v5 = vld [vmem:[%s17277_s1 + $0xb78] sm:$0xf0] }
 0x169   :  { %v11033_v4 = vld [vmem:[%s17277_s1 + $0xb6c] sm:$0xf]  ;;  %v8659_v6 = vor.u32 %v10997_v54, %v8656_v59 }
 0x16a   :  { %3267 = vmatpush.bf16.msrb.mxu2 %v8723_v43  ;;  %v10981_v43 = vld [vmem:[%s17277_s1 + $0x9cc] sm:$0xf]  ;;  %v8803_v39 = vor.u32 %v11033_v4, %v8800_v5 }
 0x16b   :  { %3202 = vmatpush.bf16.msra.mxu1 %v8511_v3  ;;  %3189 = vmatpush.bf16.msra.mxu0 %v8367_v33  ;;  %v8595_v2 = vor.u32 %v10981_v43, %v8592_v45  ;;  %v8432_v3 = vld [vmem:[%s17277_s1 + $0x898] sm:$0xf0]  ;;  %v8819_v33 = vor.u32 %v11037_v49, %v8816_v51  ;;  %v2129_v43 = vpop.f32.mrf.mxu0  ;;  %v10989_v45 = vld [vmem:[%s17277_s1 + $0xa0c] sm:$0xf] }
 0x16c   :  { %3280 = vmatpush.bf16.msrb.mxu3 %v8867_v60  ;;  %v8451_v60 = vor.u32 %v10945_v46, %v8448_v25  ;;  %v8624_v46 = vld [vmem:[%s17277_s1 + $0xa18] sm:$0xf0]  ;;  %v2130_v25 = vadd.f32 %v2129_v43, %v13226_v22  ;;  %v10969_v51 = vld [vmem:[%s17277_s1 + $0x96c] sm:$0xf] }
 0x16d   :  { %3232 = vmatmul.bf16.vlgmr.msra.gmra.mxu3 %v13527_v50  ;;  %v10933_v54 = vld [vmem:[%s17277_s1 + $0x84c] sm:$0xf]  ;;  %v8400_v22 = vld [vmem:[%s17277_s1 + $0x858] sm:$0xf0]  ;;  %v8627_v61 = vor.u32 %v10989_v45, %v8624_v46 }
 0x16e   :  { %3268 = vmatpush.bf16.msrb.mxu2 %v8707_v1  ;;  %3190 = vmatmul.bf16.vlgmr.msra.gmra.mxu0 %v13538_v57  ;;  %v10941_v1 = vld [vmem:[%s17277_s1 + $0x88c] sm:$0xf]  ;;  %v8403_v4 = vor.u32 %v10933_v54, %v8400_v22  ;;  %v8368_v45 = vld [vmem:[%s17277_s1 + $0x818] sm:$0xf0] }
 0x16f   :  { %3238 = vmatpush.bf16.msrb.mxu0 %v8483_v13  ;;  %3203 = vmatpush.bf16.msra.mxu1 %v8495_v38  ;;  %v14022_v13 = vpop.f32.mrf.mxu2  ;;  %v8435_v26 = vor.u32 %v10941_v1, %v8432_v3  ;;  %v8416_v38 = vld [vmem:[%s17277_s1 + $0x878] sm:$0xf0]  ;;  %v2143_v0 = vpop.f32.mrf.mxu1  ;;  %v10965_v5 = vld [vmem:[%s17277_s1 + $0x94c] sm:$0xf] }
 0x170   :  { %3281 = vmatpush.bf16.msrb.mxu3 %v8851_v27  ;;  %v10973_v27 = vld [vmem:[%s17277_s1 + $0x98c] sm:$0xf]  ;;  %v2144_v3 = vadd.f32 %v2143_v0, %v2130_v25 }
 0x171   :  { %v10925_v43 = vld [vmem:[%s17277_s1 + $0x80c] sm:$0xf] }
 0x172   :  { %3269 = vmatpush.bf16.msrb.mxu2 %v8691_v29  ;;  %3204 = vmatmul.bf16.vlgmr.msra.gmra.mxu1 %v13572_v15  ;;  %v10937_v29 = vld [vmem:[%s17277_s1 + $0x86c] sm:$0xf] }
 0x173   :  { %3252 = vmatpush.bf16.msrb.mxu1 %v8611_v40  ;;  %3239 = vmatpush.bf16.msrb.mxu0 %v8467_v42  ;;  %v8784_v40 = vld [vmem:[%s17277_s1 + $0xb58] sm:$0xf0]  ;;  %v8643_v42 = vor.u32 %v10993_v20, %v8640_v17  ;;  %v8419_v49 = vor.u32 %v10937_v29, %v8416_v38  ;;  %v10929_v17 = vld [vmem:[%s17277_s1 + $0x82c] sm:$0xf] }
 0x174   :  { %3282 = vmatpush.bf16.msrb.mxu3 %v8835_v48  ;;  %v8563_v48 = vor.u32 %v10973_v27, %v8560_v32  ;;  %v8787_v59 = vor.u32 %v11029_v34, %v8784_v40  ;;  %v8528_v20 = vld [vmem:[%s17277_s1 + $0x958] sm:$0xf0]  ;;  %v11021_v32 = vld [vmem:[%s17277_s1 + $0xb0c] sm:$0xf] }
 0x175   :  { %v8752_v29 = vld [vmem:[%s17277_s1 + $0xb18] sm:$0xf0]  ;;  %v10961_v40 = vld [vmem:[%s17277_s1 + $0x92c] sm:$0xf] }
 0x176   :  { %3270 = vmatpush.bf16.msrb.mxu2 %v8675_v12  ;;  %v8544_v12 = vld [vmem:[%s17277_s1 + $0x978] sm:$0xf0]  ;;  %v8755_v46 = vor.u32 %v11021_v32, %v8752_v29 }
 0x177   :  { %3253 = vmatpush.bf16.msrb.mxu1 %v8595_v2  ;;  %3240 = vmatpush.bf16.msrb.mxu0 %v8451_v60  ;;  %v11025_v2 = vld [vmem:[%s17277_s1 + $0xb2c] sm:$0xf]  ;;  %v8768_v60 = vld [vmem:[%s17277_s1 + $0xb38] sm:$0xf0]  ;;  %v2157_v1 = vpop.f32.mrf.mxu2  ;;  %v14119_v54 = vpop.f32.mrf.mxu1 }
 0x178   :  { %3283 = vmatpush.bf16.msrb.mxu3 %v8819_v33  ;;  %v8547_v33 = vor.u32 %v10969_v51, %v8544_v12  ;;  %v2158_v27 = vadd.f32 %v2157_v1, %v2144_v3  ;;  %v8496_v51 = vld [vmem:[%s17277_s1 + $0x918] sm:$0xf0] }
 0x17a   :  { %3271 = vmatpush.bf16.msrb.mxu2 %v8659_v6  ;;  %v2171_v6 = vpop.f32.mrf.mxu3 }
 0x17b   :  { %3254 = vmatpush.bf16.msrb.mxu1 %v8579_v19  ;;  %3241 = vmatpush.bf16.msrb.mxu0 %v8435_v26  ;;  %v8384_v19 = vld [vmem:[%s17277_s1 + $0x838] sm:$0xf0]  ;;  %v8771_v26 = vor.u32 %v11025_v2, %v8768_v60  ;;  %v14093_v38 = vadd.f32 %v2171_v6, %v2158_v27  ;;  %v42_v6 = vld [vmem:[%s17279_s7 + $0x50] sm:$0xff] }
 0x17c   :  { %3284 = vmatpush.bf16.msrb.mxu3 %v8803_v39  ;;  %v8531_v39 = vor.u32 %v10965_v5, %v8528_v20  ;;  %v8387_v34 = vor.u32 %v10929_v17, %v8384_v19  ;;  %v43_v5 = vld [vmem:[%s17279_s7 + $0x58] sm:$0xff]  ;;  %v41_v17 = vld [vmem:[%s17279_s7 + $0x48] sm:$0xff] }
 0x17d   :  { %v39_v27 = vld [vmem:[%s17279_s7 + $0x38] sm:$0xff] }
 0x17e   :  { %3272 = vmatpush.bf16.msrb.mxu2 %v8643_v42  ;;  %v8512_v42 = vld [vmem:[%s17277_s1 + $0x938] sm:$0xf0] }
 0x17f   :  { %3255 = vmatpush.bf16.msrb.mxu1 %v8563_v48  ;;  %3242 = vmatpush.bf16.msrb.mxu0 %v8419_v49  ;;  %v8515_v25 = vor.u32 %v10961_v40, %v8512_v42  ;;  %v8371_v48 = vor.u32 %v10925_v43, %v8368_v45  ;;  %v10957_v49 = vld [vmem:[%s17277_s1 + $0x90c] sm:$0xf]  ;;  %v14121_v22 = vpop.f32.mrf.mxu2  ;;  %v36_v45 = vld [vmem:[%s17279_s7 + $0x20] sm:$0xff] }
 0x180   :  { %3285 = vmatpush.bf16.msrb.mxu3 %v8787_v59  ;;  %v8499_v12 = vor.u32 %v10957_v49, %v8496_v51  ;;  %v37_v40 = vld [vmem:[%s17279_s7 + $0x28] sm:$0xff]  ;;  %v34_v51 = vld [vmem:[%s17279_s7 + $0x10] sm:$0xff] }
 0x182   :  { %3273 = vmatpush.bf16.msrb.mxu2 %v8627_v61  ;;  %v14123_v59 = vpop.f32.mrf.mxu3 }
 0x183   :  { %3256 = vmatpush.bf16.msrb.mxu1 %v8547_v33  ;;  %3243 = vmatpush.bf16.msrb.mxu0 %v8403_v4  ;;  %v46_v33 = vld [vmem:[%s17279_s7 + $0x70] sm:$0xff]  ;;  %v44_v4 = vld [vmem:[%s17279_s7 + $0x60] sm:$0xff] }
 0x184   :  { %3286 = vmatpush.bf16.msrb.mxu3 %v8771_v26  ;;  %v40_v26 = vld [vmem:[%s17279_s7 + $0x40] sm:$0xff] }
 0x185   :  { %3274 = vmatmul.bf16.vlgmr.msrb.gmra.mxu2 %v13456_v47  ;;  %v14116_v47 = vpop.f32.mrf.mxu0 }
 0x187   :  { %3257 = vmatpush.bf16.msrb.mxu1 %v8531_v39  ;;  %3244 = vmatpush.bf16.msrb.mxu0 %v8387_v34  ;;  %v1170_v39 = vadd.f32 %v13005_v62, %v12991_v55  ;;  %v38_v34 = vld [vmem:[%s17279_s7 + $0x30] sm:$0xff]  ;;  %v35_v55 = vld [vmem:[%s17279_s7 + $0x18] sm:$0xff] }
 0x188   :  { %3287 = vmatpush.bf16.msrb.mxu3 %v8755_v46  ;;  %v2213_v0 = vpop.f32.mrf.mxu2 }
 0x189   :  { %v1184_v43 = vadd.f32 %v13007_v63, %v1170_v39 }
 0x18b   :  { %3258 = vmatpush.bf16.msrb.mxu1 %v8515_v25  ;;  %3245 = vmatpush.bf16.msrb.mxu0 %v8371_v48  ;;  %v63_v48 = vld [vmem:[%s17279_s7 + $0xf8] sm:$0xff]  ;;  %v1198_v49 = vadd.f32 %v13028_v10, %v1184_v43  ;;  %v32_v10 = vld [vmem:[%s17279_s7] sm:$0xff] }
 0x18c   :  { %3288 = vmatmul.bf16.vlgmr.msrb.gmra.mxu3 %v13527_v50  ;;  %v47_v50 = vld [vmem:[%s17279_s7 + $0x78] sm:$0xff] }
 0x18d   :  { %v2185_v2 = vpop.f32.mrf.mxu0 }
 0x18e   :  { %3246 = vmatmul.bf16.vlgmr.msrb.gmra.mxu0 %v13538_v57  ;;  %v2186_v60 = vadd.f32 %v2185_v2, %v13483_v7  ;;  %v45_v7 = vld [vmem:[%s17279_s7 + $0x68] sm:$0xff] }
 0x18f   :  { %3259 = vmatpush.bf16.msrb.mxu1 %v8499_v12  ;;  %v2199_v61 = vpop.f32.mrf.mxu1  ;;  %3371 = vmatpush.msra.mxu0 %v47_v50  ;;  %v2020_v12 = vadd.f32 %v13786_v28, %v1198_v49  ;;  %v33_v2 = vld [vmem:[%s17279_s7 + $0x8] sm:$0xff] }
 0x190   :  { %v2200_v57 = vadd.f32 %v2199_v61, %v2186_v60  ;;  %v2227_v1 = vpop.f32.mrf.mxu3  ;;  %v14151_v19 = vpop.f32.mrf.mxu2  ;;  %v61_v28 = vld [vmem:[%s17279_s7 + $0xe8] sm:$0xff] }
 0x191   :  { %3372 = vmatpush.msra.mxu0 %v46_v33  ;;  %v2034_v50 = vadd.f32 %v13813_v21, %v2020_v12 }
 0x192   :  { %3260 = vmatmul.bf16.vlgmr.msrb.gmra.mxu1 %v13572_v15  ;;  %v2214_v3 = vadd.f32 %v2213_v0, %v2200_v57  ;;  %v62_v0 = vld [vmem:[%s17279_s7 + $0xf0] sm:$0xff] }
 0x193   :  { %3373 = vmatpush.msra.mxu0 %v45_v7  ;;  %3391 = vmatpush.msra.mxu1 %v63_v48  ;;  %v2048_v33 = vadd.f32 %v13815_v24, %v2034_v50  ;;  %v58_v24 = vld [vmem:[%s17279_s7 + $0xd0] sm:$0xff] }
 0x194   :  { %v14129_v15 = vadd.f32 %v2227_v1, %v2214_v3  ;;  %v60_v3 = vld [vmem:[%s17279_s7 + $0xe0] sm:$0xff]  ;;  %v54_v48 = vld [vmem:[%s17279_s7 + $0xb0] sm:$0xff] }
 0x195   :  { %3374 = vmatpush.msra.mxu0 %v44_v4  ;;  %v14146_v20 = vpop.f32.mrf.mxu0  ;;  %3392 = vmatpush.msra.mxu1 %v62_v0  ;;  %v2062_v21 = vadd.f32 %v13826_v36, %v2048_v33 }
 0x197   :  { %3375 = vmatpush.msra.mxu0 %v43_v5  ;;  %v14159_v32 = vpop.f32.mrf.mxu1  ;;  %3393 = vmatpush.msra.mxu1 %v61_v28  ;;  %v51_v28 = vld [vmem:[%s17279_s7 + $0x98] sm:$0xff] }
 0x198   :  { %v14161_v29 = vpop.f32.mrf.mxu3 }
 0x199   :  { %3376 = vmatpush.msra.mxu0 %v42_v6  ;;  %v59_v6 = vld [vmem:[%s17279_s7 + $0xd8] sm:$0xff]  ;;  %3394 = vmatpush.msra.mxu1 %v60_v3 }
 0x19b   :  { %3377 = vmatpush.msra.mxu0 %v41_v17  ;;  %3395 = vmatpush.msra.mxu1 %v59_v6 }
 0x19d   :  { %3378 = vmatpush.msra.mxu0 %v40_v26  ;;  %3396 = vmatpush.msra.mxu1 %v58_v24  ;;  %v48_v24 = vld [vmem:[%s17279_s7 + $0x80] sm:$0xff] }
 0x19f   :  { %3379 = vmatpush.msra.mxu0 %v39_v27 }
 0x1a1   :  { %3380 = vmatpush.msra.mxu0 %v38_v34 }
 0x1a3   :  { %3381 = vmatpush.msra.mxu0 %v37_v40 }
 0x1a5   :  { %3382 = vmatpush.msra.mxu0 %v36_v45  ;;  %v56_v45 = vld [vmem:[%s17279_s7 + $0xc0] sm:$0xff] }
 0x1a7   :  { %3383 = vmatpush.msra.mxu0 %v35_v55 }
 0x1a8   :  { %v3107_v46 = vpop.f32.mrf.mxu2 }
 0x1a9   :  { %3384 = vmatpush.msra.mxu0 %v34_v51  ;;  %v53_v51 = vld [vmem:[%s17279_s7 + $0xa8] sm:$0xff] }
 0x1ab   :  { %v3079_v42 = vpop.f32.mrf.mxu0  ;;  %3385 = vmatpush.msra.mxu0 %v33_v2 }
 0x1ad   :  { %3386 = vmatpush.msra.mxu0 %v32_v10 }
 0x1af   :  { %v3093_v62 = vpop.f32.mrf.mxu1 }
 0x1b0   :  { %v3121_v25 = vpop.f32.mrf.mxu3  ;;  %v3094_v63 = vadd.f32 %v3093_v62, %v3079_v42  ;;  %v3109_v1 = vpop.f32.mrf.mxu2 }
 0x1b2   :  { %v3108_v60 = vadd.f32 %v3107_v46, %v3094_v63  ;;  %v55_v46 = vld [vmem:[%s17279_s7 + $0xb8] sm:$0xff] }
 0x1b3   :  { %v3081_v61 = vpop.f32.mrf.mxu0 }
 0x1b4   :  { %v3122_v7 = vadd.f32 %v3121_v25, %v3108_v60  ;;  %v1226_v25 = vadd.f32 %v13127_v16, %v13125_v14  ;;  %v52_v14 = vld [vmem:[%s17279_s7 + $0xa0] sm:$0xff] }
 0x1b6   :  { %v14208_v26 = vadd.f32 %v3122_v7, %v13697_v58  ;;  %v57_v58 = vld [vmem:[%s17279_s7 + $0xc8] sm:$0xff]  ;;  %v50_v7 = vld [vmem:[%s17279_s7 + $0x90] sm:$0xff] }
 0x1b7   :  { %v3095_v57 = vpop.f32.mrf.mxu1  ;;  %3397 = vmatpush.msra.mxu1 %v57_v58 }
 0x1b8   :  { %v3096_v4 = vadd.f32 %v3095_v57, %v3081_v61  ;;  %v3123_v5 = vpop.f32.mrf.mxu3  ;;  %v3330_v34 = vmul.f32 %v14208_v26, %v14208_v26  ;;  %v1240_v61 = vadd.f32 %v13141_v11, %v1226_v25  ;;  %v79_v11 = vld [vmem:[%s17279_s7 + $0x178] sm:$0xff] }
 0x1b9   :  { %3398 = vmatpush.msra.mxu1 %v56_v45  ;;  %3411 = vmatpush.msra.mxu2 %v79_v11 }
 0x1ba   :  { %v3110_v17 = vadd.f32 %v3109_v1, %v3096_v4  ;;  %v1254_v3 = vadd.f32 %v13155_v35, %v1240_v61  ;;  %v72_v61 = vld [vmem:[%s17279_s7 + $0x140] sm:$0xff] }
 0x1bb   :  { %3399 = vmatpush.msra.mxu1 %v55_v46 }
 0x1bc   :  { %v3124_v27 = vadd.f32 %v3123_v5, %v3110_v17  ;;  %v2076_v6 = vadd.f32 %v13993_v53, %v1254_v3  ;;  %v49_v17 = vld [vmem:[%s17279_s7 + $0x88] sm:$0xff] }
 0x1bd   :  { %3400 = vmatpush.msra.mxu1 %v54_v48  ;;  %v77_v53 = vld [vmem:[%s17279_s7 + $0x168] sm:$0xff] }
 0x1be   :  { %v14210_v39 = vadd.f32 %v3124_v27, %v2062_v21 }
 0x1bf   :  { %3401 = vmatpush.msra.mxu1 %v53_v51 }
 0x1c0   :  { %v3302_v40 = vadd.f32 %v14210_v39, %v14208_v26  ;;  %v3334_v36 = vmul.f32 %v14210_v39, %v14210_v39 }
 0x1c1   :  { %3402 = vmatpush.msra.mxu1 %v52_v14  ;;  %v71_v14 = vld [vmem:[%s17279_s7 + $0x138] sm:$0xff] }
 0x1c2   :  { %v3303_v42 = vrot.slane %v3302_v40, 4  ;;  %v3338_v43 = vadd.f32 %v3334_v36, %v3330_v34  ;;  %v78_v34 = vld [vmem:[%s17279_s7 + $0x170] sm:$0xff] }
 0x1c3   :  { %3403 = vmatpush.msra.mxu1 %v51_v28  ;;  %3412 = vmatpush.msra.mxu2 %v78_v34  ;;  %v70_v28 = vld [vmem:[%s17279_s7 + $0x130] sm:$0xff] }
 0x1c4   :  { %v3304_v55 = vadd.f32 %v3303_v42, %v3302_v40  ;;  %v3339_v62 = vrot.slane %v3338_v43, 4  ;;  %v2090_v40 = vadd.f32 %v14020_v9, %v2076_v6  ;;  %v76_v42 = vld [vmem:[%s17279_s7 + $0x160] sm:$0xff]  ;;  %v67_v6 = vld [vmem:[%s17279_s7 + $0x118] sm:$0xff] }
 0x1c5   :  { %3404 = vmatpush.msra.mxu1 %v50_v7  ;;  %3413 = vmatpush.msra.mxu2 %v77_v53 }
 0x1c6   :  { %v3305_v49 = vrot.slane %v3304_v55, 2  ;;  %v3340_v63 = vadd.f32 %v3339_v62, %v3338_v43  ;;  %v2104_v43 = vadd.f32 %v14022_v13, %v2090_v40  ;;  %v75_v62 = vld [vmem:[%s17279_s7 + $0x158] sm:$0xff]  ;;  %v74_v13 = vld [vmem:[%s17279_s7 + $0x150] sm:$0xff] }
 0x1c7   :  { %3405 = vmatpush.msra.mxu1 %v49_v17  ;;  %3414 = vmatpush.msra.mxu2 %v76_v42  ;;  %v65_v42 = vld [vmem:[%s17279_s7 + $0x108] sm:$0xff] }
 0x1c8   :  { %v3306_v2 = vadd.f32 %v3305_v49, %v3304_v55  ;;  %v3341_v60 = vrot.slane %v3340_v63, 2  ;;  %v3163_v16 = vpop.f32.mrf.mxu2  ;;  %v2118_v9 = vadd.f32 %v14033_v18, %v2104_v43  ;;  %v95_v43 = vld [vmem:[%s17279_s7 + $0x1f8] sm:$0xff] }
 0x1c9   :  { %3406 = vmatpush.msra.mxu1 %v48_v24  ;;  %3415 = vmatpush.msra.mxu2 %v75_v62 }
 0x1ca   :  { %v3307_v10 = vrot.slane %v3306_v2, 1  ;;  %v3342_v0 = vadd.f32 %v3341_v60, %v3340_v63  ;;  %3431 = vmatpush.msra.mxu3 %v95_v43 }
 0x1cb   :  { %v3135_v12 = vpop.f32.mrf.mxu0  ;;  %3416 = vmatpush.msra.mxu2 %v74_v13 }
 0x1cc   :  { %v3343_v1 = vrot.slane %v3342_v0, 1  ;;  %v3308_v4 = vadd.f32 %v3307_v10, %v3306_v2 }
 0x1ce   :  { %v3344_v5 = vadd.f32 %v3343_v1, %v3342_v0  ;;  %v1282_v0 = vadd.f32 %v13339_v31, %v13337_v30  ;;  %v69_v1 = vld [vmem:[%s17279_s7 + $0x128] sm:$0xff]  ;;  %v68_v31 = vld [vmem:[%s17279_s7 + $0x120] sm:$0xff] }
 0x1cf   :  { %v3149_v50 = vpop.f32.mrf.mxu1 }
 0x1d0   :  { %v3177_v57 = vpop.f32.mrf.mxu3  ;;  %v3150_v33 = vadd.f32 %v3149_v50, %v3135_v12  ;;  %v3367_v21 = vsel %vm3366_vm2, %v3308_v4, %v3344_v5  ;;  %v3165_v58 = vpop.f32.mrf.mxu2  ;;  %v1296_v7 = vadd.f32 %v13347_v41, %v1282_v0  ;;  %v66_v41 = vld [vmem:[%s17279_s7 + $0x110] sm:$0xff] }
 0x1d1   :  { %3387 = vmatmul.f32.vlgmr.msra.gmra.mxu0 %v3367_v21 }
 0x1d2   :  { %v3164_v35 = vadd.f32 %v3163_v16, %v3150_v33 }
 0x1d3   :  { %v3137_v27 = vpop.f32.mrf.mxu0 }
 0x1d4   :  { %v3178_v45 = vadd.f32 %v3177_v57, %v3164_v35 }
 0x1d6   :  { %v14276_v48 = vadd.f32 %v3178_v45, %v13904_v44  ;;  %v73_v44 = vld [vmem:[%s17279_s7 + $0x148] sm:$0xff]  ;;  %v64_v45 = vld [vmem:[%s17279_s7 + $0x100] sm:$0xff] }
 0x1d7   :  { %v3151_v36 = vpop.f32.mrf.mxu1  ;;  %3417 = vmatpush.msra.mxu2 %v73_v44 }
 0x1d8   :  { %v3152_v46 = vadd.f32 %v3151_v36, %v3137_v27  ;;  %v3179_v55 = vpop.f32.mrf.mxu3  ;;  %v3331_v51 = vmul.f32 %v14276_v48, %v14276_v48  ;;  %v1310_v27 = vadd.f32 %v13371_v52, %v1296_v7 }
 0x1d9   :  { %3418 = vmatpush.msra.mxu2 %v72_v61  ;;  %v90_v61 = vld [vmem:[%s17279_s7 + $0x1d0] sm:$0xff] }
 0x1da   :  { %v3166_v25 = vadd.f32 %v3165_v58, %v3152_v46  ;;  %v2132_v40 = vadd.f32 %v14116_v47, %v1310_v27  ;;  %v94_v47 = vld [vmem:[%s17279_s7 + $0x1f0] sm:$0xff] }
 0x1db   :  { %3419 = vmatpush.msra.mxu2 %v71_v14  ;;  %3432 = vmatpush.msra.mxu3 %v94_v47 }
 0x1dc   :  { %v3180_v49 = vadd.f32 %v3179_v55, %v3166_v25  ;;  %v2146_v46 = vadd.f32 %v14119_v54, %v2132_v40  ;;  %v93_v25 = vld [vmem:[%s17279_s7 + $0x1e8] sm:$0xff] }
 0x1dd   :  { %3420 = vmatpush.msra.mxu2 %v70_v28  ;;  %3433 = vmatpush.msra.mxu3 %v93_v25  ;;  %v88_v28 = vld [vmem:[%s17279_s7 + $0x1c0] sm:$0xff] }
 0x1de   :  { %v14278_v63 = vadd.f32 %v3180_v49, %v2118_v9  ;;  %v2160_v9 = vadd.f32 %v14121_v22, %v2146_v46  ;;  %v91_v22 = vld [vmem:[%s17279_s7 + $0x1d8] sm:$0xff] }
 0x1df   :  { %3421 = vmatpush.msra.mxu2 %v69_v1 }
 0x1e0   :  { %v3309_v12 = vadd.f32 %v14278_v63, %v14276_v48  ;;  %v3335_v18 = vmul.f32 %v14278_v63, %v14278_v63  ;;  %v2174_v54 = vadd.f32 %v14123_v59, %v2160_v9 }
 0x1e1   :  { %3422 = vmatpush.msra.mxu2 %v68_v31 }
 0x1e2   :  { %v3310_v2 = vrot.slane %v3309_v12, 4  ;;  %v3345_v60 = vadd.f32 %v3335_v18, %v3331_v51 }
 0x1e3   :  { %3423 = vmatpush.msra.mxu2 %v67_v6 }
 0x1e4   :  { %v3311_v16 = vadd.f32 %v3310_v2, %v3309_v12  ;;  %v3346_v10 = vrot.slane %v3345_v60, 4  ;;  %v92_v12 = vld [vmem:[%s17279_s7 + $0x1e0] sm:$0xff] }
 0x1e5   :  { %3424 = vmatpush.msra.mxu2 %v66_v41  ;;  %3434 = vmatpush.msra.mxu3 %v92_v12 }
 0x1e6   :  { %v3312_v50 = vrot.slane %v3311_v16, 2  ;;  %v3347_v57 = vadd.f32 %v3346_v10, %v3345_v60 }
 0x1e7   :  { %3425 = vmatpush.msra.mxu2 %v65_v42  ;;  %3435 = vmatpush.msra.mxu3 %v91_v22  ;;  %v81_v42 = vld [vmem:[%s17279_s7 + $0x188] sm:$0xff] }
 0x1e8   :  { %v3313_v3 = vadd.f32 %v3312_v50, %v3311_v16  ;;  %v3348_v33 = vrot.slane %v3347_v57, 2  ;;  %v3219_v4 = vpop.f32.mrf.mxu2  ;;  %v89_v16 = vld [vmem:[%s17279_s7 + $0x1c8] sm:$0xff]  ;;  %v87_v50 = vld [vmem:[%s17279_s7 + $0x1b8] sm:$0xff] }
 0x1e9   :  { %3426 = vmatpush.msra.mxu2 %v64_v45  ;;  %3436 = vmatpush.msra.mxu3 %v90_v61 }
 0x1ea   :  { %v3314_v5 = vrot.slane %v3313_v3, 1  ;;  %v3349_v30 = vadd.f32 %v3348_v33, %v3347_v57 }
 0x1eb   :  { %v3191_v11 = vpop.f32.mrf.mxu0  ;;  %3437 = vmatpush.msra.mxu3 %v89_v16 }
 0x1ec   :  { %v3350_v35 = vrot.slane %v3349_v30, 1  ;;  %v3315_v34 = vadd.f32 %v3314_v5, %v3313_v3  ;;  %v86_v3 = vld [vmem:[%s17279_s7 + $0x1b0] sm:$0xff] }
 0x1ed   :  { %3438 = vmatpush.msra.mxu3 %v88_v28 }
 0x1ee   :  { %v3351_v53 = vadd.f32 %v3350_v35, %v3349_v30  ;;  %v83_v35 = vld [vmem:[%s17279_s7 + $0x198] sm:$0xff] }
 0x1ef   :  { %v3205_v17 = vpop.f32.mrf.mxu1  ;;  %3439 = vmatpush.msra.mxu3 %v87_v50 }
 0x1f0   :  { %v3233_v21 = vpop.f32.mrf.mxu3  ;;  %v3206_v24 = vadd.f32 %v3205_v17, %v3191_v11  ;;  %v3368_v36 = vsel %vm3366_vm2, %v3315_v34, %v3351_v53  ;;  %v3221_v62 = vpop.f32.mrf.mxu2  ;;  %v1338_v11 = vadd.f32 %v13589_v37, %v13558_v8  ;;  %v84_v8 = vld [vmem:[%s17279_s7 + $0x1a0] sm:$0xff] }
 0x1f1   :  { %3407 = vmatmul.f32.vlgmr.msra.gmra.mxu1 %v3368_v36  ;;  %3440 = vmatpush.msra.mxu3 %v86_v3 }
 0x1f2   :  { %v3220_v58 = vadd.f32 %v3219_v4, %v3206_v24  ;;  %v85_v4 = vld [vmem:[%s17279_s7 + $0x1a8] sm:$0xff]  ;;  %v1352_v6 = vadd.f32 %v13594_v23, %v1338_v11  ;;  %v82_v23 = vld [vmem:[%s17279_s7 + $0x190] sm:$0xff] }
 0x1f3   :  { %v3193_v52 = vpop.f32.mrf.mxu0  ;;  %3441 = vmatpush.msra.mxu3 %v85_v4 }
 0x1f4   :  { %v3234_v49 = vadd.f32 %v3233_v21, %v3220_v58  ;;  %v1366_v41 = vadd.f32 %v13610_v56, %v1352_v6  ;;  %v80_v56 = vld [vmem:[%s17279_s7 + $0x180] sm:$0xff] }
 0x1f5   :  { %3442 = vmatpush.msra.mxu3 %v84_v8 }
 0x1f6   :  { %v14341_v44 = vadd.f32 %v3234_v49, %v14093_v38  ;;  %v2188_v58 = vadd.f32 %v14146_v20, %v1366_v41  ;;  %v11210_v41 = vld [vmem:[%s17281_s2 + $0x4ec] sm:$0xf0] }
 0x1f7   :  { %v3207_v55 = vpop.f32.mrf.mxu1  ;;  %3443 = vmatpush.msra.mxu3 %v83_v35  ;;  %v98_v35 = vld [vmem:[%s17280_s8 + $0x10] sm:$0xff] }
 0x1f8   :  { %v3208_v13 = vadd.f32 %v3207_v55, %v3193_v52  ;;  %v3235_v51 = vpop.f32.mrf.mxu3  ;;  %v3332_v14 = vmul.f32 %v14341_v44, %v14341_v44  ;;  %v2202_v47 = vadd.f32 %v14159_v32, %v2188_v58  ;;  %3539 = vmatpush.msrb.mxu2 %v98_v35  ;;  %v9450_v35 = vld [vmem:[%s17281_s2 + $0x780] sm:$0xf] }
 0x1f9   :  { %3444 = vmatpush.msra.mxu3 %v82_v23 }
 0x1fa   :  { %v3222_v18 = vadd.f32 %v3221_v62, %v3208_v13  ;;  %v2216_v20 = vadd.f32 %v14151_v19, %v2202_v47 }
 0x1fb   :  { %3445 = vmatpush.msra.mxu3 %v81_v42 }
 0x1fc   :  { %v3236_v2 = vadd.f32 %v3235_v51, %v3222_v18  ;;  %v2230_v13 = vadd.f32 %v14161_v29, %v2216_v20  ;;  %v11306_v20 = vld [vmem:[%s17281_s2 + $0x7ec] sm:$0xf0] }
 0x1fd   :  { %3446 = vmatpush.msra.mxu3 %v80_v56  ;;  %v9370_v56 = vld [vmem:[%s17281_s2 + $0x6e0] sm:$0xf] }
 0x1fe   :  { %v14346_v60 = vadd.f32 %v3236_v2, %v2174_v54 }
 0x200   :  { %v3316_v38 = vadd.f32 %v14346_v60, %v14341_v44  ;;  %v3336_v59 = vmul.f32 %v14346_v60, %v14346_v60 }
 0x202   :  { %v3317_v10 = vrot.slane %v3316_v38, 4  ;;  %v3352_v0 = vadd.f32 %v3336_v59, %v3332_v14 }
 0x204   :  { %v3318_v57 = vadd.f32 %v3317_v10, %v3316_v38  ;;  %v3353_v1 = vrot.slane %v3352_v0, 4 }
 0x206   :  { %v3319_v33 = vrot.slane %v3318_v57, 2  ;;  %v3354_v7 = vadd.f32 %v3353_v1, %v3352_v0 }
 0x208   :  { %v3320_v30 = vadd.f32 %v3319_v33, %v3318_v57  ;;  %v3355_v31 = vrot.slane %v3354_v7, 2  ;;  %v3275_v37 = vpop.f32.mrf.mxu2 }
 0x20a   :  { %v3321_v17 = vrot.slane %v3320_v30, 1  ;;  %v3356_v21 = vadd.f32 %v3355_v31, %v3354_v7 }
 0x20b   :  { %v3247_v5 = vpop.f32.mrf.mxu0 }
 0x20c   :  { %v3357_v24 = vrot.slane %v3356_v21, 1  ;;  %v3322_v40 = vadd.f32 %v3321_v17, %v3320_v30  ;;  %v96_v17 = vld [vmem:[%s17280_s8] sm:$0xff] }
 0x20d   :  { %3499 = vmatpush.msrb.mxu0 %v96_v17 }
 0x20e   :  { %v3358_v36 = vadd.f32 %v3357_v24, %v3356_v21  ;;  %v97_v21 = vld [vmem:[%s17280_s8 + $0x8] sm:$0xff]  ;;  %v9114_v24 = vld [vmem:[%s17281_s2 + $0x4e0] sm:$0xf] }
 0x20f   :  { %v3261_v27 = vpop.f32.mrf.mxu1  ;;  %v3289_v53 = vpop.f32.mrf.mxu3  ;;  %3519 = vmatpush.msrb.mxu1 %v97_v21  ;;  %v9115_v23 = vor.u32 %v11210_v41, %v9114_v24  ;;  %v11262_v21 = vld [vmem:[%s17281_s2 + $0x68c] sm:$0xf0]  ;;  %v9178_v41 = vld [vmem:[%s17281_s2 + $0x560] sm:$0xf] }
 0x210   :  { %v3262_v34 = vadd.f32 %v3261_v27, %v3247_v5  ;;  %v3369_v52 = vsel %vm3366_vm2, %v3322_v40, %v3358_v36  ;;  %v3277_v55 = vpop.f32.mrf.mxu2  ;;  %v99_v27 = vld [vmem:[%s17280_s8 + $0x18] sm:$0xff]  ;;  %v9098_v40 = vld [vmem:[%s17281_s2 + $0x4c0] sm:$0xf]  ;;  %v11206_v36 = vld [vmem:[%s17281_s2 + $0x4cc] sm:$0xf0] }
 0x211   :  { %3427 = vmatmul.f32.vlgmr.msra.gmra.mxu2 %v3369_v52  ;;  %3559 = vmatpush.msrb.mxu3 %v99_v27  ;;  %v9226_v52 = vld [vmem:[%s17281_s2 + $0x5c0] sm:$0xf]  ;;  %v9099_v47 = vor.u32 %v11206_v36, %v9098_v40  ;;  %v11294_v27 = vld [vmem:[%s17281_s2 + $0x78c] sm:$0xf0] }
 0x212   :  { %v3276_v43 = vadd.f32 %v3275_v37, %v3262_v34  ;;  %v9242_v34 = vld [vmem:[%s17281_s2 + $0x5e0] sm:$0xf]  ;;  %4615 = vmatpush.bf16.msra.mxu0 %v9115_v23 }
 0x213   :  { %v3249_v45 = vpop.f32.mrf.mxu0  ;;  %v9306_v40 = vld [vmem:[%s17281_s2 + $0x660] sm:$0xf] }
 0x214   :  { %v3290_v62 = vadd.f32 %v3289_v53, %v3276_v43  ;;  %v11242_v53 = vld [vmem:[%s17281_s2 + $0x5ec] sm:$0xf0] }
 0x215   :  { %v9243_v42 = vor.u32 %v11242_v53, %v9242_v34  ;;  %v11238_v43 = vld [vmem:[%s17281_s2 + $0x5cc] sm:$0xf0]  ;;  %v9451_v53 = vor.u32 %v11294_v27, %v9450_v35 }
 0x216   :  { %v14397_v51 = vadd.f32 %v3290_v62, %v14129_v15  ;;  %v9227_v62 = vor.u32 %v11238_v43, %v9226_v52  ;;  %4616 = vmatpush.bf16.msra.mxu0 %v9099_v47  ;;  %v11226_v34 = vld [vmem:[%s17281_s2 + $0x56c] sm:$0xf0]  ;;  %v9162_v47 = vld [vmem:[%s17281_s2 + $0x540] sm:$0xf] }
 0x217   :  { %v3263_v46 = vpop.f32.mrf.mxu1  ;;  %v3291_v49 = vpop.f32.mrf.mxu3  ;;  %4629 = vmatpush.bf16.msra.mxu1 %v9243_v42  ;;  %v9434_v42 = vld [vmem:[%s17281_s2 + $0x760] sm:$0xf]  ;;  %v11290_v52 = vld [vmem:[%s17281_s2 + $0x76c] sm:$0xf0]  ;;  %v9179_v43 = vor.u32 %v11226_v34, %v9178_v41  ;;  %v11204_v41 = vld [vmem:[%s17281_s2 + $0x4c4] sm:$0xf] }
 0x218   :  { %v3264_v25 = vadd.f32 %v3263_v46, %v3249_v45  ;;  %v3333_v32 = vmul.f32 %v14397_v51, %v14397_v51  ;;  %v11274_v46 = vld [vmem:[%s17281_s2 + $0x6ec] sm:$0xf0]  ;;  %v9100_v34 = vld [vmem:[%s17281_s2 + $0x4d0] sm:$0xf0] }
 0x21a   :  { %v3278_v9 = vadd.f32 %v3277_v55, %v3264_v25  ;;  %v9498_v55 = vld [vmem:[%s17281_s2 + $0x7e0] sm:$0xf]  ;;  %v9371_v25 = vor.u32 %v11274_v46, %v9370_v56  ;;  %v11222_v46 = vld [vmem:[%s17281_s2 + $0x54c] sm:$0xf0] }
 0x21b   :  { %4630 = vmatpush.bf16.msra.mxu1 %v9227_v62  ;;  %v9034_v56 = vld [vmem:[%s17281_s2 + $0x440] sm:$0xf]  ;;  %v9435_v62 = vor.u32 %v11290_v52, %v9434_v42  ;;  %v11246_v42 = vld [vmem:[%s17281_s2 + $0x60c] sm:$0xf0] }
 0x21c   :  { %v3292_v12 = vadd.f32 %v3291_v49, %v3278_v9  ;;  %v9499_v9 = vor.u32 %v11306_v20, %v9498_v55  ;;  %v9082_v49 = vld [vmem:[%s17281_s2 + $0x4a0] sm:$0xf]  ;;  %4643 = vmatpush.bf16.msra.mxu2 %v9371_v25 }
 0x21d   :  { %v124_v55 = vld [vmem:[%s17282_s3] sm:$0x1] }
 0x21e   :  { %v14399_v18 = vadd.f32 %v3292_v12, %v2230_v13  ;;  %v11202_v13 = vld [vmem:[%s17281_s2 + $0x4ac] sm:$0xf0]  ;;  %v9290_v25 = vld [vmem:[%s17281_s2 + $0x640] sm:$0xf] }
 0x21f   :  { %v9386_v52 = vld [vmem:[%s17281_s2 + $0x700] sm:$0xf] }
 0x220   :  { %v3323_v54 = vadd.f32 %v14399_v18, %v14397_v51  ;;  %v3337_v19 = vmul.f32 %v14399_v18, %v14399_v18 }
 0x222   :  { %v3324_v2 = vrot.slane %v3323_v54, 4  ;;  %v3359_v22 = vadd.f32 %v3337_v19, %v3333_v32  ;;  %v9210_v32 = vld [vmem:[%s17281_s2 + $0x5a0] sm:$0xf] }
 0x223   :  { %v9354_v19 = vld [vmem:[%s17281_s2 + $0x6c0] sm:$0xf] }
 0x224   :  { %v3325_v61 = vadd.f32 %v3324_v2, %v3323_v54  ;;  %v3360_v14 = vrot.slane %v3359_v22, 4  ;;  %v11234_v54 = vld [vmem:[%s17281_s2 + $0x5ac] sm:$0xf0] }
 0x225   :  { %v11270_v2 = vld [vmem:[%s17281_s2 + $0x6cc] sm:$0xf0] }
 0x226   :  { %v3326_v29 = vrot.slane %v3325_v61, 2  ;;  %v3361_v38 = vadd.f32 %v3360_v14, %v3359_v22  ;;  %v9482_v22 = vld [vmem:[%s17281_s2 + $0x7c0] sm:$0xf] }
 0x228   :  { %v3327_v15 = vadd.f32 %v3326_v29, %v3325_v61  ;;  %v3362_v59 = vrot.slane %v3361_v38, 2  ;;  %v11302_v61 = vld [vmem:[%s17281_s2 + $0x7cc] sm:$0xf0]  ;;  %v9083_v29 = vor.u32 %v11202_v13, %v9082_v49  ;;  %v9418_v13 = vld [vmem:[%s17281_s2 + $0x740] sm:$0xf] }
 0x229   :  { %v11254_v49 = vld [vmem:[%s17281_s2 + $0x64c] sm:$0xf0] }
 0x22a   :  { %v3328_v16 = vrot.slane %v3327_v15, 1  ;;  %v3363_v10 = vadd.f32 %v3362_v59, %v3361_v38  ;;  %v9355_v38 = vor.u32 %v11270_v2, %v9354_v19  ;;  %v9066_v59 = vld [vmem:[%s17281_s2 + $0x480] sm:$0xf]  ;;  %4617 = vmatpush.bf16.msra.mxu0 %v9083_v29  ;;  %v11186_v19 = vld [vmem:[%s17281_s2 + $0x42c] sm:$0xf0] }
 0x22c   :  { %v3364_v0 = vrot.slane %v3363_v10, 1  ;;  %v3329_v28 = vadd.f32 %v3328_v16, %v3327_v15  ;;  %v9483_v15 = vor.u32 %v11302_v61, %v9482_v22  ;;  %v11198_v16 = vld [vmem:[%s17281_s2 + $0x48c] sm:$0xf0]  ;;  %4644 = vmatpush.bf16.msra.mxu2 %v9355_v38  ;;  %v9146_v22 = vld [vmem:[%s17281_s2 + $0x520] sm:$0xf]  ;;  %v9291_v38 = vor.u32 %v11254_v49, %v9290_v25 }
 0x22d   :  { %v11218_v61 = vld [vmem:[%s17281_s2 + $0x52c] sm:$0xf0]  ;;  %v9084_v49 = vld [vmem:[%s17281_s2 + $0x4b0] sm:$0xf0] }
 0x22e   :  { %v3365_v50 = vadd.f32 %v3364_v0, %v3363_v10  ;;  %v9211_v10 = vor.u32 %v11234_v54, %v9210_v32  ;;  %v9194_v0 = vld [vmem:[%s17281_s2 + $0x580] sm:$0xf]  ;;  %v9163_v32 = vor.u32 %v11222_v46, %v9162_v47  ;;  %v9372_v47 = vld [vmem:[%s17281_s2 + $0x6f0] sm:$0xf0] }
 0x22f   :  { %v9018_v54 = vld [vmem:[%s17281_s2 + $0x420] sm:$0xf] }
 0x230   :  { %v3370_v57 = vsel %vm3366_vm2, %v3329_v28, %v3365_v50  ;;  %v11230_v28 = vld [vmem:[%s17281_s2 + $0x58c] sm:$0xf0]  ;;  %v9338_v50 = vld [vmem:[%s17281_s2 + $0x6a0] sm:$0xf]  ;;  %4631 = vmatpush.bf16.msra.mxu1 %v9211_v10 }
 0x231   :  { %3447 = vmatmul.f32.vlgmr.msra.gmra.mxu3 %v3370_v57  ;;  %v9195_v17 = vor.u32 %v11230_v28, %v9194_v0  ;;  %v11250_v10 = vld [vmem:[%s17281_s2 + $0x62c] sm:$0xf0]  ;;  %v9402_v0 = vld [vmem:[%s17281_s2 + $0x720] sm:$0xf] }
 0x232   :  { %4657 = vmatpush.bf16.msra.mxu3 %v9499_v9  ;;  %v11282_v28 = vld [vmem:[%s17281_s2 + $0x72c] sm:$0xf0] }
 0x234   :  { %4632 = vmatpush.bf16.msra.mxu1 %v9195_v17 }
 0x236   :  { %4658 = vmatpush.bf16.msra.mxu3 %v9483_v15 }
 0x238   :  { %4633 = vmatpush.bf16.msra.mxu1 %v9179_v43 }
 0x23c   :  { %4634 = vmatpush.bf16.msra.mxu1 %v9163_v32  ;;  %v9212_v32 = vld [vmem:[%s17281_s2 + $0x5b0] sm:$0xf0] }
 0x24e   :  { %v3388_v11 = vpop.f32.mrf.mxu0 }
 0x26e   :  { %v3408_v1 = vpop.f32.mrf.mxu1 }
 0x26f   :  { %v3409_v33 = vadd.f32 %v3408_v1, %v3388_v11  ;;  %v11266_v1 = vld [vmem:[%s17281_s2 + $0x6ac] sm:$0xf0]  ;;  %v9466_v11 = vld [vmem:[%s17281_s2 + $0x7a0] sm:$0xf] }
 0x294   :  { %v3428_v3 = vpop.f32.mrf.mxu2 }
 0x295   :  { %v3429_v7 = vadd.f32 %v3428_v3, %v3409_v33  ;;  %v9339_v33 = vor.u32 %v11266_v1, %v9338_v50  ;;  %v9002_v1 = vld [vmem:[%s17281_s2 + $0x400] sm:$0xf] }
 0x297   :  { %4645 = vmatpush.bf16.msra.mxu2 %v9339_v33  ;;  %v9130_v33 = vld [vmem:[%s17281_s2 + $0x500] sm:$0xf] }
 0x2b4   :  { %v3448_v4 = vpop.f32.mrf.mxu3 }
 0x2b5   :  { %v3449_v5 = vadd.f32 %v3448_v4, %v3429_v7  ;;  %v11298_v7 = vld [vmem:[%s17281_s2 + $0x7ac] sm:$0xf0] }
 0x2b7   :  { %v14408_v30 = vmul.f32 0.0009765625, %v3449_v5  ;;  %v9067_v5 = vor.u32 %v11198_v16, %v9066_v59  ;;  %v9274_v59 = vld [vmem:[%s17281_s2 + $0x620] sm:$0xf]  ;;  %v9019_v16 = vor.u32 %v11186_v19, %v9018_v54  ;;  %v11268_v19 = vld [vmem:[%s17281_s2 + $0x6c4] sm:$0xf] }
 0x2b9   :  { %v3452_v31 = vmul.f32 %v14408_v30, %v14408_v30  ;;  %4618 = vmatpush.bf16.msra.mxu0 %v9067_v5  ;;  %v9403_v5 = vor.u32 %v11282_v28, %v9402_v0  ;;  %v11264_v28 = vld [vmem:[%s17281_s2 + $0x6a4] sm:$0xf] }
 0x2bb   :  { %v3454_v6 = vrot.slane %v3452_v31, 7  ;;  %v9467_v31 = vor.u32 %v11298_v7, %v9466_v11  ;;  %v11182_v11 = vld [vmem:[%s17281_s2 + $0x40c] sm:$0xf0]  ;;  %v11208_v7 = vld [vmem:[%s17281_s2 + $0x4e4] sm:$0xf] }
 0x2bc   :  { %v9003_v17 = vor.u32 %v11182_v11, %v9002_v1  ;;  %v9468_v11 = vld [vmem:[%s17281_s2 + $0x7b0] sm:$0xf0] }
 0x2bd   :  { %v3456_v8 = vsub.f32 %v14408_v30, %v3454_v6  ;;  %v9050_v6 = vld [vmem:[%s17281_s2 + $0x460] sm:$0xf]  ;;  %4659 = vmatpush.bf16.msra.mxu3 %v9467_v31  ;;  %v9116_v31 = vld [vmem:[%s17281_s2 + $0x4f0] sm:$0xf0] }
 0x2be   :  { %v9119_v27 = vor.u32 %v11208_v7, %v9116_v31  ;;  %v11224_v7 = vld [vmem:[%s17281_s2 + $0x564] sm:$0xf] }
 0x2bf   :  { %v3457_v37 = vadd.f32 1e-05, %v3456_v8  ;;  %v11194_v8 = vld [vmem:[%s17281_s2 + $0x46c] sm:$0xf0] }
 0x2c0   :  { %v9051_v36 = vor.u32 %v11194_v8, %v9050_v6  ;;  %v11240_v6 = vld [vmem:[%s17281_s2 + $0x5e4] sm:$0xf]  ;;  %v9244_v8 = vld [vmem:[%s17281_s2 + $0x5f0] sm:$0xf0] }
 0x2c1   :  { %11437 = vrsqrt.f32 %v3457_v37  ;;  %vm3464_vm4 = vweird.f32 %v3457_v37  ;;  %4660 = vmatpush.bf16.msra.mxu3 %v9451_v53  ;;  %v9228_v53 = vld [vmem:[%s17281_s2 + $0x5d0] sm:$0xf0] }
 0x2c2   :  { %4619 = vmatpush.bf16.msra.mxu0 %v9051_v36 }
 0x2c5   :  { %4661 = vmatpush.bf16.msra.mxu3 %v9435_v62  ;;  %v9500_v62 = vld [vmem:[%s17281_s2 + $0x7f0] sm:$0xf0] }
 0x2c7   :  { %v14443_v58 = vpop.eup %11437 }
 0x2c8   :  { %v3459_v45 = vmul.f32 %v14443_v58, %v3457_v37  ;;  %vm3465_vm3 = vweird.f32 %v14443_v58  ;;  %v9322_v37 = vld [vmem:[%s17281_s2 + $0x680] sm:$0xf] }
 0x2c9   :  { %vm14513_vm5 = vmor %vm3464_vm4, %vm3465_vm3  ;;  %v9323_v23 = vor.u32 %v11262_v21, %v9322_v37 }
 0x2ca   :  { %v3460_v12 = vmul.f32 %v14443_v58, %v3459_v45  ;;  %v11190_v45 = vld [vmem:[%s17281_s2 + $0x44c] sm:$0xf0] }
 0x2cb   :  { %4646 = vmatpush.bf16.msra.mxu2 %v9323_v23  ;;  %v9035_v9 = vor.u32 %v11190_v45, %v9034_v56  ;;  %v11236_v23 = vld [vmem:[%s17281_s2 + $0x5c4] sm:$0xf]  ;;  %v11278_v56 = vld [vmem:[%s17281_s2 + $0x70c] sm:$0xf0] }
 0x2cc   :  { %v3461_v14 = vmul.f32 0.5, %v3460_v12  ;;  %v11286_v12 = vld [vmem:[%s17281_s2 + $0x74c] sm:$0xf0]  ;;  %v9231_v36 = vor.u32 %v11236_v23, %v9228_v53  ;;  %v11272_v45 = vld [vmem:[%s17281_s2 + $0x6e4] sm:$0xf]  ;;  %v9387_v46 = vor.u32 %v11278_v56, %v9386_v52 }
 0x2cd   :  { %v9419_v15 = vor.u32 %v11286_v12, %v9418_v13  ;;  %4620 = vmatpush.bf16.msra.mxu0 %v9035_v9  ;;  %v11200_v9 = vld [vmem:[%s17281_s2 + $0x4a4] sm:$0xf]  ;;  %v9164_v23 = vld [vmem:[%s17281_s2 + $0x550] sm:$0xf0] }
 0x2ce   :  { %v3462_v57 = vsub.f32 1.5, %v3461_v14  ;;  %v125_v14 = vld [vmem:[%s17283_s4] sm:$0x1]  ;;  %v11232_v13 = vld [vmem:[%s17281_s2 + $0x5a4] sm:$0xf]  ;;  %v9087_v12 = vor.u32 %v11200_v9, %v9084_v49 }
 0x2cf   :  { %4662 = vmatpush.bf16.msra.mxu3 %v9419_v15  ;;  %v9215_v54 = vor.u32 %v11232_v13, %v9212_v32  ;;  %v9068_v15 = vld [vmem:[%s17281_s2 + $0x490] sm:$0xf0]  ;;  %v11184_v56 = vld [vmem:[%s17281_s2 + $0x424] sm:$0xf] }
 0x2d0   :  { %v3463_v4 = vmul.f32 %v14443_v58, %v3462_v57  ;;  %v9147_v57 = vor.u32 %v11218_v61, %v9146_v22  ;;  %v11300_v22 = vld [vmem:[%s17281_s2 + $0x7c4] sm:$0xf]  ;;  %v9436_v52 = vld [vmem:[%s17281_s2 + $0x770] sm:$0xf0] }
 0x2d1   :  { %4621 = vmatpush.bf16.msra.mxu0 %v9019_v16  ;;  %v11284_v49 = vld [vmem:[%s17281_s2 + $0x744] sm:$0xf]  ;;  %v9420_v13 = vld [vmem:[%s17281_s2 + $0x750] sm:$0xf0] }
 0x2d2   :  { %v3467_v24 = vsel %vm14513_vm5, %v14443_v58, %v3463_v4  ;;  %v11258_v58 = vld [vmem:[%s17281_s2 + $0x66c] sm:$0xf0]  ;;  %v9275_v4 = vor.u32 %v11250_v10, %v9274_v59  ;;  %4635 = vmatpush.bf16.msra.mxu1 %v9147_v57  ;;  %v11228_v59 = vld [vmem:[%s17281_s2 + $0x584] sm:$0xf]  ;;  %v9196_v10 = vld [vmem:[%s17281_s2 + $0x590] sm:$0xf0]  ;;  %v9423_v32 = vor.u32 %v11284_v49, %v9420_v13 }
 0x2d3   :  { %3469 = vst [vmem:[#allocation1] sm:$0xff] %v3467_v24  ;;  %v9307_v20 = vor.u32 %v11258_v58, %v9306_v40  ;;  %v9247_v24 = vor.u32 %v11240_v6, %v9244_v8  ;;  %4663 = vmatpush.bf16.msra.mxu3 %v9403_v5  ;;  %v9103_v40 = vor.u32 %v11204_v41, %v9100_v34  ;;  %v9258_v58 = vld [vmem:[%s17281_s2 + $0x600] sm:$0xf]  ;;  %v11296_v57 = vld [vmem:[%s17281_s2 + $0x7a4] sm:$0xf] }
 0x2d4   :  { %v9259_v43 = vor.u32 %v11246_v42, %v9258_v58  ;;  %v9199_v0 = vor.u32 %v11228_v59, %v9196_v10  ;;  %v9180_v5 = vld [vmem:[%s17281_s2 + $0x570] sm:$0xf0]  ;;  %v11260_v6 = vld [vmem:[%s17281_s2 + $0x684] sm:$0xf] }
 0x2d5   :  { %4647 = vmatpush.bf16.msra.mxu2 %v9307_v20  ;;  %4622 = vmatpush.bf16.msra.mxu0 %v9003_v17  ;;  %v11304_v20 = vld [vmem:[%s17281_s2 + $0x7e4] sm:$0xf]  ;;  %v9183_v31 = vor.u32 %v11224_v7, %v9180_v5  ;;  %v9324_v8 = vld [vmem:[%s17281_s2 + $0x690] sm:$0xf0] }
 0x2d6   :  { %v9503_v25 = vor.u32 %v11304_v20, %v9500_v62  ;;  %v9327_v17 = vor.u32 %v11260_v6, %v9324_v8  ;;  %v11220_v41 = vld [vmem:[%s17281_s2 + $0x544] sm:$0xf]  ;;  %v9292_v62 = vld [vmem:[%s17281_s2 + $0x650] sm:$0xf0] }
 0x2d7   :  { %4664 = vmatpush.bf16.msra.mxu3 %v9387_v46  ;;  %v9167_v53 = vor.u32 %v11220_v41, %v9164_v23  ;;  %v11288_v58 = vld [vmem:[%s17281_s2 + $0x764] sm:$0xf]  ;;  %v9404_v10 = vld [vmem:[%s17281_s2 + $0x730] sm:$0xf0] }
 0x2d8   :  { %v11252_v20 = vld [vmem:[%s17281_s2 + $0x644] sm:$0xf] }
 0x2d9   :  { %4648 = vmatpush.bf16.msra.mxu2 %v9291_v38  ;;  %v11196_v38 = vld [vmem:[%s17281_s2 + $0x484] sm:$0xf]  ;;  %v9295_v9 = vor.u32 %v11252_v20, %v9292_v62 }
 0x2da   :  { %v3471_v2 = vld [vmem:[#allocation1 + $0x1] ss:$9 sm:$0xff]  ;;  %v9071_v16 = vor.u32 %v11196_v38, %v9068_v15 }
 0x2db   :  { %v3473_v29 = vmul.f32 %v3471_v2, %v124_v55  ;;  %v9375_v55 = vor.u32 %v11272_v45, %v9372_v47  ;;  %v9356_v2 = vld [vmem:[%s17281_s2 + $0x6d0] sm:$0xf0]  ;;  %v11216_v47 = vld [vmem:[%s17281_s2 + $0x524] sm:$0xf] }
 0x2dc   :  { %v9359_v61 = vor.u32 %v11268_v19, %v9356_v2  ;;  %v9020_v45 = vld [vmem:[%s17281_s2 + $0x430] sm:$0xf0]  ;;  %v11212_v19 = vld [vmem:[%s17281_s2 + $0x504] sm:$0xf] }
 0x2dd   :  { %v3474_v50 = vmul.f32 %v3473_v29, %v14408_v30  ;;  %v11214_v30 = vld [vmem:[%s17281_s2 + $0x50c] sm:$0xf0]  ;;  %4649 = vmatpush.bf16.msra.mxu2 %v9275_v4  ;;  %v9023_v46 = vor.u32 %v11184_v56, %v9020_v45  ;;  %v9132_v2 = vld [vmem:[%s17281_s2 + $0x510] sm:$0xf0]  ;;  %v11244_v7 = vld [vmem:[%s17281_s2 + $0x604] sm:$0xf] }
 0x2de   :  { %v9131_v21 = vor.u32 %v11214_v30, %v9130_v33  ;;  %v11192_v33 = vld [vmem:[%s17281_s2 + $0x464] sm:$0xf]  ;;  %v9052_v30 = vld [vmem:[%s17281_s2 + $0x470] sm:$0xf0] }
 0x2df   :  { %v3475_v3 = vsub.f32 %v125_v14, %v3474_v50  ;;  %v9484_v14 = vld [vmem:[%s17281_s2 + $0x7d0] sm:$0xf0]  ;;  %v9055_v4 = vor.u32 %v11192_v33, %v9052_v30  ;;  %v11276_v5 = vld [vmem:[%s17281_s2 + $0x704] sm:$0xf] }
 0x2e0   :  { %4636 = vmatpush.bf16.msra.mxu1 %v9131_v21  ;;  %v9340_v50 = vld [vmem:[%s17281_s2 + $0x6b0] sm:$0xf0] }
 0x2e1   :  { %v3477_v37 = vperm.slane %v3475_v3, 0  ;;  %4650 = vmatpush.bf16.msra.mxu2 %v9259_v43  ;;  %v9343_v1 = vor.u32 %v11264_v28, %v9340_v50  ;;  %v9471_v3 = vor.u32 %v11296_v57, %v9468_v11  ;;  %v9452_v21 = vld [vmem:[%s17281_s2 + $0x790] sm:$0xf0]  ;;  %v9439_v43 = vor.u32 %v11288_v58, %v9436_v52 }
 0x2e3   :  { %v3479_v35 = vsel %vm3366_vm2, %v3473_v29, %v3477_v37  ;;  %v9487_v29 = vor.u32 %v11300_v22, %v9484_v14  ;;  %v11292_v37 = vld [vmem:[%s17281_s2 + $0x784] sm:$0xf] }
 0x2e4   :  { %8868 = vmatmul.msk.f32.vlgmr.msrb.gmra.mxu0 %vm3480_vm6, %v3479_v35  ;;  %8869 = vmatmul.msk.f32.vlgmr.msrb.gmra.mxu1 %vm3480_vm6, %v3479_v35  ;;  %v11248_v14 = vld [vmem:[%s17281_s2 + $0x624] sm:$0xf] }
 0x2e5   :  { %8870 = vmatmul.msk.f32.vlgmr.msrb.gmra.mxu2 %vm3480_vm6, %v3479_v35  ;;  %8871 = vmatmul.msk.f32.vlgmr.msrb.gmra.mxu3 %vm3480_vm6, %v3479_v35  ;;  %v9455_v35 = vor.u32 %v11292_v37, %v9452_v21 }
 0x2e6   :  { %4671 = vmatpush.bf16.msrb.mxu0 %v9119_v27  ;;  %4685 = vmatpush.bf16.msrb.mxu1 %v9247_v24  ;;  %v11188_v27 = vld [vmem:[%s17281_s2 + $0x444] sm:$0xf]  ;;  %v9036_v24 = vld [vmem:[%s17281_s2 + $0x450] sm:$0xf0] }
 0x2e7   :  { %4699 = vmatpush.bf16.msrb.mxu2 %v9375_v55  ;;  %4713 = vmatpush.bf16.msrb.mxu3 %v9503_v25  ;;  %v9039_v34 = vor.u32 %v11188_v27, %v9036_v24  ;;  %v9148_v55 = vld [vmem:[%s17281_s2 + $0x530] sm:$0xf0] }
 0x2e8   :  { %v9151_v25 = vor.u32 %v11216_v47, %v9148_v55 }
 0x2ea   :  { %4672 = vmatpush.bf16.msrb.mxu0 %v9103_v40  ;;  %4686 = vmatpush.bf16.msrb.mxu1 %v9231_v36  ;;  %v11256_v40 = vld [vmem:[%s17281_s2 + $0x664] sm:$0xf]  ;;  %v9308_v36 = vld [vmem:[%s17281_s2 + $0x670] sm:$0xf0] }
 0x2eb   :  { %4700 = vmatpush.bf16.msrb.mxu2 %v9359_v61  ;;  %4714 = vmatpush.bf16.msrb.mxu3 %v9487_v29  ;;  %v9311_v42 = vor.u32 %v11256_v40, %v9308_v36  ;;  %v9135_v61 = vor.u32 %v11212_v19, %v9132_v2  ;;  %v9276_v29 = vld [vmem:[%s17281_s2 + $0x630] sm:$0xf0] }
 0x2ec   :  { %v9279_v59 = vor.u32 %v11248_v14, %v9276_v29 }
 0x2ee   :  { %4673 = vmatpush.bf16.msrb.mxu0 %v9087_v12  ;;  %4687 = vmatpush.bf16.msrb.mxu1 %v9215_v54  ;;  %v11180_v12 = vld [vmem:[%s17281_s2 + $0x404] sm:$0xf]  ;;  %v9004_v54 = vld [vmem:[%s17281_s2 + $0x410] sm:$0xf0] }
 0x2ef   :  { %4701 = vmatpush.bf16.msrb.mxu2 %v9343_v1  ;;  %4715 = vmatpush.bf16.msrb.mxu3 %v9471_v3  ;;  %v9007_v22 = vor.u32 %v11180_v12, %v9004_v54  ;;  %v11211_v54 = vld [vmem:[%s17281_s2 + $0x4f4] sm:$0xf0] }
 0x2f2   :  { %4674 = vmatpush.bf16.msrb.mxu0 %v9071_v16  ;;  %4688 = vmatpush.bf16.msrb.mxu1 %v9199_v0  ;;  %v11280_v16 = vld [vmem:[%s17281_s2 + $0x724] sm:$0xf] }
 0x2f3   :  { %4702 = vmatpush.bf16.msrb.mxu2 %v9327_v17  ;;  %4716 = vmatpush.bf16.msrb.mxu3 %v9455_v35  ;;  %v9407_v1 = vor.u32 %v11280_v16, %v9404_v10  ;;  %v9250_v10 = vld [vmem:[%s17281_s2 + $0x5e8] sm:$0xf] }
 0x2f6   :  { %4675 = vmatpush.bf16.msrb.mxu0 %v9055_v4  ;;  %4689 = vmatpush.bf16.msrb.mxu1 %v9183_v31  ;;  %v9260_v4 = vld [vmem:[%s17281_s2 + $0x610] sm:$0xf0] }
 0x2f7   :  { %4703 = vmatpush.bf16.msrb.mxu2 %v9311_v42  ;;  %4717 = vmatpush.bf16.msrb.mxu3 %v9439_v43 }
 0x2fa   :  { %4676 = vmatpush.bf16.msrb.mxu0 %v9039_v34  ;;  %4690 = vmatpush.bf16.msrb.mxu1 %v9167_v53 }
 0x2fb   :  { %4704 = vmatpush.bf16.msrb.mxu2 %v9295_v9  ;;  %4718 = vmatpush.bf16.msrb.mxu3 %v9423_v32  ;;  %v9122_v32 = vld [vmem:[%s17281_s2 + $0x4e8] sm:$0xf] }
 0x2fe   :  { %4677 = vmatpush.bf16.msrb.mxu0 %v9023_v46  ;;  %4691 = vmatpush.bf16.msrb.mxu1 %v9151_v25 }
 0x2ff   :  { %4705 = vmatpush.bf16.msrb.mxu2 %v9279_v59  ;;  %4719 = vmatpush.bf16.msrb.mxu3 %v9407_v1 }
 0x302   :  { %4678 = vmatpush.bf16.msrb.mxu0 %v9007_v22  ;;  %4692 = vmatpush.bf16.msrb.mxu1 %v9135_v61 }
 0x361   :  { %v3501_v38 = vpop.f32.mrf.mxu0  ;;  %v3521_v15 = vpop.f32.mrf.mxu1 }
 0x362   :  { %v3564_v0 = vperm.slane %v3501_v38, 0  ;;  %v3565_v28 = vperm.slane %v3521_v15, 0  ;;  %v3576_v50 = vperm.slane %v3501_v38, 1  ;;  %v3577_v57 = vperm.slane %v3521_v15, 1 }
 0x364   :  { %v3568_v11 = vmul.f32 %v3564_v0, %v14208_v26  ;;  %v3572_v3 = vmul.f32 %v3564_v0, %v14210_v39  ;;  %v3569_v33 = vmul.f32 %v3565_v28, %v14276_v48  ;;  %v3573_v30 = vmul.f32 %v3565_v28, %v14278_v63  ;;  %v9388_v39 = vld [vmem:[%s17281_s2 + $0x710] sm:$0xf0]  ;;  %v11243_v0 = vld [vmem:[%s17281_s2 + $0x5f4] sm:$0xf0]  ;;  %v9106_v28 = vld [vmem:[%s17281_s2 + $0x4c8] sm:$0xf] }
 0x365   :  { %v9263_v26 = vor.u32 %v11244_v7, %v9260_v4  ;;  %v9391_v8 = vor.u32 %v11276_v5, %v9388_v39  ;;  %v9234_v39 = vld [vmem:[%s17281_s2 + $0x5c8] sm:$0xf] }
 0x366   :  { %v3580_v48 = vadd.f32 %v3576_v50, %v3568_v11  ;;  %v3584_v63 = vadd.f32 %v3576_v50, %v3572_v3  ;;  %v3581_v31 = vadd.f32 %v3577_v57, %v3569_v33  ;;  %v3585_v6 = vadd.f32 %v3577_v57, %v3573_v30  ;;  %v11207_v50 = vld [vmem:[%s17281_s2 + $0x4d4] sm:$0xf0] }
 0x367   :  { %4706 = vmatpush.bf16.msrb.mxu2 %v9263_v26  ;;  %4720 = vmatpush.bf16.msrb.mxu3 %v9391_v8  ;;  %v9123_v3 = vor.u32 %v11211_v54, %v9122_v32  ;;  %v9074_v32 = vld [vmem:[%s17281_s2 + $0x488] sm:$0xf]  ;;  %v11199_v54 = vld [vmem:[%s17281_s2 + $0x494] sm:$0xf0] }
 0x368   :  { %v3588_v37 = vmax.f32 %v3580_v48, 0.0  ;;  %v3592_v17 = vmax.f32 %v3584_v63, 0.0  ;;  %v3589_v21 = vmax.f32 %v3581_v31, 0.0  ;;  %v3541_v35 = vpop.f32.mrf.mxu2  ;;  %v3561_v27 = vpop.f32.mrf.mxu3  ;;  %v3593_v24 = vmax.f32 %v3585_v6, 0.0  ;;  %v11239_v48 = vld [vmem:[%s17281_s2 + $0x5d4] sm:$0xf0] }
 0x369   :  { %v3566_v41 = vperm.slane %v3541_v35, 0  ;;  %v3567_v34 = vperm.slane %v3561_v27, 0  ;;  %v3578_v40 = vperm.slane %v3541_v35, 1  ;;  %v3579_v36 = vperm.slane %v3561_v27, 1  ;;  %v9378_v6 = vld [vmem:[%s17281_s2 + $0x6e8] sm:$0xf] }
 0x36a   :  { %v3606_v23 = vrot.slane %v3588_v37, 7  ;;  %v3610_v53 = vrot.slane %v3592_v17, 7  ;;  %v3607_v56 = vrot.slane %v3589_v21, 7  ;;  %v3611_v55 = vrot.slane %v3593_v24, 7  ;;  %v11275_v27 = vld [vmem:[%s17281_s2 + $0x6f4] sm:$0xf0] }
 0x36b   :  { %v3570_v58 = vmul.f32 %v3566_v41, %v14341_v44  ;;  %v3574_v42 = vmul.f32 %v3566_v41, %v14346_v60  ;;  %v3571_v52 = vmul.f32 %v3567_v34, %v14397_v51  ;;  %v3575_v43 = vmul.f32 %v3567_v34, %v14399_v18 }
 0x36c   :  { %3622 = vst [vmem:[#allocation2 + $0x30] sm:$0xfe] %v3606_v23  ;;  %v9251_v37 = vor.u32 %v11243_v0, %v9250_v10  ;;  %v9107_v17 = vor.u32 %v11207_v50, %v9106_v28  ;;  %v9346_v10 = vld [vmem:[%s17281_s2 + $0x6a8] sm:$0xf]  ;;  %v11267_v0 = vld [vmem:[%s17281_s2 + $0x6b4] sm:$0xf0] }
 0x36d   :  { %3626 = vst [vmem:[#allocation2 + $0x50] sm:$0x1] %v3606_v23  ;;  %v3582_v45 = vadd.f32 %v3578_v40, %v3570_v58  ;;  %v3586_v47 = vadd.f32 %v3578_v40, %v3574_v42  ;;  %v3583_v46 = vadd.f32 %v3579_v36, %v3571_v52  ;;  %v3587_v20 = vadd.f32 %v3579_v36, %v3575_v43  ;;  %v9090_v23 = vld [vmem:[%s17281_s2 + $0x4a8] sm:$0xf]  ;;  %v11203_v58 = vld [vmem:[%s17281_s2 + $0x4b4] sm:$0xf0] }
 0x36e   :  { %3630 = vst [vmem:[#allocation2 + $0x40] sm:$0xfe] %v3610_v53  ;;  %v9506_v43 = vld [vmem:[%s17281_s2 + $0x7e8] sm:$0xf]  ;;  %v11195_v50 = vld [vmem:[%s17281_s2 + $0x474] sm:$0xf0] }
 0x36f   :  { %3634 = vst [vmem:[#allocation2 + $0x60] sm:$0x1] %v3610_v53  ;;  %v3590_v62 = vmax.f32 %v3582_v45, 0.0  ;;  %v3594_v25 = vmax.f32 %v3586_v47, 0.0  ;;  %v3591_v44 = vmax.f32 %v3583_v46, 0.0  ;;  %v3595_v9 = vmax.f32 %v3587_v20, 0.0 }
 0x370   :  { %3623 = vst [vmem:[#allocation2] sm:$0xfe] %v3607_v56  ;;  %v9218_v45 = vld [vmem:[%s17281_s2 + $0x5a8] sm:$0xf]  ;;  %v11235_v47 = vld [vmem:[%s17281_s2 + $0x5b4] sm:$0xf0]  ;;  %v9235_v46 = vor.u32 %v11239_v48, %v9234_v39 }
 0x371   :  { %3627 = vst [vmem:[#allocation2 + $0x68] sm:$0x1] %v3607_v56  ;;  %v3608_v60 = vrot.slane %v3590_v62, 7  ;;  %v3612_v51 = vrot.slane %v3594_v25, 7  ;;  %v3609_v49 = vrot.slane %v3591_v44, 7  ;;  %v3613_v22 = vrot.slane %v3595_v9, 7 }
 0x372   :  { %3631 = vst [vmem:[#allocation2 + $0x20] sm:$0xfe] %v3611_v55  ;;  %v11307_v56 = vld [vmem:[%s17281_s2 + $0x7f4] sm:$0xf0]  ;;  %v9379_v25 = vor.u32 %v11275_v27, %v9378_v6  ;;  %v9362_v44 = vld [vmem:[%s17281_s2 + $0x6c8] sm:$0xf] }
 0x373   :  { %3635 = vst [vmem:[#allocation2 + $0x70] sm:$0x1] %v3611_v55  ;;  %v3778_v18 = vld [vmem:[#allocation2 + $0x30] sm:$0xfe]  ;;  %v9058_v28 = vld [vmem:[%s17281_s2 + $0x468] sm:$0xf] }
 0x374   :  { %3624 = vst [vmem:[#allocation2 + $0x58] sm:$0xfe] %v3608_v60  ;;  %v3782_v13 = vld [vmem:[#allocation2 + $0x50] sm:$0x1]  ;;  %v3810_v12 = vrot.slane %v3778_v18, 1  ;;  %v9091_v18 = vor.u32 %v11203_v58, %v9090_v23 }
 0x375   :  { %3628 = vst [vmem:[#allocation2 + $0x8] sm:$0x1] %v3608_v60  ;;  %v3786_v19 = vld [vmem:[#allocation2 + $0x40] sm:$0xfe]  ;;  %v3811_v2 = vrot.slane %v3782_v13, 1 }
 0x376   :  { %3632 = vst [vmem:[#allocation2 + $0x10] sm:$0xfe] %v3612_v51  ;;  %v3790_v61 = vld [vmem:[#allocation2 + $0x60] sm:$0x1]  ;;  %v3822_v14 = vrot.slane %v3786_v19, 1 }
 0x377   :  { %3636 = vst [vmem:[#allocation2 + $0x78] sm:$0x1] %v3612_v51  ;;  %v3812_v29 = vsel %vm338_vm0, %v3810_v12, %v3811_v2  ;;  %v3823_v38 = vrot.slane %v3790_v61, 1  ;;  %v3779_v15 = vld [vmem:[#allocation2] sm:$0xfe]  ;;  %v9507_v2 = vor.u32 %v11307_v56, %v9506_v43 }
 0x378   :  { %3625 = vst [vmem:[#allocation2 + $0x18] sm:$0xfe] %v3609_v49  ;;  %v3783_v59 = vld [vmem:[#allocation2 + $0x68] sm:$0x1]  ;;  %v3813_v16 = vrot.slane %v3779_v15, 1  ;;  %v9075_v15 = vor.u32 %v11199_v54, %v9074_v32 }
 0x379   :  { %3629 = vst [vmem:[#allocation2 + $0x48] sm:$0x1] %v3609_v49  ;;  %v3824_v57 = vsel %vm338_vm0, %v3822_v14, %v3823_v38  ;;  %v3787_v1 = vld [vmem:[#allocation2 + $0x20] sm:$0xfe]  ;;  %v3814_v11 = vrot.slane %v3783_v59, 1 }
 0x37a   :  { %3633 = vst [vmem:[#allocation2 + $0x38] sm:$0xfe] %v3613_v22  ;;  %v14864_v33 = vpack.c.bf16 %v3824_v57, %v3812_v29  ;;  %v3791_v30 = vld [vmem:[#allocation2 + $0x70] sm:$0x1]  ;;  %v3825_v7 = vrot.slane %v3787_v1, 1 }
 0x37b   :  { %3637 = vst [vmem:[#allocation2 + $0x28] sm:$0x1] %v3613_v22  ;;  %v3815_v4 = vsel %vm338_vm0, %v3813_v16, %v3814_v11  ;;  %v3826_v5 = vrot.slane %v3791_v30, 1  ;;  %v3780_v26 = vld [vmem:[#allocation2 + $0x58] sm:$0xfe]  ;;  %v9219_v22 = vor.u32 %v11235_v47, %v9218_v45  ;;  %v9347_v30 = vor.u32 %v11267_v0, %v9346_v10 }
 0x37c   :  { %4623 = vmatmul.bf16.vlgmr.msra.gmra.mxu0 %v14864_v33  ;;  %v3784_v63 = vld [vmem:[#allocation2 + $0x8] sm:$0x1]  ;;  %v3816_v31 = vrot.slane %v3780_v26, 1  ;;  %v11271_v49 = vld [vmem:[%s17281_s2 + $0x6d4] sm:$0xf0] }
 0x37d   :  { %v3827_v8 = vsel %vm338_vm0, %v3825_v7, %v3826_v5  ;;  %4727 = vmatpush.bf16.msra.mxu0 %v9123_v3  ;;  %v3788_v21 = vld [vmem:[#allocation2 + $0x10] sm:$0xfe]  ;;  %v3817_v35 = vrot.slane %v3784_v63, 1  ;;  %v9490_v61 = vld [vmem:[%s17281_s2 + $0x7c8] sm:$0xf]  ;;  %v9363_v38 = vor.u32 %v11271_v49, %v9362_v44  ;;  %v9059_v7 = vor.u32 %v11195_v50, %v9058_v28 }
 0x37e   :  { %v14881_v24 = vpack.c.bf16 %v3827_v8, %v3815_v4  ;;  %v3792_v41 = vld [vmem:[#allocation2 + $0x78] sm:$0x1]  ;;  %v3828_v34 = vrot.slane %v3788_v21, 1  ;;  %v11303_v14 = vld [vmem:[%s17281_s2 + $0x7d4] sm:$0xf0] }
 0x37f   :  { %v3818_v53 = vsel %vm338_vm0, %v3816_v31, %v3817_v35  ;;  %v3829_v40 = vrot.slane %v3792_v41, 1  ;;  %v3781_v36 = vld [vmem:[#allocation2 + $0x18] sm:$0xfe]  ;;  %v9202_v59 = vld [vmem:[%s17281_s2 + $0x588] sm:$0xf]  ;;  %v9491_v57 = vor.u32 %v11303_v14, %v9490_v61 }
 0x380   :  { %4637 = vmatmul.bf16.vlgmr.msra.gmra.mxu1 %v14881_v24  ;;  %v3785_v42 = vld [vmem:[#allocation2 + $0x48] sm:$0x1]  ;;  %v3819_v52 = vrot.slane %v3781_v36, 1  ;;  %v11231_v16 = vld [vmem:[%s17281_s2 + $0x594] sm:$0xf0] }
 0x381   :  { %4741 = vmatpush.bf16.msra.mxu1 %v9251_v37  ;;  %4728 = vmatpush.bf16.msra.mxu0 %v9107_v17  ;;  %v3830_v55 = vsel %vm338_vm0, %v3828_v34, %v3829_v40  ;;  %v3789_v20 = vld [vmem:[#allocation2 + $0x38] sm:$0xfe]  ;;  %v3820_v62 = vrot.slane %v3785_v42, 1  ;;  %v9203_v1 = vor.u32 %v11231_v16, %v9202_v59  ;;  %v9474_v11 = vld [vmem:[%s17281_s2 + $0x7a8] sm:$0xf] }
 0x382   :  { %v14907_v60 = vpack.c.bf16 %v3830_v55, %v3818_v53  ;;  %v3793_v51 = vld [vmem:[#allocation2 + $0x28] sm:$0x1]  ;;  %v3831_v9 = vrot.slane %v3789_v20, 1  ;;  %v11299_v3 = vld [vmem:[%s17281_s2 + $0x7b4] sm:$0xf0] }
 0x383   :  { %v3821_v13 = vsel %vm338_vm0, %v3819_v52, %v3820_v62  ;;  %v3832_v12 = vrot.slane %v3793_v51, 1  ;;  %v9186_v4 = vld [vmem:[%s17281_s2 + $0x568] sm:$0xf]  ;;  %v11227_v5 = vld [vmem:[%s17281_s2 + $0x574] sm:$0xf0]  ;;  %v9475_v31 = vor.u32 %v11299_v3, %v9474_v11 }
 0x384   :  { %4651 = vmatmul.bf16.vlgmr.msra.gmra.mxu2 %v14907_v60  ;;  %v9330_v26 = vld [vmem:[%s17281_s2 + $0x688] sm:$0xf]  ;;  %v11263_v39 = vld [vmem:[%s17281_s2 + $0x694] sm:$0xf0]  ;;  %v9187_v6 = vor.u32 %v11227_v5, %v9186_v4  ;;  %v11209_v62 = vld [vmem:[%s17281_s2 + $0x4ec] sm:$0xf] }
 0x385   :  { %4742 = vmatpush.bf16.msra.mxu1 %v9235_v46  ;;  %v3833_v19 = vsel %vm338_vm0, %v3831_v9, %v3832_v12  ;;  %4755 = vmatpush.bf16.msra.mxu2 %v9379_v25  ;;  %v9042_v48 = vld [vmem:[%s17281_s2 + $0x448] sm:$0xf]  ;;  %v11191_v63 = vld [vmem:[%s17281_s2 + $0x454] sm:$0xf0]  ;;  %v9331_v17 = vor.u32 %v11263_v39, %v9330_v26  ;;  %v9124_v25 = vld [vmem:[%s17281_s2 + $0x4f8] sm:$0xf0] }
 0x386   :  { %v14927_v29 = vpack.c.bf16 %v3833_v19, %v3821_v13  ;;  %4729 = vmatpush.bf16.msra.mxu0 %v9091_v18  ;;  %v9458_v8 = vld [vmem:[%s17281_s2 + $0x788] sm:$0xf]  ;;  %v11295_v37 = vld [vmem:[%s17281_s2 + $0x794] sm:$0xf0]  ;;  %v9043_v21 = vor.u32 %v11191_v63, %v9042_v48  ;;  %v11241_v54 = vld [vmem:[%s17281_s2 + $0x5ec] sm:$0xf]  ;;  %v9127_v19 = vor.u32 %v11209_v62, %v9124_v25 }
 0x387   :  { %v9170_v35 = vld [vmem:[%s17281_s2 + $0x548] sm:$0xf]  ;;  %v11223_v27 = vld [vmem:[%s17281_s2 + $0x554] sm:$0xf0]  ;;  %v9459_v40 = vor.u32 %v11295_v37, %v9458_v8  ;;  %v9108_v59 = vld [vmem:[%s17281_s2 + $0x4d8] sm:$0xf0] }
 0x388   :  { %4665 = vmatmul.bf16.vlgmr.msra.gmra.mxu3 %v14927_v29  ;;  %v9314_v41 = vld [vmem:[%s17281_s2 + $0x668] sm:$0xf]  ;;  %v11259_v34 = vld [vmem:[%s17281_s2 + $0x674] sm:$0xf0]  ;;  %v9171_v36 = vor.u32 %v11223_v27, %v9170_v35  ;;  %v11237_v50 = vld [vmem:[%s17281_s2 + $0x5cc] sm:$0xf] }
 0x389   :  { %4769 = vmatpush.bf16.msra.mxu3 %v9507_v2  ;;  %4743 = vmatpush.bf16.msra.mxu1 %v9219_v22  ;;  %v9026_v23 = vld [vmem:[%s17281_s2 + $0x428] sm:$0xf]  ;;  %v11187_v53 = vld [vmem:[%s17281_s2 + $0x434] sm:$0xf0]  ;;  %v9315_v52 = vor.u32 %v11259_v34, %v9314_v41  ;;  %v9252_v2 = vld [vmem:[%s17281_s2 + $0x5f8] sm:$0xf0] }
 0x38a   :  { %4756 = vmatpush.bf16.msra.mxu2 %v9363_v38  ;;  %4730 = vmatpush.bf16.msra.mxu0 %v9075_v15  ;;  %v9442_v58 = vld [vmem:[%s17281_s2 + $0x768] sm:$0xf]  ;;  %v11291_v42 = vld [vmem:[%s17281_s2 + $0x774] sm:$0xf0]  ;;  %v9027_v43 = vor.u32 %v11187_v53, %v9026_v23  ;;  %v11205_v15 = vld [vmem:[%s17281_s2 + $0x4cc] sm:$0xf]  ;;  %v9255_v16 = vor.u32 %v11241_v54, %v9252_v2 }
 0x38b   :  { %v9154_v56 = vld [vmem:[%s17281_s2 + $0x528] sm:$0xf]  ;;  %v11219_v45 = vld [vmem:[%s17281_s2 + $0x534] sm:$0xf0]  ;;  %v9443_v44 = vor.u32 %v11291_v42, %v9442_v58  ;;  %v9111_v3 = vor.u32 %v11205_v15, %v9108_v59  ;;  %v11201_v5 = vld [vmem:[%s17281_s2 + $0x4ac] sm:$0xf] }
 0x38c   :  { %4679 = vmatmul.bf16.vlgmr.msrb.gmra.mxu0 %v14864_v33  ;;  %v9298_v47 = vld [vmem:[%s17281_s2 + $0x648] sm:$0xf]  ;;  %v11255_v46 = vld [vmem:[%s17281_s2 + $0x654] sm:$0xf0]  ;;  %v9155_v51 = vor.u32 %v11219_v45, %v9154_v56  ;;  %v9092_v26 = vld [vmem:[%s17281_s2 + $0x4b8] sm:$0xf0] }
 0x38d   :  { %4770 = vmatpush.bf16.msra.mxu3 %v9491_v57  ;;  %4744 = vmatpush.bf16.msra.mxu1 %v9203_v1  ;;  %v9010_v55 = vld [vmem:[%s17281_s2 + $0x408] sm:$0xf]  ;;  %v11183_v20 = vld [vmem:[%s17281_s2 + $0x414] sm:$0xf0]  ;;  %v9299_v49 = vor.u32 %v11255_v46, %v9298_v47  ;;  %v9236_v57 = vld [vmem:[%s17281_s2 + $0x5d8] sm:$0xf0]  ;;  %v9095_v35 = vor.u32 %v11201_v5, %v9092_v26 }
 0x38e   :  { %4757 = vmatpush.bf16.msra.mxu2 %v9347_v30  ;;  %4731 = vmatpush.bf16.msra.mxu0 %v9059_v7  ;;  %v9426_v9 = vld [vmem:[%s17281_s2 + $0x748] sm:$0xf]  ;;  %v11287_v18 = vld [vmem:[%s17281_s2 + $0x754] sm:$0xf0]  ;;  %v9011_v13 = vor.u32 %v11183_v20, %v9010_v55  ;;  %v11273_v30 = vld [vmem:[%s17281_s2 + $0x6ec] sm:$0xf]  ;;  %v9239_v39 = vor.u32 %v11237_v50, %v9236_v57 }
 0x38f   :  { %v9138_v12 = vld [vmem:[%s17281_s2 + $0x508] sm:$0xf]  ;;  %v11215_v32 = vld [vmem:[%s17281_s2 + $0x514] sm:$0xf0]  ;;  %v9427_v14 = vor.u32 %v11287_v18, %v9426_v9  ;;  %v9380_v7 = vld [vmem:[%s17281_s2 + $0x6f8] sm:$0xf0] }
 0x390   :  { %4693 = vmatmul.bf16.vlgmr.msrb.gmra.mxu1 %v14881_v24  ;;  %v9282_v22 = vld [vmem:[%s17281_s2 + $0x628] sm:$0xf]  ;;  %v11251_v61 = vld [vmem:[%s17281_s2 + $0x634] sm:$0xf0]  ;;  %v9139_v38 = vor.u32 %v11215_v32, %v9138_v12  ;;  %v9383_v8 = vor.u32 %v11273_v30, %v9380_v7  ;;  %v9508_v37 = vld [vmem:[%s17281_s2 + $0x7f8] sm:$0xf0] }
 0x391   :  { %4771 = vmatpush.bf16.msra.mxu3 %v9475_v31  ;;  %4745 = vmatpush.bf16.msra.mxu1 %v9187_v6  ;;  %v9283_v10 = vor.u32 %v11251_v61, %v9282_v22  ;;  %v9410_v0 = vld [vmem:[%s17281_s2 + $0x728] sm:$0xf]  ;;  %v11283_v28 = vld [vmem:[%s17281_s2 + $0x734] sm:$0xf0]  ;;  %v11305_v6 = vld [vmem:[%s17281_s2 + $0x7ec] sm:$0xf] }
 0x392   :  { %4758 = vmatpush.bf16.msra.mxu2 %v9331_v17  ;;  %4732 = vmatpush.bf16.msra.mxu0 %v9043_v21  ;;  %v9266_v1 = vld [vmem:[%s17281_s2 + $0x608] sm:$0xf]  ;;  %v11247_v11 = vld [vmem:[%s17281_s2 + $0x614] sm:$0xf0]  ;;  %v9411_v4 = vor.u32 %v11283_v28, %v9410_v0  ;;  %v11233_v17 = vld [vmem:[%s17281_s2 + $0x5ac] sm:$0xf] }
 0x393   :  { %v9267_v48 = vor.u32 %v11247_v11, %v9266_v1  ;;  %v9394_v63 = vld [vmem:[%s17281_s2 + $0x708] sm:$0xf]  ;;  %v11279_v31 = vld [vmem:[%s17281_s2 + $0x714] sm:$0xf0]  ;;  %v9220_v21 = vld [vmem:[%s17281_s2 + $0x5b8] sm:$0xf0] }
 0x394   :  { %4707 = vmatmul.bf16.vlgmr.msrb.gmra.mxu2 %v14907_v60  ;;  %v11269_v27 = vld [vmem:[%s17281_s2 + $0x6cc] sm:$0xf]  ;;  %v9364_v41 = vld [vmem:[%s17281_s2 + $0x6d8] sm:$0xf0]  ;;  %v9395_v34 = vor.u32 %v11279_v31, %v9394_v63 }
 0x395   :  { %4772 = vmatpush.bf16.msra.mxu3 %v9459_v40  ;;  %4746 = vmatpush.bf16.msra.mxu1 %v9171_v36  ;;  %v11197_v23 = vld [vmem:[%s17281_s2 + $0x48c] sm:$0xf]  ;;  %v9076_v53 = vld [vmem:[%s17281_s2 + $0x498] sm:$0xf0]  ;;  %v9511_v40 = vor.u32 %v11305_v6, %v9508_v37  ;;  %v9223_v36 = vor.u32 %v11233_v17, %v9220_v21  ;;  %v9367_v42 = vor.u32 %v11269_v27, %v9364_v41  ;;  %v9626_v17 = vld [vmem:[%s17281_s2 + $0xe0] sm:$0xf] }
 0x396   :  { %4759 = vmatpush.bf16.msra.mxu2 %v9315_v52  ;;  %4733 = vmatpush.bf16.msra.mxu0 %v9027_v43  ;;  %v11301_v58 = vld [vmem:[%s17281_s2 + $0x7cc] sm:$0xf]  ;;  %v9492_v52 = vld [vmem:[%s17281_s2 + $0x7d8] sm:$0xf0]  ;;  %v9079_v45 = vor.u32 %v11197_v23, %v9076_v53  ;;  %v11082_v21 = vld [vmem:[%s17281_s2 + $0xec] sm:$0xf0] }
 0x397   :  { %v11229_v43 = vld [vmem:[%s17281_s2 + $0x58c] sm:$0xf]  ;;  %v9204_v56 = vld [vmem:[%s17281_s2 + $0x598] sm:$0xf0]  ;;  %v9495_v62 = vor.u32 %v11301_v58, %v9492_v52  ;;  %v11114_v53 = vld [vmem:[%s17281_s2 + $0x1ec] sm:$0xf0]  ;;  %v9627_v58 = vor.u32 %v11082_v21, %v9626_v17 }
 0x398   :  { %4721 = vmatmul.bf16.vlgmr.msrb.gmra.mxu3 %v14927_v29  ;;  %v11265_v47 = vld [vmem:[%s17281_s2 + $0x6ac] sm:$0xf]  ;;  %v9348_v46 = vld [vmem:[%s17281_s2 + $0x6b8] sm:$0xf0]  ;;  %v9207_v25 = vor.u32 %v11229_v43, %v9204_v56  ;;  %v9610_v43 = vld [vmem:[%s17281_s2 + $0xc0] sm:$0xf] }
 0x399   :  { %4773 = vmatpush.bf16.msra.mxu3 %v9443_v44  ;;  %4747 = vmatpush.bf16.msra.mxu1 %v9155_v51  ;;  %v11193_v55 = vld [vmem:[%s17281_s2 + $0x46c] sm:$0xf]  ;;  %v9060_v20 = vld [vmem:[%s17281_s2 + $0x478] sm:$0xf0]  ;;  %v9351_v51 = vor.u32 %v11265_v47, %v9348_v46  ;;  %v11078_v56 = vld [vmem:[%s17281_s2 + $0xcc] sm:$0xf0] }
 0x39a   :  { %4760 = vmatpush.bf16.msra.mxu2 %v9299_v49  ;;  %4734 = vmatpush.bf16.msra.mxu0 %v9011_v13  ;;  %v11297_v44 = vld [vmem:[%s17281_s2 + $0x7ac] sm:$0xf]  ;;  %v9476_v9 = vld [vmem:[%s17281_s2 + $0x7b8] sm:$0xf0]  ;;  %v9063_v13 = vor.u32 %v11193_v55, %v9060_v20  ;;  %v9738_v20 = vld [vmem:[%s17281_s2 + $0x1c0] sm:$0xf] }
 0x39b   :  { %v11225_v18 = vld [vmem:[%s17281_s2 + $0x56c] sm:$0xf]  ;;  %v9188_v49 = vld [vmem:[%s17281_s2 + $0x578] sm:$0xf0]  ;;  %v9479_v2 = vor.u32 %v11297_v44, %v9476_v9  ;;  %v9882_v9 = vld [vmem:[%s17281_s2 + $0x2e0] sm:$0xf] }
 0x39c   :  { %v11261_v12 = vld [vmem:[%s17281_s2 + $0x68c] sm:$0xf]  ;;  %v9332_v32 = vld [vmem:[%s17281_s2 + $0x698] sm:$0xf0]  ;;  %v9191_v22 = vor.u32 %v11225_v18, %v9188_v49  ;;  %v11146_v18 = vld [vmem:[%s17281_s2 + $0x2ec] sm:$0xf0] }
 0x39d   :  { %4774 = vmatpush.bf16.msra.mxu3 %v9427_v14  ;;  %4748 = vmatpush.bf16.msra.mxu1 %v9139_v38  ;;  %v11189_v54 = vld [vmem:[%s17281_s2 + $0x44c] sm:$0xf]  ;;  %v9335_v14 = vor.u32 %v11261_v12, %v9332_v32  ;;  %v9460_v38 = vld [vmem:[%s17281_s2 + $0x798] sm:$0xf0]  ;;  %v11074_v12 = vld [vmem:[%s17281_s2 + $0xac] sm:$0xf0] }
 0x39e   :  { %4783 = vmatpush.bf16.msrb.mxu0 %v9127_v19  ;;  %4761 = vmatpush.bf16.msra.mxu2 %v9283_v10  ;;  %v9044_v19 = vld [vmem:[%s17281_s2 + $0x458] sm:$0xf0]  ;;  %v11293_v61 = vld [vmem:[%s17281_s2 + $0x78c] sm:$0xf]  ;;  %v9834_v21 = vld [vmem:[%s17281_s2 + $0x280] sm:$0xf] }
 0x39f   :  { %4735 = vmatmul.bf16.vlgmr.msra.gmra.mxu0 %v14864_v33  ;;  %v11221_v15 = vld [vmem:[%s17281_s2 + $0x54c] sm:$0xf]  ;;  %v9172_v59 = vld [vmem:[%s17281_s2 + $0x558] sm:$0xf0]  ;;  %v9463_v57 = vor.u32 %v11293_v61, %v9460_v38  ;;  %v9883_v61 = vor.u32 %v11146_v18, %v9882_v9  ;;  %v9722_v38 = vld [vmem:[%s17281_s2 + $0x1a0] sm:$0xf] }
 0x3a0   :  { %4749 = vmatmul.bf16.vlgmr.msra.gmra.mxu1 %v14881_v24  ;;  %v11257_v10 = vld [vmem:[%s17281_s2 + $0x66c] sm:$0xf]  ;;  %v9316_v0 = vld [vmem:[%s17281_s2 + $0x678] sm:$0xf0]  ;;  %v9175_v1 = vor.u32 %v11221_v15, %v9172_v59  ;;  %v11106_v15 = vld [vmem:[%s17281_s2 + $0x1ac] sm:$0xf0] }
 0x3a1   :  { %4797 = vmatpush.bf16.msrb.mxu1 %v9255_v16  ;;  %4775 = vmatpush.bf16.msra.mxu3 %v9411_v4  ;;  %v9047_v16 = vor.u32 %v11189_v54, %v9044_v19  ;;  %v11185_v28 = vld [vmem:[%s17281_s2 + $0x42c] sm:$0xf]  ;;  %v9028_v50 = vld [vmem:[%s17281_s2 + $0x438] sm:$0xf0]  ;;  %v9802_v9 = vld [vmem:[%s17281_s2 + $0x240] sm:$0xf] }
 0x3a2   :  { %4784 = vmatpush.bf16.msrb.mxu0 %v9111_v3  ;;  %4762 = vmatpush.bf16.msra.mxu2 %v9267_v48  ;;  %v11289_v11 = vld [vmem:[%s17281_s2 + $0x76c] sm:$0xf]  ;;  %v9319_v3 = vor.u32 %v11257_v10, %v9316_v0  ;;  %v9444_v30 = vld [vmem:[%s17281_s2 + $0x778] sm:$0xf0]  ;;  %v9031_v5 = vor.u32 %v11185_v28, %v9028_v50  ;;  %v9578_v0 = vld [vmem:[%s17281_s2 + $0x80] sm:$0xf]  ;;  %v9723_v50 = vor.u32 %v11106_v15, %v9722_v38 }
 0x3a3   :  { %v11217_v7 = vld [vmem:[%s17281_s2 + $0x52c] sm:$0xf]  ;;  %v9156_v4 = vld [vmem:[%s17281_s2 + $0x538] sm:$0xf0]  ;;  %v9447_v6 = vor.u32 %v11289_v11, %v9444_v30  ;;  %v11174_v11 = vld [vmem:[%s17281_s2 + $0x3cc] sm:$0xf0] }
 0x3a4   :  { %v11253_v26 = vld [vmem:[%s17281_s2 + $0x64c] sm:$0xf]  ;;  %v9012_v31 = vld [vmem:[%s17281_s2 + $0x418] sm:$0xf0]  ;;  %v11102_v30 = vld [vmem:[%s17281_s2 + $0x18c] sm:$0xf0] }
 0x3a5   :  { %4798 = vmatpush.bf16.msrb.mxu1 %v9239_v39  ;;  %4776 = vmatpush.bf16.msra.mxu3 %v9395_v34  ;;  %v9300_v39 = vld [vmem:[%s17281_s2 + $0x658] sm:$0xf0]  ;;  %v11285_v48 = vld [vmem:[%s17281_s2 + $0x74c] sm:$0xf]  ;;  %v9754_v34 = vld [vmem:[%s17281_s2 + $0x1e0] sm:$0xf] }
 0x3a6   :  { %4811 = vmatpush.bf16.msrb.mxu2 %v9383_v8  ;;  %4785 = vmatpush.bf16.msrb.mxu0 %v9095_v35  ;;  %v11181_v63 = vld [vmem:[%s17281_s2 + $0x40c] sm:$0xf]  ;;  %v9159_v8 = vor.u32 %v11217_v7, %v9156_v4  ;;  %v9428_v37 = vld [vmem:[%s17281_s2 + $0x758] sm:$0xf0]  ;;  %v9303_v35 = vor.u32 %v11253_v26, %v9300_v39  ;;  %v9850_v4 = vld [vmem:[%s17281_s2 + $0x2a0] sm:$0xf] }
 0x3a7   :  { %4763 = vmatmul.bf16.vlgmr.msra.gmra.mxu2 %v14907_v60  ;;  %v11213_v27 = vld [vmem:[%s17281_s2 + $0x50c] sm:$0xf]  ;;  %v9140_v41 = vld [vmem:[%s17281_s2 + $0x518] sm:$0xf0]  ;;  %v9015_v23 = vor.u32 %v11181_v63, %v9012_v31  ;;  %v9562_v26 = vld [vmem:[%s17281_s2 + $0x60] sm:$0xf] }
 0x3a8   :  { %4777 = vmatmul.bf16.vlgmr.msra.gmra.mxu3 %v14927_v29  ;;  %v9143_v52 = vor.u32 %v11213_v27, %v9140_v41  ;;  %v11281_v46 = vld [vmem:[%s17281_s2 + $0x72c] sm:$0xf]  ;;  %v9412_v55 = vld [vmem:[%s17281_s2 + $0x738] sm:$0xf0]  ;;  %v11066_v39 = vld [vmem:[%s17281_s2 + $0x6c] sm:$0xf0] }
 0x3a9   :  { %4825 = vmatpush.bf16.msrb.mxu3 %v9511_v40  ;;  %4799 = vmatpush.bf16.msrb.mxu1 %v9223_v36  ;;  %v11249_v40 = vld [vmem:[%s17281_s2 + $0x62c] sm:$0xf]  ;;  %v9284_v36 = vld [vmem:[%s17281_s2 + $0x638] sm:$0xf0]  ;;  %v9415_v49 = vor.u32 %v11281_v46, %v9412_v55  ;;  %v9978_v31 = vld [vmem:[%s17281_s2 + $0x3a0] sm:$0xf]  ;;  %v9563_v17 = vor.u32 %v11066_v39, %v9562_v26 }
 0x3aa   :  { %4812 = vmatpush.bf16.msrb.mxu2 %v9367_v42  ;;  %4786 = vmatpush.bf16.msrb.mxu0 %v9079_v45  ;;  %v9431_v42 = vor.u32 %v11285_v48, %v9428_v37  ;;  %v9755_v45 = vor.u32 %v11114_v53, %v9754_v34  ;;  %v9287_v47 = vor.u32 %v11249_v40, %v9284_v36  ;;  %v9268_v44 = vld [vmem:[%s17281_s2 + $0x618] sm:$0xf0]  ;;  %v11277_v19 = vld [vmem:[%s17281_s2 + $0x70c] sm:$0xf]  ;;  %v11098_v37 = vld [vmem:[%s17281_s2 + $0x16c] sm:$0xf0] }
 0x3ab   :  { %v9546_v27 = vld [vmem:[%s17281_s2 + $0x40] sm:$0xf]  ;;  %v11062_v41 = vld [vmem:[%s17281_s2 + $0x4c] sm:$0xf0]  ;;  %v11112_v15 = vld [vmem:[%s17281_s2 + $0x1e4] sm:$0xf] }
 0x3ac   :  { %v11166_v40 = vld [vmem:[%s17281_s2 + $0x38c] sm:$0xf0]  ;;  %v9674_v36 = vld [vmem:[%s17281_s2 + $0x140] sm:$0xf]  ;;  %v11108_v39 = vld [vmem:[%s17281_s2 + $0x1c4] sm:$0xf] }
 0x3ad   :  { %4826 = vmatpush.bf16.msrb.mxu3 %v9495_v62  ;;  %4800 = vmatpush.bf16.msrb.mxu1 %v9207_v25  ;;  %v11110_v62 = vld [vmem:[%s17281_s2 + $0x1cc] sm:$0xf0]  ;;  %v11245_v25 = vld [vmem:[%s17281_s2 + $0x60c] sm:$0xf]  ;;  %v9946_v55 = vld [vmem:[%s17281_s2 + $0x360] sm:$0xf] }
 0x3ae   :  { %4813 = vmatpush.bf16.msrb.mxu2 %v9351_v51  ;;  %4787 = vmatpush.bf16.msrb.mxu0 %v9063_v13  ;;  %v9611_v51 = vor.u32 %v11078_v56, %v9610_v43  ;;  %v9594_v13 = vld [vmem:[%s17281_s2 + $0xa0] sm:$0xf]  ;;  %v9739_v32 = vor.u32 %v11110_v62, %v9738_v20  ;;  %v9271_v54 = vor.u32 %v11245_v25, %v9268_v44  ;;  %v11130_v43 = vld [vmem:[%s17281_s2 + $0x26c] sm:$0xf0] }
 0x3af   :  { %v9595_v59 = vor.u32 %v11074_v12, %v9594_v13  ;;  %v9530_v56 = vld [vmem:[%s17281_s2 + $0x20] sm:$0xf]  ;;  %v11162_v62 = vld [vmem:[%s17281_s2 + $0x36c] sm:$0xf0] }
 0x3b0   :  { %v9658_v25 = vld [vmem:[%s17281_s2 + $0x120] sm:$0xf]  ;;  %v11090_v44 = vld [vmem:[%s17281_s2 + $0x12c] sm:$0xf0] }
 0x3b1   :  { %4827 = vmatpush.bf16.msrb.mxu3 %v9479_v2  ;;  %4801 = vmatpush.bf16.msrb.mxu1 %v9191_v22  ;;  %v9396_v2 = vld [vmem:[%s17281_s2 + $0x718] sm:$0xf0]  ;;  %v10010_v22 = vld [vmem:[%s17281_s2 + $0x3e0] sm:$0xf]  ;;  %v11126_v18 = vld [vmem:[%s17281_s2 + $0x24c] sm:$0xf0] }
 0x3b2   :  { %4814 = vmatpush.bf16.msrb.mxu2 %v9335_v14  ;;  %4788 = vmatpush.bf16.msrb.mxu0 %v9047_v16  ;;  %v11178_v14 = vld [vmem:[%s17281_s2 + $0x3ec] sm:$0xf0]  ;;  %v9399_v10 = vor.u32 %v11277_v19, %v9396_v2  ;;  %v9514_v13 = vld [vmem:[%s17281_s2] sm:$0xf]  ;;  %v11080_v2 = vld [vmem:[%s17281_s2 + $0xe4] sm:$0xf] }
 0x3b3   :  { %v11142_v16 = vld [vmem:[%s17281_s2 + $0x2cc] sm:$0xf0]  ;;  %v10011_v28 = vor.u32 %v11178_v14, %v10010_v22  ;;  %v9628_v22 = vld [vmem:[%s17281_s2 + $0xf0] sm:$0xf0]  ;;  %v9642_v14 = vld [vmem:[%s17281_s2 + $0x100] sm:$0xf] }
 0x3b4   :  { %v11054_v12 = vld [vmem:[%s17281_s2 + $0xc] sm:$0xf0] }
 0x3b5   :  { %4828 = vmatpush.bf16.msrb.mxu3 %v9463_v57  ;;  %4802 = vmatpush.bf16.msrb.mxu1 %v9175_v1  ;;  %v9994_v57 = vld [vmem:[%s17281_s2 + $0x3c0] sm:$0xf]  ;;  %v11158_v19 = vld [vmem:[%s17281_s2 + $0x34c] sm:$0xf0] }
 0x3b6   :  { %4815 = vmatpush.bf16.msrb.mxu2 %v9319_v3  ;;  %4789 = vmatpush.bf16.msrb.mxu0 %v9031_v5  ;;  %v9706_v3 = vld [vmem:[%s17281_s2 + $0x180] sm:$0xf]  ;;  %v11138_v5 = vld [vmem:[%s17281_s2 + $0x2ac] sm:$0xf0]  ;;  %v9995_v48 = vor.u32 %v11174_v11, %v9994_v57  ;;  %v3643_v11 = vld [vmem:[#allocation2 + $0x20] sm:$0xff] }
 0x3b7   :  { %v9707_v63 = vor.u32 %v11102_v30, %v9706_v3  ;;  %v11086_v38 = vld [vmem:[%s17281_s2 + $0x10c] sm:$0xf0]  ;;  %v11076_v3 = vld [vmem:[%s17281_s2 + $0xc4] sm:$0xf]  ;;  %v9612_v30 = vld [vmem:[%s17281_s2 + $0xd0] sm:$0xf0] }
 0x3b8   :  { %v9643_v57 = vor.u32 %v11086_v38, %v9642_v14  ;;  %v11154_v26 = vld [vmem:[%s17281_s2 + $0x32c] sm:$0xf0] }
 0x3b9   :  { %4829 = vmatpush.bf16.msrb.mxu3 %v9447_v6  ;;  %4803 = vmatpush.bf16.msrb.mxu1 %v9159_v8  ;;  %v9851_v6 = vor.u32 %v11138_v5, %v9850_v4  ;;  %v9690_v8 = vld [vmem:[%s17281_s2 + $0x160] sm:$0xf] }
 0x3ba   :  { %4816 = vmatpush.bf16.msrb.mxu2 %v9303_v35  ;;  %4790 = vmatpush.bf16.msrb.mxu0 %v9015_v23  ;;  %v11134_v35 = vld [vmem:[%s17281_s2 + $0x28c] sm:$0xf0]  ;;  %v9691_v34 = vor.u32 %v11098_v37, %v9690_v8  ;;  %v9962_v23 = vld [vmem:[%s17281_s2 + $0x380] sm:$0xf]  ;;  %v9884_v8 = vld [vmem:[%s17281_s2 + $0x2f0] sm:$0xf0] }
 0x3bb   :  { %v9835_v53 = vor.u32 %v11134_v35, %v9834_v21  ;;  %v9914_v5 = vld [vmem:[%s17281_s2 + $0x320] sm:$0xf]  ;;  %v11072_v21 = vld [vmem:[%s17281_s2 + $0xa4] sm:$0xf]  ;;  %v9596_v35 = vld [vmem:[%s17281_s2 + $0xb0] sm:$0xf0] }
 0x3bc   :  { %v9915_v37 = vor.u32 %v11154_v26, %v9914_v5  ;;  %v11092_v5 = vld [vmem:[%s17281_s2 + $0x144] sm:$0xf]  ;;  %v9676_v26 = vld [vmem:[%s17281_s2 + $0x150] sm:$0xf0] }
 0x3bd   :  { %4830 = vmatpush.bf16.msrb.mxu3 %v9431_v42  ;;  %4804 = vmatpush.bf16.msrb.mxu1 %v9143_v52  ;;  %v9547_v42 = vor.u32 %v11062_v41, %v9546_v27  ;;  %v9818_v52 = vld [vmem:[%s17281_s2 + $0x260] sm:$0xf] }
 0x3be   :  { %5479 = vmatpush.bf16.msra.mxu0 %v9627_v58  ;;  %4817 = vmatpush.bf16.msrb.mxu2 %v9287_v47  ;;  %v11094_v58 = vld [vmem:[%s17281_s2 + $0x14c] sm:$0xf0]  ;;  %v9963_v47 = vor.u32 %v11166_v40, %v9962_v23  ;;  %v9819_v20 = vor.u32 %v11130_v43, %v9818_v52  ;;  %v3640_v40 = vld [vmem:[#allocation2 + $0x58] sm:$0xff]  ;;  %v9724_v52 = vld [vmem:[%s17281_s2 + $0x1b0] sm:$0xf0] }
 0x3bf   :  { %4791 = vmatmul.bf16.vlgmr.msrb.gmra.mxu0 %v14864_v33  ;;  %v9866_v33 = vld [vmem:[%s17281_s2 + $0x2c0] sm:$0xf]  ;;  %v9675_v46 = vor.u32 %v11094_v58, %v9674_v36  ;;  %v11150_v23 = vld [vmem:[%s17281_s2 + $0x30c] sm:$0xf0]  ;;  %v10012_v58 = vld [vmem:[%s17281_s2 + $0x3f0] sm:$0xf0] }
 0x3c0   :  { %4805 = vmatmul.bf16.vlgmr.msrb.gmra.mxu1 %v14881_v24  ;;  %v11070_v24 = vld [vmem:[%s17281_s2 + $0x8c] sm:$0xf0]  ;;  %v9867_v1 = vor.u32 %v11142_v16, %v9866_v33  ;;  %v9756_v33 = vld [vmem:[%s17281_s2 + $0x1f0] sm:$0xf0]  ;;  %v9786_v16 = vld [vmem:[%s17281_s2 + $0x220] sm:$0xf] }
 0x3c1   :  { %5493 = vmatpush.bf16.msra.mxu1 %v9755_v45  ;;  %4831 = vmatpush.bf16.msrb.mxu3 %v9415_v49  ;;  %v9579_v7 = vor.u32 %v11070_v24, %v9578_v0  ;;  %v11058_v45 = vld [vmem:[%s17281_s2 + $0x2c] sm:$0xf0]  ;;  %v9930_v49 = vld [vmem:[%s17281_s2 + $0x340] sm:$0xf]  ;;  %v9631_v0 = vor.u32 %v11080_v2, %v9628_v22  ;;  %v3638_v24 = vld [vmem:[#allocation2 + $0x30] sm:$0xff] }
 0x3c2   :  { %5480 = vmatpush.bf16.msra.mxu0 %v9611_v51  ;;  %4818 = vmatpush.bf16.msrb.mxu2 %v9271_v54  ;;  %v9531_v51 = vor.u32 %v11058_v45, %v9530_v56  ;;  %v9659_v54 = vor.u32 %v11090_v44, %v9658_v25  ;;  %v3644_v43 = vld [vmem:[#allocation2 + $0x10] sm:$0xff]  ;;  %v9599_v56 = vor.u32 %v11072_v21, %v9596_v35  ;;  %v11140_v45 = vld [vmem:[%s17281_s2 + $0x2c4] sm:$0xf]  ;;  %v9852_v2 = vld [vmem:[%s17281_s2 + $0x2b0] sm:$0xf0] }
 0x3c3   :  { %v3641_v25 = vld [vmem:[#allocation2 + $0x18] sm:$0xff]  ;;  %v9948_v35 = vld [vmem:[%s17281_s2 + $0x370] sm:$0xf0] }
 0x3c4   :  { %v3645_v44 = vld [vmem:[#allocation2 + $0x38] sm:$0xff] }
 0x3c5   :  { %5494 = vmatpush.bf16.msra.mxu1 %v9739_v32  ;;  %4832 = vmatpush.bf16.msrb.mxu3 %v9399_v10  ;;  %v9947_v32 = vor.u32 %v11162_v62, %v9946_v55  ;;  %v11122_v10 = vld [vmem:[%s17281_s2 + $0x22c] sm:$0xf0]  ;;  %v11068_v55 = vld [vmem:[%s17281_s2 + $0x84] sm:$0xf]  ;;  %v15545_v14 = vpack.c.bf16 %v3645_v44, %v3641_v25  ;;  %v11115_v25 = vld [vmem:[%s17281_s2 + $0x1f4] sm:$0xf0] }
 0x3c6   :  { %5507 = vmatpush.bf16.msra.mxu2 %v9883_v61  ;;  %5481 = vmatpush.bf16.msra.mxu0 %v9595_v59  ;;  %v9803_v61 = vor.u32 %v11126_v18, %v9802_v9  ;;  %v9515_v59 = vor.u32 %v11054_v12, %v9514_v13  ;;  %v9787_v4 = vor.u32 %v11122_v10, %v9786_v16  ;;  %v11172_v9 = vld [vmem:[%s17281_s2 + $0x3c4] sm:$0xf]  ;;  %v9996_v13 = vld [vmem:[%s17281_s2 + $0x3d0] sm:$0xf0] }
 0x3c7   :  { %4819 = vmatmul.bf16.vlgmr.msrb.gmra.mxu2 %v14907_v60  ;;  %v11170_v60 = vld [vmem:[%s17281_s2 + $0x3ac] sm:$0xf0]  ;;  %v15521_v18 = vpack.c.bf16 %v3644_v43, %v3640_v40  ;;  %v11100_v12 = vld [vmem:[%s17281_s2 + $0x184] sm:$0xf]  ;;  %v9999_v38 = vor.u32 %v11172_v9, %v9996_v13  ;;  %v9980_v16 = vld [vmem:[%s17281_s2 + $0x3b0] sm:$0xf0] }
 0x3c8   :  { %4833 = vmatmul.bf16.vlgmr.msrb.gmra.mxu3 %v14927_v29  ;;  %v9979_v29 = vor.u32 %v11170_v60, %v9978_v31  ;;  %v11118_v31 = vld [vmem:[%s17281_s2 + $0x20c] sm:$0xf0]  ;;  %v11144_v60 = vld [vmem:[%s17281_s2 + $0x2e4] sm:$0xf]  ;;  %v9932_v43 = vld [vmem:[%s17281_s2 + $0x350] sm:$0xf0] }
 0x3c9   :  { %5521 = vmatpush.bf16.msra.mxu3 %v10011_v28  ;;  %5495 = vmatpush.bf16.msra.mxu1 %v9723_v50  ;;  %v3642_v28 = vld [vmem:[#allocation2 + $0x40] sm:$0xff]  ;;  %v9931_v50 = vor.u32 %v11158_v19, %v9930_v49  ;;  %v9887_v36 = vor.u32 %v11144_v60, %v9884_v8  ;;  %v11136_v19 = vld [vmem:[%s17281_s2 + $0x2a4] sm:$0xf]  ;;  %v9679_v8 = vor.u32 %v11092_v5, %v9676_v26  ;;  %v11107_v5 = vld [vmem:[%s17281_s2 + $0x1b4] sm:$0xf0] }
 0x3ca   :  { %5508 = vmatpush.bf16.msra.mxu2 %v9867_v1  ;;  %5482 = vmatpush.bf16.msra.mxu0 %v9579_v7  ;;  %v3639_v1 = vld [vmem:[#allocation2] sm:$0xff]  ;;  %v9759_v7 = vor.u32 %v11112_v15, %v9756_v33  ;;  %v11064_v22 = vld [vmem:[%s17281_s2 + $0x64] sm:$0xf]  ;;  %v9855_v33 = vor.u32 %v11136_v19, %v9852_v2 }
 0x3cb   :  { %v15484_v27 = vpack.c.bf16 %v3643_v11, %v3639_v1  ;;  %v11096_v10 = vld [vmem:[%s17281_s2 + $0x164] sm:$0xf]  ;;  %v9548_v1 = vld [vmem:[%s17281_s2 + $0x50] sm:$0xf0] }
 0x3cc   :  { %v11156_v40 = vld [vmem:[%s17281_s2 + $0x344] sm:$0xf] }
 0x3cd   :  { %5522 = vmatpush.bf16.msra.mxu3 %v9995_v48  ;;  %5496 = vmatpush.bf16.msra.mxu1 %v9707_v63  ;;  %v9740_v48 = vld [vmem:[%s17281_s2 + $0x1d0] sm:$0xf0]  ;;  %v9770_v63 = vld [vmem:[%s17281_s2 + $0x200] sm:$0xf]  ;;  %v11120_v44 = vld [vmem:[%s17281_s2 + $0x224] sm:$0xf] }
 0x3ce   :  { %5509 = vmatpush.bf16.msra.mxu2 %v9851_v6  ;;  %5483 = vmatpush.bf16.msra.mxu0 %v9563_v17  ;;  %v9615_v6 = vor.u32 %v11076_v3, %v9612_v30  ;;  %v15476_v17 = vpack.c.bf16 %v3642_v28, %v3638_v24  ;;  %v9743_v41 = vor.u32 %v11108_v39, %v9740_v48  ;;  %v11132_v28 = vld [vmem:[%s17281_s2 + $0x284] sm:$0xf] }
 0x3cf   :  { %v11164_v30 = vld [vmem:[%s17281_s2 + $0x384] sm:$0xf] }
 0x3d0   :  { %v11128_v48 = vld [vmem:[%s17281_s2 + $0x264] sm:$0xf] }
 0x3d1   :  { %5523 = vmatpush.bf16.msra.mxu3 %v9979_v29  ;;  %5497 = vmatpush.bf16.msra.mxu1 %v9691_v34  ;;  %v9771_v29 = vor.u32 %v11118_v31, %v9770_v63  ;;  %v9898_v34 = vld [vmem:[%s17281_s2 + $0x300] sm:$0xf]  ;;  %v9820_v63 = vld [vmem:[%s17281_s2 + $0x270] sm:$0xf0]  ;;  %v11056_v31 = vld [vmem:[%s17281_s2 + $0x24] sm:$0xf] }
 0x3d2   :  { %5510 = vmatpush.bf16.msra.mxu2 %v9835_v53  ;;  %5484 = vmatpush.bf16.msra.mxu0 %v9547_v42  ;;  %v11176_v53 = vld [vmem:[%s17281_s2 + $0x3e4] sm:$0xf]  ;;  %v9823_v21 = vor.u32 %v11128_v48, %v9820_v63  ;;  %v11143_v48 = vld [vmem:[%s17281_s2 + $0x2d4] sm:$0xf0] }
 0x3d3   :  { %v11104_v42 = vld [vmem:[%s17281_s2 + $0x1a4] sm:$0xf]  ;;  %v10015_v62 = vor.u32 %v11176_v53, %v10012_v58  ;;  %v9804_v53 = vld [vmem:[%s17281_s2 + $0x250] sm:$0xf0] }
 0x3d4   :  { %v9516_v58 = vld [vmem:[%s17281_s2 + $0x10] sm:$0xf0]  ;;  %v11152_v2 = vld [vmem:[%s17281_s2 + $0x324] sm:$0xf] }
 0x3d5   :  { %5524 = vmatpush.bf16.msra.mxu3 %v9963_v47  ;;  %5498 = vmatpush.bf16.msra.mxu1 %v9675_v46  ;;  %v9868_v47 = vld [vmem:[%s17281_s2 + $0x2d0] sm:$0xf0]  ;;  %v9899_v46 = vor.u32 %v11150_v23, %v9898_v34  ;;  %v11124_v23 = vld [vmem:[%s17281_s2 + $0x244] sm:$0xf] }
 0x3d6   :  { %5511 = vmatpush.bf16.msra.mxu2 %v9819_v20  ;;  %5485 = vmatpush.bf16.msra.mxu0 %v9531_v51  ;;  %v9580_v20 = vld [vmem:[%s17281_s2 + $0x90] sm:$0xf0]  ;;  %v9727_v51 = vor.u32 %v11104_v42, %v9724_v52  ;;  %v9871_v49 = vor.u32 %v11140_v45, %v9868_v47  ;;  %v11083_v45 = vld [vmem:[%s17281_s2 + $0xf4] sm:$0xf0]  ;;  %v9807_v47 = vor.u32 %v11124_v23, %v9804_v53  ;;  %v9858_v53 = vld [vmem:[%s17281_s2 + $0x2a8] sm:$0xf] }
 0x3d9   :  { %5525 = vmatpush.bf16.msra.mxu3 %v9947_v32  ;;  %5499 = vmatpush.bf16.msra.mxu1 %v9659_v54  ;;  %v9708_v32 = vld [vmem:[%s17281_s2 + $0x190] sm:$0xf0]  ;;  %v9583_v54 = vor.u32 %v11068_v55, %v9580_v20  ;;  %v9762_v20 = vld [vmem:[%s17281_s2 + $0x1e8] sm:$0xf] }
 0x3da   :  { %5512 = vmatpush.bf16.msra.mxu2 %v9803_v61  ;;  %5486 = vmatpush.bf16.msra.mxu0 %v9515_v59  ;;  %v9564_v61 = vld [vmem:[%s17281_s2 + $0x70] sm:$0xf0]  ;;  %v9711_v15 = vor.u32 %v11100_v12, %v9708_v32  ;;  %v11168_v59 = vld [vmem:[%s17281_s2 + $0x3a4] sm:$0xf]  ;;  %v9618_v12 = vld [vmem:[%s17281_s2 + $0xc8] sm:$0xf] }
 0x3db   :  { %v9567_v24 = vor.u32 %v11064_v22, %v9564_v61  ;;  %v9983_v11 = vor.u32 %v11168_v59, %v9980_v16  ;;  %v9644_v55 = vld [vmem:[%s17281_s2 + $0x110] sm:$0xf0]  ;;  %v11079_v32 = vld [vmem:[%s17281_s2 + $0xd4] sm:$0xf0]  ;;  %v9746_v61 = vld [vmem:[%s17281_s2 + $0x1c8] sm:$0xf] }
 0x3dc   :  { %v9916_v22 = vld [vmem:[%s17281_s2 + $0x330] sm:$0xf0]  ;;  %v9890_v16 = vld [vmem:[%s17281_s2 + $0x2e8] sm:$0xf] }
 0x3dd   :  { %5526 = vmatpush.bf16.msra.mxu3 %v9931_v50  ;;  %5500 = vmatpush.bf16.msra.mxu1 %v9643_v57  ;;  %v9836_v50 = vld [vmem:[%s17281_s2 + $0x290] sm:$0xf0]  ;;  %v11060_v57 = vld [vmem:[%s17281_s2 + $0x44] sm:$0xf] }
 0x3de   :  { %5535 = vmatpush.bf16.msrb.mxu0 %v9631_v0  ;;  %5513 = vmatpush.bf16.msra.mxu2 %v9787_v4  ;;  %v9692_v0 = vld [vmem:[%s17281_s2 + $0x170] sm:$0xf0]  ;;  %v9551_v39 = vor.u32 %v11060_v57, %v9548_v1  ;;  %v11148_v1 = vld [vmem:[%s17281_s2 + $0x304] sm:$0xf] }
 0x3df   :  { %5487 = vmatmul.bf16.vlgmr.msra.gmra.mxu0 %v15476_v17  ;;  %v9695_v3 = vor.u32 %v11096_v10, %v9692_v0  ;;  %v9964_v4 = vld [vmem:[%s17281_s2 + $0x390] sm:$0xf0]  ;;  %v11147_v10 = vld [vmem:[%s17281_s2 + $0x2f4] sm:$0xf0]  ;;  %v9919_v0 = vor.u32 %v11152_v2, %v9916_v22 }
 0x3e0   :  { %5501 = vmatmul.bf16.vlgmr.msra.gmra.mxu1 %v15484_v27  ;;  %v9967_v60 = vor.u32 %v11164_v30, %v9964_v4  ;;  %v9772_v59 = vld [vmem:[%s17281_s2 + $0x210] sm:$0xf0]  ;;  %v9891_v30 = vor.u32 %v11147_v10, %v9890_v16  ;;  %v9730_v4 = vld [vmem:[%s17281_s2 + $0x1a8] sm:$0xf]  ;;  %v11095_v2 = vld [vmem:[%s17281_s2 + $0x154] sm:$0xf0] }
 0x3e1   :  { %5549 = vmatpush.bf16.msrb.mxu1 %v9759_v7  ;;  %5527 = vmatpush.bf16.msra.mxu3 %v9915_v37  ;;  %v9839_v7 = vor.u32 %v11132_v28, %v9836_v50  ;;  %v11160_v37 = vld [vmem:[%s17281_s2 + $0x364] sm:$0xf]  ;;  %v11075_v28 = vld [vmem:[%s17281_s2 + $0xb4] sm:$0xf0] }
 0x3e2   :  { %5536 = vmatpush.bf16.msrb.mxu0 %v9615_v6  ;;  %5514 = vmatpush.bf16.msra.mxu2 %v9771_v29  ;;  %v9532_v6 = vld [vmem:[%s17281_s2 + $0x30] sm:$0xf0]  ;;  %v9951_v42 = vor.u32 %v11160_v37, %v9948_v35 }
 0x3e3   :  { %v9660_v29 = vld [vmem:[%s17281_s2 + $0x130] sm:$0xf0]  ;;  %v9535_v34 = vor.u32 %v11056_v31, %v9532_v6  ;;  %v9586_v31 = vld [vmem:[%s17281_s2 + $0x88] sm:$0xf]  ;;  %v11071_v6 = vld [vmem:[%s17281_s2 + $0x94] sm:$0xf0] }
 0x3e4   :  { %v9587_v23 = vor.u32 %v11071_v6, %v9586_v31  ;;  %v11081_v31 = vld [vmem:[%s17281_s2 + $0xec] sm:$0xf]  ;;  %v9636_v6 = vld [vmem:[%s17281_s2 + $0xf8] sm:$0xf0] }
 0x3e5   :  { %5550 = vmatpush.bf16.msrb.mxu1 %v9743_v41  ;;  %5528 = vmatpush.bf16.msra.mxu3 %v9899_v46  ;;  %v11088_v41 = vld [vmem:[%s17281_s2 + $0x124] sm:$0xf] }
 0x3e6   :  { %5563 = vmatpush.bf16.msrb.mxu2 %v9887_v36  ;;  %5537 = vmatpush.bf16.msrb.mxu0 %v9599_v56  ;;  %v11052_v36 = vld [vmem:[%s17281_s2 + $0x4] sm:$0xf]  ;;  %v9663_v52 = vor.u32 %v11088_v41, %v9660_v29  ;;  %v9634_v56 = vld [vmem:[%s17281_s2 + $0xe8] sm:$0xf]  ;;  %v11175_v41 = vld [vmem:[%s17281_s2 + $0x3d4] sm:$0xf0] }
 0x3e7   :  { %5515 = vmatmul.bf16.vlgmr.msra.gmra.mxu2 %v15521_v18  ;;  %v11084_v46 = vld [vmem:[%s17281_s2 + $0x104] sm:$0xf]  ;;  %v9635_v9 = vor.u32 %v11083_v45, %v9634_v56  ;;  %v9714_v29 = vld [vmem:[%s17281_s2 + $0x188] sm:$0xf] }
 0x3e8   :  { %5529 = vmatmul.bf16.vlgmr.msra.gmra.mxu3 %v15545_v14  ;;  %v9647_v13 = vor.u32 %v11084_v46, %v9644_v55  ;;  %v9986_v56 = vld [vmem:[%s17281_s2 + $0x3a8] sm:$0xf]  ;;  %v11099_v55 = vld [vmem:[%s17281_s2 + $0x174] sm:$0xf0] }
 0x3e9   :  { %5577 = vmatpush.bf16.msrb.mxu3 %v10015_v62  ;;  %5551 = vmatpush.bf16.msrb.mxu1 %v9727_v51  ;;  %v9519_v62 = vor.u32 %v11052_v36, %v9516_v58  ;;  %v9788_v51 = vld [vmem:[%s17281_s2 + $0x230] sm:$0xf0]  ;;  %v9570_v36 = vld [vmem:[%s17281_s2 + $0x68] sm:$0xf]  ;;  %v11067_v58 = vld [vmem:[%s17281_s2 + $0x74] sm:$0xf0] }
 0x3ea   :  { %5564 = vmatpush.bf16.msrb.mxu2 %v9871_v49  ;;  %5538 = vmatpush.bf16.msrb.mxu0 %v9583_v54  ;;  %v9935_v49 = vor.u32 %v11156_v40, %v9932_v43  ;;  %v9763_v54 = vor.u32 %v11115_v25, %v9762_v20  ;;  %v9791_v19 = vor.u32 %v11120_v44, %v9788_v51  ;;  %v11139_v40 = vld [vmem:[%s17281_s2 + $0x2b4] sm:$0xf0]  ;;  %v9698_v46 = vld [vmem:[%s17281_s2 + $0x168] sm:$0xf] }
 0x3eb   :  { %v9859_v45 = vor.u32 %v11139_v40, %v9858_v53  ;;  %v9571_v20 = vor.u32 %v11067_v58, %v9570_v36  ;;  %v11135_v25 = vld [vmem:[%s17281_s2 + $0x294] sm:$0xf0]  ;;  %v9554_v44 = vld [vmem:[%s17281_s2 + $0x48] sm:$0xf]  ;;  %v9639_v40 = vor.u32 %v11081_v31, %v9636_v6 }
 0x3ec   :  { %v11063_v51 = vld [vmem:[%s17281_s2 + $0x54] sm:$0xf0] }
 0x3ed   :  { %5578 = vmatpush.bf16.msrb.mxu3 %v9999_v38  ;;  %5552 = vmatpush.bf16.msrb.mxu1 %v9711_v15  ;;  %v11111_v38 = vld [vmem:[%s17281_s2 + $0x1d4] sm:$0xf0]  ;;  %v11116_v15 = vld [vmem:[%s17281_s2 + $0x204] sm:$0xf]  ;;  %v9555_v22 = vor.u32 %v11063_v51, %v9554_v44  ;;  %v9748_v44 = vld [vmem:[%s17281_s2 + $0x1d8] sm:$0xf0] }
 0x3ee   :  { %5565 = vmatpush.bf16.msrb.mxu2 %v9855_v33  ;;  %5539 = vmatpush.bf16.msrb.mxu0 %v9567_v24  ;;  %v9619_v33 = vor.u32 %v11079_v32, %v9618_v12  ;;  %v9602_v24 = vld [vmem:[%s17281_s2 + $0xa8] sm:$0xf]  ;;  %v9747_v50 = vor.u32 %v11111_v38, %v9746_v61  ;;  %v9775_v57 = vor.u32 %v11116_v15, %v9772_v59  ;;  %v11131_v38 = vld [vmem:[%s17281_s2 + $0x274] sm:$0xf0] }
 0x3ef   :  { %v9603_v26 = vor.u32 %v11075_v28, %v9602_v24  ;;  %v9970_v12 = vld [vmem:[%s17281_s2 + $0x388] sm:$0xf]  ;;  %v11059_v59 = vld [vmem:[%s17281_s2 + $0x34] sm:$0xf0] }
 0x3f0   :  { %v9826_v61 = vld [vmem:[%s17281_s2 + $0x268] sm:$0xf]  ;;  %v11163_v28 = vld [vmem:[%s17281_s2 + $0x374] sm:$0xf0] }
 0x3f1   :  { %5579 = vmatpush.bf16.msrb.mxu3 %v9983_v11  ;;  %5553 = vmatpush.bf16.msrb.mxu1 %v9695_v3  ;;  %v9900_v11 = vld [vmem:[%s17281_s2 + $0x310] sm:$0xf0]  ;;  %v10018_v3 = vld [vmem:[%s17281_s2 + $0x3e8] sm:$0xf]  ;;  %v9827_v24 = vor.u32 %v11131_v38, %v9826_v61  ;;  %v11123_v53 = vld [vmem:[%s17281_s2 + $0x234] sm:$0xf0] }
 0x3f2   :  { %5566 = vmatpush.bf16.msrb.mxu2 %v9839_v7  ;;  %5540 = vmatpush.bf16.msrb.mxu0 %v9551_v39  ;;  %v11179_v7 = vld [vmem:[%s17281_s2 + $0x3f4] sm:$0xf0]  ;;  %v9874_v39 = vld [vmem:[%s17281_s2 + $0x2c8] sm:$0xf]  ;;  %v9903_v63 = vor.u32 %v11148_v1, %v9900_v11 }
 0x3f3   :  { %v9875_v35 = vor.u32 %v11143_v48, %v9874_v39  ;;  %v9538_v15 = vld [vmem:[%s17281_s2 + $0x28] sm:$0xf] }
 0x3f4   :  { %v9539_v11 = vor.u32 %v11059_v59, %v9538_v15  ;;  %v9778_v51 = vld [vmem:[%s17281_s2 + $0x208] sm:$0xf]  ;;  %v11151_v59 = vld [vmem:[%s17281_s2 + $0x314] sm:$0xf0] }
 0x3f5   :  { %5580 = vmatpush.bf16.msrb.mxu3 %v9967_v60  ;;  %5554 = vmatpush.bf16.msrb.mxu1 %v9679_v8  ;;  %v10019_v60 = vor.u32 %v11179_v7, %v10018_v3  ;;  %v9731_v8 = vor.u32 %v11107_v5, %v9730_v4  ;;  %v9810_v3 = vld [vmem:[%s17281_s2 + $0x248] sm:$0xf]  ;;  %v11055_v5 = vld [vmem:[%s17281_s2 + $0x14] sm:$0xf0] }
 0x3f6   :  { %5567 = vmatpush.bf16.msrb.mxu2 %v9823_v21  ;;  %5541 = vmatpush.bf16.msrb.mxu0 %v9535_v34  ;;  %v10002_v21 = vld [vmem:[%s17281_s2 + $0x3c8] sm:$0xf]  ;;  %v11103_v34 = vld [vmem:[%s17281_s2 + $0x194] sm:$0xf0] }
 0x3f7   :  { %v9715_v43 = vor.u32 %v11103_v34, %v9714_v29  ;;  %v9938_v7 = vld [vmem:[%s17281_s2 + $0x348] sm:$0xf]  ;;  %v9764_v34 = vld [vmem:[%s17281_s2 + $0x1f8] sm:$0xf0] }
 0x3f8   :  { %v9522_v4 = vld [vmem:[%s17281_s2 + $0x8] sm:$0xf] }
 0x3f9   :  { %5581 = vmatpush.bf16.msrb.mxu3 %v9951_v42  ;;  %5555 = vmatpush.bf16.msrb.mxu1 %v9663_v52  ;;  %v15718_v37 = vpop.f32.mrf.mxu0  ;;  %v10003_v52 = vor.u32 %v11175_v41, %v10002_v21  ;;  %v11087_v21 = vld [vmem:[%s17281_s2 + $0x114] sm:$0xf0]  ;;  %v9523_v29 = vor.u32 %v11055_v5, %v9522_v4  ;;  %v9906_v15 = vld [vmem:[%s17281_s2 + $0x308] sm:$0xf]  ;;  %v11069_v4 = vld [vmem:[%s17281_s2 + $0x8c] sm:$0xf] }
 0x3fa   :  { %5568 = vmatpush.bf16.msrb.mxu2 %v9807_v47  ;;  %5542 = vmatpush.bf16.msrb.mxu0 %v9519_v62  ;;  %v11171_v47 = vld [vmem:[%s17281_s2 + $0x3b4] sm:$0xf0]  ;;  %v9842_v62 = vld [vmem:[%s17281_s2 + $0x288] sm:$0xf]  ;;  %v9588_v5 = vld [vmem:[%s17281_s2 + $0x98] sm:$0xf0] }
 0x3fb   :  { %v9843_v32 = vor.u32 %v11135_v25, %v9842_v62  ;;  %v11109_v62 = vld [vmem:[%s17281_s2 + $0x1cc] sm:$0xf] }
 0x3fc   :  { %v9751_v61 = vor.u32 %v11109_v62, %v9748_v44  ;;  %v11133_v44 = vld [vmem:[%s17281_s2 + $0x28c] sm:$0xf] }
 0x3fd   :  { %5582 = vmatpush.bf16.msrb.mxu3 %v9935_v49  ;;  %5556 = vmatpush.bf16.msrb.mxu1 %v9647_v13  ;;  %v15745_v42 = vpop.f32.mrf.mxu1  ;;  %v9699_v49 = vor.u32 %v11099_v55, %v9698_v46  ;;  %v9922_v55 = vld [vmem:[%s17281_s2 + $0x328] sm:$0xf] }
 0x3fe   :  { %5591 = vmatpush.bf16.msra.mxu0 %v9635_v9  ;;  %5569 = vmatpush.bf16.msrb.mxu2 %v9791_v19  ;;  %v9987_v9 = vor.u32 %v11171_v47, %v9986_v56  ;;  %v9682_v19 = vld [vmem:[%s17281_s2 + $0x148] sm:$0xf]  ;;  %v9620_v56 = vld [vmem:[%s17281_s2 + $0xd8] sm:$0xf0] }
 0x3ff   :  { %5543 = vmatmul.bf16.vlgmr.msrb.gmra.mxu0 %v15476_v17  ;;  %v9683_v10 = vor.u32 %v11095_v2, %v9682_v19  ;;  %v11073_v19 = vld [vmem:[%s17281_s2 + $0xac] sm:$0xf]  ;;  %v9604_v2 = vld [vmem:[%s17281_s2 + $0xb8] sm:$0xf0] }
 0x400   :  { %5557 = vmatmul.bf16.vlgmr.msrb.gmra.mxu1 %v15484_v27 }
 0x401   :  { %5605 = vmatpush.bf16.msra.mxu1 %v9763_v54  ;;  %5583 = vmatpush.bf16.msrb.mxu3 %v9919_v0  ;;  %v15772_v13 = vpop.f32.mrf.mxu0  ;;  %v11167_v54 = vld [vmem:[%s17281_s2 + $0x394] sm:$0xf0]  ;;  %v9954_v0 = vld [vmem:[%s17281_s2 + $0x368] sm:$0xf] }
 0x402   :  { %5592 = vmatpush.bf16.msra.mxu0 %v9619_v33  ;;  %5570 = vmatpush.bf16.msrb.mxu2 %v9775_v57  ;;  %v9971_v16 = vor.u32 %v11167_v54, %v9970_v12  ;;  %v11091_v57 = vld [vmem:[%s17281_s2 + $0x134] sm:$0xf0]  ;;  %v11145_v12 = vld [vmem:[%s17281_s2 + $0x2ec] sm:$0xf] }
 0x405   :  { %5606 = vmatpush.bf16.msra.mxu1 %v9747_v50  ;;  %5584 = vmatpush.bf16.msrb.mxu3 %v9903_v63  ;;  %v15798_v33 = vpop.f32.mrf.mxu1  ;;  %v9666_v50 = vld [vmem:[%s17281_s2 + $0x128] sm:$0xf]  ;;  %v11159_v63 = vld [vmem:[%s17281_s2 + $0x354] sm:$0xf0] }
 0x406   :  { %5619 = vmatpush.bf16.msra.mxu2 %v9891_v30  ;;  %5593 = vmatpush.bf16.msra.mxu0 %v9603_v26  ;;  %v11127_v30 = vld [vmem:[%s17281_s2 + $0x254] sm:$0xf0]  ;;  %v9955_v26 = vor.u32 %v11163_v28, %v9954_v0  ;;  %v9667_v39 = vor.u32 %v11091_v57, %v9666_v50  ;;  %v9939_v58 = vor.u32 %v11159_v63, %v9938_v7  ;;  %v11105_v28 = vld [vmem:[%s17281_s2 + $0x1ac] sm:$0xf]  ;;  %v9732_v50 = vld [vmem:[%s17281_s2 + $0x1b8] sm:$0xf0] }
 0x407   :  { %5571 = vmatmul.bf16.vlgmr.msrb.gmra.mxu2 %v15521_v18  ;;  %v15812_v1 = vpop.f32.mrf.mxu2  ;;  %v9607_v57 = vor.u32 %v11073_v19, %v9604_v2  ;;  %v9907_v7 = vor.u32 %v11151_v59, %v9906_v15  ;;  %v11173_v63 = vld [vmem:[%s17281_s2 + $0x3cc] sm:$0xf]  ;;  %v9684_v59 = vld [vmem:[%s17281_s2 + $0x158] sm:$0xf0] }
 0x408   :  { %5585 = vmatmul.bf16.vlgmr.msrb.gmra.mxu3 %v15545_v14  ;;  %v11165_v2 = vld [vmem:[%s17281_s2 + $0x38c] sm:$0xf] }
 0x409   :  { %5633 = vmatpush.bf16.msra.mxu3 %v10019_v60  ;;  %5607 = vmatpush.bf16.msra.mxu1 %v9731_v8  ;;  %v4680_v48 = vpop.f32.mrf.mxu0  ;;  %v9811_v60 = vor.u32 %v11127_v30, %v9810_v3  ;;  %v9650_v8 = vld [vmem:[%s17281_s2 + $0x108] sm:$0xf]  ;;  %v9876_v3 = vld [vmem:[%s17281_s2 + $0x2d8] sm:$0xf0]  ;;  %v11093_v15 = vld [vmem:[%s17281_s2 + $0x14c] sm:$0xf] }
 0x40a   :  { %5620 = vmatpush.bf16.msra.mxu2 %v9875_v35  ;;  %5594 = vmatpush.bf16.msra.mxu0 %v9587_v23  ;;  %v11113_v35 = vld [vmem:[%s17281_s2 + $0x1ec] sm:$0xf]  ;;  %v9794_v23 = vld [vmem:[%s17281_s2 + $0x228] sm:$0xf] }
 0x40b   :  { %v15847_v41 = vpop.f32.mrf.mxu3  ;;  %v9767_v47 = vor.u32 %v11113_v35, %v9764_v34  ;;  %v9795_v46 = vor.u32 %v11123_v53, %v9794_v23  ;;  %v11137_v34 = vld [vmem:[%s17281_s2 + $0x2ac] sm:$0xf]  ;;  %v9860_v23 = vld [vmem:[%s17281_s2 + $0x2b8] sm:$0xf0] }
 0x40c   :  { %v11065_v53 = vld [vmem:[%s17281_s2 + $0x6c] sm:$0xf] }
 0x40d   :  { %5634 = vmatpush.bf16.msra.mxu3 %v10003_v52  ;;  %5608 = vmatpush.bf16.msra.mxu1 %v9715_v43  ;;  %v4694_v36 = vpop.f32.mrf.mxu1  ;;  %v9651_v52 = vor.u32 %v11087_v21, %v9650_v8  ;;  %v11077_v43 = vld [vmem:[%s17281_s2 + $0xcc] sm:$0xf]  ;;  %v9716_v21 = vld [vmem:[%s17281_s2 + $0x198] sm:$0xf0] }
 0x40e   :  { %5621 = vmatpush.bf16.msra.mxu2 %v9859_v45  ;;  %5595 = vmatpush.bf16.msra.mxu0 %v9571_v20  ;;  %v4695_v45 = vadd.f32 %v4694_v36, %v4680_v48  ;;  %v11155_v20 = vld [vmem:[%s17281_s2 + $0x334] sm:$0xf0]  ;;  %v9735_v48 = vor.u32 %v11105_v28, %v9732_v50  ;;  %v11101_v8 = vld [vmem:[%s17281_s2 + $0x18c] sm:$0xf]  ;;  %v9828_v28 = vld [vmem:[%s17281_s2 + $0x278] sm:$0xf0] }
 0x40f   :  { %v15873_v25 = vpop.f32.mrf.mxu2  ;;  %v9923_v54 = vor.u32 %v11155_v20, %v9922_v55  ;;  %v11057_v50 = vld [vmem:[%s17281_s2 + $0x2c] sm:$0xf] }
 0x411   :  { %5635 = vmatpush.bf16.msra.mxu3 %v9987_v9  ;;  %5609 = vmatpush.bf16.msra.mxu1 %v9699_v49  ;;  %v11119_v9 = vld [vmem:[%s17281_s2 + $0x214] sm:$0xf0]  ;;  %v9623_v49 = vor.u32 %v11077_v43, %v9620_v56  ;;  %v9863_v56 = vor.u32 %v11137_v34, %v9860_v23 }
 0x412   :  { %5622 = vmatpush.bf16.msra.mxu2 %v9843_v32  ;;  %5596 = vmatpush.bf16.msra.mxu0 %v9555_v22  ;;  %v9892_v32 = vld [vmem:[%s17281_s2 + $0x2f8] sm:$0xf0]  ;;  %v4682_v22 = vpop.f32.mrf.mxu0  ;;  %v9779_v38 = vor.u32 %v11119_v9, %v9778_v51 }
 0x413   :  { %v9895_v0 = vor.u32 %v11145_v12, %v9892_v32  ;;  %v9844_v51 = vld [vmem:[%s17281_s2 + $0x298] sm:$0xf0] }
 0x414   :  { %v9556_v12 = vld [vmem:[%s17281_s2 + $0x58] sm:$0xf0] }
 0x415   :  { %5636 = vmatpush.bf16.msra.mxu3 %v9971_v16  ;;  %5610 = vmatpush.bf16.msra.mxu1 %v9683_v10  ;;  %v11177_v16 = vld [vmem:[%s17281_s2 + $0x3ec] sm:$0xf]  ;;  %v15905_v10 = vpop.f32.mrf.mxu3  ;;  %v4696_v30 = vpop.f32.mrf.mxu1 }
 0x416   :  { %5623 = vmatpush.bf16.msra.mxu2 %v9827_v24  ;;  %5597 = vmatpush.bf16.msra.mxu0 %v9539_v11  ;;  %v10020_v24 = vld [vmem:[%s17281_s2 + $0x3f8] sm:$0xf0]  ;;  %v11141_v11 = vld [vmem:[%s17281_s2 + $0x2cc] sm:$0xf] }
 0x417   :  { %v4708_v31 = vpop.f32.mrf.mxu2  ;;  %v9879_v6 = vor.u32 %v11141_v11, %v9876_v3  ;;  %v9687_v3 = vor.u32 %v11093_v15, %v9684_v59  ;;  %v10378_v15 = vld [vmem:[%s17281_s2 + $0x9c0] sm:$0xf] }
 0x418   :  { %v4709_v35 = vadd.f32 %v4708_v31, %v4695_v45  ;;  %v9988_v45 = vld [vmem:[%s17281_s2 + $0x3b8] sm:$0xf0] }
 0x419   :  { %5637 = vmatpush.bf16.msra.mxu3 %v9955_v26  ;;  %5611 = vmatpush.bf16.msra.mxu1 %v9667_v39  ;;  %v4697_v26 = vadd.f32 %v4696_v30, %v4682_v22  ;;  %v10023_v39 = vor.u32 %v11177_v16, %v10020_v24  ;;  %v11129_v24 = vld [vmem:[%s17281_s2 + $0x26c] sm:$0xf] }
 0x41a   :  { %5624 = vmatpush.bf16.msra.mxu2 %v9811_v60  ;;  %5598 = vmatpush.bf16.msra.mxu0 %v9523_v29  ;;  %v10004_v60 = vld [vmem:[%s17281_s2 + $0x3d8] sm:$0xf0]  ;;  %v9591_v29 = vor.u32 %v11069_v4, %v9588_v5  ;;  %v11161_v30 = vld [vmem:[%s17281_s2 + $0x36c] sm:$0xf]  ;;  %v9831_v4 = vor.u32 %v11129_v24, %v9828_v28 }
 0x41b   :  { %v10007_v36 = vor.u32 %v11173_v63, %v10004_v60  ;;  %v9956_v5 = vld [vmem:[%s17281_s2 + $0x378] sm:$0xf0] }
 0x41c   :  { %v4736_v20 = vpop.f32.mrf.mxu0  ;;  %v9812_v60 = vld [vmem:[%s17281_s2 + $0x258] sm:$0xf0]  ;;  %v9959_v23 = vor.u32 %v11161_v30, %v9956_v5  ;;  %v11330_v30 = vld [vmem:[%s17281_s2 + $0x8ac] sm:$0xf0]  ;;  %v11149_v5 = vld [vmem:[%s17281_s2 + $0x30c] sm:$0xf] }
 0x41d   :  { %5638 = vmatpush.bf16.msra.mxu3 %v9939_v58  ;;  %5612 = vmatpush.bf16.msra.mxu1 %v9651_v52  ;;  %v9719_v58 = vor.u32 %v11101_v8, %v9716_v21  ;;  %v11169_v52 = vld [vmem:[%s17281_s2 + $0x3ac] sm:$0xf]  ;;  %v4722_v43 = vpop.f32.mrf.mxu3  ;;  %v4750_v9 = vpop.f32.mrf.mxu1  ;;  %v9780_v24 = vld [vmem:[%s17281_s2 + $0x218] sm:$0xf0] }
 0x41e   :  { %5647 = vmatpush.bf16.msrb.mxu0 %v9639_v40  ;;  %5625 = vmatpush.bf16.msra.mxu2 %v9795_v46  ;;  %v9572_v40 = vld [vmem:[%s17281_s2 + $0x78] sm:$0xf0]  ;;  %v15967_v55 = vadd.f32 %v4722_v43, %v4709_v35  ;;  %v4751_v32 = vadd.f32 %v4750_v9, %v4736_v20  ;;  %v11157_v21 = vld [vmem:[%s17281_s2 + $0x34c] sm:$0xf]  ;;  %v11370_v20 = vld [vmem:[%s17281_s2 + $0x9ec] sm:$0xf0] }
 0x41f   :  { %5599 = vmatmul.bf16.vlgmr.msra.gmra.mxu0 %v15476_v17  ;;  %v9700_v46 = vld [vmem:[%s17281_s2 + $0x178] sm:$0xf0]  ;;  %v9575_v62 = vor.u32 %v11065_v53, %v9572_v40  ;;  %v4710_v22 = vpop.f32.mrf.mxu2  ;;  %v11053_v35 = vld [vmem:[%s17281_s2 + $0xc] sm:$0xf] }
 0x420   :  { %5613 = vmatmul.bf16.vlgmr.msra.gmra.mxu1 %v15484_v27  ;;  %v4711_v16 = vadd.f32 %v4710_v22, %v4697_v26  ;;  %v11089_v26 = vld [vmem:[%s17281_s2 + $0x12c] sm:$0xf]  ;;  %v9940_v40 = vld [vmem:[%s17281_s2 + $0x358] sm:$0xf0] }
 0x421   :  { %5661 = vmatpush.bf16.msrb.mxu1 %v9767_v47  ;;  %5639 = vmatpush.bf16.msra.mxu3 %v9923_v54  ;;  %v11097_v47 = vld [vmem:[%s17281_s2 + $0x16c] sm:$0xf]  ;;  %v9991_v54 = vor.u32 %v11169_v52, %v9988_v45  ;;  %v10394_v45 = vld [vmem:[%s17281_s2 + $0x9e0] sm:$0xf] }
 0x422   :  { %5648 = vmatpush.bf16.msrb.mxu0 %v9623_v49  ;;  %5626 = vmatpush.bf16.msra.mxu2 %v9779_v38  ;;  %v11061_v49 = vld [vmem:[%s17281_s2 + $0x4c] sm:$0xf]  ;;  %v9703_v19 = vor.u32 %v11097_v47, %v9700_v46  ;;  %v9972_v38 = vld [vmem:[%s17281_s2 + $0x398] sm:$0xf0]  ;;  %v10395_v22 = vor.u32 %v11370_v20, %v10394_v45  ;;  %v11430_v45 = vld [vmem:[%s17281_s2 + $0xbcc] sm:$0xf0] }
 0x423   :  { %v9975_v11 = vor.u32 %v11165_v2, %v9972_v38  ;;  %v11085_v43 = vld [vmem:[%s17281_s2 + $0x10c] sm:$0xf]  ;;  %v9924_v38 = vld [vmem:[%s17281_s2 + $0x338] sm:$0xf0]  ;;  %v16148_v20 = vld [vmem:[#allocation2 + $0x50] sm:$0x3] }
 0x424   :  { %v4738_v63 = vpop.f32.mrf.mxu0 }
 0x425   :  { %5662 = vmatpush.bf16.msrb.mxu1 %v9751_v61  ;;  %5640 = vmatpush.bf16.msra.mxu3 %v9907_v7  ;;  %v9847_v61 = vor.u32 %v11133_v44, %v9844_v51  ;;  %v4724_v7 = vpop.f32.mrf.mxu3  ;;  %v4752_v8 = vpop.f32.mrf.mxu1  ;;  %v9796_v44 = vld [vmem:[%s17281_s2 + $0x238] sm:$0xf0] }
 0x426   :  { %5675 = vmatpush.bf16.msrb.mxu2 %v9895_v0  ;;  %5649 = vmatpush.bf16.msrb.mxu0 %v9607_v57  ;;  %v9559_v0 = vor.u32 %v11061_v49, %v9556_v12  ;;  %v9540_v57 = vld [vmem:[%s17281_s2 + $0x38] sm:$0xf0]  ;;  %v4753_v34 = vadd.f32 %v4752_v8, %v4738_v63  ;;  %v9943_v49 = vor.u32 %v11157_v21, %v9940_v40  ;;  %v11362_v8 = vld [vmem:[%s17281_s2 + $0x9ac] sm:$0xf0] }
 0x427   :  { %5627 = vmatmul.bf16.vlgmr.msra.gmra.mxu2 %v15521_v18  ;;  %v9543_v31 = vor.u32 %v11057_v50, %v9540_v57  ;;  %v10522_v50 = vld [vmem:[%s17281_s2 + $0xae0] sm:$0xf]  ;;  %v11402_v57 = vld [vmem:[%s17281_s2 + $0xaec] sm:$0xf0] }
 0x428   :  { %5641 = vmatmul.bf16.vlgmr.msra.gmra.mxu3 %v15545_v14 }
 0x429   :  { %5689 = vmatpush.bf16.msrb.mxu3 %v10023_v39  ;;  %5663 = vmatpush.bf16.msrb.mxu1 %v9735_v48  ;;  %v9668_v39 = vld [vmem:[%s17281_s2 + $0x138] sm:$0xf0]  ;;  %v16018_v48 = vadd.f32 %v4724_v7, %v4711_v16  ;;  %v11366_v16 = vld [vmem:[%s17281_s2 + $0x9cc] sm:$0xf0] }
 0x42a   :  { %5676 = vmatpush.bf16.msrb.mxu2 %v9879_v6  ;;  %5650 = vmatpush.bf16.msrb.mxu0 %v9591_v29  ;;  %v11125_v6 = vld [vmem:[%s17281_s2 + $0x24c] sm:$0xf]  ;;  %v9524_v29 = vld [vmem:[%s17281_s2 + $0x18] sm:$0xf0]  ;;  %v9671_v53 = vor.u32 %v11089_v26, %v9668_v39  ;;  %v4764_v47 = vpop.f32.mrf.mxu2  ;;  %v10379_v7 = vor.u32 %v11366_v16, %v10378_v15  ;;  %v10650_v39 = vld [vmem:[%s17281_s2 + $0xbe0] sm:$0xf] }
 0x42b   :  { %v9815_v52 = vor.u32 %v11125_v6, %v9812_v60  ;;  %v9527_v46 = vor.u32 %v11053_v35, %v9524_v29  ;;  %v4765_v51 = vadd.f32 %v4764_v47, %v4751_v32  ;;  %v11153_v32 = vld [vmem:[%s17281_s2 + $0x32c] sm:$0xf]  ;;  %v9908_v26 = vld [vmem:[%s17281_s2 + $0x318] sm:$0xf0]  ;;  %v11434_v6 = vld [vmem:[%s17281_s2 + $0xbec] sm:$0xf0] }
 0x42c   :  { %v10362_v60 = vld [vmem:[%s17281_s2 + $0x9a0] sm:$0xf]  ;;  %v11398_v29 = vld [vmem:[%s17281_s2 + $0xacc] sm:$0xf0]  ;;  %v10651_v40 = vor.u32 %v11434_v6, %v10650_v39 }
 0x42d   :  { %5690 = vmatpush.bf16.msrb.mxu3 %v10007_v36  ;;  %5664 = vmatpush.bf16.msrb.mxu1 %v9719_v58  ;;  %v10266_v36 = vld [vmem:[%s17281_s2 + $0x8e0] sm:$0xf]  ;;  %v11338_v58 = vld [vmem:[%s17281_s2 + $0x8ec] sm:$0xf0]  ;;  %v4778_v2 = vpop.f32.mrf.mxu3 }
 0x42e   :  { %5677 = vmatpush.bf16.msrb.mxu2 %v9863_v56  ;;  %5651 = vmatpush.bf16.msrb.mxu0 %v9575_v62  ;;  %v9652_v56 = vld [vmem:[%s17281_s2 + $0x118] sm:$0xf0]  ;;  %v11121_v62 = vld [vmem:[%s17281_s2 + $0x22c] sm:$0xf]  ;;  %v10267_v9 = vor.u32 %v11338_v58, %v10266_v36  ;;  %v16077_v59 = vadd.f32 %v4778_v2, %v4765_v51  ;;  %v10363_v36 = vor.u32 %v11362_v8, %v10362_v60  ;;  %v10634_v58 = vld [vmem:[%s17281_s2 + $0xbc0] sm:$0xf] }
 0x42f   :  { %v9655_v12 = vor.u32 %v11085_v43, %v9652_v56  ;;  %v10346_v47 = vld [vmem:[%s17281_s2 + $0x980] sm:$0xf]  ;;  %v10635_v2 = vor.u32 %v11430_v45, %v10634_v58  ;;  %v11426_v15 = vld [vmem:[%s17281_s2 + $0xbac] sm:$0xf0]  ;;  %v16208_v60 = vld [vmem:[#allocation2 + $0x70] sm:$0x3] }
 0x430   :  { %v10490_v51 = vld [vmem:[%s17281_s2 + $0xaa0] sm:$0xf]  ;;  %v16234_v58 = vld [vmem:[#allocation2 + $0x8] sm:$0x3] }
 0x431   :  { %5691 = vmatpush.bf16.msrb.mxu3 %v9991_v54  ;;  %5665 = vmatpush.bf16.msrb.mxu1 %v9703_v19  ;;  %v10250_v54 = vld [vmem:[%s17281_s2 + $0x8c0] sm:$0xf]  ;;  %v11334_v19 = vld [vmem:[%s17281_s2 + $0x8cc] sm:$0xf0] }
 0x432   :  { %5678 = vmatpush.bf16.msrb.mxu2 %v9847_v61  ;;  %5652 = vmatpush.bf16.msrb.mxu0 %v9559_v0  ;;  %v9799_v61 = vor.u32 %v11121_v62, %v9796_v44  ;;  %v11117_v0 = vld [vmem:[%s17281_s2 + $0x20c] sm:$0xf]  ;;  %v10251_v28 = vor.u32 %v11334_v19, %v10250_v54  ;;  %v4766_v63 = vpop.f32.mrf.mxu2  ;;  %v11322_v54 = vld [vmem:[%s17281_s2 + $0x86c] sm:$0xf0]  ;;  %v10330_v16 = vld [vmem:[%s17281_s2 + $0x960] sm:$0xf] }
 0x433   :  { %v4767_v21 = vadd.f32 %v4766_v63, %v4753_v34  ;;  %v16150_v62 = vld [vmem:[#allocation2 + $0x40] sm:$0xfc]  ;;  %v10602_v6 = vld [vmem:[%s17281_s2 + $0xb80] sm:$0xf] }
 0x435   :  { %5692 = vmatpush.bf16.msrb.mxu3 %v9975_v11  ;;  %5666 = vmatpush.bf16.msrb.mxu1 %v9687_v3  ;;  %v9927_v11 = vor.u32 %v11153_v32, %v9924_v38  ;;  %v10234_v3 = vld [vmem:[%s17281_s2 + $0x8a0] sm:$0xf]  ;;  %v4780_v34 = vpop.f32.mrf.mxu3  ;;  %v16171_v32 = vld [vmem:[#allocation2] sm:$0xfc] }
 0x436   :  { %5679 = vmatpush.bf16.msrb.mxu2 %v9831_v4  ;;  %5653 = vmatpush.bf16.msrb.mxu0 %v9543_v31  ;;  %v9783_v4 = vor.u32 %v11117_v0, %v9780_v24  ;;  %v10523_v31 = vor.u32 %v11402_v57, %v10522_v50  ;;  %v10235_v35 = vor.u32 %v11330_v30, %v10234_v3  ;;  %v11354_v0 = vld [vmem:[%s17281_s2 + $0x96c] sm:$0xf0]  ;;  %v10474_v50 = vld [vmem:[%s17281_s2 + $0xa80] sm:$0xf]  ;;  %v5747_v3 = vrot.slane %v16150_v62, 2 }
 0x437   :  { %v16137_v43 = vadd.f32 %v4780_v34, %v4767_v21  ;;  %v11390_v57 = vld [vmem:[%s17281_s2 + $0xa8c] sm:$0xf0]  ;;  %v16226_v34 = vld [vmem:[#allocation2 + $0x58] sm:$0xfc] }
 0x438   :  { %v10475_v21 = vor.u32 %v11390_v57, %v10474_v50  ;;  %v10154_v50 = vld [vmem:[%s17281_s2 + $0x800] sm:$0xf]  ;;  %v11310_v57 = vld [vmem:[%s17281_s2 + $0x80c] sm:$0xf0] }
 0x439   :  { %5693 = vmatpush.bf16.msrb.mxu3 %v9959_v23  ;;  %5667 = vmatpush.bf16.msrb.mxu1 %v9671_v53  ;;  %v9911_v23 = vor.u32 %v11149_v5, %v9908_v26  ;;  %v10218_v53 = vld [vmem:[%s17281_s2 + $0x880] sm:$0xf]  ;;  %v16200_v5 = vld [vmem:[#allocation2 + $0x20] sm:$0xfc]  ;;  %v5738_v26 = vrot.slane %v16171_v32, 2 }
 0x43a   :  { %5680 = vmatpush.bf16.msrb.mxu2 %v9815_v52  ;;  %5654 = vmatpush.bf16.msrb.mxu0 %v9527_v46  ;;  %v16135_v52 = vld [vmem:[#allocation2 + $0x30] sm:$0xfc]  ;;  %v11358_v46 = vld [vmem:[%s17281_s2 + $0x98c] sm:$0xf0] }
 0x43b   :  { %v5735_v19 = vrot.slane %v16135_v52, 2 }
 0x43c   :  { %v4792_v24 = vpop.f32.mrf.mxu0 }
 0x43d   :  { %5694 = vmatpush.bf16.msrb.mxu3 %v9943_v49  ;;  %5668 = vmatpush.bf16.msrb.mxu1 %v9655_v12  ;;  %v16158_v49 = vld [vmem:[#allocation2 + $0x60] sm:$0x3]  ;;  %v10202_v12 = vld [vmem:[%s17281_s2 + $0x860] sm:$0xf]  ;;  %v4806_v30 = vpop.f32.mrf.mxu1 }
 0x43e   :  { %6540 = vmatpush.bf16.msra.mxu0 %v10267_v9  ;;  %5681 = vmatpush.bf16.msrb.mxu2 %v9799_v61  ;;  %v11394_v9 = vld [vmem:[%s17281_s2 + $0xaac] sm:$0xf0]  ;;  %v10618_v61 = vld [vmem:[%s17281_s2 + $0xba0] sm:$0xf]  ;;  %v16203_v39 = vadd.f32 %v4806_v30, %v4792_v24 }
 0x43f   :  { %5655 = vmatmul.bf16.vlgmr.msrb.gmra.mxu0 %v15476_v17  ;;  %v10506_v17 = vld [vmem:[%s17281_s2 + $0xac0] sm:$0xf]  ;;  %v10491_v38 = vor.u32 %v11394_v9, %v10490_v51  ;;  %v10619_v63 = vor.u32 %v11426_v15, %v10618_v61  ;;  %v11418_v9 = vld [vmem:[%s17281_s2 + $0xb6c] sm:$0xf0] }
 0x440   :  { %5669 = vmatmul.bf16.vlgmr.msrb.gmra.mxu1 %v15484_v27  ;;  %v11326_v27 = vld [vmem:[%s17281_s2 + $0x88c] sm:$0xf0]  ;;  %v10507_v56 = vor.u32 %v11398_v29, %v10506_v17  ;;  %v10314_v17 = vld [vmem:[%s17281_s2 + $0x940] sm:$0xf] }
 0x441   :  { %6554 = vmatpush.bf16.msra.mxu1 %v10395_v22  ;;  %5695 = vmatpush.bf16.msrb.mxu3 %v9927_v11  ;;  %v10219_v44 = vor.u32 %v11326_v27, %v10218_v53  ;;  %v10347_v22 = vor.u32 %v11358_v46, %v10346_v47  ;;  %v5736_v11 = vrot.slane %v16148_v20, 2  ;;  %v11350_v29 = vld [vmem:[%s17281_s2 + $0x94c] sm:$0xf0]  ;;  %v10458_v53 = vld [vmem:[%s17281_s2 + $0xa60] sm:$0xf]  ;;  %v5750_v46 = vrot.slane %v16200_v5, 2 }
 0x442   :  { %6541 = vmatpush.bf16.msra.mxu0 %v10251_v28  ;;  %5682 = vmatpush.bf16.msrb.mxu2 %v9783_v4  ;;  %v10203_v28 = vor.u32 %v11322_v54, %v10202_v12  ;;  %v5748_v4 = vrot.slane %v16158_v49, 2  ;;  %v11386_v27 = vld [vmem:[%s17281_s2 + $0xa6c] sm:$0xf0]  ;;  %v10315_v45 = vor.u32 %v11350_v29, %v10314_v17  ;;  %v10586_v47 = vld [vmem:[%s17281_s2 + $0xb60] sm:$0xf]  ;;  %v10155_v29 = vor.u32 %v11310_v57, %v10154_v50 }
 0x443   :  { %v10459_v51 = vor.u32 %v11386_v27, %v10458_v53  ;;  %v10298_v12 = vld [vmem:[%s17281_s2 + $0x920] sm:$0xf]  ;;  %v11346_v54 = vld [vmem:[%s17281_s2 + $0x92c] sm:$0xf0] }
 0x444   :  { %v10442_v61 = vld [vmem:[%s17281_s2 + $0xa40] sm:$0xf]  ;;  %v11414_v5 = vld [vmem:[%s17281_s2 + $0xb4c] sm:$0xf0] }
 0x445   :  { %6555 = vmatpush.bf16.msra.mxu1 %v10379_v7  ;;  %5696 = vmatpush.bf16.msrb.mxu3 %v9911_v23  ;;  %v11318_v7 = vld [vmem:[%s17281_s2 + $0x84c] sm:$0xf0]  ;;  %v16258_v15 = vld [vmem:[#allocation2 + $0x78] sm:$0x3]  ;;  %v4808_v24 = vpop.f32.mrf.mxu1  ;;  %v16320_v49 = vld [vmem:[#allocation2 + $0x38] sm:$0xfc] }
 0x446   :  { %6568 = vmatpush.bf16.msra.mxu2 %v10523_v31  ;;  %6542 = vmatpush.bf16.msra.mxu0 %v10235_v35  ;;  %v10331_v31 = vor.u32 %v11354_v0, %v10330_v16  ;;  %v11422_v35 = vld [vmem:[%s17281_s2 + $0xb8c] sm:$0xf0]  ;;  %v5741_v16 = vrot.slane %v16226_v34, 2  ;;  %v5742_v0 = vrot.slane %v16234_v58, 2  ;;  %v10426_v53 = vld [vmem:[%s17281_s2 + $0xa20] sm:$0xf] }
 0x447   :  { %5683 = vmatmul.bf16.vlgmr.msrb.gmra.mxu2 %v15521_v18  ;;  %v16173_v18 = vld [vmem:[#allocation2 + $0x68] sm:$0x3]  ;;  %v5754_v52 = vrot.slane %v16258_v15, 2  ;;  %v10538_v34 = vld [vmem:[%s17281_s2 + $0xb00] sm:$0xf] }
 0x448   :  { %5697 = vmatmul.bf16.vlgmr.msrb.gmra.mxu3 %v15545_v14  ;;  %v10186_v14 = vld [vmem:[%s17281_s2 + $0x840] sm:$0xf]  ;;  %v5739_v8 = vrot.slane %v16173_v18, 2  ;;  %v11382_v18 = vld [vmem:[%s17281_s2 + $0xa4c] sm:$0xf0] }
 0x449   :  { %6582 = vmatpush.bf16.msra.mxu3 %v10651_v40  ;;  %6556 = vmatpush.bf16.msra.mxu1 %v10363_v36  ;;  %v10187_v23 = vor.u32 %v11318_v7, %v10186_v14  ;;  %v10170_v40 = vld [vmem:[%s17281_s2 + $0x820] sm:$0xf]  ;;  %v11314_v36 = vld [vmem:[%s17281_s2 + $0x82c] sm:$0xf0]  ;;  %v10587_v14 = vor.u32 %v11418_v9, %v10586_v47  ;;  %v10299_v7 = vor.u32 %v11346_v54, %v10298_v12 }
 0x44a   :  { %6569 = vmatpush.bf16.msra.mxu2 %v10507_v56  ;;  %6543 = vmatpush.bf16.msra.mxu0 %v10219_v44  ;;  %v10603_v56 = vor.u32 %v11422_v35, %v10602_v6  ;;  %v5751_v44 = vrot.slane %v16208_v60, 2  ;;  %v10443_v6 = vor.u32 %v11382_v18, %v10442_v61  ;;  %v10282_v60 = vld [vmem:[%s17281_s2 + $0x900] sm:$0xf]  ;;  %v11368_v35 = vld [vmem:[%s17281_s2 + $0x9e4] sm:$0xf]  ;;  %v4820_v17 = vpop.f32.mrf.mxu2 }
 0x44b   :  { %v11378_v27 = vld [vmem:[%s17281_s2 + $0xa2c] sm:$0xf0]  ;;  %v4821_v47 = vadd.f32 %v4820_v17, %v16203_v39  ;;  %v4834_v39 = vpop.f32.mrf.mxu3  ;;  %v10554_v12 = vld [vmem:[%s17281_s2 + $0xb20] sm:$0xf] }
 0x44c   :  { %v5752_v32 = vsel %vm2264_vm1, %v5750_v46, %v5751_v44  ;;  %v10427_v9 = vor.u32 %v11378_v27, %v10426_v53  ;;  %v11410_v46 = vld [vmem:[%s17281_s2 + $0xb2c] sm:$0xf0]  ;;  %v11364_v44 = vld [vmem:[%s17281_s2 + $0x9c4] sm:$0xf]  ;;  %v10410_v61 = vld [vmem:[%s17281_s2 + $0xa00] sm:$0xf] }
 0x44d   :  { %6583 = vmatpush.bf16.msra.mxu3 %v10635_v2  ;;  %6557 = vmatpush.bf16.msra.mxu1 %v10347_v22  ;;  %v4794_v2 = vpop.f32.mrf.mxu0  ;;  %v10171_v22 = vor.u32 %v11314_v36, %v10170_v40  ;;  %v5737_v40 = vsel %vm2264_vm1, %v5735_v19, %v5736_v11  ;;  %v5749_v36 = vsel %vm2264_vm1, %v5747_v3, %v5748_v4  ;;  %v16318_v19 = vld [vmem:[#allocation2 + $0x48] sm:$0x3]  ;;  %v11332_v3 = vld [vmem:[%s17281_s2 + $0x8c4] sm:$0xf]  ;;  %v10252_v4 = vld [vmem:[%s17281_s2 + $0x8d0] sm:$0xf0] }
 0x44e   :  { %6570 = vmatpush.bf16.msra.mxu2 %v10491_v38  ;;  %6544 = vmatpush.bf16.msra.mxu0 %v10203_v28  ;;  %v16256_v38 = vld [vmem:[#allocation2 + $0x10] sm:$0xfc]  ;;  %v10570_v28 = vld [vmem:[%s17281_s2 + $0xb40] sm:$0xf]  ;;  %v16271_v30 = vadd.f32 %v4808_v24, %v4794_v2  ;;  %v16340_v54 = vadd.f32 %v4834_v39, %v4821_v47  ;;  %v16342_v2 = vpack.c.bf16 %v5749_v36, %v5737_v40  ;;  %v11374_v18 = vld [vmem:[%s17281_s2 + $0xa0c] sm:$0xf0] }
 0x44f   :  { %v5753_v20 = vrot.slane %v16256_v38, 2  ;;  %v10571_v62 = vor.u32 %v11414_v5, %v10570_v28  ;;  %v10255_v15 = vor.u32 %v11332_v3, %v10252_v4  ;;  %v11400_v24 = vld [vmem:[%s17281_s2 + $0xae4] sm:$0xf]  ;;  %v10524_v28 = vld [vmem:[%s17281_s2 + $0xaf0] sm:$0xf0]  ;;  %v5745_v57 = vrot.slane %v16318_v19, 2 }
 0x450   :  { %v5756_v5 = vrot.slane %v16320_v49, 2  ;;  %v10411_v58 = vor.u32 %v11374_v18, %v10410_v61  ;;  %v10527_v17 = vor.u32 %v11400_v24, %v10524_v28  ;;  %v10364_v53 = vld [vmem:[%s17281_s2 + $0x9b0] sm:$0xf0]  ;;  %v11396_v36 = vld [vmem:[%s17281_s2 + $0xac4] sm:$0xf] }
 0x451   :  { %6584 = vmatpush.bf16.msra.mxu3 %v10619_v63  ;;  %6558 = vmatpush.bf16.msra.mxu1 %v10331_v31  ;;  %v11336_v63 = vld [vmem:[%s17281_s2 + $0x8e4] sm:$0xf]  ;;  %v10268_v31 = vld [vmem:[%s17281_s2 + $0x8f0] sm:$0xf0] }
 0x452   :  { %6571 = vmatpush.bf16.msra.mxu2 %v10475_v21  ;;  %6545 = vmatpush.bf16.msra.mxu0 %v10187_v23  ;;  %v11342_v21 = vld [vmem:[%s17281_s2 + $0x90c] sm:$0xf0]  ;;  %v10396_v23 = vld [vmem:[%s17281_s2 + $0x9f0] sm:$0xf0]  ;;  %v11424_v18 = vld [vmem:[%s17281_s2 + $0xba4] sm:$0xf] }
 0x453   :  { %v10283_v11 = vor.u32 %v11342_v21, %v10282_v60  ;;  %v5755_v21 = vsel %vm2264_vm1, %v5753_v20, %v5754_v52  ;;  %v10220_v20 = vld [vmem:[%s17281_s2 + $0x890] sm:$0xf0]  ;;  %v4836_v52 = vpop.f32.mrf.mxu3 }
 0x454   :  { %v10636_v4 = vld [vmem:[%s17281_s2 + $0xbd0] sm:$0xf0] }
 0x455   :  { %6585 = vmatpush.bf16.msra.mxu3 %v10603_v56  ;;  %6559 = vmatpush.bf16.msra.mxu1 %v10315_v45  ;;  %v5740_v56 = vsel %vm2264_vm1, %v5738_v26, %v5739_v8  ;;  %v16313_v45 = vld [vmem:[#allocation2 + $0x18] sm:$0xfc]  ;;  %v16329_v26 = vld [vmem:[#allocation2 + $0x28] sm:$0x3]  ;;  %v10399_v8 = vor.u32 %v11368_v35, %v10396_v23  ;;  %v4822_v35 = vpop.f32.mrf.mxu2  ;;  %v10348_v39 = vld [vmem:[%s17281_s2 + $0x990] sm:$0xf0] }
 0x456   :  { %6572 = vmatpush.bf16.msra.mxu2 %v10459_v51  ;;  %6546 = vmatpush.bf16.msra.mxu0 %v10171_v22  ;;  %v10271_v51 = vor.u32 %v11336_v63, %v10268_v31  ;;  %v10380_v22 = vld [vmem:[%s17281_s2 + $0x9d0] sm:$0xf0]  ;;  %v16353_v38 = vpack.c.bf16 %v5752_v32, %v5740_v56  ;;  %v5744_v50 = vrot.slane %v16313_v45, 2  ;;  %v5757_v63 = vrot.slane %v16329_v26, 2  ;;  %v11328_v31 = vld [vmem:[%s17281_s2 + $0x8a4] sm:$0xf] }
 0x457   :  { %v10383_v60 = vor.u32 %v11364_v44, %v10380_v22  ;;  %v11360_v23 = vld [vmem:[%s17281_s2 + $0x9a4] sm:$0xf]  ;;  %v4823_v27 = vadd.f32 %v4822_v35, %v16271_v30  ;;  %v10508_v56 = vld [vmem:[%s17281_s2 + $0xad0] sm:$0xf0]  ;;  %v4639_v45 = vadd.f32 %v15745_v42, %v15718_v37 }
 0x458   :  { %v11324_v30 = vld [vmem:[%s17281_s2 + $0x884] sm:$0xf]  ;;  %v5746_v49 = vsel %vm2264_vm1, %v5744_v50, %v5745_v57  ;;  %v5758_v32 = vsel %vm2264_vm1, %v5756_v5, %v5757_v63  ;;  %v10511_v3 = vor.u32 %v11396_v36, %v10508_v56  ;;  %v10620_v28 = vld [vmem:[%s17281_s2 + $0xbb0] sm:$0xf0] }
 0x459   :  { %6586 = vmatpush.bf16.msra.mxu3 %v10587_v14  ;;  %6560 = vmatpush.bf16.msra.mxu1 %v10299_v7  ;;  %v10555_v14 = vor.u32 %v11410_v46, %v10554_v12  ;;  %v5743_v7 = vsel %vm2264_vm1, %v5741_v16, %v5742_v0  ;;  %v11406_v16 = vld [vmem:[%s17281_s2 + $0xb0c] sm:$0xf0]  ;;  %v11432_v0 = vld [vmem:[%s17281_s2 + $0xbe4] sm:$0xf]  ;;  %v4653_v42 = vadd.f32 %v15812_v1, %v4639_v45  ;;  %v10204_v46 = vld [vmem:[%s17281_s2 + $0x870] sm:$0xf0] }
 0x45a   :  { %6573 = vmatpush.bf16.msra.mxu2 %v10443_v6  ;;  %6547 = vmatpush.bf16.msra.mxu0 %v10155_v29  ;;  %v10236_v6 = vld [vmem:[%s17281_s2 + $0x8b0] sm:$0xf0]  ;;  %v10539_v47 = vor.u32 %v11406_v16, %v10538_v34  ;;  %v11428_v37 = vld [vmem:[%s17281_s2 + $0xbc4] sm:$0xf]  ;;  %v10223_v1 = vor.u32 %v11324_v30, %v10220_v20  ;;  %v16444_v44 = vpack.c.bf16 %v5758_v32, %v5746_v49 }
 0x45b   :  { %v10652_v29 = vld [vmem:[%s17281_s2 + $0xbf0] sm:$0xf0]  ;;  %v10239_v40 = vor.u32 %v11328_v31, %v10236_v6  ;;  %v11356_v26 = vld [vmem:[%s17281_s2 + $0x984] sm:$0xf]  ;;  %v10639_v22 = vor.u32 %v11428_v37, %v10636_v4  ;;  %v4641_v30 = vadd.f32 %v15798_v33, %v15772_v13 }
 0x45c   :  { %v10655_v19 = vor.u32 %v11432_v0, %v10652_v29  ;;  %v11320_v12 = vld [vmem:[%s17281_s2 + $0x864] sm:$0xf]  ;;  %v10351_v61 = vor.u32 %v11356_v26, %v10348_v39  ;;  %v10332_v57 = vld [vmem:[%s17281_s2 + $0x970] sm:$0xf0]  ;;  %v10274_v39 = vld [vmem:[%s17281_s2 + $0x8e8] sm:$0xf] }
 0x45d   :  { %6587 = vmatpush.bf16.msra.mxu3 %v10571_v62  ;;  %6561 = vmatpush.bf16.msra.mxu1 %v10283_v11  ;;  %v10367_v62 = vor.u32 %v11360_v23, %v10364_v53  ;;  %v16419_v11 = vadd.f32 %v4836_v52, %v4823_v27  ;;  %v11352_v50 = vld [vmem:[%s17281_s2 + $0x964] sm:$0xf]  ;;  %v10476_v5 = vld [vmem:[%s17281_s2 + $0xa90] sm:$0xf0]  ;;  %v4655_v37 = vadd.f32 %v15873_v25, %v4641_v30 }
 0x45e   :  { %6596 = vmatpush.bf16.msrb.mxu0 %v10271_v51  ;;  %6574 = vmatpush.bf16.msra.mxu2 %v10427_v9  ;;  %v16406_v51 = vpack.c.bf16 %v5755_v21, %v5743_v7  ;;  %v10492_v9 = vld [vmem:[%s17281_s2 + $0xab0] sm:$0xf0]  ;;  %v10207_v7 = vor.u32 %v11320_v12, %v10204_v46  ;;  %v11316_v31 = vld [vmem:[%s17281_s2 + $0x844] sm:$0xf]  ;;  %v10335_v34 = vor.u32 %v11352_v50, %v10332_v57  ;;  %v10402_v46 = vld [vmem:[%s17281_s2 + $0x9e8] sm:$0xf] }
 0x45f   :  { %6548 = vmatmul.bf16.vlgmr.msra.gmra.mxu0 %v16342_v2  ;;  %v10188_v6 = vld [vmem:[%s17281_s2 + $0x850] sm:$0xf0]  ;;  %v11420_v16 = vld [vmem:[%s17281_s2 + $0xb84] sm:$0xf]  ;;  %v4669_v50 = vadd.f32 %v15905_v10, %v4655_v37  ;;  %v11363_v37 = vld [vmem:[%s17281_s2 + $0x9b4] sm:$0xf0] }
 0x460   :  { %6562 = vmatmul.bf16.vlgmr.msra.gmra.mxu1 %v16353_v38  ;;  %v10604_v35 = vld [vmem:[%s17281_s2 + $0xb90] sm:$0xf0]  ;;  %v10191_v23 = vor.u32 %v11316_v31, %v10188_v6  ;;  %v11384_v53 = vld [vmem:[%s17281_s2 + $0xa64] sm:$0xf] }
 0x461   :  { %6610 = vmatpush.bf16.msrb.mxu1 %v10399_v8  ;;  %6588 = vmatpush.bf16.msra.mxu3 %v10555_v14  ;;  %v11392_v8 = vld [vmem:[%s17281_s2 + $0xaa4] sm:$0xf]  ;;  %v5488_v14 = vpop.f32.mrf.mxu0  ;;  %v10316_v29 = vld [vmem:[%s17281_s2 + $0x950] sm:$0xf0]  ;;  %v10607_v56 = vor.u32 %v11420_v16, %v10604_v35  ;;  %v10386_v16 = vld [vmem:[%s17281_s2 + $0x9c8] sm:$0xf] }
 0x462   :  { %6597 = vmatpush.bf16.msrb.mxu0 %v10255_v15  ;;  %6575 = vmatpush.bf16.msra.mxu2 %v10411_v58  ;;  %v4667_v15 = vadd.f32 %v15847_v41, %v4653_v42  ;;  %v10495_v24 = vor.u32 %v11392_v8, %v10492_v9  ;;  %v11388_v41 = vld [vmem:[%s17281_s2 + $0xa84] sm:$0xf]  ;;  %v10623_v58 = vor.u32 %v11424_v18, %v10620_v28  ;;  %v10460_v27 = vld [vmem:[%s17281_s2 + $0xa70] sm:$0xf0] }
 0x463   :  { %v10479_v21 = vor.u32 %v11388_v41, %v10476_v5  ;;  %v10172_v36 = vld [vmem:[%s17281_s2 + $0x830] sm:$0xf0]  ;;  %v10463_v20 = vor.u32 %v11384_v53, %v10460_v27  ;;  %v11380_v13 = vld [vmem:[%s17281_s2 + $0xa44] sm:$0xf]  ;;  %v10258_v5 = vld [vmem:[%s17281_s2 + $0x8c8] sm:$0xf] }
 0x464   :  { %v5489_v63 = vadd.f32 %v5488_v14, %v4667_v15  ;;  %v10588_v52 = vld [vmem:[%s17281_s2 + $0xb70] sm:$0xf0]  ;;  %v11412_v42 = vld [vmem:[%s17281_s2 + $0xb44] sm:$0xf]  ;;  %v11371_v15 = vld [vmem:[%s17281_s2 + $0x9f4] sm:$0xf0] }
 0x465   :  { %6611 = vmatpush.bf16.msrb.mxu1 %v10383_v60  ;;  %6589 = vmatpush.bf16.msra.mxu3 %v10539_v47  ;;  %v5502_v60 = vpop.f32.mrf.mxu1  ;;  %v11416_v47 = vld [vmem:[%s17281_s2 + $0xb64] sm:$0xf]  ;;  %v10300_v49 = vld [vmem:[%s17281_s2 + $0x930] sm:$0xf0]  ;;  %v11403_v53 = vld [vmem:[%s17281_s2 + $0xaf4] sm:$0xf0] }
 0x466   :  { %6624 = vmatpush.bf16.msrb.mxu2 %v10527_v17  ;;  %6598 = vmatpush.bf16.msrb.mxu0 %v10239_v40  ;;  %v5503_v0 = vadd.f32 %v5502_v60, %v5489_v63  ;;  %v11348_v17 = vld [vmem:[%s17281_s2 + $0x944] sm:$0xf]  ;;  %v10444_v33 = vld [vmem:[%s17281_s2 + $0xa50] sm:$0xf0]  ;;  %v10591_v4 = vor.u32 %v11416_v47, %v10588_v52  ;;  %v11335_v63 = vld [vmem:[%s17281_s2 + $0x8d4] sm:$0xf0]  ;;  %v10403_v60 = vor.u32 %v11371_v15, %v10402_v46 }
 0x467   :  { %6576 = vmatmul.bf16.vlgmr.msra.gmra.mxu2 %v16406_v51  ;;  %v11312_v40 = vld [vmem:[%s17281_s2 + $0x824] sm:$0xf]  ;;  %v10319_v45 = vor.u32 %v11348_v17, %v10316_v29  ;;  %v10572_v25 = vld [vmem:[%s17281_s2 + $0xb50] sm:$0xf0]  ;;  %v10447_v8 = vor.u32 %v11380_v13, %v10444_v33  ;;  %v10259_v29 = vor.u32 %v11335_v63, %v10258_v5  ;;  %v11435_v13 = vld [vmem:[%s17281_s2 + $0xbf4] sm:$0xf0] }
 0x468   :  { %6590 = vmatmul.bf16.vlgmr.msra.gmra.mxu3 %v16444_v44  ;;  %v11308_v32 = vld [vmem:[%s17281_s2 + $0x804] sm:$0xf]  ;;  %v10284_v12 = vld [vmem:[%s17281_s2 + $0x910] sm:$0xf0]  ;;  %v10370_v33 = vld [vmem:[%s17281_s2 + $0x9a8] sm:$0xf] }
 0x469   :  { %6638 = vmatpush.bf16.msrb.mxu3 %v10655_v19  ;;  %6612 = vmatpush.bf16.msrb.mxu1 %v10367_v62  ;;  %v11344_v19 = vld [vmem:[%s17281_s2 + $0x924] sm:$0xf]  ;;  %v10175_v62 = vor.u32 %v11312_v40, %v10172_v36  ;;  %v10428_v28 = vld [vmem:[%s17281_s2 + $0xa30] sm:$0xf0]  ;;  %v10242_v36 = vld [vmem:[%s17281_s2 + $0x8a8] sm:$0xf] }
 0x46a   :  { %6625 = vmatpush.bf16.msrb.mxu2 %v10511_v3  ;;  %6599 = vmatpush.bf16.msrb.mxu0 %v10223_v1  ;;  %v10156_v3 = vld [vmem:[%s17281_s2 + $0x810] sm:$0xf0]  ;;  %v10303_v26 = vor.u32 %v11344_v19, %v10300_v49  ;;  %v11339_v1 = vld [vmem:[%s17281_s2 + $0x8f4] sm:$0xf0]  ;;  %v11340_v9 = vld [vmem:[%s17281_s2 + $0x904] sm:$0xf] }
 0x46b   :  { %v10159_v18 = vor.u32 %v11308_v32, %v10156_v3  ;;  %v10275_v14 = vor.u32 %v11339_v1, %v10274_v39  ;;  %v10287_v41 = vor.u32 %v11340_v9, %v10284_v12  ;;  %v5530_v6 = vpop.f32.mrf.mxu3  ;;  %v11408_v10 = vld [vmem:[%s17281_s2 + $0xb24] sm:$0xf]  ;;  %v10412_v17 = vld [vmem:[%s17281_s2 + $0xa10] sm:$0xf0]  ;;  %v10658_v19 = vld [vmem:[%s17281_s2 + $0xbe8] sm:$0xf]  ;;  %v10371_v9 = vor.u32 %v11363_v37, %v10370_v33 }
 0x46c   :  { %v11372_v35 = vld [vmem:[%s17281_s2 + $0xa04] sm:$0xf]  ;;  %v10540_v52 = vld [vmem:[%s17281_s2 + $0xb10] sm:$0xf0]  ;;  %v10514_v3 = vld [vmem:[%s17281_s2 + $0xac8] sm:$0xf] }
 0x46d   :  { %6639 = vmatpush.bf16.msrb.mxu3 %v10639_v22  ;;  %6613 = vmatpush.bf16.msrb.mxu1 %v10351_v61  ;;  %v5490_v22 = vpop.f32.mrf.mxu0  ;;  %v5516_v61 = vpop.f32.mrf.mxu2  ;;  %v10415_v30 = vor.u32 %v11372_v35, %v10412_v17  ;;  %v11327_v39 = vld [vmem:[%s17281_s2 + $0x894] sm:$0xf0]  ;;  %v10642_v12 = vld [vmem:[%s17281_s2 + $0xbc8] sm:$0xf] }
 0x46e   :  { %6626 = vmatpush.bf16.msrb.mxu2 %v10495_v24  ;;  %6600 = vmatpush.bf16.msrb.mxu0 %v10207_v7  ;;  %v11376_v24 = vld [vmem:[%s17281_s2 + $0xa24] sm:$0xf]  ;;  %v5517_v57 = vadd.f32 %v5516_v61, %v5503_v0  ;;  %v10575_v7 = vor.u32 %v11412_v42, %v10572_v25  ;;  %v5491_v31 = vadd.f32 %v5490_v22, %v4669_v50  ;;  %v5504_v27 = vpop.f32.mrf.mxu1  ;;  %v10226_v25 = vld [vmem:[%s17281_s2 + $0x888] sm:$0xf]  ;;  %v11431_v61 = vld [vmem:[%s17281_s2 + $0xbd4] sm:$0xf0] }
 0x46f   :  { %v11359_v15 = vld [vmem:[%s17281_s2 + $0x994] sm:$0xf0]  ;;  %v10626_v5 = vld [vmem:[%s17281_s2 + $0xba8] sm:$0xf] }
 0x470   :  { %v16569_v0 = vadd.f32 %v5530_v6, %v5517_v57  ;;  %v11395_v50 = vld [vmem:[%s17281_s2 + $0xab4] sm:$0xf0]  ;;  %v10210_v57 = vld [vmem:[%s17281_s2 + $0x868] sm:$0xf] }
 0x471   :  { %6640 = vmatpush.bf16.msrb.mxu3 %v10623_v58  ;;  %6614 = vmatpush.bf16.msrb.mxu1 %v10335_v34  ;;  %v10431_v58 = vor.u32 %v11376_v24, %v10428_v28  ;;  %v10556_v34 = vld [vmem:[%s17281_s2 + $0xb30] sm:$0xf0]  ;;  %v10227_v24 = vor.u32 %v11327_v39, %v10226_v25  ;;  %v10498_v28 = vld [vmem:[%s17281_s2 + $0xaa8] sm:$0xf]  ;;  %v11419_v37 = vld [vmem:[%s17281_s2 + $0xb74] sm:$0xf0] }
 0x472   :  { %6627 = vmatpush.bf16.msrb.mxu2 %v10479_v21  ;;  %6601 = vmatpush.bf16.msrb.mxu0 %v10191_v23  ;;  %v11367_v21 = vld [vmem:[%s17281_s2 + $0x9d4] sm:$0xf0]  ;;  %v10530_v23 = vld [vmem:[%s17281_s2 + $0xae8] sm:$0xf]  ;;  %v10559_v40 = vor.u32 %v11408_v10, %v10556_v34  ;;  %v10499_v63 = vor.u32 %v11395_v50, %v10498_v28 }
 0x473   :  { %v10387_v47 = vor.u32 %v11367_v21, %v10386_v16  ;;  %v5532_v1 = vpop.f32.mrf.mxu3  ;;  %v10338_v6 = vld [vmem:[%s17281_s2 + $0x968] sm:$0xf]  ;;  %v11391_v16 = vld [vmem:[%s17281_s2 + $0xa94] sm:$0xf0] }
 0x474   :  { %v10482_v34 = vld [vmem:[%s17281_s2 + $0xa88] sm:$0xf]  ;;  %v11383_v25 = vld [vmem:[%s17281_s2 + $0xa54] sm:$0xf0] }
 0x475   :  { %6641 = vmatpush.bf16.msrb.mxu3 %v10607_v56  ;;  %6615 = vmatpush.bf16.msrb.mxu1 %v10319_v45  ;;  %v11331_v56 = vld [vmem:[%s17281_s2 + $0x8b4] sm:$0xf0]  ;;  %v5505_v45 = vadd.f32 %v5504_v27, %v5491_v31  ;;  %v5518_v49 = vpop.f32.mrf.mxu2  ;;  %v10194_v17 = vld [vmem:[%s17281_s2 + $0x848] sm:$0xf] }
 0x476   :  { %6628 = vmatpush.bf16.msrb.mxu2 %v10463_v20  ;;  %6602 = vmatpush.bf16.msrb.mxu0 %v10175_v62  ;;  %v11404_v20 = vld [vmem:[%s17281_s2 + $0xb04] sm:$0xf]  ;;  %v10531_v62 = vor.u32 %v11403_v53, %v10530_v23  ;;  %v10243_v32 = vor.u32 %v11331_v56, %v10242_v36  ;;  %v11427_v31 = vld [vmem:[%s17281_s2 + $0xbb4] sm:$0xf0]  ;;  %v10610_v27 = vld [vmem:[%s17281_s2 + $0xb88] sm:$0xf] }
 0x477   :  { %v5519_v42 = vadd.f32 %v5518_v49, %v5505_v45  ;;  %v10627_v23 = vor.u32 %v11427_v31, %v10626_v5  ;;  %v11423_v36 = vld [vmem:[%s17281_s2 + $0xb94] sm:$0xf0]  ;;  %v10322_v56 = vld [vmem:[%s17281_s2 + $0x948] sm:$0xf]  ;;  %v10404_v5 = vld [vmem:[%s17281_s2 + $0x9f8] sm:$0xf0] }
 0x478   :  { %v11351_v45 = vld [vmem:[%s17281_s2 + $0x954] sm:$0xf0]  ;;  %v10611_v49 = vor.u32 %v11423_v36, %v10610_v27  ;;  %v10290_v50 = vld [vmem:[%s17281_s2 + $0x908] sm:$0xf] }
 0x479   :  { %6642 = vmatpush.bf16.msrb.mxu3 %v10591_v4  ;;  %6616 = vmatpush.bf16.msrb.mxu1 %v10303_v26  ;;  %v11399_v4 = vld [vmem:[%s17281_s2 + $0xad4] sm:$0xf0]  ;;  %v10543_v26 = vor.u32 %v11404_v20, %v10540_v52  ;;  %v16627_v46 = vadd.f32 %v5532_v1, %v5519_v42  ;;  %v10178_v52 = vld [vmem:[%s17281_s2 + $0x828] sm:$0xf] }
 0x47a   :  { %6629 = vmatpush.bf16.msrb.mxu2 %v10447_v8  ;;  %6603 = vmatpush.bf16.msrb.mxu0 %v10159_v18  ;;  %v10659_v8 = vor.u32 %v11435_v13, %v10658_v19  ;;  %v10515_v22 = vor.u32 %v11399_v4, %v10514_v3  ;;  %v10354_v18 = vld [vmem:[%s17281_s2 + $0x988] sm:$0xf]  ;;  %v11387_v20 = vld [vmem:[%s17281_s2 + $0xa74] sm:$0xf0] }
 0x47b   :  { %v11315_v19 = vld [vmem:[%s17281_s2 + $0x834] sm:$0xf0]  ;;  %v10594_v13 = vld [vmem:[%s17281_s2 + $0xb68] sm:$0xf] }
 0x47c   :  { %v10306_v42 = vld [vmem:[%s17281_s2 + $0x928] sm:$0xf]  ;;  %v10179_v4 = vor.u32 %v11315_v19, %v10178_v52  ;;  %v11379_v31 = vld [vmem:[%s17281_s2 + $0xa34] sm:$0xf0]  ;;  %v10244_v52 = vld [vmem:[%s17281_s2 + $0x8b8] sm:$0xf0] }
 0x47d   :  { %6643 = vmatpush.bf16.msrb.mxu3 %v10575_v7  ;;  %6617 = vmatpush.bf16.msrb.mxu1 %v10287_v41  ;;  %v10643_v7 = vor.u32 %v11431_v61, %v10642_v12  ;;  %v10355_v41 = vor.u32 %v11359_v15, %v10354_v18  ;;  %v5558_v35 = vpop.f32.mrf.mxu1  ;;  %v10578_v1 = vld [vmem:[%s17281_s2 + $0xb48] sm:$0xf]  ;;  %v11337_v18 = vld [vmem:[%s17281_s2 + $0x8ec] sm:$0xf]  ;;  %v10276_v15 = vld [vmem:[%s17281_s2 + $0x8f8] sm:$0xf0] }
 0x47e   :  { %6652 = vmatpush.bf16.msra.mxu0 %v10275_v14  ;;  %6630 = vmatpush.bf16.msrb.mxu2 %v10431_v58  ;;  %v11323_v14 = vld [vmem:[%s17281_s2 + $0x874] sm:$0xf0]  ;;  %v5544_v58 = vpop.f32.mrf.mxu0 }
 0x47f   :  { %6604 = vmatmul.bf16.vlgmr.msrb.gmra.mxu0 %v16342_v2  ;;  %v10211_v10 = vor.u32 %v11323_v14, %v10210_v57  ;;  %v5545_v21 = vadd.f32 %v5544_v58, %v15967_v55  ;;  %v10483_v55 = vor.u32 %v11391_v16, %v10482_v34  ;;  %v11343_v57 = vld [vmem:[%s17281_s2 + $0x914] sm:$0xf0]  ;;  %v11369_v14 = vld [vmem:[%s17281_s2 + $0x9ec] sm:$0xf]  ;;  %v10260_v16 = vld [vmem:[%s17281_s2 + $0x8d8] sm:$0xf0] }
 0x480   :  { %6618 = vmatmul.bf16.vlgmr.msrb.gmra.mxu1 %v16353_v38  ;;  %v11333_v34 = vld [vmem:[%s17281_s2 + $0x8cc] sm:$0xf]  ;;  %v11375_v36 = vld [vmem:[%s17281_s2 + $0xa14] sm:$0xf0] }
 0x481   :  { %6666 = vmatpush.bf16.msra.mxu1 %v10403_v60  ;;  %6644 = vmatpush.bf16.msrb.mxu3 %v10559_v40  ;;  %v11355_v60 = vld [vmem:[%s17281_s2 + $0x974] sm:$0xf0]  ;;  %v5559_v40 = vadd.f32 %v5558_v35, %v5545_v21  ;;  %v10407_v35 = vor.u32 %v11369_v14, %v10404_v5  ;;  %v11321_v5 = vld [vmem:[%s17281_s2 + $0x86c] sm:$0xf] }
 0x482   :  { %6653 = vmatpush.bf16.msra.mxu0 %v10259_v29  ;;  %6631 = vmatpush.bf16.msrb.mxu2 %v10415_v30  ;;  %v11319_v29 = vld [vmem:[%s17281_s2 + $0x854] sm:$0xf0]  ;;  %v10339_v53 = vor.u32 %v11355_v60, %v10338_v6  ;;  %v10466_v30 = vld [vmem:[%s17281_s2 + $0xa68] sm:$0xf]  ;;  %v10279_v60 = vor.u32 %v11337_v18, %v10276_v15  ;;  %v11429_v18 = vld [vmem:[%s17281_s2 + $0xbcc] sm:$0xf] }
 0x483   :  { %v10467_v33 = vor.u32 %v11387_v20, %v10466_v30  ;;  %v11329_v20 = vld [vmem:[%s17281_s2 + $0x8ac] sm:$0xf] }
 0x485   :  { %6667 = vmatpush.bf16.msra.mxu1 %v10387_v47  ;;  %6645 = vmatpush.bf16.msrb.mxu3 %v10543_v26  ;;  %v10195_v47 = vor.u32 %v11319_v29, %v10194_v17  ;;  %v10450_v26 = vld [vmem:[%s17281_s2 + $0xa48] sm:$0xf]  ;;  %v5560_v12 = vpop.f32.mrf.mxu1 }
 0x486   :  { %6680 = vmatpush.bf16.msra.mxu2 %v10531_v62  ;;  %6654 = vmatpush.bf16.msra.mxu0 %v10243_v32  ;;  %v10323_v62 = vor.u32 %v11351_v45, %v10322_v56  ;;  %v11347_v32 = vld [vmem:[%s17281_s2 + $0x934] sm:$0xf0]  ;;  %v5546_v3 = vpop.f32.mrf.mxu0  ;;  %v10451_v28 = vor.u32 %v11383_v25, %v10450_v26  ;;  %v10562_v29 = vld [vmem:[%s17281_s2 + $0xb28] sm:$0xf]  ;;  %v10263_v56 = vor.u32 %v11333_v34, %v10260_v16  ;;  %v11401_v45 = vld [vmem:[%s17281_s2 + $0xaec] sm:$0xf] }
 0x487   :  { %6632 = vmatmul.bf16.vlgmr.msrb.gmra.mxu2 %v16406_v51  ;;  %v5547_v39 = vadd.f32 %v5546_v3, %v16018_v48  ;;  %v10307_v61 = vor.u32 %v11347_v32, %v10306_v42  ;;  %v11415_v48 = vld [vmem:[%s17281_s2 + $0xb54] sm:$0xf0]  ;;  %v10660_v32 = vld [vmem:[%s17281_s2 + $0xbf8] sm:$0xf0]  ;;  %v11361_v3 = vld [vmem:[%s17281_s2 + $0x9ac] sm:$0xf]  ;;  %v10247_v25 = vor.u32 %v11329_v20, %v10244_v52 }
 0x488   :  { %6646 = vmatmul.bf16.vlgmr.msrb.gmra.mxu3 %v16444_v44  ;;  %v10579_v58 = vor.u32 %v11415_v48, %v10578_v1  ;;  %v10516_v1 = vld [vmem:[%s17281_s2 + $0xad8] sm:$0xf0]  ;;  %v11353_v34 = vld [vmem:[%s17281_s2 + $0x96c] sm:$0xf] }
 0x489   :  { %6694 = vmatpush.bf16.msra.mxu3 %v10659_v8  ;;  %6668 = vmatpush.bf16.msra.mxu1 %v10371_v9  ;;  %v10162_v8 = vld [vmem:[%s17281_s2 + $0x808] sm:$0xf]  ;;  %v11311_v9 = vld [vmem:[%s17281_s2 + $0x814] sm:$0xf0]  ;;  %v10340_v16 = vld [vmem:[%s17281_s2 + $0x978] sm:$0xf0] }
 0x48a   :  { %6681 = vmatpush.bf16.msra.mxu2 %v10515_v22  ;;  %6655 = vmatpush.bf16.msra.mxu0 %v10227_v24  ;;  %v10595_v22 = vor.u32 %v11419_v37, %v10594_v13  ;;  %v5561_v24 = vadd.f32 %v5560_v12, %v5547_v39  ;;  %v11407_v13 = vld [vmem:[%s17281_s2 + $0xb14] sm:$0xf0]  ;;  %v11397_v39 = vld [vmem:[%s17281_s2 + $0xacc] sm:$0xf]  ;;  %v10228_v12 = vld [vmem:[%s17281_s2 + $0x898] sm:$0xf0] }
 0x48b   :  { %v5586_v21 = vpop.f32.mrf.mxu3  ;;  %v11349_v20 = vld [vmem:[%s17281_s2 + $0x94c] sm:$0xf]  ;;  %v10324_v52 = vld [vmem:[%s17281_s2 + $0x958] sm:$0xf0] }
 0x48d   :  { %6695 = vmatpush.bf16.msra.mxu3 %v10643_v7  ;;  %6669 = vmatpush.bf16.msra.mxu1 %v10355_v41  ;;  %v5572_v7 = vpop.f32.mrf.mxu2  ;;  %v10163_v41 = vor.u32 %v11311_v9, %v10162_v8  ;;  %v11325_v9 = vld [vmem:[%s17281_s2 + $0x88c] sm:$0xf] }
 0x48e   :  { %6682 = vmatpush.bf16.msra.mxu2 %v10499_v63  ;;  %6656 = vmatpush.bf16.msra.mxu0 %v10211_v10  ;;  %v10434_v63 = vld [vmem:[%s17281_s2 + $0xa28] sm:$0xf]  ;;  %v5573_v6 = vadd.f32 %v5572_v7, %v5559_v40  ;;  %v10291_v10 = vor.u32 %v11343_v57, %v10290_v50  ;;  %v10388_v40 = vld [vmem:[%s17281_s2 + $0x9d8] sm:$0xf0]  ;;  %v11357_v50 = vld [vmem:[%s17281_s2 + $0x98c] sm:$0xf]  ;;  %v10231_v14 = vor.u32 %v11325_v9, %v10228_v12 }
 0x48f   :  { %v10435_v17 = vor.u32 %v11379_v31, %v10434_v63  ;;  %v10356_v57 = vld [vmem:[%s17281_s2 + $0x998] sm:$0xf0]  ;;  %v11393_v7 = vld [vmem:[%s17281_s2 + $0xaac] sm:$0xf] }
 0x490   :  { %v16771_v27 = vadd.f32 %v5586_v21, %v5573_v6  ;;  %v10212_v63 = vld [vmem:[%s17281_s2 + $0x878] sm:$0xf0]  ;;  %v10359_v6 = vor.u32 %v11357_v50, %v10356_v57 }
 0x491   :  { %6696 = vmatpush.bf16.msra.mxu3 %v10627_v23  ;;  %6670 = vmatpush.bf16.msra.mxu1 %v10339_v53  ;;  %v11411_v23 = vld [vmem:[%s17281_s2 + $0xb34] sm:$0xf0]  ;;  %v11365_v53 = vld [vmem:[%s17281_s2 + $0x9cc] sm:$0xf]  ;;  %v10452_v9 = vld [vmem:[%s17281_s2 + $0xa58] sm:$0xf0] }
 0x492   :  { %6683 = vmatpush.bf16.msra.mxu2 %v10483_v55  ;;  %6657 = vmatpush.bf16.msra.mxu0 %v10195_v47  ;;  %v10418_v55 = vld [vmem:[%s17281_s2 + $0xa08] sm:$0xf]  ;;  %v10532_v47 = vld [vmem:[%s17281_s2 + $0xaf8] sm:$0xf0]  ;;  %v10563_v30 = vor.u32 %v11411_v23, %v10562_v29  ;;  %v10391_v19 = vor.u32 %v11365_v53, %v10388_v40  ;;  %v11317_v40 = vld [vmem:[%s17281_s2 + $0x84c] sm:$0xf] }
 0x493   :  { %v10535_v42 = vor.u32 %v11401_v45, %v10532_v47  ;;  %v10484_v29 = vld [vmem:[%s17281_s2 + $0xa98] sm:$0xf0]  ;;  %v11421_v45 = vld [vmem:[%s17281_s2 + $0xb8c] sm:$0xf] }
 0x494   :  { %v10580_v57 = vld [vmem:[%s17281_s2 + $0xb58] sm:$0xf0] }
 0x495   :  { %6697 = vmatpush.bf16.msra.mxu3 %v10611_v49  ;;  %6671 = vmatpush.bf16.msra.mxu1 %v10323_v62  ;;  %v10419_v49 = vor.u32 %v11375_v36, %v10418_v55  ;;  %v10546_v62 = vld [vmem:[%s17281_s2 + $0xb08] sm:$0xf]  ;;  %v5574_v37 = vpop.f32.mrf.mxu2  ;;  %v10196_v55 = vld [vmem:[%s17281_s2 + $0x858] sm:$0xf0] }
 0x496   :  { %6684 = vmatpush.bf16.msra.mxu2 %v10467_v33  ;;  %6658 = vmatpush.bf16.msra.mxu0 %v10179_v4  ;;  %v11433_v33 = vld [vmem:[%s17281_s2 + $0xbec] sm:$0xf]  ;;  %v10372_v4 = vld [vmem:[%s17281_s2 + $0x9b8] sm:$0xf0]  ;;  %v5575_v26 = vadd.f32 %v5574_v37, %v5561_v24  ;;  %v10547_v8 = vor.u32 %v11407_v13, %v10546_v62  ;;  %v10519_v24 = vor.u32 %v11397_v39, %v10516_v1 }
 0x497   :  { %v10375_v48 = vor.u32 %v11361_v3, %v10372_v4  ;;  %v10468_v62 = vld [vmem:[%s17281_s2 + $0xa78] sm:$0xf0]  ;;  %v11313_v13 = vld [vmem:[%s17281_s2 + $0x82c] sm:$0xf] }
 0x498   :  { %v10596_v4 = vld [vmem:[%s17281_s2 + $0xb78] sm:$0xf0] }
 0x499   :  { %6698 = vmatpush.bf16.msra.mxu3 %v10595_v22  ;;  %6672 = vmatpush.bf16.msra.mxu1 %v10307_v61  ;;  %v5588_v22 = vpop.f32.mrf.mxu3  ;;  %v10663_v61 = vor.u32 %v11433_v33, %v10660_v32  ;;  %v10180_v33 = vld [vmem:[%s17281_s2 + $0x838] sm:$0xf0]  ;;  %v11417_v32 = vld [vmem:[%s17281_s2 + $0xb6c] sm:$0xf] }
 0x49a   :  { %6685 = vmatpush.bf16.msra.mxu2 %v10451_v28  ;;  %6659 = vmatpush.bf16.msra.mxu0 %v10163_v41  ;;  %v16829_v15 = vadd.f32 %v5588_v22, %v5575_v26  ;;  %v10644_v28 = vld [vmem:[%s17281_s2 + $0xbd8] sm:$0xf0]  ;;  %v11345_v26 = vld [vmem:[%s17281_s2 + $0x92c] sm:$0xf]  ;;  %v10183_v1 = vor.u32 %v11313_v13, %v10180_v33  ;;  %v11450_v33 = vld [vmem:[%s17279_s7 + $0xe0] sm:$0xff] }
 0x49b   :  { %v10500_v41 = vld [vmem:[%s17281_s2 + $0xab8] sm:$0xf0]  ;;  %v10647_v31 = vor.u32 %v11429_v18, %v10644_v28  ;;  %v11309_v22 = vld [vmem:[%s17281_s2 + $0x80c] sm:$0xf]  ;;  %v10599_v18 = vor.u32 %v11417_v32, %v10596_v4  ;;  %v11453_v32 = vld [vmem:[%s17279_s7 + $0x50] sm:$0xff] }
 0x49c   :  { %v5600_v21 = vpop.f32.mrf.mxu0  ;;  %v11413_v28 = vld [vmem:[%s17281_s2 + $0xb4c] sm:$0xf]  ;;  %v11449_v13 = vld [vmem:[%s17279_s7 + $0x58] sm:$0xff] }
 0x49d   :  { %6699 = vmatpush.bf16.msra.mxu3 %v10579_v58  ;;  %6673 = vmatpush.bf16.msra.mxu1 %v10291_v10  ;;  %v10503_v58 = vor.u32 %v11393_v7, %v10500_v41  ;;  %v10628_v10 = vld [vmem:[%s17281_s2 + $0xbb8] sm:$0xf0]  ;;  %v5601_v23 = vadd.f32 %v5600_v21, %v16077_v59  ;;  %v5614_v53 = vpop.f32.mrf.mxu1 }
 0x49e   :  { %6708 = vmatpush.bf16.msrb.mxu0 %v10279_v60  ;;  %6686 = vmatpush.bf16.msra.mxu2 %v10435_v17  ;;  %v11425_v60 = vld [vmem:[%s17281_s2 + $0xbac] sm:$0xf]  ;;  %v10292_v7 = vld [vmem:[%s17281_s2 + $0x918] sm:$0xf0] }
 0x49f   :  { %6660 = vmatmul.bf16.vlgmr.msra.gmra.mxu0 %v16342_v2  ;;  %v11389_v17 = vld [vmem:[%s17281_s2 + $0xa8c] sm:$0xf]  ;;  %v10631_v36 = vor.u32 %v11425_v60, %v10628_v10  ;;  %v5615_v47 = vadd.f32 %v5614_v53, %v5601_v23  ;;  %v10583_v60 = vor.u32 %v11413_v28, %v10580_v57  ;;  %v10564_v21 = vld [vmem:[%s17281_s2 + $0xb38] sm:$0xf0]  ;;  %v11467_v28 = vld [vmem:[%s17279_s7 + $0x150] sm:$0xff] }
 0x4a0   :  { %6674 = vmatmul.bf16.vlgmr.msra.gmra.mxu1 %v16353_v38  ;;  %v10487_v59 = vor.u32 %v11389_v17, %v10484_v29  ;;  %v11373_v17 = vld [vmem:[%s17281_s2 + $0xa0c] sm:$0xf]  ;;  %v10420_v29 = vld [vmem:[%s17281_s2 + $0xa18] sm:$0xf0] }
 0x4a1   :  { %6722 = vmatpush.bf16.msrb.mxu1 %v10407_v35  ;;  %6700 = vmatpush.bf16.msra.mxu3 %v10563_v30  ;;  %v10215_v35 = vor.u32 %v11321_v5, %v10212_v63  ;;  %v10612_v30 = vld [vmem:[%s17281_s2 + $0xb98] sm:$0xf0]  ;;  %v11377_v63 = vld [vmem:[%s17281_s2 + $0xa2c] sm:$0xf] }
 0x4a2   :  { %6709 = vmatpush.bf16.msrb.mxu0 %v10263_v56  ;;  %6687 = vmatpush.bf16.msra.mxu2 %v10419_v49  ;;  %v10343_v56 = vor.u32 %v11353_v34, %v10340_v16  ;;  %v11385_v49 = vld [vmem:[%s17281_s2 + $0xa6c] sm:$0xf]  ;;  %v10615_v37 = vor.u32 %v11421_v45, %v10612_v30  ;;  %v11441_v23 = vld [vmem:[%s17279_s7 + $0x78] sm:$0xff]  ;;  %v11442_v45 = vld [vmem:[%s17279_s7 + $0x70] sm:$0xff] }
 0x4a3   :  { %v10471_v3 = vor.u32 %v11385_v49, %v10468_v62  ;;  %v11409_v16 = vld [vmem:[%s17281_s2 + $0xb2c] sm:$0xf]  ;;  %v11447_v49 = vld [vmem:[%s17279_s7 + $0x178] sm:$0xff] }
 0x4a4   :  { %v5602_v39 = vpop.f32.mrf.mxu0  ;;  %v10567_v53 = vor.u32 %v11409_v16, %v10564_v21  ;;  %v11444_v30 = vld [vmem:[%s17279_s7 + $0x68] sm:$0xff]  ;;  %v11469_v57 = vld [vmem:[%s17279_s7 + $0x1d8] sm:$0xff] }
 0x4a5   :  { %6723 = vmatpush.bf16.msrb.mxu1 %v10391_v19  ;;  %6701 = vmatpush.bf16.msra.mxu3 %v10547_v8  ;;  %v10199_v19 = vor.u32 %v11317_v40, %v10196_v55  ;;  %v11381_v8 = vld [vmem:[%s17281_s2 + $0xa4c] sm:$0xf]  ;;  %v5603_v12 = vadd.f32 %v5602_v39, %v16137_v43  ;;  %v10423_v40 = vor.u32 %v11373_v17, %v10420_v29  ;;  %v11479_v17 = vld [vmem:[%s17279_s7 + $0x138] sm:$0xff] }
 0x4a6   :  { %6736 = vmatpush.bf16.msrb.mxu2 %v10535_v42  ;;  %6710 = vmatpush.bf16.msrb.mxu0 %v10247_v25  ;;  %v10327_v42 = vor.u32 %v11349_v20, %v10324_v52  ;;  %v10308_v25 = vld [vmem:[%s17281_s2 + $0x938] sm:$0xf0]  ;;  %v10455_v43 = vor.u32 %v11381_v8, %v10452_v9  ;;  %v11405_v55 = vld [vmem:[%s17281_s2 + $0xb0c] sm:$0xf]  ;;  %v11445_v52 = vld [vmem:[%s17279_s7 + $0xf0] sm:$0xff] }
 0x4a7   :  { %6688 = vmatmul.bf16.vlgmr.msra.gmra.mxu2 %v16406_v51  ;;  %v11448_v62 = vld [vmem:[%s17279_s7 + $0xe8] sm:$0xff]  ;;  %v11459_v8 = vld [vmem:[%s17279_s7 + $0x160] sm:$0xff]  ;;  %v11480_v29 = vld [vmem:[%s17279_s7 + $0x18] sm:$0xff] }
 0x4a8   :  { %6702 = vmatmul.bf16.vlgmr.msra.gmra.mxu3 %v16444_v44  ;;  %v11460_v9 = vld [vmem:[%s17279_s7 + $0x40] sm:$0xff]  ;;  %v11478_v21 = vld [vmem:[%s17279_s7 + $0xa8] sm:$0xff] }
 0x4a9   :  { %6750 = vmatpush.bf16.msrb.mxu3 %v10663_v61  ;;  %6724 = vmatpush.bf16.msrb.mxu1 %v10375_v48  ;;  %v10164_v61 = vld [vmem:[%s17281_s2 + $0x818] sm:$0xf0]  ;;  %v5616_v48 = vpop.f32.mrf.mxu1 }
 0x4aa   :  { %6737 = vmatpush.bf16.msrb.mxu2 %v10519_v24  ;;  %6711 = vmatpush.bf16.msrb.mxu0 %v10231_v14  ;;  %v10311_v24 = vor.u32 %v11345_v26, %v10308_v25  ;;  %v5617_v50 = vadd.f32 %v5616_v48, %v5603_v12  ;;  %v11341_v14 = vld [vmem:[%s17281_s2 + $0x90c] sm:$0xf]  ;;  %v5628_v41 = vpop.f32.mrf.mxu2  ;;  %v10167_v5 = vor.u32 %v11309_v22, %v10164_v61  ;;  %v11454_v26 = vld [vmem:[%s17279_s7 + $0xd8] sm:$0xff] }
 0x4ab   :  { %v5642_v10 = vpop.f32.mrf.mxu3  ;;  %v11455_v25 = vld [vmem:[%s17279_s7 + $0x168] sm:$0xff]  ;;  %v11463_v61 = vld [vmem:[%s17279_s7 + $0x158] sm:$0xff] }
 0x4ac   :  { %v11461_v12 = vld [vmem:[%s17279_s7 + $0x1e8] sm:$0xff]  ;;  %v11464_v48 = vld [vmem:[%s17279_s7 + $0x38] sm:$0xff] }
 0x4ad   :  { %6751 = vmatpush.bf16.msrb.mxu3 %v10647_v31  ;;  %6725 = vmatpush.bf16.msrb.mxu1 %v10359_v6  ;;  %v10436_v31 = vld [vmem:[%s17281_s2 + $0xa38] sm:$0xf0]  ;;  %v5629_v6 = vadd.f32 %v5628_v41, %v5615_v47  ;;  %v11462_v22 = vld [vmem:[%s17279_s7 + $0xc8] sm:$0xff] }
 0x4ae   :  { %6738 = vmatpush.bf16.msrb.mxu2 %v10503_v58  ;;  %6712 = vmatpush.bf16.msrb.mxu0 %v10215_v35  ;;  %v10295_v58 = vor.u32 %v11341_v14, %v10292_v7  ;;  %v10439_v34 = vor.u32 %v11377_v63, %v10436_v31  ;;  %v11443_v47 = vld [vmem:[%s17279_s7 + $0xf8] sm:$0xff]  ;;  %v11471_v41 = vld [vmem:[%s17279_s7 + $0x148] sm:$0xff] }
 0x4af   :  { %v16952_v35 = vadd.f32 %v5642_v10, %v5629_v6  ;;  %v11470_v7 = vld [vmem:[%s17279_s7 + $0xb8] sm:$0xff]  ;;  %v11472_v63 = vld [vmem:[%s17279_s7 + $0x28] sm:$0xff]  ;;  %v11474_v6 = vld [vmem:[%s17279_s7 + $0xb0] sm:$0xff] }
 0x4b0   :  { %v11476_v10 = vld [vmem:[%s17279_s7 + $0x20] sm:$0xff] }
 0x4b1   :  { %6752 = vmatpush.bf16.msrb.mxu3 %v10631_v36  ;;  %6726 = vmatpush.bf16.msrb.mxu1 %v10343_v56  ;;  %v10548_v36 = vld [vmem:[%s17281_s2 + $0xb18] sm:$0xf0] }
 0x4b2   :  { %6739 = vmatpush.bf16.msrb.mxu2 %v10487_v59  ;;  %6713 = vmatpush.bf16.msrb.mxu0 %v10199_v19  ;;  %v5630_v56 = vpop.f32.mrf.mxu2  ;;  %v10551_v59 = vor.u32 %v11405_v55, %v10548_v36  ;;  %v11483_v55 = vld [vmem:[%s17279_s7 + $0x130] sm:$0xff] }
 0x4b3   :  { %v5644_v20 = vpop.f32.mrf.mxu3 }
 0x4b5   :  { %6753 = vmatpush.bf16.msrb.mxu3 %v10615_v37  ;;  %6727 = vmatpush.bf16.msrb.mxu1 %v10327_v42  ;;  %v11451_v37 = vld [vmem:[%s17279_s7 + $0x170] sm:$0xff]  ;;  %v11452_v42 = vld [vmem:[%s17279_s7 + $0x1f8] sm:$0xff] }
 0x4b6   :  { %6740 = vmatpush.bf16.msrb.mxu2 %v10471_v3  ;;  %6714 = vmatpush.bf16.msrb.mxu0 %v10183_v1  ;;  %v11458_v1 = vld [vmem:[%s17279_s7 + $0xd0] sm:$0xff] }
 0x4b9   :  { %6754 = vmatpush.bf16.msrb.mxu3 %v10599_v18  ;;  %6728 = vmatpush.bf16.msrb.mxu1 %v10311_v24  ;;  %v11465_v18 = vld [vmem:[%s17279_s7 + $0x1e0] sm:$0xff] }
 0x4ba   :  { %6741 = vmatpush.bf16.msrb.mxu2 %v10455_v43  ;;  %6715 = vmatpush.bf16.msrb.mxu0 %v10167_v5  ;;  %v11466_v24 = vld [vmem:[%s17279_s7 + $0xc0] sm:$0xff]  ;;  %v11468_v43 = vld [vmem:[%s17279_s7 + $0x30] sm:$0xff] }
 0x4bd   :  { %6755 = vmatpush.bf16.msrb.mxu3 %v10583_v60  ;;  %6729 = vmatpush.bf16.msrb.mxu1 %v10295_v58  ;;  %v5670_v4 = vpop.f32.mrf.mxu1  ;;  %v11475_v60 = vld [vmem:[%s17279_s7 + $0x140] sm:$0xff] }
 0x4be   :  { %6840 = vmatpush.msra.mxu0 %v11441_v23  ;;  %6742 = vmatpush.bf16.msrb.mxu2 %v10439_v34  ;;  %v11477_v34 = vld [vmem:[%s17279_s7 + $0x1c8] sm:$0xff]  ;;  %v11481_v23 = vld [vmem:[%s17279_s7 + $0x1c0] sm:$0xff] }
 0x4bf   :  { %6716 = vmatmul.bf16.vlgmr.msrb.gmra.mxu0 %v16342_v2  ;;  %v5631_v2 = vadd.f32 %v5630_v56, %v5617_v50  ;;  %v11484_v56 = vld [vmem:[%s17279_s7 + $0x10] sm:$0xff] }
 0x4c0   :  { %6841 = vmatpush.msra.mxu0 %v11442_v45  ;;  %6730 = vmatmul.bf16.vlgmr.msrb.gmra.mxu1 %v16353_v38  ;;  %v11446_v38 = vld [vmem:[%s17279_s7 + $0x60] sm:$0xff]  ;;  %v11485_v45 = vld [vmem:[%s17279_s7 + $0x1b8] sm:$0xff] }
 0x4c1   :  { %6860 = vmatpush.msra.mxu1 %v11443_v47  ;;  %6756 = vmatpush.bf16.msrb.mxu3 %v10567_v53  ;;  %v16983_v19 = vadd.f32 %v5644_v20, %v5631_v2  ;;  %v11486_v47 = vld [vmem:[%s17279_s7 + $0x98] sm:$0xff]  ;;  %v11487_v2 = vld [vmem:[%s17279_s7 + $0x128] sm:$0xff]  ;;  %v11490_v20 = vld [vmem:[%s17279_s7 + $0x90] sm:$0xff] }
 0x4c2   :  { %6842 = vmatpush.msra.mxu0 %v11444_v30  ;;  %6743 = vmatpush.bf16.msrb.mxu2 %v10423_v40  ;;  %v11482_v40 = vld [vmem:[%s17279_s7 + $0xa0] sm:$0xff]  ;;  %v11489_v30 = vld [vmem:[%s17279_s7 + $0x1b0] sm:$0xff] }
 0x4c3   :  { %6861 = vmatpush.msra.mxu1 %v11445_v52  ;;  %v11491_v52 = vld [vmem:[%s17279_s7 + $0x120] sm:$0xff] }
 0x4c4   :  { %6843 = vmatpush.msra.mxu0 %v11446_v38 }
 0x4c5   :  { %6862 = vmatpush.msra.mxu1 %v11448_v62  ;;  %6757 = vmatpush.bf16.msrb.mxu3 %v10551_v59  ;;  %v5672_v5 = vpop.f32.mrf.mxu1  ;;  %v11488_v59 = vld [vmem:[%s17279_s7 + $0x8] sm:$0xff] }
 0x4c6   :  { %6880 = vmatpush.msra.mxu2 %v11447_v49  ;;  %6844 = vmatpush.msra.mxu0 %v11449_v13  ;;  %v11492_v49 = vld [vmem:[%s17279_s7] sm:$0xff]  ;;  %v11493_v62 = vld [vmem:[%s17279_s7 + $0x1a8] sm:$0xff] }
 0x4c7   :  { %6744 = vmatmul.bf16.vlgmr.msrb.gmra.mxu2 %v16406_v51  ;;  %6863 = vmatpush.msra.mxu1 %v11450_v33  ;;  %v5656_v51 = vpop.f32.mrf.mxu0  ;;  %v11494_v33 = vld [vmem:[%s17279_s7 + $0x88] sm:$0xff] }
 0x4c8   :  { %6881 = vmatpush.msra.mxu2 %v11451_v37  ;;  %6758 = vmatmul.bf16.vlgmr.msrb.gmra.mxu3 %v16444_v44  ;;  %v5657_v3 = vadd.f32 %v5656_v51, %v16340_v54  ;;  %v11456_v44 = vld [vmem:[%s17279_s7 + $0x48] sm:$0xff]  ;;  %v11457_v54 = vld [vmem:[%s17279_s7 + $0x1f0] sm:$0xff]  ;;  %v11495_v37 = vld [vmem:[%s17279_s7 + $0x118] sm:$0xff] }
 0x4c9   :  { %6900 = vmatpush.msra.mxu3 %v11452_v42  ;;  %6845 = vmatpush.msra.mxu0 %v11453_v32  ;;  %v11496_v42 = vld [vmem:[%s17279_s7 + $0x1a0] sm:$0xff] }
 0x4ca   :  { %6864 = vmatpush.msra.mxu1 %v11454_v26  ;;  %6882 = vmatpush.msra.mxu2 %v11455_v25  ;;  %v5671_v39 = vadd.f32 %v5670_v4, %v5657_v3  ;;  %v5684_v58 = vpop.f32.mrf.mxu2  ;;  %v11497_v51 = vld [vmem:[%s17280_s8] sm:$0xff]  ;;  %v11499_v4 = vld [vmem:[%s17279_s7 + $0x110] sm:$0xff]  ;;  %v11500_v25 = vld [vmem:[%s17279_s7 + $0x198] sm:$0xff] }
 0x4cb   :  { %6846 = vmatpush.msra.mxu0 %v11456_v44  ;;  %6901 = vmatpush.msra.mxu3 %v11457_v54  ;;  %v5698_v53 = vpop.f32.mrf.mxu3  ;;  %v11498_v3 = vld [vmem:[%s17279_s7 + $0x80] sm:$0xff]  ;;  %v11501_v44 = vld [vmem:[%s17280_s8 + $0x8] sm:$0xff] }
 0x4cc   :  { %6865 = vmatpush.msra.mxu1 %v11458_v1  ;;  %6883 = vmatpush.msra.mxu2 %v11459_v8  ;;  %v5685_v16 = vadd.f32 %v5684_v58, %v5671_v39  ;;  %v11502_v54 = vld [vmem:[%s17279_s7 + $0x108] sm:$0xff]  ;;  %v11503_v39 = vld [vmem:[%s17279_s7 + $0x190] sm:$0xff]  ;;  %v11504_v1 = vld [vmem:[%s17279_s7 + $0x100] sm:$0xff] }
 0x4cd   :  { %6847 = vmatpush.msra.mxu0 %v11460_v9  ;;  %6902 = vmatpush.msra.mxu3 %v11461_v12  ;;  %v11505_v8 = vld [vmem:[%s17279_s7 + $0x188] sm:$0xff]  ;;  %v11506_v9 = vld [vmem:[%s17280_s8 + $0x10] sm:$0xff]  ;;  %v11507_v12 = vld [vmem:[%s17279_s7 + $0x180] sm:$0xff] }
 0x4ce   :  { %6866 = vmatpush.msra.mxu1 %v11462_v22  ;;  %6884 = vmatpush.msra.mxu2 %v11463_v61  ;;  %v17103_v36 = vadd.f32 %v5698_v53, %v5685_v16  ;;  %v11508_v22 = vld [vmem:[%s17280_s8 + $0x18] sm:$0xff] }
 0x4cf   :  { %6848 = vmatpush.msra.mxu0 %v11464_v48  ;;  %6903 = vmatpush.msra.mxu3 %v11465_v18  ;;  %v5658_v50 = vpop.f32.mrf.mxu0 }
 0x4d0   :  { %6867 = vmatpush.msra.mxu1 %v11466_v24  ;;  %6885 = vmatpush.msra.mxu2 %v11467_v28  ;;  %v5659_v14 = vadd.f32 %v5658_v50, %v16419_v11  ;;  %v11473_v11 = vld [vmem:[%s17279_s7 + $0x1d0] sm:$0xff] }
 0x4d1   :  { %6849 = vmatpush.msra.mxu0 %v11468_v43  ;;  %6904 = vmatpush.msra.mxu3 %v11469_v57 }
 0x4d2   :  { %6868 = vmatpush.msra.mxu1 %v11470_v7  ;;  %6886 = vmatpush.msra.mxu2 %v11471_v41  ;;  %v5673_v31 = vadd.f32 %v5672_v5, %v5659_v14  ;;  %v5686_v38 = vpop.f32.mrf.mxu2 }
 0x4d3   :  { %6850 = vmatpush.msra.mxu0 %v11472_v63  ;;  %6905 = vmatpush.msra.mxu3 %v11473_v11  ;;  %v5700_v32 = vpop.f32.mrf.mxu3 }
 0x4d4   :  { %6869 = vmatpush.msra.mxu1 %v11474_v6  ;;  %6887 = vmatpush.msra.mxu2 %v11475_v60  ;;  %v5687_v13 = vadd.f32 %v5686_v38, %v5673_v31 }
 0x4d5   :  { %6851 = vmatpush.msra.mxu0 %v11476_v10  ;;  %6906 = vmatpush.msra.mxu3 %v11477_v34 }
 0x4d6   :  { %6870 = vmatpush.msra.mxu1 %v11478_v21  ;;  %6888 = vmatpush.msra.mxu2 %v11479_v17  ;;  %v17153_v26 = vadd.f32 %v5700_v32, %v5687_v13 }
 0x4d7   :  { %6852 = vmatpush.msra.mxu0 %v11480_v29  ;;  %6907 = vmatpush.msra.mxu3 %v11481_v23 }
 0x4d8   :  { %6871 = vmatpush.msra.mxu1 %v11482_v40  ;;  %6889 = vmatpush.msra.mxu2 %v11483_v55 }
 0x4d9   :  { %6853 = vmatpush.msra.mxu0 %v11484_v56  ;;  %6908 = vmatpush.msra.mxu3 %v11485_v45 }
 0x4da   :  { %6872 = vmatpush.msra.mxu1 %v11486_v47  ;;  %6890 = vmatpush.msra.mxu2 %v11487_v2 }
 0x4db   :  { %6854 = vmatpush.msra.mxu0 %v11488_v59  ;;  %6909 = vmatpush.msra.mxu3 %v11489_v30 }
 0x4dc   :  { %6873 = vmatpush.msra.mxu1 %v11490_v20  ;;  %6891 = vmatpush.msra.mxu2 %v11491_v52  ;;  %v6549_v61 = vpop.f32.mrf.mxu0 }
 0x4dd   :  { %6855 = vmatpush.msra.mxu0 %v11492_v49  ;;  %6910 = vmatpush.msra.mxu3 %v11493_v62  ;;  %v6563_v48 = vpop.f32.mrf.mxu1 }
 0x4de   :  { %6874 = vmatpush.msra.mxu1 %v11494_v33  ;;  %6892 = vmatpush.msra.mxu2 %v11495_v37  ;;  %v6564_v24 = vadd.f32 %v6563_v48, %v6549_v61 }
 0x4df   :  { %6911 = vmatpush.msra.mxu3 %v11496_v42  ;;  %6967 = vmatpush.msrb.mxu0 %v11497_v51 }
 0x4e0   :  { %6875 = vmatpush.msra.mxu1 %v11498_v3  ;;  %6893 = vmatpush.msra.mxu2 %v11499_v4 }
 0x4e1   :  { %6912 = vmatpush.msra.mxu3 %v11500_v25 }
 0x4e2   :  { %6987 = vmatpush.msrb.mxu1 %v11501_v44  ;;  %6894 = vmatpush.msra.mxu2 %v11502_v54 }
 0x4e3   :  { %6913 = vmatpush.msra.mxu3 %v11503_v39 }
 0x4e4   :  { %6895 = vmatpush.msra.mxu2 %v11504_v1  ;;  %v6551_v50 = vpop.f32.mrf.mxu0 }
 0x4e5   :  { %6914 = vmatpush.msra.mxu3 %v11505_v8  ;;  %v6565_v43 = vpop.f32.mrf.mxu1 }
 0x4e6   :  { %7007 = vmatpush.msrb.mxu2 %v11506_v9  ;;  %v6566_v14 = vadd.f32 %v6565_v43, %v6551_v50 }
 0x4e7   :  { %6915 = vmatpush.msra.mxu3 %v11507_v12 }
 0x4e9   :  { %7027 = vmatpush.msrb.mxu3 %v11508_v22 }
 0x4ea   :  { %v6577_v18 = vpop.f32.mrf.mxu2 }
 0x4eb   :  { %v6591_v28 = vpop.f32.mrf.mxu3  ;;  %v6578_v57 = vadd.f32 %v6577_v18, %v6564_v24 }
 0x4ed   :  { %v6592_v7 = vadd.f32 %v6591_v28, %v6578_v57 }
 0x4ef   :  { %v17183_v11 = vadd.f32 %v6592_v7, %v16569_v0 }
 0x4f1   :  { %v6800_v60 = vmul.f32 %v17183_v11, %v17183_v11 }
 0x4f2   :  { %v6579_v41 = vpop.f32.mrf.mxu2 }
 0x4f3   :  { %v6580_v5 = vadd.f32 %v6579_v41, %v6566_v14  ;;  %v6593_v63 = vpop.f32.mrf.mxu3 }
 0x4f5   :  { %v6594_v31 = vadd.f32 %v6593_v63, %v6580_v5 }
 0x4f7   :  { %v17186_v6 = vadd.f32 %v6594_v31, %v16627_v46 }
 0x4f9   :  { %v6772_v58 = vadd.f32 %v17186_v6, %v17183_v11  ;;  %v6804_v10 = vmul.f32 %v17186_v6, %v17186_v6 }
 0x4fb   :  { %v6773_v34 = vrot.slane %v6772_v58, 4  ;;  %v6808_v16 = vadd.f32 %v6804_v10, %v6800_v60 }
 0x4fc   :  { %v6605_v23 = vpop.f32.mrf.mxu0 }
 0x4fd   :  { %v6774_v21 = vadd.f32 %v6773_v34, %v6772_v58  ;;  %v6809_v17 = vrot.slane %v6808_v16, 4  ;;  %v6619_v53 = vpop.f32.mrf.mxu1 }
 0x4fe   :  { %v6620_v30 = vadd.f32 %v6619_v53, %v6605_v23 }
 0x4ff   :  { %v6775_v29 = vrot.slane %v6774_v21, 2  ;;  %v6810_v0 = vadd.f32 %v6809_v17, %v6808_v16 }
 0x501   :  { %v6776_v40 = vadd.f32 %v6775_v29, %v6774_v21  ;;  %v6811_v46 = vrot.slane %v6810_v0, 2 }
 0x503   :  { %v6777_v55 = vrot.slane %v6776_v40, 1  ;;  %v6812_v56 = vadd.f32 %v6811_v46, %v6810_v0 }
 0x504   :  { %v6607_v38 = vpop.f32.mrf.mxu0 }
 0x505   :  { %v6813_v45 = vrot.slane %v6812_v56, 1  ;;  %v6778_v2 = vadd.f32 %v6777_v55, %v6776_v40  ;;  %v6621_v49 = vpop.f32.mrf.mxu1 }
 0x506   :  { %v6622_v13 = vadd.f32 %v6621_v49, %v6607_v38 }
 0x507   :  { %v6814_v59 = vadd.f32 %v6813_v45, %v6812_v56 }
 0x509   :  { %v6836_v52 = vsel %vm3366_vm2, %v6778_v2, %v6814_v59 }
 0x50a   :  { %v6633_v47 = vpop.f32.mrf.mxu2  ;;  %6856 = vmatmul.f32.vlgmr.msra.gmra.mxu0 %v6836_v52 }
 0x50b   :  { %v6647_v20 = vpop.f32.mrf.mxu3  ;;  %v6634_v62 = vadd.f32 %v6633_v47, %v6620_v30 }
 0x50d   :  { %v6648_v33 = vadd.f32 %v6647_v20, %v6634_v62 }
 0x50f   :  { %v17196_v32 = vadd.f32 %v6648_v33, %v16771_v27 }
 0x511   :  { %v6801_v25 = vmul.f32 %v17196_v32, %v17196_v32 }
 0x512   :  { %v6635_v37 = vpop.f32.mrf.mxu2 }
 0x513   :  { %v6636_v42 = vadd.f32 %v6635_v37, %v6622_v13  ;;  %v6649_v51 = vpop.f32.mrf.mxu3 }
 0x515   :  { %v6650_v3 = vadd.f32 %v6649_v51, %v6636_v42 }
 0x517   :  { %v17199_v4 = vadd.f32 %v6650_v3, %v16829_v15 }
 0x519   :  { %v6779_v44 = vadd.f32 %v17199_v4, %v17196_v32  ;;  %v6805_v54 = vmul.f32 %v17199_v4, %v17199_v4 }
 0x51b   :  { %v6780_v39 = vrot.slane %v6779_v44, 4  ;;  %v6815_v1 = vadd.f32 %v6805_v54, %v6801_v25 }
 0x51c   :  { %v6661_v22 = vpop.f32.mrf.mxu0 }
 0x51d   :  { %v6781_v8 = vadd.f32 %v6780_v39, %v6779_v44  ;;  %v6816_v9 = vrot.slane %v6815_v1, 4  ;;  %v6675_v61 = vpop.f32.mrf.mxu1 }
 0x51e   :  { %v6676_v14 = vadd.f32 %v6675_v61, %v6661_v22 }
 0x51f   :  { %v6782_v12 = vrot.slane %v6781_v8, 2  ;;  %v6817_v27 = vadd.f32 %v6816_v9, %v6815_v1 }
 0x521   :  { %v6783_v48 = vadd.f32 %v6782_v12, %v6781_v8  ;;  %v6818_v15 = vrot.slane %v6817_v27, 2 }
 0x523   :  { %v6784_v18 = vrot.slane %v6783_v48, 1  ;;  %v6819_v24 = vadd.f32 %v6818_v15, %v6817_v27 }
 0x524   :  { %v6663_v5 = vpop.f32.mrf.mxu0 }
 0x525   :  { %v6820_v28 = vrot.slane %v6819_v24, 1  ;;  %v6785_v43 = vadd.f32 %v6784_v18, %v6783_v48  ;;  %v6677_v63 = vpop.f32.mrf.mxu1 }
 0x526   :  { %v6678_v60 = vadd.f32 %v6677_v63, %v6663_v5 }
 0x527   :  { %v6821_v57 = vadd.f32 %v6820_v28, %v6819_v24 }
 0x529   :  { %v6837_v41 = vsel %vm3366_vm2, %v6785_v43, %v6821_v57 }
 0x52a   :  { %v6689_v50 = vpop.f32.mrf.mxu2  ;;  %6876 = vmatmul.f32.vlgmr.msra.gmra.mxu1 %v6837_v41 }
 0x52b   :  { %v6703_v7 = vpop.f32.mrf.mxu3  ;;  %v6690_v31 = vadd.f32 %v6689_v50, %v6676_v14 }
 0x52d   :  { %v6704_v58 = vadd.f32 %v6703_v7, %v6690_v31 }
 0x52f   :  { %v17209_v21 = vadd.f32 %v6704_v58, %v16952_v35 }
 0x531   :  { %v6802_v0 = vmul.f32 %v17209_v21, %v17209_v21 }
 0x532   :  { %v6691_v10 = vpop.f32.mrf.mxu2 }
 0x533   :  { %v6692_v34 = vadd.f32 %v6691_v10, %v6678_v60  ;;  %v6705_v16 = vpop.f32.mrf.mxu3 }
 0x535   :  { %v6706_v17 = vadd.f32 %v6705_v16, %v6692_v34 }
 0x537   :  { %v17212_v29 = vadd.f32 %v6706_v17, %v16983_v19 }
 0x539   :  { %v6786_v23 = vadd.f32 %v17212_v29, %v17209_v21  ;;  %v6806_v53 = vmul.f32 %v17212_v29, %v17212_v29 }
 0x53b   :  { %v6787_v40 = vrot.slane %v6786_v23, 4  ;;  %v6822_v46 = vadd.f32 %v6806_v53, %v6802_v0 }
 0x53c   :  { %v6717_v47 = vpop.f32.mrf.mxu0 }
 0x53d   :  { %v6788_v55 = vadd.f32 %v6787_v40, %v6786_v23  ;;  %v6823_v56 = vrot.slane %v6822_v46, 4  ;;  %v6731_v2 = vpop.f32.mrf.mxu1 }
 0x53e   :  { %v6732_v13 = vadd.f32 %v6731_v2, %v6717_v47 }
 0x53f   :  { %v6789_v45 = vrot.slane %v6788_v55, 2  ;;  %v6824_v35 = vadd.f32 %v6823_v56, %v6822_v46 }
 0x541   :  { %v6790_v59 = vadd.f32 %v6789_v45, %v6788_v55  ;;  %v6825_v19 = vrot.slane %v6824_v35, 2 }
 0x543   :  { %v6791_v30 = vrot.slane %v6790_v59, 1  ;;  %v6826_v20 = vadd.f32 %v6825_v19, %v6824_v35 }
 0x544   :  { %v6719_v42 = vpop.f32.mrf.mxu0 }
 0x545   :  { %v6827_v52 = vrot.slane %v6826_v20, 1  ;;  %v6792_v49 = vadd.f32 %v6791_v30, %v6790_v59  ;;  %v6733_v51 = vpop.f32.mrf.mxu1  ;;  %v3596_v59 = vld [vmem:[%s17284_s5] sm:$0x1] }
 0x546   :  { %v6734_v25 = vadd.f32 %v6733_v51, %v6719_v42 }
 0x547   :  { %v6828_v62 = vadd.f32 %v6827_v52, %v6826_v20  ;;  %v3597_v20 = vld [vmem:[%s17285_s6] sm:$0x1] }
 0x549   :  { %v6838_v37 = vsel %vm3366_vm2, %v6792_v49, %v6828_v62 }
 0x54a   :  { %v6745_v38 = vpop.f32.mrf.mxu2  ;;  %6896 = vmatmul.f32.vlgmr.msra.gmra.mxu2 %v6838_v37 }
 0x54b   :  { %v6759_v33 = vpop.f32.mrf.mxu3  ;;  %v6746_v3 = vadd.f32 %v6745_v38, %v6732_v13 }
 0x54d   :  { %v6760_v44 = vadd.f32 %v6759_v33, %v6746_v3 }
 0x54f   :  { %v17222_v8 = vadd.f32 %v6760_v44, %v17103_v36 }
 0x551   :  { %v6803_v27 = vmul.f32 %v17222_v8, %v17222_v8 }
 0x552   :  { %v6747_v54 = vpop.f32.mrf.mxu2 }
 0x553   :  { %v6748_v39 = vadd.f32 %v6747_v54, %v6734_v25  ;;  %v6761_v1 = vpop.f32.mrf.mxu3 }
 0x555   :  { %v6762_v9 = vadd.f32 %v6761_v1, %v6748_v39 }
 0x557   :  { %v17225_v12 = vadd.f32 %v6762_v9, %v17153_v26 }
 0x559   :  { %v6793_v22 = vadd.f32 %v17225_v12, %v17222_v8  ;;  %v6807_v61 = vmul.f32 %v17225_v12, %v17225_v12 }
 0x55b   :  { %v6794_v48 = vrot.slane %v6793_v22, 4  ;;  %v6829_v15 = vadd.f32 %v6807_v61, %v6803_v27 }
 0x55d   :  { %v6795_v18 = vadd.f32 %v6794_v48, %v6793_v22  ;;  %v6830_v24 = vrot.slane %v6829_v15, 4 }
 0x55f   :  { %v6796_v28 = vrot.slane %v6795_v18, 2  ;;  %v6831_v36 = vadd.f32 %v6830_v24, %v6829_v15 }
 0x561   :  { %v6797_v50 = vadd.f32 %v6796_v28, %v6795_v18  ;;  %v6832_v43 = vrot.slane %v6831_v36, 2 }
 0x563   :  { %v6798_v57 = vrot.slane %v6797_v50, 1  ;;  %v6833_v26 = vadd.f32 %v6832_v43, %v6831_v36 }
 0x565   :  { %v6834_v14 = vrot.slane %v6833_v26, 1  ;;  %v6799_v7 = vadd.f32 %v6798_v57, %v6797_v50 }
 0x567   :  { %v6835_v41 = vadd.f32 %v6834_v14, %v6833_v26 }
 0x569   :  { %v6839_v5 = vsel %vm3366_vm2, %v6799_v7, %v6835_v41 }
 0x56a   :  { %6916 = vmatmul.f32.vlgmr.msra.gmra.mxu3 %v6839_v5 }
 0x587   :  { %v6857_v31 = vpop.f32.mrf.mxu0 }
 0x5a7   :  { %v6877_v63 = vpop.f32.mrf.mxu1 }
 0x5a8   :  { %v6878_v58 = vadd.f32 %v6877_v63, %v6857_v31 }
 0x5cd   :  { %v6897_v60 = vpop.f32.mrf.mxu2 }
 0x5ce   :  { %v6898_v10 = vadd.f32 %v6897_v60, %v6878_v58 }
 0x5ed   :  { %v6917_v34 = vpop.f32.mrf.mxu3 }
 0x5ee   :  { %v6918_v16 = vadd.f32 %v6917_v34, %v6898_v10 }
 0x5f0   :  { %v6920_v17 = vmul.f32 0.0009765625, %v6918_v16 }
 0x5f2   :  { %v6921_v0 = vmul.f32 %v6920_v17, %v6920_v17 }
 0x5f4   :  { %v6923_v23 = vrot.slane %v6921_v0, 7 }
 0x5f6   :  { %v6925_v53 = vsub.f32 %v6920_v17, %v6923_v23 }
 0x5f8   :  { %v6926_v40 = vadd.f32 1e-05, %v6925_v53 }
 0x5fa   :  { %11439 = vrsqrt.f32 %v6926_v40  ;;  %vm6933_vm8 = vweird.f32 %v6926_v40 }
 0x600   :  { %v11440_v46 = vpop.eup %11439 }
 0x601   :  { %v6928_v55 = vmul.f32 %v11440_v46, %v6926_v40  ;;  %vm6934_vm7 = vweird.f32 %v11440_v46 }
 0x602   :  { %vm6935_vm9 = vmor %vm6933_vm8, %vm6934_vm7 }
 0x603   :  { %v6929_v56 = vmul.f32 %v11440_v46, %v6928_v55 }
 0x605   :  { %v6930_v45 = vmul.f32 0.5, %v6929_v56 }
 0x607   :  { %v6931_v35 = vsub.f32 1.5, %v6930_v45 }
 0x609   :  { %v6932_v47 = vmul.f32 %v11440_v46, %v6931_v35 }
 0x60b   :  { %v6936_v2 = vsel %vm6935_vm9, %v11440_v46, %v6932_v47 }
 0x60c   :  { %6938 = vst [vmem:[#allocation1] sm:$0xff] %v6936_v2 }
 0x613   :  { %v6940_v19 = vld [vmem:[#allocation1 + $0x1] ss:$9 sm:$0xff] }
 0x614   :  { %v6942_v30 = vmul.f32 %v6940_v19, %v3596_v59 }
 0x616   :  { %v6943_v52 = vmul.f32 %v6942_v30, %v6920_v17 }
 0x618   :  { %v6944_v38 = vsub.f32 %v3597_v20, %v6943_v52 }
 0x61a   :  { %v6946_v49 = vperm.slane %v6944_v38, 0 }
 0x61c   :  { %v6948_v62 = vsel %vm3366_vm2, %v6942_v30, %v6946_v49 }
 0x61d   :  { %10664 = vmatmul.msk.f32.vlgmr.msrb.gmra.mxu0 %vm3480_vm6, %v6948_v62  ;;  %10665 = vmatmul.msk.f32.vlgmr.msrb.gmra.mxu1 %vm3480_vm6, %v6948_v62 }
 0x61e   :  { %10666 = vmatmul.msk.f32.vlgmr.msrb.gmra.mxu2 %vm3480_vm6, %v6948_v62  ;;  %10667 = vmatmul.msk.f32.vlgmr.msrb.gmra.mxu3 %vm3480_vm6, %v6948_v62 }
 0x69a   :  { %v6969_v13 = vpop.f32.mrf.mxu0  ;;  %v6989_v33 = vpop.f32.mrf.mxu1 }
 0x69b   :  { %v7032_v37 = vperm.slane %v6969_v13, 0  ;;  %v7033_v42 = vperm.slane %v6989_v33, 0  ;;  %v7044_v51 = vperm.slane %v6969_v13, 1  ;;  %v7045_v3 = vperm.slane %v6989_v33, 1 }
 0x69d   :  { %v7036_v25 = vmul.f32 %v7032_v37, %v17183_v11  ;;  %v7040_v44 = vmul.f32 %v7032_v37, %v17186_v6  ;;  %v7037_v54 = vmul.f32 %v7033_v42, %v17196_v32  ;;  %v7041_v39 = vmul.f32 %v7033_v42, %v17199_v4 }
 0x69f   :  { %v7048_v1 = vadd.f32 %v7044_v51, %v7036_v25  ;;  %v7052_v9 = vadd.f32 %v7044_v51, %v7040_v44  ;;  %v7049_v27 = vadd.f32 %v7045_v3, %v7037_v54  ;;  %v7053_v22 = vadd.f32 %v7045_v3, %v7041_v39 }
 0x6a1   :  { %v7056_v61 = vmax.f32 %v7048_v1, 0.0  ;;  %v7060_v48 = vmax.f32 %v7052_v9, 0.0  ;;  %v7057_v15 = vmax.f32 %v7049_v27, 0.0  ;;  %v7009_v18 = vpop.f32.mrf.mxu2  ;;  %v7029_v24 = vpop.f32.mrf.mxu3  ;;  %v7061_v28 = vmax.f32 %v7053_v22, 0.0 }
 0x6a2   :  { %v7034_v36 = vperm.slane %v7009_v18, 0  ;;  %v7035_v50 = vperm.slane %v7029_v24, 0  ;;  %v7046_v11 = vperm.slane %v7009_v18, 1  ;;  %v7047_v6 = vperm.slane %v7029_v24, 1 }
 0x6a3   :  { %7064 = vst [vmem:[%s17286_s9] sm:$0xff] %v7056_v61 }
 0x6a4   :  { %7068 = vst [vmem:[%s17286_s9 + $0x20] sm:$0xff] %v7060_v48  ;;  %v7038_v32 = vmul.f32 %v7034_v36, %v17209_v21  ;;  %v7042_v4 = vmul.f32 %v7034_v36, %v17212_v29  ;;  %v7039_v43 = vmul.f32 %v7035_v50, %v17222_v8  ;;  %v7043_v57 = vmul.f32 %v7035_v50, %v17225_v12 }
 0x6a5   :  { %7065 = vst [vmem:[%s17286_s9 + $0x8] sm:$0xff] %v7057_v15 }
 0x6a6   :  { %7069 = vst [vmem:[%s17286_s9 + $0x28] sm:$0xff] %v7061_v28  ;;  %v7050_v26 = vadd.f32 %v7046_v11, %v7038_v32  ;;  %v7054_v14 = vadd.f32 %v7046_v11, %v7042_v4  ;;  %v7051_v7 = vadd.f32 %v7047_v6, %v7039_v43  ;;  %v7055_v41 = vadd.f32 %v7047_v6, %v7043_v57 }
 0x6a8   :  { %v7058_v5 = vmax.f32 %v7050_v26, 0.0  ;;  %v7062_v21 = vmax.f32 %v7054_v14, 0.0  ;;  %v7059_v63 = vmax.f32 %v7051_v7, 0.0  ;;  %v7063_v29 = vmax.f32 %v7055_v41, 0.0 }
 0x6aa   :  { %7066 = vst [vmem:[%s17286_s9 + $0x10] sm:$0xff] %v7058_v5 }
 0x6ab   :  { %7070 = vst [vmem:[%s17286_s9 + $0x30] sm:$0xff] %v7062_v21 }
 0x6ac   :  { %7067 = vst [vmem:[%s17286_s9 + $0x18] sm:$0xff] %v7059_v63 }
 0x6ad   :  { %7071 = vst [vmem:[%s17286_s9 + $0x38] sm:$0xff] %v7063_v29 }

</bundles_post_ra>
